<compile_context>
chip_gen: v5e
topology: v5e:2x2
jax: 0.10.0
libtpu: 0.0.40
codegen_flags: <defaults>
</compile_context>

<pallas_src>
import functools

import jax
import jax.numpy as jnp
from jax import lax
from jax.experimental import pallas as pl
from jax.experimental.pallas import tpu as pltpu


# Tap geometry in the phase-packed layout.  Padded slot j of phase p corresponds to
# original row/column 2*(j-1) + p.  (source phase, slot offset) per tap position:
_GEOM_EVEN = ((1, 0), (0, 1), (1, 1))   # even output location (also stride-2 outputs)
_GEOM_ODD = ((0, 1), (1, 1), (0, 2))    # odd output location


# ---------------------------------------------------------------------------
# Fused kernel: whole BottleNeckPool for one batch-block per grid step
# ---------------------------------------------------------------------------
def _bottleneck_pool_kernel(
    x_int_ref,      # (B, Hq, Wq, 4*Cin)         bf16, unpadded (1x1 path)
    x_pad_ref,      # (B, Hq+2, Wq+2, 4*Cin)     bf16, very-negative halo (max-pool)
    w1, b1,         # fused 1x1 convs, phase block-diag: (4*Cin, 4*(C11+C21))
    wm, bm,         # branch-2 3x3 s1, output-phase block-diag: (4*9*C21, 4*C23)
    ws, bs,         # fused stride-2 convs [b1|b2], block-diag: (9*C11+9*C23, C13+C23)
    out_ref,        # (B, Hq, Wq, CPAD)          bf16
    s1,             # (B, Hq+2, Wq+2, 4*(C11+C21)) bf16 scratch (1x1 outputs)
    s2,             # (B, Hq+2, Wq+2, 4*C23)       bf16 scratch (mid 3x3 outputs)
    *, B, Hq, Wq, Cin, C11, C21, C23, C13,
):
    CP1 = C11 + C21
    M = B * Hq * Wq
    CPAD = out_ref.shape[-1]
    Ctot = C13 + C23 + Cin

    # ---- halo-only clears (interiors are fully overwritten every step; NOT gated
    #      on program_id so it stays correct with a "parallel" batch axis).
    for s in (s1, s2):
        lanes = s.shape[-1]
        zrow = jnp.zeros((B, 1, Wq + 2, lanes), s.dtype)
        zcol = jnp.zeros((B, Hq + 2, 1, lanes), s.dtype)
        s[:, 0:1, :, :] = zrow
        s[:, Hq + 1:Hq + 2, :, :] = zrow
        s[:, :, 0:1, :] = zcol
        s[:, :, Wq + 1:Wq + 2, :] = zcol

    # ---- stage 1: both branches' 1x1 conv + BN + ReLU as ONE matmul --------------
    xm = x_int_ref[...].reshape(M, 4 * Cin)
    a = jnp.dot(xm, w1[...], preferred_element_type=jnp.float32)
    a = jnp.maximum(a + b1[...], 0.0).astype(jnp.bfloat16)
    s1[:, 1:Hq + 1, 1:Wq + 1, :] = a.reshape(B, Hq, Wq, 4 * CP1)

    def tap(src, hp, i0, wp, j0, lane_off, width, lane_stride):
        po = (hp * 2 + wp) * lane_stride + lane_off
        v = src[:, i0:i0 + Hq, j0:j0 + Wq, po:po + width]
        return v.reshape(M, width)

    # ---- stage 2: branch-2 3x3 stride-1 conv, all 4 output phases in ONE matmul --
    taps_mid = []
    for hgeom in (_GEOM_EVEN, _GEOM_ODD):
        for wgeom in (_GEOM_EVEN, _GEOM_ODD):
            for hp, i0 in hgeom:
                for wp, j0 in wgeom:
                    taps_mid.append(tap(s1, hp, i0, wp, j0, C11, C21, CP1))
    t_mid = jnp.concatenate(taps_mid, axis=-1)                   # (M, 4*9*C21)
    r = jnp.dot(t_mid, wm[...], preferred_element_type=jnp.float32)
    r = jnp.maximum(r + bm[...], 0.0).astype(jnp.bfloat16)
    s2[:, 1:Hq + 1, 1:Wq + 1, :] = r.reshape(B, Hq, Wq, 4 * C23)

    # ---- stage 3: BOTH stride-2 convs as ONE matmul -> output lanes [f1 | f2] ----
    taps1, taps2 = [], []
    for hp, i0 in _GEOM_EVEN:
        for wp, j0 in _GEOM_EVEN:
            taps1.append(tap(s1, hp, i0, wp, j0, 0, C11, CP1))
            taps2.append(tap(s2, hp, i0, wp, j0, 0, C23, C23))
    t_f = jnp.concatenate(taps1 + taps2, axis=-1)                # (M, 9*C11 + 9*C23)
    f12 = jnp.dot(t_f, ws[...], preferred_element_type=jnp.float32)
    f12 = jnp.maximum(f12 + bs[...], 0.0).astype(jnp.bfloat16)   # (M, C13 + C23)

    # ---- stage 4: 3x3 stride-2 max-pool (x_pad halos hold a very negative value) -
    m = None
    for hp, i0 in _GEOM_EVEN:
        for wp, j0 in _GEOM_EVEN:
            v = tap(x_pad_ref, hp, i0, wp, j0, 0, Cin, Cin)
            m = v if m is None else jnp.maximum(m, v)

    # ---- lane-padded concat [f1 | f2 | pool | zeros] and a single bf16 store -----
    pieces = [f12, m]
    if CPAD > Ctot:
        pieces.append(jnp.zeros((M, CPAD - Ctot), jnp.bfloat16))
    out = jnp.concatenate(pieces, axis=-1)                       # (M, CPAD)
    out_ref[...] = out.reshape(B, Hq, Wq, CPAD)


# ---------------------------------------------------------------------------
# pallas_call wrapper (NCHW in / NCHW out, matching the PyTorch module)
# ---------------------------------------------------------------------------
def _round_up(x, m):
    return (x + m - 1) // m * m


def _block_diag(blocks):
    rows = sum(b.shape[0] for b in blocks)
    cols = sum(b.shape[1] for b in blocks)
    out = jnp.zeros((rows, cols), jnp.float32)
    r = c = 0
    for b in blocks:
        out = out.at[r:r + b.shape[0], c:c + b.shape[1]].set(b.astype(jnp.float32))
        r += b.shape[0]
        c += b.shape[1]
    return out


def bottleneck_pool_forward(x_nchw, params, *, batch_block=None):
    N, Cin, H, W = x_nchw.shape
    assert H % 2 == 0 and W % 2 == 0, "phase-split layout expects even H, W"
    Hq, Wq = H // 2, W // 2

    C11 = params["b1_c1"]["w"].shape[1]
    C13 = params["b1_c2"]["w"].shape[1]
    C21 = params["b2_c1"]["w"].shape[1]
    C23 = params["b2_c2"]["w"].shape[1]
    CP1 = C11 + C21
    Ctot = C13 + C23 + Cin
    CPAD = _round_up(Ctot, 32)         # lane-padded output channel count (28 -> 32)

    # Whole batch per grid step by default (fewer, bigger steps: best on 1-TC
    # v5e/v6e).  On v7x pass batch_block=N//2 so the "parallel" batch axis divides
    # across the 2 TensorCores.
    B = N if batch_block is None else batch_block
    assert N % B == 0

    p = params
    w11, b11 = p["b1_c1"]["w"], p["b1_c1"]["b"]
    w13, b13 = p["b1_c2"]["w"], p["b1_c2"]["b"]
    w21, b21 = p["b2_c1"]["w"], p["b2_c1"]["b"]
    w23a, b23a = p["b2_c2"]["w"], p["b2_c2"]["b"]
    w23b, b23b = p["b2_c3"]["w"], p["b2_c3"]["b"]

    # Packed weights: 1x1 convs fused along cout and phase-block-diagonalised; mid
    # 3x3 block-diag over output phases; both stride-2 convs block-diag side by side
    # (fewer MXU pushes / bias+ReLU passes; the zero blocks contribute exactly 0).
    wcat = jnp.concatenate([w11, w21], axis=1)                        # (Cin, CP1)
    w1 = _block_diag([wcat] * 4).astype(jnp.bfloat16)                 # (4Cin, 4CP1)
    b1 = jnp.tile(jnp.concatenate([b11, b21], axis=1), (1, 4))        # (1, 4CP1)
    wm = _block_diag([w23a] * 4).astype(jnp.bfloat16)                 # (4*9C21, 4C23)
    bm = jnp.tile(b23a, (1, 4))                                       # (1, 4C23)
    ws = _block_diag([w13, w23b]).astype(jnp.bfloat16)                # (9C11+9C23, C13+C23)
    bs = jnp.concatenate([b13, b23b], axis=1)                         # (1, C13+C23)

    # NCHW -> phase-packed NHWC: (N, Hq, Wq, (hp*2+wp)*Cin + c), one XLA transpose.
    x5 = x_nchw.reshape(N, Cin, Hq, 2, Wq, 2)
    xpp = jnp.transpose(x5, (0, 2, 4, 3, 5, 1))                       # (N,Hq,Wq,2,2,Cin)
    xpp = xpp.reshape(N, Hq, Wq, 4 * Cin).astype(jnp.bfloat16)

    # Padded copy (very negative halo) is only read by the max-pool branch.
    neg = jnp.asarray(jnp.finfo(jnp.bfloat16).min, jnp.bfloat16)
    xpad = jnp.full((N, Hq + 2, Wq + 2, 4 * Cin), neg, jnp.bfloat16)
    xpad = xpad.at[:, 1:Hq + 1, 1:Wq + 1, :].set(xpp)

    kern = functools.partial(
        _bottleneck_pool_kernel,
        B=B, Hq=Hq, Wq=Wq, Cin=Cin, C11=C11, C21=C21, C23=C23, C13=C13)

    def _img_spec(shape):
        nd = len(shape)
        return pl.BlockSpec((B,) + shape[1:], lambda n, _nd=nd: (n,) + (0,) * (_nd - 1))

    def _const_spec(a):
        zeros = (0,) * a.ndim
        return pl.BlockSpec(a.shape, lambda n, _z=zeros: _z,
                            pipeline_mode=pl.Buffered(1))

    consts = (w1, b1, wm, bm, ws, bs)

    out = pl.pallas_call(
        kern,
        grid=(N // B,),
        in_specs=[_img_spec(xpp.shape), _img_spec(xpad.shape)]
                 + [_const_spec(a) for a in consts],
        out_specs=pl.BlockSpec((B, Hq, Wq, CPAD), lambda n: (n, 0, 0, 0)),
        out_shape=jax.ShapeDtypeStruct((N, Hq, Wq, CPAD), jnp.bfloat16),
        scratch_shapes=[
            pltpu.VMEM((B, Hq + 2, Wq + 2, 4 * CP1), jnp.bfloat16),
            pltpu.VMEM((B, Hq + 2, Wq + 2, 4 * C23), jnp.bfloat16),
        ],
        compiler_params=pltpu.CompilerParams(
            dimension_semantics=("parallel",),            # batch blocks across cores
            vmem_limit_bytes=32 * 1024 * 1024,            # > v5e's 16MiB default, fits v7x
        ),
    )(xpp, xpad, *consts)

    out = out[..., :Ctot].astype(jnp.float32)             # strip lane padding
    return jnp.transpose(out, (0, 3, 1, 2))               # NHWC -> NCHW


bottleneck_pool = jax.jit(bottleneck_pool_forward)


# ---------------------------------------------------------------------------
# Parameter construction (deterministic, synthetic) + eval-BN folding
# ---------------------------------------------------------------------------
def _make_conv_bn_params(key, cin, cout, k, eps=1e-3):
    kw, kb, kg, kbe, km, kv = jax.random.split(key, 6)
    w = jax.random.normal(kw, (cout, cin, k, k), jnp.float32) * 0.1
    b = jax.random.normal(kb, (cout,), jnp.float32) * 0.05
    gamma = 1.0 + 0.1 * jax.random.normal(kg, (cout,), jnp.float32)
    beta = 0.05 * jax.random.normal(kbe, (cout,), jnp.float32)
    mean = 0.05 * jax.random.normal(km, (cout,), jnp.float32)
    var = 1.0 + 0.1 * jax.random.uniform(kv, (cout,), jnp.float32)
    scale = gamma / jnp.sqrt(var + eps)
    w_f = w * scale[:, None, None, None]
    b_f = ((b - mean) * scale + beta).reshape(1, cout)
    if k == 1:
        w_p = w_f[:, :, 0, 0].T                                       # (cin, cout)
    else:
        # (cout, cin, 3, 3) -> (ky, kx, cin, cout) -> (9*cin, cout)
        w_p = jnp.transpose(w_f, (2, 3, 1, 0)).reshape(k * k * cin, cout)
    return {"w": w_p.astype(jnp.bfloat16), "b": b_f.astype(jnp.float32)}


def make_bottleneck_pool_params(key, in_channel, out1_1, out1_3, out2_1, out2_3):
    ks = jax.random.split(key, 5)
    return {
        "b1_c1": _make_conv_bn_params(ks[0], in_channel, out1_1, 1),
        "b1_c2": _make_conv_bn_params(ks[1], out1_1, out1_3, 3),
        "b2_c1": _make_conv_bn_params(ks[2], in_channel, out2_1, 1),
        "b2_c2": _make_conv_bn_params(ks[3], out2_1, out2_3, 3),
        "b2_c3": _make_conv_bn_params(ks[4], out2_3, out2_3, 3),
    }


# ---------------------------------------------------------------------------
# Pure-JAX reference (mirrors the kernel's bf16 casting) for a self-check
# ---------------------------------------------------------------------------
def _reference(x_nchw, params):
    x = jnp.transpose(x_nchw, (0, 2, 3, 1)).astype(jnp.bfloat16)   # NHWC bf16

    def conv(h, pw, pb, k, stride):
        cin, cout = h.shape[-1], pw.shape[1]
        w = pw.astype(jnp.bfloat16).reshape(k, k, cin, cout)
        pad = ((0, 0), (0, 0)) if k == 1 else ((1, 1), (1, 1))
        y = lax.conv_general_dilated(
            h, w, window_strides=(stride, stride), padding=pad,
            dimension_numbers=("NHWC", "HWIO", "NHWC"),
            preferred_element_type=jnp.float32)
        y = jnp.maximum(y + pb.reshape(1, 1, 1, cout), 0.0)
        return y.astype(jnp.bfloat16)

    f1 = conv(x, params["b1_c1"]["w"], params["b1_c1"]["b"], 1, 1)
    f1 = conv(f1, params["b1_c2"]["w"], params["b1_c2"]["b"], 3, 2)
    f2 = conv(x, params["b2_c1"]["w"], params["b2_c1"]["b"], 1, 1)
    f2 = conv(f2, params["b2_c2"]["w"], params["b2_c2"]["b"], 3, 1)
    f2 = conv(f2, params["b2_c3"]["w"], params["b2_c3"]["b"], 3, 2)
    f3 = lax.reduce_window(
        x.astype(jnp.float32), -jnp.inf, lax.max,
        (1, 3, 3, 1), (1, 2, 2, 1), ((0, 0), (1, 1), (1, 1), (0, 0)))
    out = jnp.concatenate(
        [f1.astype(jnp.float32), f2.astype(jnp.float32), f3], axis=-1)
    return jnp.transpose(out, (0, 3, 1, 2))


if __name__ == "__main__":
    key = jax.random.PRNGKey(0)
    kx, kp = jax.random.split(key)

    in_channel, out1_1, out1_3, out2_1, out2_3 = 4, 8, 8, 8, 16
    N, H, W = 2, 16, 16

    x = jax.random.normal(kx, (N, in_channel, H, W), jnp.float32)
    params = make_bottleneck_pool_params(kp, in_channel, out1_1, out1_3, out2_1, out2_3)

    out = jax.block_until_ready(bottleneck_pool(x, params))

    expected_shape = (N, out1_3 + out2_3 + in_channel, H // 2, W // 2)
    assert out.shape == expected_shape, (out.shape, expected_shape)
    assert bool(jnp.all(jnp.isfinite(out)))

    ref = jax.block_until_ready(_reference(x, params))
    err = float(jnp.max(jnp.abs(out - ref)))
    scale = float(jnp.max(jnp.abs(ref)))
    assert err <= 0.03 * scale + 1e-3, ("mismatch vs reference", err, scale)

    print("KERNEL_OK")
</pallas_src>

<mosaic_0001>
module attributes {stable_mosaic.version = 11 : i64} {
  func.func @_bottleneck_pool_kernel(%arg0: i32, %arg1: memref<2x8x8x16xbf16, #tpu.memory_space<vmem>>, %arg2: memref<2x10x10x16xbf16, #tpu.memory_space<vmem>>, %arg3: memref<16x64xbf16, #tpu.memory_space<vmem>>, %arg4: memref<1x64xf32, #tpu.memory_space<vmem>>, %arg5: memref<288x64xbf16, #tpu.memory_space<vmem>>, %arg6: memref<1x64xf32, #tpu.memory_space<vmem>>, %arg7: memref<216x24xbf16, #tpu.memory_space<vmem>>, %arg8: memref<1x24xf32, #tpu.memory_space<vmem>>, %arg9: memref<2x8x8x32xbf16, #tpu.memory_space<vmem>>, %arg10: memref<2x10x10x64xbf16, #tpu.memory_space<vmem>>, %arg11: memref<2x10x10x64xbf16, #tpu.memory_space<vmem>>) attributes {dimension_semantics = [#tpu.dimension_semantics<parallel>], iteration_bounds = array<i64: 1>, scalar_prefetch = 0 : i64, scratch_operands = 2 : i64, tpu.core_type = #tpu.core_type<tc>, window_params = [{transform_indices = @transform_0, window_bounds = array<i64: 2, 8, 8, 16>}, {transform_indices = @transform_1, window_bounds = array<i64: 2, 10, 10, 16>}, {pipeline_mode = #tpu.pipeline_mode<synchronous>, transform_indices = @transform_2, window_bounds = array<i64: 16, 64>}, {pipeline_mode = #tpu.pipeline_mode<synchronous>, transform_indices = @transform_3, window_bounds = array<i64: 1, 64>}, {pipeline_mode = #tpu.pipeline_mode<synchronous>, transform_indices = @transform_4, window_bounds = array<i64: 288, 64>}, {pipeline_mode = #tpu.pipeline_mode<synchronous>, transform_indices = @transform_5, window_bounds = array<i64: 1, 64>}, {pipeline_mode = #tpu.pipeline_mode<synchronous>, transform_indices = @transform_6, window_bounds = array<i64: 216, 24>}, {pipeline_mode = #tpu.pipeline_mode<synchronous>, transform_indices = @transform_7, window_bounds = array<i64: 1, 24>}, {transform_indices = @transform_8, window_bounds = array<i64: 2, 8, 8, 32>}]} {
    %cst = arith.constant 0.000000e+00 : bf16
    %0 = vector.broadcast %cst : bf16 to vector<2x1x10x64xbf16>
    %cst_0 = arith.constant 0.000000e+00 : bf16
    %1 = vector.broadcast %cst_0 : bf16 to vector<2x10x1x64xbf16>
    %c0 = arith.constant 0 : index
    %c0_1 = arith.constant 0 : index
    %c0_2 = arith.constant 0 : index
    %c0_3 = arith.constant 0 : index
    %2 = vector.load %arg10[%c0, %c0_1, %c0_2, %c0_3] : memref<2x10x10x64xbf16, #tpu.memory_space<vmem>>, vector<2x1x10x64xbf16>
    tpu.vector_store %arg10[%c0, %c0_1, %c0_2, %c0_3], %0 {strides = array<i32>} : memref<2x10x10x64xbf16, #tpu.memory_space<vmem>>, vector<2x1x10x64xbf16>,
    %c0_4 = arith.constant 0 : index
    %c9 = arith.constant 9 : index
    %c0_5 = arith.constant 0 : index
    %c0_6 = arith.constant 0 : index
    %3 = vector.load %arg10[%c0_4, %c9, %c0_5, %c0_6] : memref<2x10x10x64xbf16, #tpu.memory_space<vmem>>, vector<2x1x10x64xbf16>
    tpu.vector_store %arg10[%c0_4, %c9, %c0_5, %c0_6], %0 {strides = array<i32>} : memref<2x10x10x64xbf16, #tpu.memory_space<vmem>>, vector<2x1x10x64xbf16>,
    %c0_7 = arith.constant 0 : index
    %c0_8 = arith.constant 0 : index
    %c0_9 = arith.constant 0 : index
    %c0_10 = arith.constant 0 : index
    %4 = vector.load %arg10[%c0_7, %c0_8, %c0_9, %c0_10] : memref<2x10x10x64xbf16, #tpu.memory_space<vmem>>, vector<2x10x1x64xbf16>
    tpu.vector_store %arg10[%c0_7, %c0_8, %c0_9, %c0_10], %1 {strides = array<i32>} : memref<2x10x10x64xbf16, #tpu.memory_space<vmem>>, vector<2x10x1x64xbf16>,
    %c0_11 = arith.constant 0 : index
    %c0_12 = arith.constant 0 : index
    %c9_13 = arith.constant 9 : index
    %c0_14 = arith.constant 0 : index
    %5 = vector.load %arg10[%c0_11, %c0_12, %c9_13, %c0_14] : memref<2x10x10x64xbf16, #tpu.memory_space<vmem>>, vector<2x10x1x64xbf16>
    tpu.vector_store %arg10[%c0_11, %c0_12, %c9_13, %c0_14], %1 {strides = array<i32>} : memref<2x10x10x64xbf16, #tpu.memory_space<vmem>>, vector<2x10x1x64xbf16>,
    %cst_15 = arith.constant 0.000000e+00 : bf16
    %6 = vector.broadcast %cst_15 : bf16 to vector<2x1x10x64xbf16>
    %cst_16 = arith.constant 0.000000e+00 : bf16
    %7 = vector.broadcast %cst_16 : bf16 to vector<2x10x1x64xbf16>
    %c0_17 = arith.constant 0 : index
    %c0_18 = arith.constant 0 : index
    %c0_19 = arith.constant 0 : index
    %c0_20 = arith.constant 0 : index
    %8 = vector.load %arg11[%c0_17, %c0_18, %c0_19, %c0_20] : memref<2x10x10x64xbf16, #tpu.memory_space<vmem>>, vector<2x1x10x64xbf16>
    tpu.vector_store %arg11[%c0_17, %c0_18, %c0_19, %c0_20], %6 {strides = array<i32>} : memref<2x10x10x64xbf16, #tpu.memory_space<vmem>>, vector<2x1x10x64xbf16>,
    %c0_21 = arith.constant 0 : index
    %c9_22 = arith.constant 9 : index
    %c0_23 = arith.constant 0 : index
    %c0_24 = arith.constant 0 : index
    %9 = vector.load %arg11[%c0_21, %c9_22, %c0_23, %c0_24] : memref<2x10x10x64xbf16, #tpu.memory_space<vmem>>, vector<2x1x10x64xbf16>
    tpu.vector_store %arg11[%c0_21, %c9_22, %c0_23, %c0_24], %6 {strides = array<i32>} : memref<2x10x10x64xbf16, #tpu.memory_space<vmem>>, vector<2x1x10x64xbf16>,
    %c0_25 = arith.constant 0 : index
    %c0_26 = arith.constant 0 : index
    %c0_27 = arith.constant 0 : index
    %c0_28 = arith.constant 0 : index
    %10 = vector.load %arg11[%c0_25, %c0_26, %c0_27, %c0_28] : memref<2x10x10x64xbf16, #tpu.memory_space<vmem>>, vector<2x10x1x64xbf16>
    tpu.vector_store %arg11[%c0_25, %c0_26, %c0_27, %c0_28], %7 {strides = array<i32>} : memref<2x10x10x64xbf16, #tpu.memory_space<vmem>>, vector<2x10x1x64xbf16>,
    %c0_29 = arith.constant 0 : index
    %c0_30 = arith.constant 0 : index
    %c9_31 = arith.constant 9 : index
    %c0_32 = arith.constant 0 : index
    %11 = vector.load %arg11[%c0_29, %c0_30, %c9_31, %c0_32] : memref<2x10x10x64xbf16, #tpu.memory_space<vmem>>, vector<2x10x1x64xbf16>
    tpu.vector_store %arg11[%c0_29, %c0_30, %c9_31, %c0_32], %7 {strides = array<i32>} : memref<2x10x10x64xbf16, #tpu.memory_space<vmem>>, vector<2x10x1x64xbf16>,
    %c0_33 = arith.constant 0 : index
    %c0_34 = arith.constant 0 : index
    %c0_35 = arith.constant 0 : index
    %c0_36 = arith.constant 0 : index
    %12 = vector.load %arg1[%c0_33, %c0_34, %c0_35, %c0_36] : memref<2x8x8x16xbf16, #tpu.memory_space<vmem>>, vector<2x8x8x16xbf16>
    %13 = vector.shape_cast %12 : vector<2x8x8x16xbf16> to vector<128x16xbf16>
    %c0_37 = arith.constant 0 : index
    %c0_38 = arith.constant 0 : index
    %14 = vector.load %arg3[%c0_37, %c0_38] : memref<16x64xbf16, #tpu.memory_space<vmem>>, vector<16x64xbf16>
    %cst_39 = arith.constant dense<0.000000e+00> : vector<128x64xf32>
    %15 = tpu.matmul %13, %14, %cst_39 {dimension_numbers = #tpu.dot_dimension_numbers<[1], [0], [0], [1], [0, 0, 1, 1], [], []>} : vector<128x16xbf16>, vector<16x64xbf16>, vector<128x64xf32> -> vector<128x64xf32>
    %c0_40 = arith.constant 0 : index
    %c0_41 = arith.constant 0 : index
    %16 = vector.load %arg4[%c0_40, %c0_41] : memref<1x64xf32, #tpu.memory_space<vmem>>, vector<1x64xf32>
    %17 = vector.broadcast %16 : vector<1x64xf32> to vector<128x64xf32>
    %18 = arith.addf %15, %17 : vector<128x64xf32>
    %cst_42 = arith.constant 0.000000e+00 : f32
    %19 = vector.broadcast %cst_42 : f32 to vector<128x64xf32>
    %20 = arith.maximumf %18, %19 : vector<128x64xf32>
    %21 = arith.truncf %20 : vector<128x64xf32> to vector<128x64xbf16>
    %22 = vector.shape_cast %21 : vector<128x64xbf16> to vector<2x8x8x64xbf16>
    %c0_43 = arith.constant 0 : index
    %c1 = arith.constant 1 : index
    %c1_44 = arith.constant 1 : index
    %c0_45 = arith.constant 0 : index
    %23 = vector.load %arg10[%c0_43, %c1, %c1_44, %c0_45] : memref<2x10x10x64xbf16, #tpu.memory_space<vmem>>, vector<2x8x8x64xbf16>
    tpu.vector_store %arg10[%c0_43, %c1, %c1_44, %c0_45], %22 {strides = array<i32>} : memref<2x10x10x64xbf16, #tpu.memory_space<vmem>>, vector<2x8x8x64xbf16>,
    %c0_46 = arith.constant 0 : index
    %c0_47 = arith.constant 0 : index
    %c0_48 = arith.constant 0 : index
    %c56 = arith.constant 56 : index
    %24 = vector.load %arg10[%c0_46, %c0_47, %c0_48, %c56] : memref<2x10x10x64xbf16, #tpu.memory_space<vmem>>, vector<2x8x8x8xbf16>
    %25 = vector.shape_cast %24 : vector<2x8x8x8xbf16> to vector<128x8xbf16>
    %c0_49 = arith.constant 0 : index
    %c0_50 = arith.constant 0 : index
    %c1_51 = arith.constant 1 : index
    %c40 = arith.constant 40 : index
    %26 = vector.load %arg10[%c0_49, %c0_50, %c1_51, %c40] : memref<2x10x10x64xbf16, #tpu.memory_space<vmem>>, vector<2x8x8x8xbf16>
    %27 = vector.shape_cast %26 : vector<2x8x8x8xbf16> to vector<128x8xbf16>
    %c0_52 = arith.constant 0 : index
    %c0_53 = arith.constant 0 : index
    %c1_54 = arith.constant 1 : index
    %c56_55 = arith.constant 56 : index
    %28 = vector.load %arg10[%c0_52, %c0_53, %c1_54, %c56_55] : memref<2x10x10x64xbf16, #tpu.memory_space<vmem>>, vector<2x8x8x8xbf16>
    %29 = vector.shape_cast %28 : vector<2x8x8x8xbf16> to vector<128x8xbf16>
    %c0_56 = arith.constant 0 : index
    %c1_57 = arith.constant 1 : index
    %c0_58 = arith.constant 0 : index
    %c24 = arith.constant 24 : index
    %30 = vector.load %arg10[%c0_56, %c1_57, %c0_58, %c24] : memref<2x10x10x64xbf16, #tpu.memory_space<vmem>>, vector<2x8x8x8xbf16>
    %31 = vector.shape_cast %30 : vector<2x8x8x8xbf16> to vector<128x8xbf16>
    %c0_59 = arith.constant 0 : index
    %c1_60 = arith.constant 1 : index
    %c1_61 = arith.constant 1 : index
    %c8 = arith.constant 8 : index
    %32 = vector.load %arg10[%c0_59, %c1_60, %c1_61, %c8] : memref<2x10x10x64xbf16, #tpu.memory_space<vmem>>, vector<2x8x8x8xbf16>
    %33 = vector.shape_cast %32 : vector<2x8x8x8xbf16> to vector<128x8xbf16>
    %c0_62 = arith.constant 0 : index
    %c1_63 = arith.constant 1 : index
    %c1_64 = arith.constant 1 : index
    %c24_65 = arith.constant 24 : index
    %34 = vector.load %arg10[%c0_62, %c1_63, %c1_64, %c24_65] : memref<2x10x10x64xbf16, #tpu.memory_space<vmem>>, vector<2x8x8x8xbf16>
    %35 = vector.shape_cast %34 : vector<2x8x8x8xbf16> to vector<128x8xbf16>
    %c0_66 = arith.constant 0 : index
    %c1_67 = arith.constant 1 : index
    %c0_68 = arith.constant 0 : index
    %c56_69 = arith.constant 56 : index
    %36 = vector.load %arg10[%c0_66, %c1_67, %c0_68, %c56_69] : memref<2x10x10x64xbf16, #tpu.memory_space<vmem>>, vector<2x8x8x8xbf16>
    %37 = vector.shape_cast %36 : vector<2x8x8x8xbf16> to vector<128x8xbf16>
    %c0_70 = arith.constant 0 : index
    %c1_71 = arith.constant 1 : index
    %c1_72 = arith.constant 1 : index
    %c40_73 = arith.constant 40 : index
    %38 = vector.load %arg10[%c0_70, %c1_71, %c1_72, %c40_73] : memref<2x10x10x64xbf16, #tpu.memory_space<vmem>>, vector<2x8x8x8xbf16>
    %39 = vector.shape_cast %38 : vector<2x8x8x8xbf16> to vector<128x8xbf16>
    %c0_74 = arith.constant 0 : index
    %c1_75 = arith.constant 1 : index
    %c1_76 = arith.constant 1 : index
    %c56_77 = arith.constant 56 : index
    %40 = vector.load %arg10[%c0_74, %c1_75, %c1_76, %c56_77] : memref<2x10x10x64xbf16, #tpu.memory_space<vmem>>, vector<2x8x8x8xbf16>
    %41 = vector.shape_cast %40 : vector<2x8x8x8xbf16> to vector<128x8xbf16>
    %c0_78 = arith.constant 0 : index
    %c0_79 = arith.constant 0 : index
    %c1_80 = arith.constant 1 : index
    %c40_81 = arith.constant 40 : index
    %42 = vector.load %arg10[%c0_78, %c0_79, %c1_80, %c40_81] : memref<2x10x10x64xbf16, #tpu.memory_space<vmem>>, vector<2x8x8x8xbf16>
    %43 = vector.shape_cast %42 : vector<2x8x8x8xbf16> to vector<128x8xbf16>
    %c0_82 = arith.constant 0 : index
    %c0_83 = arith.constant 0 : index
    %c1_84 = arith.constant 1 : index
    %c56_85 = arith.constant 56 : index
    %44 = vector.load %arg10[%c0_82, %c0_83, %c1_84, %c56_85] : memref<2x10x10x64xbf16, #tpu.memory_space<vmem>>, vector<2x8x8x8xbf16>
    %45 = vector.shape_cast %44 : vector<2x8x8x8xbf16> to vector<128x8xbf16>
    %c0_86 = arith.constant 0 : index
    %c0_87 = arith.constant 0 : index
    %c2 = arith.constant 2 : index
    %c40_88 = arith.constant 40 : index
    %46 = vector.load %arg10[%c0_86, %c0_87, %c2, %c40_88] : memref<2x10x10x64xbf16, #tpu.memory_space<vmem>>, vector<2x8x8x8xbf16>
    %47 = vector.shape_cast %46 : vector<2x8x8x8xbf16> to vector<128x8xbf16>
    %c0_89 = arith.constant 0 : index
    %c1_90 = arith.constant 1 : index
    %c1_91 = arith.constant 1 : index
    %c8_92 = arith.constant 8 : index
    %48 = vector.load %arg10[%c0_89, %c1_90, %c1_91, %c8_92] : memref<2x10x10x64xbf16, #tpu.memory_space<vmem>>, vector<2x8x8x8xbf16>
    %49 = vector.shape_cast %48 : vector<2x8x8x8xbf16> to vector<128x8xbf16>
    %c0_93 = arith.constant 0 : index
    %c1_94 = arith.constant 1 : index
    %c1_95 = arith.constant 1 : index
    %c24_96 = arith.constant 24 : index
    %50 = vector.load %arg10[%c0_93, %c1_94, %c1_95, %c24_96] : memref<2x10x10x64xbf16, #tpu.memory_space<vmem>>, vector<2x8x8x8xbf16>
    %51 = vector.shape_cast %50 : vector<2x8x8x8xbf16> to vector<128x8xbf16>
    %c0_97 = arith.constant 0 : index
    %c1_98 = arith.constant 1 : index
    %c2_99 = arith.constant 2 : index
    %c8_100 = arith.constant 8 : index
    %52 = vector.load %arg10[%c0_97, %c1_98, %c2_99, %c8_100] : memref<2x10x10x64xbf16, #tpu.memory_space<vmem>>, vector<2x8x8x8xbf16>
    %53 = vector.shape_cast %52 : vector<2x8x8x8xbf16> to vector<128x8xbf16>
    %c0_101 = arith.constant 0 : index
    %c1_102 = arith.constant 1 : index
    %c1_103 = arith.constant 1 : index
    %c40_104 = arith.constant 40 : index
    %54 = vector.load %arg10[%c0_101, %c1_102, %c1_103, %c40_104] : memref<2x10x10x64xbf16, #tpu.memory_space<vmem>>, vector<2x8x8x8xbf16>
    %55 = vector.shape_cast %54 : vector<2x8x8x8xbf16> to vector<128x8xbf16>
    %c0_105 = arith.constant 0 : index
    %c1_106 = arith.constant 1 : index
    %c1_107 = arith.constant 1 : index
    %c56_108 = arith.constant 56 : index
    %56 = vector.load %arg10[%c0_105, %c1_106, %c1_107, %c56_108] : memref<2x10x10x64xbf16, #tpu.memory_space<vmem>>, vector<2x8x8x8xbf16>
    %57 = vector.shape_cast %56 : vector<2x8x8x8xbf16> to vector<128x8xbf16>
    %c0_109 = arith.constant 0 : index
    %c1_110 = arith.constant 1 : index
    %c2_111 = arith.constant 2 : index
    %c40_112 = arith.constant 40 : index
    %58 = vector.load %arg10[%c0_109, %c1_110, %c2_111, %c40_112] : memref<2x10x10x64xbf16, #tpu.memory_space<vmem>>, vector<2x8x8x8xbf16>
    %59 = vector.shape_cast %58 : vector<2x8x8x8xbf16> to vector<128x8xbf16>
    %c0_113 = arith.constant 0 : index
    %c1_114 = arith.constant 1 : index
    %c0_115 = arith.constant 0 : index
    %c24_116 = arith.constant 24 : index
    %60 = vector.load %arg10[%c0_113, %c1_114, %c0_115, %c24_116] : memref<2x10x10x64xbf16, #tpu.memory_space<vmem>>, vector<2x8x8x8xbf16>
    %61 = vector.shape_cast %60 : vector<2x8x8x8xbf16> to vector<128x8xbf16>
    %c0_117 = arith.constant 0 : index
    %c1_118 = arith.constant 1 : index
    %c1_119 = arith.constant 1 : index
    %c8_120 = arith.constant 8 : index
    %62 = vector.load %arg10[%c0_117, %c1_118, %c1_119, %c8_120] : memref<2x10x10x64xbf16, #tpu.memory_space<vmem>>, vector<2x8x8x8xbf16>
    %63 = vector.shape_cast %62 : vector<2x8x8x8xbf16> to vector<128x8xbf16>
    %c0_121 = arith.constant 0 : index
    %c1_122 = arith.constant 1 : index
    %c1_123 = arith.constant 1 : index
    %c24_124 = arith.constant 24 : index
    %64 = vector.load %arg10[%c0_121, %c1_122, %c1_123, %c24_124] : memref<2x10x10x64xbf16, #tpu.memory_space<vmem>>, vector<2x8x8x8xbf16>
    %65 = vector.shape_cast %64 : vector<2x8x8x8xbf16> to vector<128x8xbf16>
    %c0_125 = arith.constant 0 : index
    %c1_126 = arith.constant 1 : index
    %c0_127 = arith.constant 0 : index
    %c56_128 = arith.constant 56 : index
    %66 = vector.load %arg10[%c0_125, %c1_126, %c0_127, %c56_128] : memref<2x10x10x64xbf16, #tpu.memory_space<vmem>>, vector<2x8x8x8xbf16>
    %67 = vector.shape_cast %66 : vector<2x8x8x8xbf16> to vector<128x8xbf16>
    %c0_129 = arith.constant 0 : index
    %c1_130 = arith.constant 1 : index
    %c1_131 = arith.constant 1 : index
    %c40_132 = arith.constant 40 : index
    %68 = vector.load %arg10[%c0_129, %c1_130, %c1_131, %c40_132] : memref<2x10x10x64xbf16, #tpu.memory_space<vmem>>, vector<2x8x8x8xbf16>
    %69 = vector.shape_cast %68 : vector<2x8x8x8xbf16> to vector<128x8xbf16>
    %c0_133 = arith.constant 0 : index
    %c1_134 = arith.constant 1 : index
    %c1_135 = arith.constant 1 : index
    %c56_136 = arith.constant 56 : index
    %70 = vector.load %arg10[%c0_133, %c1_134, %c1_135, %c56_136] : memref<2x10x10x64xbf16, #tpu.memory_space<vmem>>, vector<2x8x8x8xbf16>
    %71 = vector.shape_cast %70 : vector<2x8x8x8xbf16> to vector<128x8xbf16>
    %c0_137 = arith.constant 0 : index
    %c2_138 = arith.constant 2 : index
    %c0_139 = arith.constant 0 : index
    %c24_140 = arith.constant 24 : index
    %72 = vector.load %arg10[%c0_137, %c2_138, %c0_139, %c24_140] : memref<2x10x10x64xbf16, #tpu.memory_space<vmem>>, vector<2x8x8x8xbf16>
    %73 = vector.shape_cast %72 : vector<2x8x8x8xbf16> to vector<128x8xbf16>
    %c0_141 = arith.constant 0 : index
    %c2_142 = arith.constant 2 : index
    %c1_143 = arith.constant 1 : index
    %c8_144 = arith.constant 8 : index
    %74 = vector.load %arg10[%c0_141, %c2_142, %c1_143, %c8_144] : memref<2x10x10x64xbf16, #tpu.memory_space<vmem>>, vector<2x8x8x8xbf16>
    %75 = vector.shape_cast %74 : vector<2x8x8x8xbf16> to vector<128x8xbf16>
    %c0_145 = arith.constant 0 : index
    %c2_146 = arith.constant 2 : index
    %c1_147 = arith.constant 1 : index
    %c24_148 = arith.constant 24 : index
    %76 = vector.load %arg10[%c0_145, %c2_146, %c1_147, %c24_148] : memref<2x10x10x64xbf16, #tpu.memory_space<vmem>>, vector<2x8x8x8xbf16>
    %77 = vector.shape_cast %76 : vector<2x8x8x8xbf16> to vector<128x8xbf16>
    %c0_149 = arith.constant 0 : index
    %c1_150 = arith.constant 1 : index
    %c1_151 = arith.constant 1 : index
    %c8_152 = arith.constant 8 : index
    %78 = vector.load %arg10[%c0_149, %c1_150, %c1_151, %c8_152] : memref<2x10x10x64xbf16, #tpu.memory_space<vmem>>, vector<2x8x8x8xbf16>
    %79 = vector.shape_cast %78 : vector<2x8x8x8xbf16> to vector<128x8xbf16>
    %c0_153 = arith.constant 0 : index
    %c1_154 = arith.constant 1 : index
    %c1_155 = arith.constant 1 : index
    %c24_156 = arith.constant 24 : index
    %80 = vector.load %arg10[%c0_153, %c1_154, %c1_155, %c24_156] : memref<2x10x10x64xbf16, #tpu.memory_space<vmem>>, vector<2x8x8x8xbf16>
    %81 = vector.shape_cast %80 : vector<2x8x8x8xbf16> to vector<128x8xbf16>
    %c0_157 = arith.constant 0 : index
    %c1_158 = arith.constant 1 : index
    %c2_159 = arith.constant 2 : index
    %c8_160 = arith.constant 8 : index
    %82 = vector.load %arg10[%c0_157, %c1_158, %c2_159, %c8_160] : memref<2x10x10x64xbf16, #tpu.memory_space<vmem>>, vector<2x8x8x8xbf16>
    %83 = vector.shape_cast %82 : vector<2x8x8x8xbf16> to vector<128x8xbf16>
    %c0_161 = arith.constant 0 : index
    %c1_162 = arith.constant 1 : index
    %c1_163 = arith.constant 1 : index
    %c40_164 = arith.constant 40 : index
    %84 = vector.load %arg10[%c0_161, %c1_162, %c1_163, %c40_164] : memref<2x10x10x64xbf16, #tpu.memory_space<vmem>>, vector<2x8x8x8xbf16>
    %85 = vector.shape_cast %84 : vector<2x8x8x8xbf16> to vector<128x8xbf16>
    %c0_165 = arith.constant 0 : index
    %c1_166 = arith.constant 1 : index
    %c1_167 = arith.constant 1 : index
    %c56_168 = arith.constant 56 : index
    %86 = vector.load %arg10[%c0_165, %c1_166, %c1_167, %c56_168] : memref<2x10x10x64xbf16, #tpu.memory_space<vmem>>, vector<2x8x8x8xbf16>
    %87 = vector.shape_cast %86 : vector<2x8x8x8xbf16> to vector<128x8xbf16>
    %c0_169 = arith.constant 0 : index
    %c1_170 = arith.constant 1 : index
    %c2_171 = arith.constant 2 : index
    %c40_172 = arith.constant 40 : index
    %88 = vector.load %arg10[%c0_169, %c1_170, %c2_171, %c40_172] : memref<2x10x10x64xbf16, #tpu.memory_space<vmem>>, vector<2x8x8x8xbf16>
    %89 = vector.shape_cast %88 : vector<2x8x8x8xbf16> to vector<128x8xbf16>
    %c0_173 = arith.constant 0 : index
    %c2_174 = arith.constant 2 : index
    %c1_175 = arith.constant 1 : index
    %c8_176 = arith.constant 8 : index
    %90 = vector.load %arg10[%c0_173, %c2_174, %c1_175, %c8_176] : memref<2x10x10x64xbf16, #tpu.memory_space<vmem>>, vector<2x8x8x8xbf16>
    %91 = vector.shape_cast %90 : vector<2x8x8x8xbf16> to vector<128x8xbf16>
    %c0_177 = arith.constant 0 : index
    %c2_178 = arith.constant 2 : index
    %c1_179 = arith.constant 1 : index
    %c24_180 = arith.constant 24 : index
    %92 = vector.load %arg10[%c0_177, %c2_178, %c1_179, %c24_180] : memref<2x10x10x64xbf16, #tpu.memory_space<vmem>>, vector<2x8x8x8xbf16>
    %93 = vector.shape_cast %92 : vector<2x8x8x8xbf16> to vector<128x8xbf16>
    %c0_181 = arith.constant 0 : index
    %c2_182 = arith.constant 2 : index
    %c2_183 = arith.constant 2 : index
    %c8_184 = arith.constant 8 : index
    %94 = vector.load %arg10[%c0_181, %c2_182, %c2_183, %c8_184] : memref<2x10x10x64xbf16, #tpu.memory_space<vmem>>, vector<2x8x8x8xbf16>
    %95 = vector.shape_cast %94 : vector<2x8x8x8xbf16> to vector<128x8xbf16>
    %96 = tpu.concatenate %25, %27, %29, %31, %33, %35, %37, %39, %41, %43, %45, %47, %49, %51, %53, %55 in 1 : vector<128x8xbf16>, vector<128x8xbf16>, vector<128x8xbf16>, vector<128x8xbf16>, vector<128x8xbf16>, vector<128x8xbf16>, vector<128x8xbf16>, vector<128x8xbf16>, vector<128x8xbf16>, vector<128x8xbf16>, vector<128x8xbf16>, vector<128x8xbf16>, vector<128x8xbf16>, vector<128x8xbf16>, vector<128x8xbf16>, vector<128x8xbf16> -> vector<128x128xbf16>
    %97 = tpu.concatenate %57, %59, %61, %63, %65, %67, %69, %71, %73, %75, %77, %79, %81, %83, %85, %87 in 1 : vector<128x8xbf16>, vector<128x8xbf16>, vector<128x8xbf16>, vector<128x8xbf16>, vector<128x8xbf16>, vector<128x8xbf16>, vector<128x8xbf16>, vector<128x8xbf16>, vector<128x8xbf16>, vector<128x8xbf16>, vector<128x8xbf16>, vector<128x8xbf16>, vector<128x8xbf16>, vector<128x8xbf16>, vector<128x8xbf16>, vector<128x8xbf16> -> vector<128x128xbf16>
    %98 = tpu.concatenate %89, %91, %93, %95 in 1 : vector<128x8xbf16>, vector<128x8xbf16>, vector<128x8xbf16>, vector<128x8xbf16> -> vector<128x32xbf16>
    %99 = tpu.concatenate %96, %97, %98 in 1 : vector<128x128xbf16>, vector<128x128xbf16>, vector<128x32xbf16> -> vector<128x288xbf16>
    %c0_185 = arith.constant 0 : index
    %c0_186 = arith.constant 0 : index
    %100 = vector.load %arg5[%c0_185, %c0_186] : memref<288x64xbf16, #tpu.memory_space<vmem>>, vector<288x64xbf16>
    %cst_187 = arith.constant dense<0.000000e+00> : vector<128x64xf32>
    %101 = tpu.matmul %99, %100, %cst_187 {dimension_numbers = #tpu.dot_dimension_numbers<[1], [0], [0], [1], [0, 0, 1, 1], [], []>} : vector<128x288xbf16>, vector<288x64xbf16>, vector<128x64xf32> -> vector<128x64xf32>
    %c0_188 = arith.constant 0 : index
    %c0_189 = arith.constant 0 : index
    %102 = vector.load %arg6[%c0_188, %c0_189] : memref<1x64xf32, #tpu.memory_space<vmem>>, vector<1x64xf32>
    %103 = vector.broadcast %102 : vector<1x64xf32> to vector<128x64xf32>
    %104 = arith.addf %101, %103 : vector<128x64xf32>
    %cst_190 = arith.constant 0.000000e+00 : f32
    %105 = vector.broadcast %cst_190 : f32 to vector<128x64xf32>
    %106 = arith.maximumf %104, %105 : vector<128x64xf32>
    %107 = arith.truncf %106 : vector<128x64xf32> to vector<128x64xbf16>
    %108 = vector.shape_cast %107 : vector<128x64xbf16> to vector<2x8x8x64xbf16>
    %c0_191 = arith.constant 0 : index
    %c1_192 = arith.constant 1 : index
    %c1_193 = arith.constant 1 : index
    %c0_194 = arith.constant 0 : index
    %109 = vector.load %arg11[%c0_191, %c1_192, %c1_193, %c0_194] : memref<2x10x10x64xbf16, #tpu.memory_space<vmem>>, vector<2x8x8x64xbf16>
    tpu.vector_store %arg11[%c0_191, %c1_192, %c1_193, %c0_194], %108 {strides = array<i32>} : memref<2x10x10x64xbf16, #tpu.memory_space<vmem>>, vector<2x8x8x64xbf16>,
    %c0_195 = arith.constant 0 : index
    %c0_196 = arith.constant 0 : index
    %c0_197 = arith.constant 0 : index
    %c48 = arith.constant 48 : index
    %110 = vector.load %arg10[%c0_195, %c0_196, %c0_197, %c48] : memref<2x10x10x64xbf16, #tpu.memory_space<vmem>>, vector<2x8x8x8xbf16>
    %111 = vector.shape_cast %110 : vector<2x8x8x8xbf16> to vector<128x8xbf16>
    %c0_198 = arith.constant 0 : index
    %c0_199 = arith.constant 0 : index
    %c0_200 = arith.constant 0 : index
    %c48_201 = arith.constant 48 : index
    %112 = vector.load %arg11[%c0_198, %c0_199, %c0_200, %c48_201] : memref<2x10x10x64xbf16, #tpu.memory_space<vmem>>, vector<2x8x8x16xbf16>
    %113 = vector.shape_cast %112 : vector<2x8x8x16xbf16> to vector<128x16xbf16>
    %c0_202 = arith.constant 0 : index
    %c0_203 = arith.constant 0 : index
    %c1_204 = arith.constant 1 : index
    %c32 = arith.constant 32 : index
    %114 = vector.load %arg10[%c0_202, %c0_203, %c1_204, %c32] : memref<2x10x10x64xbf16, #tpu.memory_space<vmem>>, vector<2x8x8x8xbf16>
    %115 = vector.shape_cast %114 : vector<2x8x8x8xbf16> to vector<128x8xbf16>
    %c0_205 = arith.constant 0 : index
    %c0_206 = arith.constant 0 : index
    %c1_207 = arith.constant 1 : index
    %c32_208 = arith.constant 32 : index
    %116 = vector.load %arg11[%c0_205, %c0_206, %c1_207, %c32_208] : memref<2x10x10x64xbf16, #tpu.memory_space<vmem>>, vector<2x8x8x16xbf16>
    %117 = vector.shape_cast %116 : vector<2x8x8x16xbf16> to vector<128x16xbf16>
    %c0_209 = arith.constant 0 : index
    %c0_210 = arith.constant 0 : index
    %c1_211 = arith.constant 1 : index
    %c48_212 = arith.constant 48 : index
    %118 = vector.load %arg10[%c0_209, %c0_210, %c1_211, %c48_212] : memref<2x10x10x64xbf16, #tpu.memory_space<vmem>>, vector<2x8x8x8xbf16>
    %119 = vector.shape_cast %118 : vector<2x8x8x8xbf16> to vector<128x8xbf16>
    %c0_213 = arith.constant 0 : index
    %c0_214 = arith.constant 0 : index
    %c1_215 = arith.constant 1 : index
    %c48_216 = arith.constant 48 : index
    %120 = vector.load %arg11[%c0_213, %c0_214, %c1_215, %c48_216] : memref<2x10x10x64xbf16, #tpu.memory_space<vmem>>, vector<2x8x8x16xbf16>
    %121 = vector.shape_cast %120 : vector<2x8x8x16xbf16> to vector<128x16xbf16>
    %c0_217 = arith.constant 0 : index
    %c1_218 = arith.constant 1 : index
    %c0_219 = arith.constant 0 : index
    %c16 = arith.constant 16 : index
    %122 = vector.load %arg10[%c0_217, %c1_218, %c0_219, %c16] : memref<2x10x10x64xbf16, #tpu.memory_space<vmem>>, vector<2x8x8x8xbf16>
    %123 = vector.shape_cast %122 : vector<2x8x8x8xbf16> to vector<128x8xbf16>
    %c0_220 = arith.constant 0 : index
    %c1_221 = arith.constant 1 : index
    %c0_222 = arith.constant 0 : index
    %c16_223 = arith.constant 16 : index
    %124 = vector.load %arg11[%c0_220, %c1_221, %c0_222, %c16_223] : memref<2x10x10x64xbf16, #tpu.memory_space<vmem>>, vector<2x8x8x16xbf16>
    %125 = vector.shape_cast %124 : vector<2x8x8x16xbf16> to vector<128x16xbf16>
    %c0_224 = arith.constant 0 : index
    %c1_225 = arith.constant 1 : index
    %c1_226 = arith.constant 1 : index
    %c0_227 = arith.constant 0 : index
    %126 = vector.load %arg10[%c0_224, %c1_225, %c1_226, %c0_227] : memref<2x10x10x64xbf16, #tpu.memory_space<vmem>>, vector<2x8x8x8xbf16>
    %127 = vector.shape_cast %126 : vector<2x8x8x8xbf16> to vector<128x8xbf16>
    %c0_228 = arith.constant 0 : index
    %c1_229 = arith.constant 1 : index
    %c1_230 = arith.constant 1 : index
    %c0_231 = arith.constant 0 : index
    %128 = vector.load %arg11[%c0_228, %c1_229, %c1_230, %c0_231] : memref<2x10x10x64xbf16, #tpu.memory_space<vmem>>, vector<2x8x8x16xbf16>
    %129 = vector.shape_cast %128 : vector<2x8x8x16xbf16> to vector<128x16xbf16>
    %c0_232 = arith.constant 0 : index
    %c1_233 = arith.constant 1 : index
    %c1_234 = arith.constant 1 : index
    %c16_235 = arith.constant 16 : index
    %130 = vector.load %arg10[%c0_232, %c1_233, %c1_234, %c16_235] : memref<2x10x10x64xbf16, #tpu.memory_space<vmem>>, vector<2x8x8x8xbf16>
    %131 = vector.shape_cast %130 : vector<2x8x8x8xbf16> to vector<128x8xbf16>
    %c0_236 = arith.constant 0 : index
    %c1_237 = arith.constant 1 : index
    %c1_238 = arith.constant 1 : index
    %c16_239 = arith.constant 16 : index
    %132 = vector.load %arg11[%c0_236, %c1_237, %c1_238, %c16_239] : memref<2x10x10x64xbf16, #tpu.memory_space<vmem>>, vector<2x8x8x16xbf16>
    %133 = vector.shape_cast %132 : vector<2x8x8x16xbf16> to vector<128x16xbf16>
    %c0_240 = arith.constant 0 : index
    %c1_241 = arith.constant 1 : index
    %c0_242 = arith.constant 0 : index
    %c48_243 = arith.constant 48 : index
    %134 = vector.load %arg10[%c0_240, %c1_241, %c0_242, %c48_243] : memref<2x10x10x64xbf16, #tpu.memory_space<vmem>>, vector<2x8x8x8xbf16>
    %135 = vector.shape_cast %134 : vector<2x8x8x8xbf16> to vector<128x8xbf16>
    %c0_244 = arith.constant 0 : index
    %c1_245 = arith.constant 1 : index
    %c0_246 = arith.constant 0 : index
    %c48_247 = arith.constant 48 : index
    %136 = vector.load %arg11[%c0_244, %c1_245, %c0_246, %c48_247] : memref<2x10x10x64xbf16, #tpu.memory_space<vmem>>, vector<2x8x8x16xbf16>
    %137 = vector.shape_cast %136 : vector<2x8x8x16xbf16> to vector<128x16xbf16>
    %c0_248 = arith.constant 0 : index
    %c1_249 = arith.constant 1 : index
    %c1_250 = arith.constant 1 : index
    %c32_251 = arith.constant 32 : index
    %138 = vector.load %arg10[%c0_248, %c1_249, %c1_250, %c32_251] : memref<2x10x10x64xbf16, #tpu.memory_space<vmem>>, vector<2x8x8x8xbf16>
    %139 = vector.shape_cast %138 : vector<2x8x8x8xbf16> to vector<128x8xbf16>
    %c0_252 = arith.constant 0 : index
    %c1_253 = arith.constant 1 : index
    %c1_254 = arith.constant 1 : index
    %c32_255 = arith.constant 32 : index
    %140 = vector.load %arg11[%c0_252, %c1_253, %c1_254, %c32_255] : memref<2x10x10x64xbf16, #tpu.memory_space<vmem>>, vector<2x8x8x16xbf16>
    %141 = vector.shape_cast %140 : vector<2x8x8x16xbf16> to vector<128x16xbf16>
    %c0_256 = arith.constant 0 : index
    %c1_257 = arith.constant 1 : index
    %c1_258 = arith.constant 1 : index
    %c48_259 = arith.constant 48 : index
    %142 = vector.load %arg10[%c0_256, %c1_257, %c1_258, %c48_259] : memref<2x10x10x64xbf16, #tpu.memory_space<vmem>>, vector<2x8x8x8xbf16>
    %143 = vector.shape_cast %142 : vector<2x8x8x8xbf16> to vector<128x8xbf16>
    %c0_260 = arith.constant 0 : index
    %c1_261 = arith.constant 1 : index
    %c1_262 = arith.constant 1 : index
    %c48_263 = arith.constant 48 : index
    %144 = vector.load %arg11[%c0_260, %c1_261, %c1_262, %c48_263] : memref<2x10x10x64xbf16, #tpu.memory_space<vmem>>, vector<2x8x8x16xbf16>
    %145 = vector.shape_cast %144 : vector<2x8x8x16xbf16> to vector<128x16xbf16>
    %146 = tpu.concatenate %111, %115, %119, %123, %127, %131, %135, %139, %143, %113, %117, %121, %125, %129, %133, %137 in 1 : vector<128x8xbf16>, vector<128x8xbf16>, vector<128x8xbf16>, vector<128x8xbf16>, vector<128x8xbf16>, vector<128x8xbf16>, vector<128x8xbf16>, vector<128x8xbf16>, vector<128x8xbf16>, vector<128x16xbf16>, vector<128x16xbf16>, vector<128x16xbf16>, vector<128x16xbf16>, vector<128x16xbf16>, vector<128x16xbf16>, vector<128x16xbf16> -> vector<128x184xbf16>
    %147 = tpu.concatenate %141, %145 in 1 : vector<128x16xbf16>, vector<128x16xbf16> -> vector<128x32xbf16>
    %148 = tpu.concatenate %146, %147 in 1 : vector<128x184xbf16>, vector<128x32xbf16> -> vector<128x216xbf16>
    %c0_264 = arith.constant 0 : index
    %c0_265 = arith.constant 0 : index
    %149 = vector.load %arg7[%c0_264, %c0_265] : memref<216x24xbf16, #tpu.memory_space<vmem>>, vector<216x24xbf16>
    %cst_266 = arith.constant dense<0.000000e+00> : vector<128x24xf32>
    %150 = tpu.matmul %148, %149, %cst_266 {dimension_numbers = #tpu.dot_dimension_numbers<[1], [0], [0], [1], [0, 0, 1, 1], [], []>} : vector<128x216xbf16>, vector<216x24xbf16>, vector<128x24xf32> -> vector<128x24xf32>
    %c0_267 = arith.constant 0 : index
    %c0_268 = arith.constant 0 : index
    %151 = vector.load %arg8[%c0_267, %c0_268] : memref<1x24xf32, #tpu.memory_space<vmem>>, vector<1x24xf32>
    %152 = vector.broadcast %151 : vector<1x24xf32> to vector<128x24xf32>
    %153 = arith.addf %150, %152 : vector<128x24xf32>
    %cst_269 = arith.constant 0.000000e+00 : f32
    %154 = vector.broadcast %cst_269 : f32 to vector<128x24xf32>
    %155 = arith.maximumf %153, %154 : vector<128x24xf32>
    %156 = arith.truncf %155 : vector<128x24xf32> to vector<128x24xbf16>
    %c0_270 = arith.constant 0 : index
    %c0_271 = arith.constant 0 : index
    %c0_272 = arith.constant 0 : index
    %c12 = arith.constant 12 : index
    %157 = vector.load %arg2[%c0_270, %c0_271, %c0_272, %c12] : memref<2x10x10x16xbf16, #tpu.memory_space<vmem>>, vector<2x8x8x4xbf16>
    %158 = vector.shape_cast %157 : vector<2x8x8x4xbf16> to vector<128x4xbf16>
    %c0_273 = arith.constant 0 : index
    %c0_274 = arith.constant 0 : index
    %c1_275 = arith.constant 1 : index
    %c8_276 = arith.constant 8 : index
    %159 = vector.load %arg2[%c0_273, %c0_274, %c1_275, %c8_276] : memref<2x10x10x16xbf16, #tpu.memory_space<vmem>>, vector<2x8x8x4xbf16>
    %160 = vector.shape_cast %159 : vector<2x8x8x4xbf16> to vector<128x4xbf16>
    %161 = arith.maximumf %158, %160 : vector<128x4xbf16>
    %c0_277 = arith.constant 0 : index
    %c0_278 = arith.constant 0 : index
    %c1_279 = arith.constant 1 : index
    %c12_280 = arith.constant 12 : index
    %162 = vector.load %arg2[%c0_277, %c0_278, %c1_279, %c12_280] : memref<2x10x10x16xbf16, #tpu.memory_space<vmem>>, vector<2x8x8x4xbf16>
    %163 = vector.shape_cast %162 : vector<2x8x8x4xbf16> to vector<128x4xbf16>
    %164 = arith.maximumf %161, %163 : vector<128x4xbf16>
    %c0_281 = arith.constant 0 : index
    %c1_282 = arith.constant 1 : index
    %c0_283 = arith.constant 0 : index
    %c4 = arith.constant 4 : index
    %165 = vector.load %arg2[%c0_281, %c1_282, %c0_283, %c4] : memref<2x10x10x16xbf16, #tpu.memory_space<vmem>>, vector<2x8x8x4xbf16>
    %166 = vector.shape_cast %165 : vector<2x8x8x4xbf16> to vector<128x4xbf16>
    %167 = arith.maximumf %164, %166 : vector<128x4xbf16>
    %c0_284 = arith.constant 0 : index
    %c1_285 = arith.constant 1 : index
    %c1_286 = arith.constant 1 : index
    %c0_287 = arith.constant 0 : index
    %168 = vector.load %arg2[%c0_284, %c1_285, %c1_286, %c0_287] : memref<2x10x10x16xbf16, #tpu.memory_space<vmem>>, vector<2x8x8x4xbf16>
    %169 = vector.shape_cast %168 : vector<2x8x8x4xbf16> to vector<128x4xbf16>
    %170 = arith.maximumf %167, %169 : vector<128x4xbf16>
    %c0_288 = arith.constant 0 : index
    %c1_289 = arith.constant 1 : index
    %c1_290 = arith.constant 1 : index
    %c4_291 = arith.constant 4 : index
    %171 = vector.load %arg2[%c0_288, %c1_289, %c1_290, %c4_291] : memref<2x10x10x16xbf16, #tpu.memory_space<vmem>>, vector<2x8x8x4xbf16>
    %172 = vector.shape_cast %171 : vector<2x8x8x4xbf16> to vector<128x4xbf16>
    %173 = arith.maximumf %170, %172 : vector<128x4xbf16>
    %c0_292 = arith.constant 0 : index
    %c1_293 = arith.constant 1 : index
    %c0_294 = arith.constant 0 : index
    %c12_295 = arith.constant 12 : index
    %174 = vector.load %arg2[%c0_292, %c1_293, %c0_294, %c12_295] : memref<2x10x10x16xbf16, #tpu.memory_space<vmem>>, vector<2x8x8x4xbf16>
    %175 = vector.shape_cast %174 : vector<2x8x8x4xbf16> to vector<128x4xbf16>
    %176 = arith.maximumf %173, %175 : vector<128x4xbf16>
    %c0_296 = arith.constant 0 : index
    %c1_297 = arith.constant 1 : index
    %c1_298 = arith.constant 1 : index
    %c8_299 = arith.constant 8 : index
    %177 = vector.load %arg2[%c0_296, %c1_297, %c1_298, %c8_299] : memref<2x10x10x16xbf16, #tpu.memory_space<vmem>>, vector<2x8x8x4xbf16>
    %178 = vector.shape_cast %177 : vector<2x8x8x4xbf16> to vector<128x4xbf16>
    %179 = arith.maximumf %176, %178 : vector<128x4xbf16>
    %c0_300 = arith.constant 0 : index
    %c1_301 = arith.constant 1 : index
    %c1_302 = arith.constant 1 : index
    %c12_303 = arith.constant 12 : index
    %180 = vector.load %arg2[%c0_300, %c1_301, %c1_302, %c12_303] : memref<2x10x10x16xbf16, #tpu.memory_space<vmem>>, vector<2x8x8x4xbf16>
    %181 = vector.shape_cast %180 : vector<2x8x8x4xbf16> to vector<128x4xbf16>
    %182 = arith.maximumf %179, %181 : vector<128x4xbf16>
    %cst_304 = arith.constant 0.000000e+00 : bf16
    %183 = vector.broadcast %cst_304 : bf16 to vector<128x4xbf16>
    %184 = tpu.concatenate %156, %182, %183 in 1 : vector<128x24xbf16>, vector<128x4xbf16>, vector<128x4xbf16> -> vector<128x32xbf16>
    %185 = vector.shape_cast %184 : vector<128x32xbf16> to vector<2x8x8x32xbf16>
    %c0_305 = arith.constant 0 : index
    %c0_306 = arith.constant 0 : index
    %c0_307 = arith.constant 0 : index
    %c0_308 = arith.constant 0 : index
    %186 = vector.load %arg9[%c0_305, %c0_306, %c0_307, %c0_308] : memref<2x8x8x32xbf16, #tpu.memory_space<vmem>>, vector<2x8x8x32xbf16>
    tpu.vector_store %arg9[%c0_305, %c0_306, %c0_307, %c0_308], %185 {strides = array<i32>} : memref<2x8x8x32xbf16, #tpu.memory_space<vmem>>, vector<2x8x8x32xbf16>,
    return
  }
  func.func @transform_0(%arg0: i32) -> (i32, i32, i32, i32) {
    %c0_i32 = arith.constant 0 : i32
    %c0_i32_0 = arith.constant 0 : i32
    %c0_i32_1 = arith.constant 0 : i32
    %c0_i32_2 = arith.constant 0 : i32
    return %arg0, %c0_i32, %c0_i32_0, %c0_i32_1 : i32, i32, i32, i32
  }
  func.func @transform_1(%arg0: i32) -> (i32, i32, i32, i32) {
    %c0_i32 = arith.constant 0 : i32
    %c0_i32_0 = arith.constant 0 : i32
    %c0_i32_1 = arith.constant 0 : i32
    %c0_i32_2 = arith.constant 0 : i32
    return %arg0, %c0_i32, %c0_i32_0, %c0_i32_1 : i32, i32, i32, i32
  }
  func.func @transform_2(%arg0: i32) -> (i32, i32) {
    %c0_i32 = arith.constant 0 : i32
    %c0_i32_0 = arith.constant 0 : i32
    %c0_i32_1 = arith.constant 0 : i32
    return %c0_i32, %c0_i32_0 : i32, i32
  }
  func.func @transform_3(%arg0: i32) -> (i32, i32) {
    %c0_i32 = arith.constant 0 : i32
    %c0_i32_0 = arith.constant 0 : i32
    %c0_i32_1 = arith.constant 0 : i32
    return %c0_i32, %c0_i32_0 : i32, i32
  }
  func.func @transform_4(%arg0: i32) -> (i32, i32) {
    %c0_i32 = arith.constant 0 : i32
    %c0_i32_0 = arith.constant 0 : i32
    %c0_i32_1 = arith.constant 0 : i32
    return %c0_i32, %c0_i32_0 : i32, i32
  }
  func.func @transform_5(%arg0: i32) -> (i32, i32) {
    %c0_i32 = arith.constant 0 : i32
    %c0_i32_0 = arith.constant 0 : i32
    %c0_i32_1 = arith.constant 0 : i32
    return %c0_i32, %c0_i32_0 : i32, i32
  }
  func.func @transform_6(%arg0: i32) -> (i32, i32) {
    %c0_i32 = arith.constant 0 : i32
    %c0_i32_0 = arith.constant 0 : i32
    %c0_i32_1 = arith.constant 0 : i32
    return %c0_i32, %c0_i32_0 : i32, i32
  }
  func.func @transform_7(%arg0: i32) -> (i32, i32) {
    %c0_i32 = arith.constant 0 : i32
    %c0_i32_0 = arith.constant 0 : i32
    %c0_i32_1 = arith.constant 0 : i32
    return %c0_i32, %c0_i32_0 : i32, i32
  }
  func.func @transform_8(%arg0: i32) -> (i32, i32, i32, i32) {
    %c0_i32 = arith.constant 0 : i32
    %c0_i32_0 = arith.constant 0 : i32
    %c0_i32_1 = arith.constant 0 : i32
    %c0_i32_2 = arith.constant 0 : i32
    return %arg0, %c0_i32, %c0_i32_0, %c0_i32_1 : i32, i32, i32, i32
  }
}

</mosaic_0001>

<bundles_post_ra>
// kernel: bottleneck_pool_forward.1
= control target key start
LH: loop header
LB: loop body
LE: loop exit
PB: predicated region body
PF: predicated region fallthrough
CT: control target
= control target key end

     0   :  { %vm363_vm0 = vcmask 130048   ;;  %vm32_vm1 = vcmask 516096   ;;  %vm42_vm2 = vsmask.f32 256  ;;  %v47_v7 = vld [vmem:[#allocation2 + $0x8] sm:$0x1]  ;;  %s12170_s2 = inlined_call_operand.vmem [shape: bf16[16,64], index: 2, kind: input, shape index: {}]   ;;  %s12171_s0 = inlined_call_operand.vmem [shape: bf16[2,8,8,16], index: 0, kind: input, shape index: {}]   ;;  %s12172_s3 = inlined_call_operand.vmem [shape: f32[1,64], index: 3, kind: input, shape index: {}]   ;;  %s12173_s4 = inlined_call_operand.vmem [shape: bf16[288,64], index: 4, kind: input, shape index: {}]   ;;  %s12174_s5 = inlined_call_operand.vmem [shape: f32[1,64], index: 5, kind: input, shape index: {}]   ;;  %s12175_s6 = inlined_call_operand.vmem [shape: bf16[216,24], index: 6, kind: input, shape index: {}]   ;;  %s12176_s7 = inlined_call_operand.vmem [shape: f32[1,24], index: 7, kind: input, shape index: {}]   ;;  %s12177_s1 = inlined_call_operand.vmem [shape: bf16[2,10,10,16], index: 1, kind: input, shape index: {}]   ;;  %s12178_s8 = inlined_call_operand.vmem [shape: bf16[2,8,8,32], index: 8, kind: output, shape index: {}]  }
   0x1   :  { %v7571_v0 = vld [vmem:[%s12170_s2] sm:$0xff]  ;;  %v7568_v2 = vld [vmem:[%s12171_s0 + $0x28] sm:$0xff]  ;;  %v7569_v4 = vld [vmem:[%s12171_s0 + $0x30] sm:$0xff]  ;;  %v12341_v8 = vmov 0  ;;  %vm104_vm4 = vsmask.f32 7938 }
   0x2   :  { %v7563_v1 = vld [vmem:[%s12171_s0] sm:$0xff]  ;;  %395 = vmatpush.bf16.msra.mxu0 %v7571_v0  ;;  %7659 = vmatpush.bf16.msra.mxu2 %v7571_v0  ;;  %v7564_v3 = vld [vmem:[%s12171_s0 + $0x8] sm:$0xff]  ;;  %v7565_v5 = vld [vmem:[%s12171_s0 + $0x10] sm:$0xff]  ;;  %v12344_v11 = vmov 0  ;;  %vm30_vm6 = vcmask 519168   ;;  %v7899_v15 = vmov 0  }
   0x3   :  { %v7570_v6 = vld [vmem:[%s12171_s0 + $0x38] sm:$0xff]  ;;  %vm7990_vm3 = vmand %vm32_vm1, %vm42_vm2  ;;  %v109_v9 = vld [vmem:[#allocation2 + $0xc] sm:$0x1]  ;;  %31 = vst.msk [vmem:[#allocation2] sm:$0xf] %vm30_vm6, %v7899_v15  ;;  %vm1291_vm8 = vcmask 1042432  }
   0x4   :  { %v12342_v8 = vsel %vm7990_vm3, 4294967295, %v12341_v8  ;;  %v48_v10 = vsel %vm7990_vm3, 0, %v47_v7  ;;  %vm7998_vm5 = vmand %vm32_vm1, %vm104_vm4  ;;  %v7566_v13 = vld [vmem:[%s12171_s0 + $0x18] sm:$0xff]  ;;  %v7567_v14 = vld [vmem:[%s12171_s0 + $0x20] sm:$0xff]  ;;  %171 = vst.msk [vmem:[#allocation3 + $0x48] sm:$0xf] %vm30_vm6, %v7899_v15 }
   0x5   :  { %7111 = vmatmul.msk.bf16.vlgmr.msra.gmra.mxu0 %vm363_vm0, %v7563_v1  ;;  %7116 = vmatmul.msk.bf16.vlgmr.msra.gmra.mxu2 %vm363_vm0, %v7568_v2  ;;  %12343 = vst [vmem:[#allocation4_spill] sm:$0xff] %v12342_v8  ;;  %v12345_v11 = vsel %vm7998_vm5, 4294967295, %v12344_v11  ;;  %v110_v12 = vsel %vm7998_vm5, 0, %v109_v9  ;;  %v83_v16 = vld [vmem:[#allocation2 + $0x68] sm:$0x1]  ;;  %vm8070_vm7 = vmand %vm30_vm6, %vm104_vm4  ;;  %vm1292_vm9 = vcmask 1046532  }
   0x6   :  { %12346 = vst [vmem:[#allocation5_spill] sm:$0xff] %v12345_v11  ;;  %v145_v17 = vld [vmem:[#allocation2 + $0x6c] sm:$0x1]  ;;  %v84_v18 = vsel %vm7990_vm3, 0, %v83_v16  ;;  %v50_v20 = vld [vmem:[#allocation2 + $0x10] sm:$0x1]  ;;  %vm8093_vm12 = vmor %vm1291_vm8, %vm1292_vm9 }
   0x7   :  { %49 = vst [vmem:[#allocation2 + $0x8] sm:$0x1] %v48_v10  ;;  %v146_v19 = vsel %vm7998_vm5, 0, %v145_v17  ;;  %v51_v21 = vsel %vm7990_vm3, 0, %v50_v20  ;;  %v112_v22 = vld [vmem:[#allocation2 + $0x14] sm:$0x1] }
   0x8   :  { %111 = vst [vmem:[#allocation2 + $0xc] sm:$0x1] %v110_v12  ;;  %v113_v23 = vsel %vm7998_vm5, 0, %v112_v22  ;;  %v86_v26 = vld [vmem:[#allocation2 + $0x70] sm:$0x1]  ;;  %s7900_s23 = smov 72  }
   0x9   :  { %172 = vst.msk [vmem:[#allocation3 + $0x4c] sm:$0x1] %vm32_vm1, %v7899_v15  ;;  %v148_v27 = vld [vmem:[#allocation2 + $0x74] sm:$0x1]  ;;  %v87_v28 = vsel %vm7990_vm3, 0, %v86_v26  ;;  %s7901_s24 = smov 120  }
   0xa   :  { %173 = vst.msk [vmem:[#allocation3 + $0x98] sm:$0xf] %vm30_vm6, %v7899_v15  ;;  %v44_v24 = vld [vmem:[#allocation2] sm:$0x1]  ;;  %v149_v29 = vsel %vm7998_vm5, 0, %v148_v27  ;;  %s7902_s25 = smov 48  }
   0xb   :  { %174 = vst.msk [vmem:[#allocation3 + $0x9c] sm:$0x1] %vm32_vm1, %v7899_v15  ;;  %v45_v25 = vsel %vm7990_vm3, 0, %v44_v24  ;;  %v53_v30 = vld [vmem:[#allocation2 + $0x18] sm:$0x1]  ;;  %s7903_s26 = smov 96  }
   0xc   :  { %85 = vst [vmem:[#allocation2 + $0x68] sm:$0x1] %v84_v18  ;;  %v54_v31 = vsel %vm7990_vm3, 0, %v53_v30  ;;  %v115_v32 = vld [vmem:[#allocation2 + $0x1c] sm:$0x1]  ;;  %s7904_s27 = smov 88  }
   0xd   :  { %147 = vst [vmem:[#allocation2 + $0x6c] sm:$0x1] %v146_v19  ;;  %v116_v33 = vsel %vm7998_vm5, 0, %v115_v32  ;;  %v89_v34 = vld [vmem:[#allocation2 + $0x78] sm:$0x1]  ;;  %s7905_s28 = smov 32  }
   0xe   :  { %52 = vst [vmem:[#allocation2 + $0x10] sm:$0x1] %v51_v21  ;;  %v151_v35 = vld [vmem:[#allocation2 + $0x7c] sm:$0x1]  ;;  %v90_v36 = vsel %vm7990_vm3, 0, %v89_v34  ;;  %s7906_s29 = smov 24  }
   0xf   :  { %114 = vst [vmem:[#allocation2 + $0x14] sm:$0x1] %v113_v23  ;;  %v152_v37 = vsel %vm7998_vm5, 0, %v151_v35  ;;  %v8049_v38 = vld [vmem:[%s12172_s3] ss:$0 sm:$0xff]  ;;  %s7907_s30 = smov 16  }
  0x10   :  { %46 = vst [vmem:[#allocation2] sm:$0x1] %v45_v25  ;;  %v56_v39 = vld [vmem:[#allocation2 + $0x20] sm:$0x1]  ;;  %v118_v41 = vld [vmem:[#allocation2 + $0x24] sm:$0x1] }
  0x11   :  { %33 = vst.msk [vmem:[#allocation2 + $0x4] sm:$0x1] %vm32_vm1, %v7899_v15  ;;  %v57_v40 = vsel %vm7990_vm3, 0, %v56_v39  ;;  %v119_v43 = vsel %vm7998_vm5, 0, %v118_v41  ;;  %v59_v50 = vld [vmem:[#allocation2 + $0x28] sm:$0x1] }
  0x12   :  { %34 = vst.msk [vmem:[#allocation2 + $0x50] sm:$0xf] %vm30_vm6, %v7899_v15  ;;  %v60_v52 = vsel %vm7990_vm3, 0, %v59_v50  ;;  %v121_v55 = vld [vmem:[#allocation2 + $0x2c] sm:$0x1]  ;;  %s7908_s9 = smov 80  }
  0x13   :  { %35 = vst.msk [vmem:[#allocation2 + $0x54] sm:$0x1] %vm32_vm1, %v7899_v15  ;;  %v632_v58 = vld [vmem:[#allocation2 + $0x8] sm:$0xf]  ;;  %v635_v59 = vld [vmem:[#allocation2 + $0xc] sm:$0x1] }
  0x14   :  { %88 = vst [vmem:[#allocation2 + $0x70] sm:$0x1] %v87_v28  ;;  %v202_v61 = vld [vmem:[#allocation3 + $0x48] sm:$0x1]  ;;  %v232_v62 = vld [vmem:[#allocation3 + $0x98] sm:$0x1] }
  0x15   :  { %7112 = vmatmul.msk.bf16.gmra.mxu0 %vm363_vm0, %v7564_v3  ;;  %7117 = vmatmul.msk.bf16.gmra.mxu2 %vm363_vm0, %v7569_v4  ;;  %150 = vst [vmem:[#allocation2 + $0x74] sm:$0x1] %v149_v29  ;;  %v203_v3 = vsel %vm7990_vm3, 0, %v202_v61  ;;  %v262_v4 = vld [vmem:[#allocation3 + $0x4c] sm:$0x1]  ;;  %v122_v17 = vsel %vm7998_vm5, 0, %v121_v55 }
  0x16   :  { %55 = vst [vmem:[#allocation2 + $0x18] sm:$0x1] %v54_v31  ;;  %v263_v7 = vsel %vm7998_vm5, 0, %v262_v4  ;;  %v292_v9 = vld [vmem:[#allocation3 + $0x9c] sm:$0x1]  ;;  %s7909_s10 = smov 8  }
  0x17   :  { %37 = vst.msk [vmem:[#allocation2 + $0x48] sm:$0xf] %vm30_vm6, %v7899_v15  ;;  %v728_v48 = vld [vmem:[#allocation2] sm:$0xf]  ;;  %v293_v16 = vsel %vm7998_vm5, 0, %v292_v9  ;;  %s7911_s16 = smov 112  }
  0x18   :  { %117 = vst [vmem:[#allocation2 + $0x1c] sm:$0x1] %v116_v33  ;;  %v106_v44 = vld [vmem:[#allocation2 + $0x4] sm:$0x1]  ;;  %v764_v56 = vshrl.u32 %v728_v48, 16  ;;  %v767_v63 = vshll.u32 %v728_v48, 16 }
  0x19   :  { %38 = vst.msk [vmem:[#allocation2 + $0x4c] sm:$0x1] %vm32_vm1, %v7899_v15  ;;  %v107_v47 = vsel %vm7998_vm5, 0, %v106_v44  ;;  %v692_v25 = vld [vmem:[#allocation2 + $0x68] sm:$0xf]  ;;  %vm2223_vm14 = vcmask 64512  }
  0x1a   :  { %39 = vst.msk [vmem:[#allocation2 + $0x98] sm:$0xf] %vm30_vm6, %v7899_v15  ;;  %v766_v18 = vrot.slane %v764_v56, 4  ;;  %v769_v19 = vrot.slane %v767_v63, 5  ;;  %v695_v26 = vld [vmem:[#allocation2 + $0x6c] sm:$0x1] }
  0x1b   :  { %40 = vst.msk [vmem:[#allocation2 + $0x9c] sm:$0x1] %vm32_vm1, %v7899_v15  ;;  %v92_v32 = vld [vmem:[#allocation2 + $0x80] sm:$0x1]  ;;  %vm760_vm10 = vsmask.f32 3328 }
  0x1c   :  { %91 = vst [vmem:[#allocation2 + $0x78] sm:$0x1] %v90_v36  ;;  %vm761_vm11 = vsmask.f32 7440  ;;  %v770_v36 = vor.u32 %v769_v19, %v766_v18  ;;  %v641_v41 = vld [vmem:[#allocation2 + $0x14] sm:$0x1] }
  0x1d   :  { %153 = vst [vmem:[#allocation2 + $0x7c] sm:$0x1] %v152_v37  ;;  %v154_v48 = vld [vmem:[#allocation2 + $0x84] sm:$0x1]  ;;  %vm8130_vm13 = vmor %vm760_vm10, %vm761_vm11  ;;  %vm2264_vm15 = vcmask 195584   ;;  %vm12253_vm2 = vcmask 326656  }
  0x1e   :  { %58 = vst [vmem:[#allocation2 + $0x20] sm:$0x1] %v57_v40  ;;  %v638_v40 = vld [vmem:[#allocation2 + $0x10] sm:$0xf]  ;;  %vm12249_vm4 = vcmask 392192   ;;  %vm12251_vm8 = vcmask 523264  }
  0x1f   :  { %166 = vst.msk [vmem:[#allocation3] sm:$0xf] %vm30_vm6, %v7899_v15  ;;  %vm12252_vm9 = vcmask 588800   ;;  %vm2375_vm10 = vcmask 654336   ;;  %s7912_s13 = smov 40   ;;  %vm12254_vm11 = vcmask 719872  }
  0x20   :  { %120 = vst [vmem:[#allocation2 + $0x24] sm:$0x1] %v119_v43  ;;  %s7913_s14 = smov 64   ;;  %s7914_s15 = smov 56  }
  0x21   :  { %167 = vst.msk [vmem:[#allocation3 + $0x4] sm:$0x1] %vm32_vm1, %v7899_v15  ;;  %s7915_s18 = smov 4   ;;  %s7916_s2 = smov 12  }
  0x22   :  { %168 = vst.msk [vmem:[#allocation3 + $0x50] sm:$0xf] %vm30_vm6, %v7899_v15  ;;  %vm12250_vm6 = vcmask 457728  }
  0x23   :  { %169 = vst.msk [vmem:[#allocation3 + $0x54] sm:$0x1] %vm32_vm1, %v7899_v15  ;;  %v1243_v15 = vld [vmem:[#allocation2] sm:$0xe]  ;;  %vm12255_vm1 = vcmask 261120  }
  0x24   :  { %108 = vst [vmem:[#allocation2 + $0x4] sm:$0x1] %v107_v47  ;;  %v7119_v31 = vrot.slane %v1243_v15, 9  ;;  %v93_v47 = vsel %vm7990_vm3, 0, %v92_v32  ;;  %v644_v15 = vld [vmem:[#allocation2 + $0x18] sm:$0xf] }
  0x25   :  { %7113 = vmatmul.msk.bf16.gmra.mxu0 %vm363_vm0, %v7565_v5  ;;  %7118 = vmatmul.msk.bf16.gmra.mxu2 %vm363_vm0, %v7570_v6  ;;  %61 = vst [vmem:[#allocation2 + $0x28] sm:$0x1] %v60_v52  ;;  %v12347_v5 = vmov 0  ;;  %v233_v6 = vsel %vm7990_vm3, 0, %v232_v62  ;;  %v155_v62 = vsel %vm7998_vm5, 0, %v154_v48 }
  0x26   :  { %v12348_v5 = vsel %vm8070_vm7, 4294967295, %v12347_v5  ;;  %204 = vst [vmem:[#allocation3 + $0x48] sm:$0x1] %v203_v3  ;;  %v701_v3 = vld [vmem:[#allocation2 + $0x74] sm:$0x1] }
  0x27   :  { %12349 = vst [vmem:[#allocation6_spill] sm:$0xff] %v12348_v5 }
  0x28   :  { %234 = vst [vmem:[#allocation3 + $0x98] sm:$0x1] %v233_v6 }
  0x29   :  { %264 = vst [vmem:[#allocation3 + $0x4c] sm:$0x1] %v263_v7 }
  0x2a   :  { %294 = vst [vmem:[#allocation3 + $0x9c] sm:$0x1] %v293_v16  ;;  %v647_v16 = vld [vmem:[#allocation2 + $0x1c] sm:$0x1] }
  0x2b   :  { %v8086_v24 = vld [vmem:[#allocation2 + $0x4] sm:$0x1]  ;;  %123 = vst [vmem:[#allocation2 + $0x2c] sm:$0x1] %v122_v17 }
  0x2c   :  { %v1296_v35 = vrot.slane %v8086_v24, 5  ;;  %94 = vst [vmem:[#allocation2 + $0x80] sm:$0x1] %v93_v47  ;;  %v773_v56 = vshll.u32 %v8086_v24, 16 }
  0x2d   :  { %156 = vst [vmem:[#allocation2 + $0x84] sm:$0x1] %v155_v62 }
  0x2e   :  { %v8108_v61 = vsel %vm8093_vm12, %v7119_v31, %v1296_v35  ;;  %v8118_v18 = vrot.slane %v773_v56, 5 }
  0x35   :  { %7114 = vmatmul.msk.bf16.gmra.mxu0 %vm363_vm0, %v7566_v13 }
  0x45   :  { %7115 = vmatmul.msk.bf16.gmra.mxu0 %vm363_vm0, %v7567_v14 }
  0x82   :  { %v397_v42 = vpop.f32.mrf.mxu0 }
  0x83   :  { %v398_v45 = vadd.f32 %v8049_v38, %v397_v42 }
  0x85   :  { %v437_v46 = vmax.f32 %v398_v45, 0.0 }
  0x87   :  { %v453_v49 = vpack.c.bf16 %v437_v46, %v437_v46  ;;  %v12350_v46 = vmov 0 }
  0x88   :  { %v422_v51 = vpop.f32.mrf.mxu2  ;;  %v12351_v46 = vsel %vm8093_vm12, 4294967295, %v12350_v46 }
  0x89   :  { %v470_v53 = vshrl.u32 %v453_v49, 16  ;;  %v423_v54 = vadd.f32 %v8049_v38, %v422_v51  ;;  %v473_v57 = vshll.u32 %v453_v49, 16  ;;  %12352 = vst [vmem:[#allocation7_spill] sm:$0xff] %v12351_v46 }
  0x8a   :  { %v399_v60 = vpop.f32.mrf.mxu0 }
  0x8b   :  { %v472_v0 = vrot.slane %v470_v53, 7  ;;  %v447_v1 = vmax.f32 %v423_v54, 0.0  ;;  %v400_v2 = vadd.f32 %v8049_v38, %v399_v60  ;;  %v7169_v53 = vld [vmem:[#allocation2] sm:$0xf] }
  0x8d   :  { %v475_v10 = vor.u32 %v473_v57, %v472_v0  ;;  %v476_v12 = vrot.slane %v472_v0, 4  ;;  %v463_v13 = vpack.c.bf16 %v447_v1, %v447_v1  ;;  %v438_v14 = vmax.f32 %v400_v2, 0.0  ;;  %v698_v2 = vld [vmem:[#allocation2 + $0x70] sm:$0xf] }
  0x8e   :  { %v8104_v57 = vrot.slane %v770_v36, 4  ;;  %v62_v36 = vld [vmem:[#allocation2 + $0x30] sm:$0x1] }
  0x8f   :  { %v633_v20 = vsel %vm8070_vm7, %v475_v10, %v632_v58  ;;  %v636_v21 = vsel %vm7990_vm3, %v476_v12, %v635_v59  ;;  %v550_v22 = vshrl.u32 %v463_v13, 16  ;;  %v553_v23 = vshll.u32 %v463_v13, 16 }
  0x90   :  { %634 = vst [vmem:[#allocation2 + $0x8] sm:$0xf] %v633_v20  ;;  %v454_v27 = vpack.c.bf16 %v438_v14, %v438_v14  ;;  %v424_v28 = vpop.f32.mrf.mxu2 }
  0x91   :  { %637 = vst [vmem:[#allocation2 + $0xc] sm:$0x1] %v636_v21  ;;  %v552_v29 = vrot.slane %v550_v22, 7  ;;  %v425_v30 = vadd.f32 %v8049_v38, %v424_v28  ;;  %v2111_v21 = vunpack.c.l.b16 %v8108_v61  ;;  %v95_v61 = vld [vmem:[#allocation2 + $0x88] sm:$0x1] }
  0x92   :  { %v478_v33 = vshrl.u32 %v454_v27, 16  ;;  %v402_v34 = vpop.f32.mrf.mxu0  ;;  %v481_v45 = vshll.u32 %v454_v27, 16 }
  0x93   :  { %v555_v37 = vor.u32 %v553_v23, %v552_v29  ;;  %v556_v39 = vrot.slane %v552_v29, 4  ;;  %v448_v42 = vmax.f32 %v425_v30, 0.0  ;;  %v403_v43 = vadd.f32 %v8049_v38, %v402_v34 }
  0x94   :  { %v480_v44 = vrot.slane %v478_v33, 7 }
  0x95   :  { %v693_v49 = vsel %vm8070_vm7, %v555_v37, %v692_v25  ;;  %v696_v50 = vsel %vm7990_vm3, %v556_v39, %v695_v26  ;;  %v464_v51 = vpack.c.bf16 %v448_v42, %v448_v42  ;;  %v439_v52 = vmax.f32 %v403_v43, 0.0  ;;  %v124_v42 = vld [vmem:[#allocation2 + $0x34] sm:$0x1] }
  0x96   :  { %694 = vst [vmem:[#allocation2 + $0x68] sm:$0xf] %v693_v49  ;;  %v483_v54 = vor.u32 %v481_v45, %v480_v44  ;;  %v484_v55 = vrot.slane %v480_v44, 4 }
  0x97   :  { %697 = vst [vmem:[#allocation2 + $0x6c] sm:$0x1] %v696_v50  ;;  %v558_v58 = vshrl.u32 %v464_v51, 16  ;;  %v455_v59 = vpack.c.bf16 %v439_v52, %v439_v52  ;;  %v7572_v60 = vld [vmem:[#allocation2 + $0x4] sm:$0xf0]  ;;  %v561_v1 = vshll.u32 %v464_v51, 16 }
  0x98   :  { %v639_v63 = vsel %vm8070_vm7, %v483_v54, %v638_v40  ;;  %v642_v0 = vsel %vm7990_vm3, %v484_v55, %v641_v41  ;;  %v427_v4 = vpop.f32.mrf.mxu2  ;;  %v7170_v6 = vor.u32 %v7572_v60, %v7169_v53  ;;  %v745_v7 = vld [vmem:[#allocation2 + $0xc] sm:$0x1]  ;;  %v1244_v9 = vld [vmem:[#allocation2 + $0x8] sm:$0xe]  ;;  %v776_v53 = vsel %vm8130_vm13, %v8104_v57, %v8118_v18  ;;  %v704_v55 = vld [vmem:[#allocation2 + $0x78] sm:$0xf] }
  0x99   :  { %640 = vst [vmem:[#allocation2 + $0x10] sm:$0xf] %v639_v63  ;;  %v560_v10 = vrot.slane %v558_v58, 7  ;;  %v486_v12 = vshrl.u32 %v455_v59, 16  ;;  %v489_v13 = vshll.u32 %v455_v59, 16  ;;  %v428_v14 = vadd.f32 %v8049_v38, %v427_v4 }
  0x9a   :  { %643 = vst [vmem:[#allocation2 + $0x14] sm:$0x1] %v642_v0  ;;  %v404_v17 = vpop.f32.mrf.mxu0  ;;  %1879 = vrot.lane.b32.xlu0 %v7170_v6, %s7900_s23  ;;  %v787_v19 = vshll.u32 %v745_v7, 16  ;;  %v7120_v20 = vrot.slane %v1244_v9, 9  ;;  %v729_v26 = vld [vmem:[#allocation2 + $0x8] sm:$0xf]  ;;  %v1895_v18 = vunpack.c.l.b16 %v776_v53 }
  0x9b   :  { %v563_v22 = vor.u32 %v561_v1, %v560_v10  ;;  %v564_v23 = vrot.slane %v560_v10, 4  ;;  %v488_v24 = vrot.slane %v486_v12, 7  ;;  %v449_v25 = vmax.f32 %v428_v14, 0.0  ;;  %v7201_v45 = vld [vmem:[#allocation2 + $0x8] sm:$0xf] }
  0x9c   :  { %v405_v27 = vadd.f32 %v8049_v38, %v404_v17  ;;  %v8122_v28 = vrot.slane %v787_v19, 5  ;;  %v1300_v29 = vrot.slane %v745_v7, 5  ;;  %v778_v30 = vshrl.u32 %v729_v26, 16  ;;  %v707_v63 = vld [vmem:[#allocation2 + $0x7c] sm:$0x1] }
  0x9d   :  { %v699_v31 = vsel %vm8070_vm7, %v563_v22, %v698_v2  ;;  %v702_v32 = vsel %vm7990_vm3, %v564_v23, %v701_v3  ;;  %v491_v33 = vor.u32 %v489_v13, %v488_v24  ;;  %v492_v34 = vrot.slane %v488_v24, 4  ;;  %v650_v4 = vld [vmem:[#allocation2 + $0x20] sm:$0xf]  ;;  %v653_v57 = vld [vmem:[#allocation2 + $0x24] sm:$0x1] }
  0x9e   :  { %700 = vst [vmem:[#allocation2 + $0x70] sm:$0xf] %v699_v31  ;;  %v465_v37 = vpack.c.bf16 %v449_v25, %v449_v25  ;;  %v440_v39 = vmax.f32 %v405_v27, 0.0  ;;  %v1301_v40 = vsel %vm8093_vm12, %v7120_v20, %v1300_v29  ;;  %v780_v41 = vrot.slane %v778_v30, 4  ;;  %v7221_v20 = vld [vmem:[#allocation2 + $0x68] sm:$0xf] }
  0x9f   :  { %703 = vst [vmem:[#allocation2 + $0x74] sm:$0x1] %v702_v32  ;;  %v645_v43 = vsel %vm8070_vm7, %v491_v33, %v644_v15  ;;  %v648_v44 = vsel %vm7990_vm3, %v492_v34, %v647_v16  ;;  %v2112_v47 = vunpack.c.l.b16 %v1301_v40  ;;  %v781_v48 = vshll.u32 %v729_v26, 16  ;;  %v157_v26 = vld [vmem:[#allocation2 + $0x8c] sm:$0x1] }
  0xa0   :  { %646 = vst [vmem:[#allocation2 + $0x18] sm:$0xf] %v645_v43  ;;  %v566_v49 = vshrl.u32 %v465_v37, 16  ;;  %v569_v50 = vshll.u32 %v465_v37, 16  ;;  %v456_v51 = vpack.c.bf16 %v440_v39, %v440_v39  ;;  %v7580_v52 = vld [vmem:[#allocation2 + $0xc] sm:$0xf0]  ;;  %v429_v54 = vpop.f32.mrf.mxu2 }
  0xa1   :  { %649 = vst [vmem:[#allocation2 + $0x1c] sm:$0x1] %v648_v44  ;;  %v8144_v56 = vor.u32 %v7580_v52, %v7201_v45  ;;  %v2127_v58 = vpack.c.b16 %v2112_v47, %v2111_v21  ;;  %v783_v59 = vrot.slane %v781_v48, 5  ;;  %v430_v60 = vadd.f32 %v8049_v38, %v429_v54  ;;  %v65_v27 = vld [vmem:[#allocation2 + $0x38] sm:$0x1] }
  0xa2   :  { %v568_v62 = vrot.slane %v566_v49, 7  ;;  %v494_v0 = vshrl.u32 %v456_v51, 16  ;;  %v497_v1 = vshll.u32 %v456_v51, 16  ;;  %v407_v2 = vpop.f32.mrf.mxu0  ;;  %v63_v3 = vsel %vm7990_vm3, 0, %v62_v36  ;;  %v127_v33 = vld [vmem:[#allocation2 + $0x3c] sm:$0x1] }
  0xa3   :  { %v408_v6 = vadd.f32 %v8049_v38, %v407_v2  ;;  %2047 = vrot.lane.b32.xlu1 %v8144_v56, %s7901_s24  ;;  %2135 = vrot.lane.b32.xlu0 %v2127_v58, %s7902_s25  ;;  %v784_v7 = vor.u32 %v783_v59, %v780_v41  ;;  %v450_v9 = vmax.f32 %v430_v60, 0.0  ;;  %64 = vst [vmem:[#allocation2 + $0x30] sm:$0x1] %v63_v3  ;;  %v125_v10 = vsel %vm7998_vm5, 0, %v124_v42  ;;  %v710_v39 = vld [vmem:[#allocation2 + $0x80] sm:$0xf] }
  0xa4   :  { %v571_v12 = vor.u32 %v569_v50, %v568_v62  ;;  %v572_v13 = vrot.slane %v568_v62, 4  ;;  %v496_v14 = vrot.slane %v494_v0, 7  ;;  %126 = vst [vmem:[#allocation2 + $0x34] sm:$0x1] %v125_v10  ;;  %v96_v15 = vsel %vm7990_vm3, 0, %v95_v61 }
  0xa5   :  { %v441_v16 = vmax.f32 %v408_v6, 0.0  ;;  %v785_v17 = vrot.slane %v784_v7, 4  ;;  %v466_v19 = vpack.c.bf16 %v450_v9, %v450_v9  ;;  %v7585_v21 = vld [vmem:[#allocation2 + $0x6c] sm:$0xf0]  ;;  %97 = vst [vmem:[#allocation2 + $0x88] sm:$0x1] %v96_v15 }
  0xa6   :  { %v705_v22 = vsel %vm8070_vm7, %v571_v12, %v704_v55  ;;  %v708_v23 = vsel %vm7990_vm3, %v572_v13, %v707_v63  ;;  %v499_v24 = vor.u32 %v497_v1, %v496_v14  ;;  %v500_v25 = vrot.slane %v496_v14, 4  ;;  %v987_v42 = vld [vmem:[#allocation2 + $0x8] sm:$0xf]  ;;  %v713_v49 = vld [vmem:[#allocation2 + $0x84] sm:$0x1] }
  0xa7   :  { %706 = vst [vmem:[#allocation2 + $0x78] sm:$0xf] %v705_v22  ;;  %v457_v29 = vpack.c.bf16 %v441_v16, %v441_v16  ;;  %v790_v30 = vsel %vm8130_vm13, %v785_v17, %v8122_v28  ;;  %v574_v31 = vshrl.u32 %v466_v19, 16  ;;  %v577_v32 = vshll.u32 %v466_v19, 16  ;;  %v656_v47 = vld [vmem:[#allocation2 + $0x28] sm:$0xf] }
  0xa8   :  { %709 = vst [vmem:[#allocation2 + $0x7c] sm:$0x1] %v708_v23  ;;  %v651_v34 = vsel %vm8070_vm7, %v499_v24, %v650_v4  ;;  %v654_v36 = vsel %vm7990_vm3, %v500_v25, %v653_v57  ;;  %v1896_v37 = vunpack.c.l.b16 %v790_v30  ;;  %v8168_v40 = vor.u32 %v7585_v21, %v7221_v20  ;;  %v432_v41 = vpop.f32.mrf.mxu2  ;;  %v659_v55 = vld [vmem:[#allocation2 + $0x2c] sm:$0x1]  ;;  %v7573_v62 = vld [vmem:[#allocation2 + $0x14] sm:$0xf0] }
  0xa9   :  { %652 = vst [vmem:[#allocation2 + $0x20] sm:$0xf] %v651_v34  ;;  %v502_v43 = vshrl.u32 %v457_v29, 16  ;;  %v505_v44 = vshll.u32 %v457_v29, 16  ;;  %v576_v28 = vrot.slane %v574_v31, 7  ;;  %v158_v45 = vsel %vm7998_vm5, 0, %v157_v26 }
  0xaa   :  { %12355 = vst [vmem:[#allocation8_spill] sm:$0xff] %v8168_v40  ;;  %v8172_v48 = vpack.c.b16 %v1896_v37, %v1895_v18  ;;  %v409_v50 = vpop.f32.mrf.mxu0  ;;  %v433_v51 = vadd.f32 %v8049_v38, %v432_v41  ;;  %v66_v52 = vsel %vm7990_vm3, 0, %v65_v27  ;;  %v128_v53 = vsel %vm7998_vm5, 0, %v127_v33  ;;  %v988_v63 = vld [vmem:[#allocation2 + $0x10] sm:$0xf] }
  0xab   :  { %655 = vst [vmem:[#allocation2 + $0x24] sm:$0x1] %v654_v36  ;;  %v504_v54 = vrot.slane %v502_v43, 7  ;;  %v579_v58 = vor.u32 %v577_v32, %v576_v28  ;;  %v580_v59 = vrot.slane %v576_v28, 4  ;;  %v410_v60 = vadd.f32 %v8049_v38, %v409_v50  ;;  %2057 = vrot.lane.b32.xlu0 %v8168_v40, %s7901_s24  ;;  %v1003_v57 = vld [vmem:[#allocation2 + $0xc] sm:$0x1] }
  0xac   :  { %159 = vst [vmem:[#allocation2 + $0x8c] sm:$0x1] %v158_v45  ;;  %1919 = vrot.lane.b32.xlu2 %v8172_v48, %s7903_s26  ;;  %1935 = vrot.lane.b32.xlu1 %v8172_v48, %s7904_s27  ;;  %v451_v61 = vmax.f32 %v433_v51, 0.0  ;;  %v1020_v0 = vshrl.u32 %v987_v42, 16  ;;  %v7173_v9 = vld [vmem:[#allocation2 + $0x10] sm:$0xf] }
  0xad   :  { %67 = vst [vmem:[#allocation2 + $0x38] sm:$0x1] %v66_v52  ;;  %v507_v1 = vor.u32 %v505_v44, %v504_v54  ;;  %v508_v2 = vrot.slane %v504_v54, 4  ;;  %v711_v3 = vsel %vm8070_vm7, %v579_v58, %v710_v39  ;;  %v714_v4 = vsel %vm7990_vm3, %v580_v59, %v713_v49  ;;  %v1004_v10 = vld [vmem:[#allocation2 + $0x14] sm:$0x1] }
  0xae   :  { %129 = vst [vmem:[#allocation2 + $0x3c] sm:$0x1] %v128_v53  ;;  %v442_v6 = vmax.f32 %v410_v60, 0.0  ;;  %v467_v7 = vpack.c.bf16 %v451_v61, %v451_v61  ;;  %v1022_v12 = vrot.slane %v1020_v0, 4  ;;  %v1023_v13 = vshll.u32 %v987_v42, 16 }
  0xaf   :  { %712 = vst [vmem:[#allocation2 + $0x80] sm:$0xf] %v711_v3  ;;  %v657_v14 = vsel %vm8070_vm7, %v507_v1, %v656_v47  ;;  %v660_v15 = vsel %vm7990_vm3, %v508_v2, %v659_v55  ;;  %v1034_v16 = vshrl.u32 %v988_v63, 16  ;;  %v68_v17 = vld [vmem:[#allocation2 + $0x40] sm:$0x1]  ;;  %v7174_v22 = vor.u32 %v7573_v62, %v7173_v9 }
  0xb0   :  { %715 = vst [vmem:[#allocation2 + $0x84] sm:$0x1] %v714_v4  ;;  %v458_v18 = vpack.c.bf16 %v442_v6, %v442_v6  ;;  %v582_v19 = vshrl.u32 %v467_v7, 16  ;;  %v585_v20 = vshll.u32 %v467_v7, 16  ;;  %v1025_v21 = vrot.slane %v1023_v13, 5 }
  0xb1   :  { %658 = vst [vmem:[#allocation2 + $0x28] sm:$0xf] %v657_v14  ;;  %v1029_v23 = vshll.u32 %v1003_v57, 16  ;;  %v1036_v24 = vrot.slane %v1034_v16, 4  ;;  %v1037_v25 = vshll.u32 %v988_v63, 16  ;;  %v1043_v39 = vshll.u32 %v1004_v10, 16 }
  0xb2   :  { %661 = vst [vmem:[#allocation2 + $0x2c] sm:$0x1] %v660_v15  ;;  %v510_v26 = vshrl.u32 %v458_v18, 16  ;;  %v513_v27 = vshll.u32 %v458_v18, 16  ;;  %v584_v29 = vrot.slane %v582_v19, 7  ;;  %v412_v31 = vpop.f32.mrf.mxu0  ;;  %v1026_v32 = vor.u32 %v1025_v21, %v1022_v12 }
  0xb3   :  { %v716_v30 = vld [vmem:[#allocation2 + $0x88] sm:$0xf]  ;;  %v662_v33 = vld [vmem:[#allocation2 + $0x30] sm:$0xf]  ;;  %v719_v34 = vld [vmem:[#allocation2 + $0x8c] sm:$0x1]  ;;  %v413_v36 = vadd.f32 %v8049_v38, %v412_v31  ;;  %1881 = vrot.lane.b32.xlu0 %v7174_v22, %s7900_s23 }
  0xb4   :  { %v1039_v37 = vrot.slane %v1037_v25, 5  ;;  %v69_v41 = vsel %vm7990_vm3, 0, %v68_v17  ;;  %v512_v42 = vrot.slane %v510_v26, 7  ;;  %v665_v43 = vld [vmem:[#allocation2 + $0x34] sm:$0x1]  ;;  %2079 = vrot.lane.b32.xlu2 %v8172_v48, %s7905_s28  ;;  %v587_v44 = vor.u32 %v585_v20, %v584_v29  ;;  %2095 = vrot.lane.b32.xlu1 %v8172_v48, %s7906_s29 }
  0xb5   :  { %v588_v28 = vrot.slane %v584_v29, 4  ;;  %v1027_v45 = vrot.slane %v1026_v32, 4  ;;  %v443_v47 = vmax.f32 %v413_v36, 0.0  ;;  %v1031_v49 = vrot.slane %v1029_v23, 5  ;;  %70 = vst [vmem:[#allocation2 + $0x40] sm:$0x1] %v69_v41 }
  0xb6   :  { %v1040_v50 = vor.u32 %v1039_v37, %v1036_v24  ;;  %v130_v51 = vld [vmem:[#allocation2 + $0x44] sm:$0x1]  ;;  %v515_v52 = vor.u32 %v513_v27, %v512_v42  ;;  %v516_v53 = vrot.slane %v512_v42, 4  ;;  %v717_v54 = vsel %vm8070_vm7, %v587_v44, %v716_v30  ;;  %v77_v58 = vld [vmem:[#allocation2 + $0x58] sm:$0x1] }
  0xb7   :  { %v720_v55 = vsel %vm7990_vm3, %v588_v28, %v719_v34  ;;  %718 = vst [vmem:[#allocation2 + $0x88] sm:$0xf] %v717_v54  ;;  %v459_v59 = vpack.c.bf16 %v443_v47, %v443_v47  ;;  %v1032_v48 = vsel %vm8130_vm13, %v1027_v45, %v1031_v49  ;;  %v1045_v61 = vrot.slane %v1043_v39, 5  ;;  %v139_v62 = vld [vmem:[#allocation2 + $0x5c] sm:$0x1] }
  0xb8   :  { %v1041_v60 = vrot.slane %v1040_v50, 4  ;;  %v663_v63 = vsel %vm8070_vm7, %v515_v52, %v662_v33  ;;  %v666_v0 = vsel %vm7990_vm3, %v516_v53, %v665_v43  ;;  %721 = vst [vmem:[#allocation2 + $0x8c] sm:$0x1] %v720_v55  ;;  %v131_v1 = vsel %vm7998_vm5, 0, %v130_v51  ;;  %v8216_v3 = vld [vmem:[#allocation2 + $0x14] sm:$0x1] }
  0xb9   :  { %v78_v2 = vsel %vm7990_vm3, 0, %v77_v58  ;;  %664 = vst [vmem:[#allocation2 + $0x30] sm:$0xf] %v663_v63  ;;  %v518_v4 = vshrl.u32 %v459_v59, 16  ;;  %v521_v57 = vshll.u32 %v459_v59, 16  ;;  %v1991_v9 = vunpack.c.l.b16 %v1032_v48 }
  0xba   :  { %v1046_v6 = vsel %vm8130_vm13, %v1041_v60, %v1045_v61  ;;  %v8220_v7 = vld [vmem:[#allocation2 + $0x1c] sm:$0x1]  ;;  %667 = vst [vmem:[#allocation2 + $0x34] sm:$0x1] %v666_v0  ;;  %v414_v12 = vpop.f32.mrf.mxu0  ;;  %v140_v13 = vsel %vm7998_vm5, 0, %v139_v62  ;;  %v1304_v25 = vrot.slane %v8216_v3, 5 }
  0xbb   :  { %v1992_v10 = vunpack.c.l.b16 %v1046_v6  ;;  %v1245_v14 = vld [vmem:[#allocation2 + $0x10] sm:$0xe]  ;;  %v520_v15 = vrot.slane %v518_v4, 7  ;;  %132 = vst [vmem:[#allocation2 + $0x44] sm:$0x1] %v131_v1  ;;  %v415_v16 = vadd.f32 %v8049_v38, %v414_v12  ;;  %v1308_v27 = vrot.slane %v8220_v7, 5 }
  0xbc   :  { %v1246_v17 = vld [vmem:[#allocation2 + $0x18] sm:$0xe]  ;;  %v7121_v18 = vrot.slane %v1245_v14, 9  ;;  %v671_v20 = vld [vmem:[#allocation2 + $0x3c] sm:$0x1]  ;;  %v801_v36 = vshll.u32 %v8216_v3, 16 }
  0xbd   :  { %v668_v19 = vld [vmem:[#allocation2 + $0x38] sm:$0xf]  ;;  %v8225_v21 = vpack.c.b16 %v1992_v10, %v1991_v9  ;;  %79 = vst [vmem:[#allocation2 + $0x58] sm:$0x1] %v78_v2  ;;  %v523_v22 = vor.u32 %v521_v57, %v520_v15  ;;  %v524_v23 = vrot.slane %v520_v15, 4  ;;  %v444_v24 = vmax.f32 %v415_v16, 0.0 }
  0xbe   :  { %141 = vst [vmem:[#allocation2 + $0x5c] sm:$0x1] %v140_v13  ;;  %v7122_v26 = vrot.slane %v1246_v17, 9  ;;  %v1305_v32 = vsel %vm8093_vm12, %v7121_v18, %v1304_v25  ;;  %v80_v33 = vld [vmem:[#allocation2 + $0x60] sm:$0x1]  ;;  %v815_v37 = vshll.u32 %v8220_v7, 16 }
  0xbf   :  { %12356 = vst [vmem:[#allocation9_spill] sm:$0xff] %v8225_v21  ;;  %2031 = vrot.lane.b32.xlu2 %v8225_v21, %s7907_s30  ;;  %2015 = vrot.lane.b32.xlu0 %v8225_v21, %s7906_s29  ;;  %v669_v29 = vsel %vm8070_vm7, %v523_v22, %v668_v19  ;;  %v672_v30 = vsel %vm7990_vm3, %v524_v23, %v671_v20  ;;  %v142_v34 = vld [vmem:[#allocation2 + $0x64] sm:$0x1]  ;;  %v81_v41 = vsel %vm7990_vm3, 0, %v80_v33  ;;  %v674_v45 = vld [vmem:[#allocation2 + $0x40] sm:$0xf]  ;;  %v2113_v49 = vunpack.c.l.b16 %v1305_v32 }
  0xc0   :  { %v460_v31 = vpack.c.bf16 %v444_v24, %v444_v24  ;;  %2167 = vrot.lane.b32.xlu1 %v8225_v21, %s7908_s9  ;;  %670 = vst [vmem:[#allocation2 + $0x38] sm:$0xf] %v669_v29  ;;  %v1309_v39 = vsel %vm8093_vm12, %v7122_v26, %v1308_v27  ;;  %v143_v28 = vsel %vm7998_vm5, 0, %v142_v34  ;;  %v997_v50 = vld [vmem:[#allocation2 + $0x68] sm:$0xf] }
  0xc1   :  { %673 = vst [vmem:[#allocation2 + $0x3c] sm:$0x1] %v672_v30  ;;  %v2114_v44 = vunpack.c.l.b16 %v1309_v39  ;;  %v7581_v53 = vld [vmem:[#allocation2 + $0x1c] sm:$0xf0]  ;;  %v1160_v54 = vshrl.u32 %v997_v50, 16  ;;  %v1163_v57 = vshll.u32 %v997_v50, 16 }
  0xc2   :  { %v526_v42 = vshrl.u32 %v460_v31, 16  ;;  %v529_v43 = vshll.u32 %v460_v31, 16  ;;  %v417_v47 = vpop.f32.mrf.mxu0  ;;  %82 = vst [vmem:[#allocation2 + $0x60] sm:$0x1] %v81_v41  ;;  %v677_v55 = vld [vmem:[#allocation2 + $0x44] sm:$0x1] }
  0xc3   :  { %v418_v52 = vadd.f32 %v8049_v38, %v417_v47  ;;  %144 = vst [vmem:[#allocation2 + $0x64] sm:$0x1] %v143_v28  ;;  %v2128_v58 = vpack.c.b16 %v2114_v44, %v2113_v49  ;;  %v998_v59 = vld [vmem:[#allocation2 + $0x70] sm:$0xf]  ;;  %v1013_v48 = vld [vmem:[#allocation2 + $0x6c] sm:$0x1] }
  0xc4   :  { %v528_v51 = vrot.slane %v526_v42, 7  ;;  %v7205_v63 = vld [vmem:[#allocation2 + $0x18] sm:$0xf]  ;;  %v1014_v0 = vld [vmem:[#allocation2 + $0x74] sm:$0x1]  ;;  %v1162_v1 = vrot.slane %v1160_v54, 4 }
  0xc5   :  { %v445_v62 = vmax.f32 %v418_v52, 0.0  ;;  %v7193_v2 = vld [vmem:[#allocation2 + $0x70] sm:$0xf]  ;;  %v7578_v4 = vld [vmem:[#allocation2 + $0x74] sm:$0xf0]  ;;  %v1169_v6 = vshll.u32 %v1013_v48, 16  ;;  %v8259_v18 = vor.u32 %v7581_v53, %v7205_v63 }
  0xc6   :  { %v531_v60 = vor.u32 %v529_v43, %v528_v51  ;;  %v532_v61 = vrot.slane %v528_v51, 4  ;;  %v1174_v9 = vshrl.u32 %v998_v59, 16  ;;  %v1177_v10 = vshll.u32 %v998_v59, 16  ;;  %v730_v16 = vld [vmem:[#allocation2 + $0x10] sm:$0xf] }
  0xc7   :  { %2151 = vrot.lane.b32.xlu2 %v8225_v21, %s7904_s27  ;;  %2063 = vrot.lane.b32.xlu0 %v8225_v21, %s7909_s10  ;;  %v461_v14 = vpack.c.bf16 %v445_v62, %v445_v62  ;;  %v1183_v15 = vshll.u32 %v1014_v0, 16  ;;  %v731_v17 = vld [vmem:[#allocation2 + $0x18] sm:$0xf]  ;;  %v1165_v19 = vrot.slane %v1163_v57, 5  ;;  %v7194_v25 = vor.u32 %v7578_v4, %v7193_v2  ;;  %v683_v43 = vld [vmem:[#allocation2 + $0x5c] sm:$0x1] }
  0xc8   :  { %v675_v12 = vsel %vm8070_vm7, %v531_v60, %v674_v45  ;;  %v678_v13 = vsel %vm7990_vm3, %v532_v61, %v677_v55  ;;  %2137 = vrot.lane.b32.xlu1 %v2128_v58, %s7902_s25  ;;  %v1176_v20 = vrot.slane %v1174_v9, 4  ;;  %v1179_v22 = vrot.slane %v1177_v10, 5  ;;  %v680_v34 = vld [vmem:[#allocation2 + $0x58] sm:$0xf]  ;;  %v1363_v5 = vld [vmem:[#allocation2 + $0x30] sm:$0xe] }
  0xc9   :  { %676 = vst [vmem:[#allocation2 + $0x40] sm:$0xf] %v675_v12  ;;  %v534_v23 = vshrl.u32 %v461_v14, 16  ;;  %v537_v24 = vshll.u32 %v461_v14, 16  ;;  %v1171_v26 = vrot.slane %v1169_v6, 5  ;;  %v1166_v29 = vor.u32 %v1165_v19, %v1162_v1 }
  0xca   :  { %679 = vst [vmem:[#allocation2 + $0x44] sm:$0x1] %v678_v13  ;;  %v419_v27 = vpop.f32.mrf.mxu0  ;;  %v1180_v30 = vor.u32 %v1179_v22, %v1176_v20  ;;  %v1185_v31 = vrot.slane %v1183_v15, 5  ;;  %v792_v32 = vshrl.u32 %v730_v16, 16  ;;  %v795_v41 = vshll.u32 %v730_v16, 16 }
  0xcb   :  { %v536_v33 = vrot.slane %v534_v23, 7  ;;  %v420_v39 = vadd.f32 %v8049_v38, %v419_v27  ;;  %v806_v42 = vshrl.u32 %v731_v17, 16  ;;  %v1167_v44 = vrot.slane %v1166_v29, 4  ;;  %v686_v12 = vld [vmem:[#allocation2 + $0x60] sm:$0xf] }
  0xcc   :  { %v1181_v28 = vrot.slane %v1180_v30, 4  ;;  %v794_v45 = vrot.slane %v792_v32, 4  ;;  %v809_v47 = vshll.u32 %v731_v17, 16  ;;  %v797_v52 = vrot.slane %v795_v41, 5  ;;  %v689_v7 = vld [vmem:[#allocation2 + $0x64] sm:$0x1] }
  0xcd   :  { %v539_v49 = vor.u32 %v537_v24, %v536_v33  ;;  %v540_v50 = vrot.slane %v536_v33, 4  ;;  %v446_v51 = vmax.f32 %v420_v39, 0.0  ;;  %v1172_v53 = vsel %vm8130_vm13, %v1167_v44, %v1171_v26  ;;  %v990_v16 = vld [vmem:[#allocation2 + $0x20] sm:$0xf]  ;;  %v989_v22 = vld [vmem:[#allocation2 + $0x18] sm:$0xf] }
  0xce   :  { %v1186_v38 = vsel %vm8130_vm13, %v1181_v28, %v1185_v31  ;;  %v808_v54 = vrot.slane %v806_v42, 4  ;;  %v811_v55 = vrot.slane %v809_v47, 5  ;;  %v817_v48 = vrot.slane %v815_v37, 5  ;;  %v8293_v23 = vld [vmem:[#allocation2 + $0x7c] sm:$0x1] }
  0xcf   :  { %2049 = vrot.lane.b32.xlu2 %v8259_v18, %s7901_s24  ;;  %1891 = vrot.lane.b32.xlu0 %v7194_v25, %s7900_s23  ;;  %v681_v58 = vsel %vm8070_vm7, %v539_v49, %v680_v34  ;;  %v684_v59 = vsel %vm7990_vm3, %v540_v50, %v683_v43  ;;  %v462_v60 = vpack.c.bf16 %v446_v51, %v446_v51  ;;  %v2001_v61 = vunpack.c.l.b16 %v1172_v53  ;;  %v1256_v24 = vld [vmem:[#allocation2 + $0x78] sm:$0xe]  ;;  %v740_v31 = vld [vmem:[#allocation2 + $0x70] sm:$0xf]  ;;  %v8297_v32 = vld [vmem:[#allocation2 + $0x74] sm:$0x1] }
  0xd0   :  { %682 = vst [vmem:[#allocation2 + $0x58] sm:$0xf] %v681_v58  ;;  %v2002_v62 = vunpack.c.l.b16 %v1186_v38  ;;  %v798_v63 = vor.u32 %v797_v52, %v794_v45  ;;  %v812_v0 = vor.u32 %v811_v55, %v808_v54  ;;  %v803_v4 = vrot.slane %v801_v36, 5  ;;  %v741_v27 = vld [vmem:[#allocation2 + $0x78] sm:$0xf]  ;;  %v434_v55 = vpop.f32.mrf.mxu2 }
  0xd1   :  { %685 = vst [vmem:[#allocation2 + $0x5c] sm:$0x1] %v684_v59  ;;  %v542_v1 = vshrl.u32 %v462_v60, 16  ;;  %v545_v2 = vshll.u32 %v462_v60, 16  ;;  %v1062_v25 = vshrl.u32 %v990_v16, 16  ;;  %v1065_v26 = vshll.u32 %v990_v16, 16 }
  0xd2   :  { %v8277_v57 = vpack.c.b16 %v2002_v62, %v2001_v61  ;;  %v799_v6 = vrot.slane %v798_v63, 4  ;;  %v813_v9 = vrot.slane %v812_v0, 4  ;;  %v1048_v29 = vshrl.u32 %v989_v22, 16  ;;  %v1255_v33 = vld [vmem:[#allocation2 + $0x70] sm:$0xe] }
  0xd3   :  { %v544_v10 = vrot.slane %v542_v1, 7  ;;  %v1051_v30 = vshll.u32 %v989_v22, 16  ;;  %v7132_v34 = vrot.slane %v1256_v24, 9  ;;  %v1348_v39 = vrot.slane %v8293_v23, 5  ;;  %v7225_v41 = vld [vmem:[#allocation2 + $0x78] sm:$0xf] }
  0xd4   :  { %12357 = vst [vmem:[#allocation10_spill] sm:$0xff] %v8277_v57  ;;  %2041 = vrot.lane.b32.xlu1 %v8277_v57, %s7907_s30  ;;  %v804_v37 = vsel %vm8130_vm13, %v799_v6, %v803_v4  ;;  %v818_v13 = vsel %vm8130_vm13, %v813_v9, %v817_v48  ;;  %v1064_v42 = vrot.slane %v1062_v25, 4  ;;  %v1067_v43 = vrot.slane %v1065_v26, 5  ;;  %v7586_v45 = vld [vmem:[#allocation2 + $0x7c] sm:$0xf0] }
  0xd5   :  { %v547_v14 = vor.u32 %v545_v2, %v544_v10  ;;  %v548_v15 = vrot.slane %v544_v10, 4  ;;  %v1897_v3 = vunpack.c.l.b16 %v804_v37  ;;  %v1898_v36 = vunpack.c.l.b16 %v818_v13  ;;  %v8302_v47 = vld [vmem:[#allocation2 + $0x24] sm:$0x1]  ;;  %v98_v54 = vld [vmem:[#allocation2 + $0x90] sm:$0x1] }
  0xd6   :  { %v946_v44 = vshrl.u32 %v741_v27, 16  ;;  %v949_v28 = vshll.u32 %v741_v27, 16  ;;  %v932_v49 = vshrl.u32 %v740_v31, 16  ;;  %v935_v50 = vshll.u32 %v740_v31, 16  ;;  %v160_v60 = vld [vmem:[#allocation2 + $0x94] sm:$0x1] }
  0xd7   :  { %2025 = vrot.lane.b32.xlu2 %v8277_v57, %s7906_s29  ;;  %v687_v17 = vsel %vm8070_vm7, %v547_v14, %v686_v12  ;;  %v690_v19 = vsel %vm7990_vm3, %v548_v15, %v689_v7  ;;  %v8291_v20 = vpack.c.b16 %v1898_v36, %v1897_v3  ;;  %v7131_v51 = vrot.slane %v1255_v33, 9  ;;  %v7883_v61 = vld [vmem:[%s12172_s3] ss:$0 sm:$0xff]  ;;  %v8314_v0 = vld [vmem:[#allocation2 + $0x1c] sm:$0x1]  ;;  %s7910_s3 = smov 104  }
  0xd8   :  { %688 = vst [vmem:[#allocation2 + $0x60] sm:$0xf] %v687_v17  ;;  %v1344_v52 = vrot.slane %v8297_v32, 5  ;;  %v1050_v53 = vrot.slane %v1048_v29, 4  ;;  %v1053_v38 = vrot.slane %v1051_v30, 5  ;;  %v948_v58 = vrot.slane %v946_v44, 4 }
  0xd9   :  { %691 = vst [vmem:[#allocation2 + $0x64] sm:$0x1] %v690_v19  ;;  %1921 = vrot.lane.b32.xlu0 %v8291_v20, %s7903_s26  ;;  %v951_v59 = vrot.slane %v949_v28, 5  ;;  %v99_v48 = vsel %vm7990_vm3, 0, %v98_v54  ;;  %v435_v62 = vadd.f32 %v7883_v61, %v434_v55  ;;  %v1349_v63 = vsel %vm8093_vm12, %v7132_v34, %v1348_v39  ;;  %v7574_v31 = vld [vmem:[#allocation2 + $0x24] sm:$0xf0] }
  0xda   :  { %v1068_v1 = vor.u32 %v1067_v43, %v1064_v42  ;;  %100 = vst [vmem:[#allocation2 + $0x90] sm:$0x1] %v99_v48  ;;  %v161_v2 = vsel %vm7998_vm5, 0, %v160_v60  ;;  %v8320_v4 = vor.u32 %v7586_v45, %v7225_v41  ;;  %v934_v6 = vrot.slane %v932_v49, 4  ;;  %v7177_v43 = vld [vmem:[#allocation2 + $0x20] sm:$0xf] }
  0xdb   :  { %v937_v9 = vrot.slane %v935_v50, 5  ;;  %162 = vst [vmem:[#allocation2 + $0x94] sm:$0x1] %v161_v2  ;;  %v452_v10 = vmax.f32 %v435_v62, 0.0  ;;  %v1345_v12 = vsel %vm8093_vm12, %v7131_v51, %v1344_v52  ;;  %v1054_v7 = vor.u32 %v1053_v38, %v1050_v53  ;;  %v999_v54 = vld [vmem:[#allocation2 + $0x78] sm:$0xf] }
  0xdc   :  { %2161 = vrot.lane.b32.xlu1 %v8277_v57, %s7904_s27  ;;  %12358 = vst [vmem:[#allocation11_spill] sm:$0xff] %v8320_v4  ;;  %v1057_v37 = vshll.u32 %v8314_v0, 16  ;;  %v1071_v13 = vshll.u32 %v8302_v47, 16  ;;  %v955_v14 = vshll.u32 %v8293_v23, 16  ;;  %v2124_v15 = vunpack.c.l.b16 %v1349_v63  ;;  %v1365_v11 = vld [vmem:[#allocation2 + $0x40] sm:$0xe] }
  0xdd   :  { %v952_v3 = vor.u32 %v951_v59, %v948_v58  ;;  %v468_v36 = vpack.c.bf16 %v452_v10, %v452_v10  ;;  %v1069_v16 = vrot.slane %v1068_v1, 4  ;;  %v2123_v17 = vunpack.c.l.b16 %v1345_v12  ;;  %v1000_v59 = vld [vmem:[#allocation2 + $0x80] sm:$0xf] }
  0xde   :  { %v938_v19 = vor.u32 %v937_v9, %v934_v6  ;;  %v941_v25 = vshll.u32 %v8297_v32, 16  ;;  %v1055_v26 = vrot.slane %v1054_v7, 4  ;;  %v1059_v27 = vrot.slane %v1057_v37, 5  ;;  %v8356_v37 = vld [vmem:[#allocation2 + $0x84] sm:$0x1] }
  0xdf   :  { %2073 = vrot.lane.b32.xlu2 %v8277_v57, %s7909_s10  ;;  %v590_v22 = vshrl.u32 %v468_v36, 16  ;;  %v593_v24 = vshll.u32 %v468_v36, 16  ;;  %v1073_v29 = vrot.slane %v1071_v13, 5  ;;  %v957_v23 = vrot.slane %v955_v14, 5  ;;  %v7209_v36 = vld [vmem:[#allocation2 + $0x28] sm:$0xf] }
  0xe0   :  { %v2133_v30 = vpack.c.b16 %v2124_v15, %v2123_v17  ;;  %v953_v33 = vrot.slane %v952_v3, 4  ;;  %v939_v44 = vrot.slane %v938_v19, 4  ;;  %v943_v32 = vrot.slane %v941_v25, 5  ;;  %v733_v25 = vld [vmem:[#allocation2 + $0x28] sm:$0xf] }
  0xe1   :  { %2081 = vrot.lane.b32.xlu0 %v8291_v20, %s7905_s28  ;;  %v592_v34 = vrot.slane %v590_v22, 7  ;;  %v1074_v39 = vsel %vm8130_vm13, %v1069_v16, %v1073_v29  ;;  %v722_v41 = vld [vmem:[#allocation2 + $0x90] sm:$0xf]  ;;  %v7178_v49 = vor.u32 %v7574_v31, %v7177_v43  ;;  %v1060_v50 = vsel %vm8130_vm13, %v1055_v26, %v1059_v27  ;;  %v749_v26 = vld [vmem:[#allocation2 + $0x2c] sm:$0x1] }
  0xe2   :  { %v725_v42 = vld [vmem:[#allocation2 + $0x94] sm:$0x1]  ;;  %v1994_v51 = vunpack.c.l.b16 %v1074_v39  ;;  %v958_v52 = vsel %vm8130_vm13, %v953_v33, %v957_v23  ;;  %v1993_v55 = vunpack.c.l.b16 %v1060_v50  ;;  %v944_v58 = vsel %vm8130_vm13, %v939_v44, %v943_v32  ;;  %v7582_v16 = vld [vmem:[#allocation2 + $0x2c] sm:$0xf0]  ;;  %v1248_v27 = vld [vmem:[#allocation2 + $0x28] sm:$0xe] }
  0xe3   :  { %v595_v28 = vor.u32 %v593_v24, %v592_v34  ;;  %v596_v45 = vrot.slane %v592_v34, 4  ;;  %v1908_v48 = vunpack.c.l.b16 %v958_v52  ;;  %v1188_v61 = vshrl.u32 %v999_v54, 16  ;;  %v732_v23 = vld [vmem:[#allocation2 + $0x20] sm:$0xf]  ;;  %v748_v33 = vld [vmem:[#allocation2 + $0x24] sm:$0x1] }
  0xe4   :  { %2059 = vrot.lane.b32.xlu1 %v8320_v4, %s7901_s24  ;;  %v8348_v60 = vpack.c.b16 %v1994_v51, %v1993_v55  ;;  %v1907_v62 = vunpack.c.l.b16 %v944_v58  ;;  %v1191_v63 = vshll.u32 %v999_v54, 16  ;;  %v1202_v1 = vshrl.u32 %v1000_v59, 16  ;;  %v1247_v34 = vld [vmem:[#allocation2 + $0x20] sm:$0xe] }
  0xe5   :  { %v723_v53 = vsel %vm8070_vm7, %v595_v28, %v722_v41  ;;  %v726_v38 = vsel %vm7990_vm3, %v596_v45, %v725_v42  ;;  %v1205_v2 = vshll.u32 %v1000_v59, 16  ;;  %v1190_v9 = vrot.slane %v1188_v61, 4 }
  0xe6   :  { %724 = vst [vmem:[#allocation2 + $0x90] sm:$0xf] %v723_v53  ;;  %v1917_v6 = vpack.c.b16 %v1908_v48, %v1907_v62  ;;  %v1193_v10 = vrot.slane %v1191_v63, 5  ;;  %v1204_v12 = vrot.slane %v1202_v1, 4  ;;  %v1211_v3 = vshll.u32 %v8356_v37, 16 }
  0xe7   :  { %1937 = vrot.lane.b32.xlu2 %v8291_v20, %s7904_s27  ;;  %727 = vst [vmem:[#allocation2 + $0x94] sm:$0x1] %v726_v38  ;;  %v1207_v7 = vrot.slane %v1205_v2, 5  ;;  %v8364_v29 = vor.u32 %v7582_v16, %v7209_v36  ;;  %v834_v39 = vshrl.u32 %v733_v25, 16  ;;  %v837_v41 = vshll.u32 %v733_v25, 16 }
  0xe8   :  { %12359 = vst [vmem:[#allocation12_spill] sm:$0xff] %v8348_v60  ;;  %v1194_v13 = vor.u32 %v1193_v10, %v1190_v9  ;;  %v1213_v24 = vrot.slane %v1211_v3, 5  ;;  %v7124_v42 = vrot.slane %v1248_v27, 9  ;;  %v1316_v43 = vrot.slane %v749_v26, 5  ;;  %v1360_v63 = vld [vmem:[#allocation2 + $0x18] sm:$0xe] }
  0xe9   :  { %2147 = vrot.lane.b32.xlu0 %v2133_v30, %s7902_s25  ;;  %v1208_v15 = vor.u32 %v1207_v7, %v1204_v12  ;;  %v820_v44 = vshrl.u32 %v732_v23, 16  ;;  %v823_v28 = vshll.u32 %v732_v23, 16  ;;  %v1312_v50 = vrot.slane %v748_v33, 5  ;;  %v742_v12 = vld [vmem:[#allocation2 + $0x80] sm:$0xf] }
  0xea   :  { %v1195_v17 = vrot.slane %v1194_v13, 4  ;;  %v836_v51 = vrot.slane %v834_v39, 4  ;;  %v839_v52 = vrot.slane %v837_v41, 5  ;;  %v1317_v53 = vsel %vm8093_vm12, %v7124_v42, %v1316_v43  ;;  %v743_v36 = vld [vmem:[#allocation2 + $0x88] sm:$0xf] }
  0xeb   :  { %v1209_v22 = vrot.slane %v1208_v15, 4  ;;  %v822_v54 = vrot.slane %v820_v44, 4  ;;  %v825_v55 = vrot.slane %v823_v28, 5  ;;  %v843_v59 = vshll.u32 %v749_v26, 16  ;;  %v1371_v42 = vld [vmem:[#allocation2 + $0x80] sm:$0xe] }
  0xec   :  { %1883 = vrot.lane.b32.xlu1 %v7178_v49, %s7900_s23  ;;  %v7123_v49 = vrot.slane %v1247_v34, 9  ;;  %v2116_v61 = vunpack.c.l.b16 %v1317_v53  ;;  %v840_v62 = vor.u32 %v839_v52, %v836_v51  ;;  %v829_v9 = vshll.u32 %v748_v33, 16  ;;  %v1370_v34 = vld [vmem:[#allocation2 + $0x78] sm:$0xe] }
  0xed   :  { %v1214_v31 = vsel %vm8130_vm13, %v1209_v22, %v1213_v24  ;;  %v826_v2 = vor.u32 %v825_v55, %v822_v54  ;;  %v845_v10 = vrot.slane %v843_v59, 5  ;;  %v7137_v15 = vrot.slane %v1360_v63, 9  ;;  %v7579_v22 = vld [vmem:[#allocation2 + $0x84] sm:$0xf0] }
  0xee   :  { %v2004_v32 = vunpack.c.l.b16 %v1214_v31  ;;  %v1313_v48 = vsel %vm8093_vm12, %v7123_v49, %v1312_v50  ;;  %v1416_v3 = vrot.slane %v8314_v0, 5  ;;  %v960_v25 = vshrl.u32 %v742_v12, 16 }
  0xef   :  { %2097 = vrot.lane.b32.xlu2 %v8291_v20, %s7906_s29  ;;  %v8354_v20 = vld [vmem:[#allocation2 + $0x7c] sm:$0x1]  ;;  %v2115_v1 = vunpack.c.l.b16 %v1313_v48  ;;  %v827_v24 = vrot.slane %v826_v2, 4  ;;  %v831_v26 = vrot.slane %v829_v9, 5  ;;  %v963_v27 = vshll.u32 %v742_v12, 16 }
  0xf0   :  { %v1197_v14 = vshll.u32 %v8354_v20, 16  ;;  %v1420_v23 = vrot.slane %v8302_v47, 5  ;;  %v974_v31 = vshrl.u32 %v743_v36, 16  ;;  %v977_v33 = vshll.u32 %v743_v36, 16  ;;  %v758_v48 = vld [vmem:[#allocation2 + $0x84] sm:$0x1] }
  0xf1   :  { %2033 = vrot.lane.b32.xlu0 %v8348_v60, %s7907_s30  ;;  %v2129_v7 = vpack.c.b16 %v2116_v61, %v2115_v1  ;;  %v1417_v0 = vsel %vm8093_vm12, %v7137_v15, %v1416_v3  ;;  %v832_v47 = vsel %vm8130_vm13, %v827_v24, %v831_v26  ;;  %v962_v43 = vrot.slane %v960_v25, 4  ;;  %v1258_v3 = vld [vmem:[#allocation2 + $0x88] sm:$0xe] }
  0xf2   :  { %v1199_v19 = vrot.slane %v1197_v14, 5  ;;  %v841_v14 = vrot.slane %v840_v62, 4  ;;  %v7147_v28 = vrot.slane %v1370_v34, 9  ;;  %v2185_v49 = vunpack.c.l.b16 %v1417_v0  ;;  %v992_v0 = vld [vmem:[#allocation2 + $0x30] sm:$0xf] }
  0xf3   :  { %v1456_v50 = vrot.slane %v8354_v20, 5  ;;  %v976_v51 = vrot.slane %v974_v31, 4  ;;  %v979_v52 = vrot.slane %v977_v33, 5  ;;  %v7148_v53 = vrot.slane %v1371_v42, 9  ;;  %v759_v20 = vld [vmem:[#allocation2 + $0x8c] sm:$0x1] }
  0xf4   :  { %1947 = vrot.lane.b32.xlu1 %v1917_v6, %s7904_s27  ;;  %v1200_v30 = vsel %vm8130_vm13, %v1195_v17, %v1199_v19  ;;  %v7197_v19 = vld [vmem:[#allocation2 + $0x80] sm:$0xf]  ;;  %v1899_v54 = vunpack.c.l.b16 %v832_v47  ;;  %v969_v63 = vshll.u32 %v758_v48, 16  ;;  %v1460_v1 = vrot.slane %v8356_v37, 5  ;;  %v991_v33 = vld [vmem:[#allocation2 + $0x28] sm:$0xf] }
  0xf5   :  { %v2003_v45 = vunpack.c.l.b16 %v1200_v30  ;;  %v846_v30 = vsel %vm8130_vm13, %v841_v14, %v845_v10  ;;  %v7198_v39 = vor.u32 %v7579_v22, %v7197_v19  ;;  %v1457_v62 = vsel %vm8093_vm12, %v7147_v28, %v1456_v50  ;;  %v1257_v14 = vld [vmem:[#allocation2 + $0x80] sm:$0xe]  ;;  %v1001_v50 = vld [vmem:[#allocation2 + $0x88] sm:$0xf] }
  0xf6   :  { %v983_v9 = vshll.u32 %v759_v20, 16  ;;  %v2195_v10 = vunpack.c.l.b16 %v1457_v62  ;;  %v1461_v15 = vsel %vm8093_vm12, %v7148_v53, %v1460_v1  ;;  %v7133_v24 = vrot.slane %v1257_v14, 9  ;;  %v1249_v1 = vld [vmem:[#allocation2 + $0x30] sm:$0xe] }
  0xf7   :  { %1931 = vrot.lane.b32.xlu2 %v1917_v6, %s7903_s26  ;;  %v8380_v58 = vpack.c.b16 %v2004_v32, %v2003_v45  ;;  %v1900_v45 = vunpack.c.l.b16 %v846_v30  ;;  %v965_v32 = vrot.slane %v963_v27, 5  ;;  %v2196_v36 = vunpack.c.l.b16 %v1461_v15 }
  0xf8   :  { %v985_v22 = vrot.slane %v983_v9, 5  ;;  %v1352_v26 = vrot.slane %v758_v48, 5  ;;  %v7134_v27 = vrot.slane %v1258_v3, 9  ;;  %v1076_v28 = vshrl.u32 %v991_v33, 16 }
  0xf9   :  { %2153 = vrot.lane.b32.xlu0 %v8348_v60, %s7904_s27  ;;  %12360 = vst [vmem:[#allocation13_spill] sm:$0xff] %v8380_v58  ;;  %v1913_v2 = vpack.c.b16 %v1900_v45, %v1899_v54  ;;  %v8423_v37 = vpack.c.b16 %v2196_v36, %v2195_v10  ;;  %v1079_v45 = vshll.u32 %v991_v33, 16  ;;  %v1216_v9 = vshrl.u32 %v1001_v50, 16 }
  0xfa   :  { %v1353_v42 = vsel %vm8093_vm12, %v7133_v24, %v1352_v26  ;;  %v1219_v10 = vshll.u32 %v1001_v50, 16  ;;  %v1078_v3 = vrot.slane %v1076_v28, 4  ;;  %v7125_v26 = vrot.slane %v1249_v1, 9 }
  0xfb   :  { %12366 = vst [vmem:[#allocation19_spill] sm:$0xff] %v8423_v37  ;;  %v2125_v54 = vunpack.c.l.b16 %v1353_v42  ;;  %v1081_v36 = vrot.slane %v1079_v45, 5 }
  0xfc   :  { %2107 = vrot.lane.b32.xlu1 %v1917_v6, %s7906_s29  ;;  %v1221_v42 = vrot.slane %v1219_v10, 5 }
  0xff   :  { %2091 = vrot.lane.b32.xlu2 %v1917_v6, %s7905_s28  ;;  %v1361_v6 = vld [vmem:[#allocation2 + $0x20] sm:$0xe] }
 0x100   :  { %v7138_v16 = vrot.slane %v1361_v6, 9  ;;  %v966_v6 = vor.u32 %v965_v32, %v962_v43  ;;  %v7229_v43 = vld [vmem:[#allocation2 + $0x88] sm:$0xf]  ;;  %v1090_v32 = vshrl.u32 %v992_v0, 16 }
 0x101   :  { %2051 = vrot.lane.b32.xlu0 %v8364_v29, %s7901_s24 }
 0x102   :  { %v1421_v41 = vsel %vm8093_vm12, %v7138_v16, %v1420_v23  ;;  %v971_v16 = vrot.slane %v969_v63, 5  ;;  %v967_v19 = vrot.slane %v966_v6, 4  ;;  %v1356_v23 = vrot.slane %v759_v20, 5  ;;  %v8446_v20 = vld [vmem:[#allocation2 + $0x34] sm:$0x1] }
 0x103   :  { %v2186_v44 = vunpack.c.l.b16 %v1421_v41  ;;  %v8448_v63 = vld [vmem:[#allocation2 + $0x3c] sm:$0x1]  ;;  %v1250_v6 = vld [vmem:[#allocation2 + $0x38] sm:$0xe] }
 0x104   :  { %2017 = vrot.lane.b32.xlu1 %v8348_v60, %s7906_s29  ;;  %v1357_v47 = vsel %vm8093_vm12, %v7134_v27, %v1356_v23  ;;  %v1320_v27 = vrot.slane %v8446_v20, 5  ;;  %v7126_v23 = vrot.slane %v1250_v6, 9  ;;  %v1324_v33 = vrot.slane %v8448_v63, 5  ;;  %v734_v6 = vld [vmem:[#allocation2 + $0x30] sm:$0xf] }
 0x105   :  { %v8411_v61 = vpack.c.b16 %v2186_v44, %v2185_v49  ;;  %v7587_v44 = vld [vmem:[#allocation2 + $0x8c] sm:$0xf0]  ;;  %v1093_v49 = vshll.u32 %v992_v0, 16  ;;  %v2126_v48 = vunpack.c.l.b16 %v1357_v47  ;;  %v8462_v0 = vld [vmem:[#allocation2 + $0x2c] sm:$0x1] }
 0x106   :  { %v8378_v38 = vpop.permute.xlu2 %1919  ;;  %v8444_v62 = vor.u32 %v7587_v44, %v7229_v43  ;;  %v1082_v44 = vor.u32 %v1081_v36, %v1078_v3  ;;  %v1085_v28 = vshll.u32 %v8462_v0, 16  ;;  %v1325_v50 = vsel %vm8093_vm12, %v7126_v23, %v1324_v33  ;;  %v7181_v3 = vld [vmem:[#allocation2 + $0x30] sm:$0xf]  ;;  %v7575_v36 = vld [vmem:[#allocation2 + $0x34] sm:$0xf0] }
 0x107   :  { %2169 = vrot.lane.b32.xlu2 %v8348_v60, %s7908_s9  ;;  %12364 = vst [vmem:[#allocation17_spill] sm:$0xff] %v8411_v61 }
 0x108   :  { %12369 = vst [vmem:[#allocation22_spill] sm:$0xff] %v8444_v62  ;;  %v1087_v10 = vrot.slane %v1085_v28, 5 }
 0x109   :  { %2027 = vrot.lane.b32.xlu0 %v8380_v58, %s7906_s29 }
 0x10c   :  { %2065 = vrot.lane.b32.xlu1 %v8348_v60, %s7909_s10  ;;  %v8388_v13 = vpop.permute.xlu0 %1879 }
 0x10e   :  { %v8392_v17 = vpop.permute.xlu2 %2079 }
 0x10f   :  { %2139 = vrot.lane.b32.xlu2 %v2129_v7, %s7902_s25  ;;  %12361 = vst [vmem:[#allocation14_spill] sm:$0xff] %v8392_v17  ;;  %v980_v7 = vor.u32 %v979_v52, %v976_v51  ;;  %v1002_v51 = vld [vmem:[#allocation2 + $0x90] sm:$0xf] }
 0x110   :  { %v1233_v14 = vshll.u32 %v1002_v51, 16 }
 0x111   :  { %2075 = vrot.lane.b32.xlu0 %v8380_v58, %s7909_s10  ;;  %v981_v25 = vrot.slane %v980_v7, 4  ;;  %v1230_v7 = vshrl.u32 %v1002_v51, 16  ;;  %v8475_v51 = vld [vmem:[#allocation2 + $0x8c] sm:$0x1] }
 0x112   :  { %v1235_v43 = vrot.slane %v1233_v14, 5 }
 0x113   :  { %v986_v41 = vsel %vm8130_vm13, %v981_v25, %v985_v22  ;;  %v2134_v22 = vpack.c.b16 %v2126_v48, %v2125_v54  ;;  %v1232_v47 = vrot.slane %v1230_v7, 4  ;;  %v1225_v54 = vshll.u32 %v8475_v51, 16 }
 0x114   :  { %1893 = vrot.lane.b32.xlu1 %v7198_v39, %s7900_s23  ;;  %v972_v39 = vsel %vm8130_vm13, %v967_v19, %v971_v16  ;;  %v1910_v53 = vunpack.c.l.b16 %v986_v41  ;;  %v1095_v16 = vrot.slane %v1093_v49, 5  ;;  %v1218_v41 = vrot.slane %v1216_v9, 4 }
 0x115   :  { %v8407_v55 = vpop.permute.xlu1 %2047  ;;  %v8409_v59 = vpop.permute.xlu0 %2135  ;;  %v1909_v52 = vunpack.c.l.b16 %v972_v39  ;;  %v8466_v39 = vld [vmem:[#allocation2 + $0x34] sm:$0x1]  ;;  %v1321_v49 = vsel %vm8093_vm12, %v7125_v26, %v1320_v27  ;;  %v1236_v48 = vor.u32 %v1235_v43, %v1232_v47  ;;  %v1083_v9 = vrot.slane %v1082_v44, 4  ;;  %v735_v47 = vld [vmem:[#allocation2 + $0x38] sm:$0xf] }
 0x116   :  { %12362 = vst [vmem:[#allocation15_spill] sm:$0xff] %v8407_v55  ;;  %v848_v27 = vshrl.u32 %v734_v6, 16  ;;  %v1227_v33 = vrot.slane %v1225_v54, 5  ;;  %v7182_v43 = vor.u32 %v7575_v36, %v7181_v3  ;;  %v851_v54 = vshll.u32 %v734_v6, 16 }
 0x117   :  { %12363 = vst [vmem:[#allocation16_spill] sm:$0xff] %v8409_v59  ;;  %2043 = vrot.lane.b32.xlu2 %v8380_v58, %s7907_s30  ;;  %v8454_v19 = vpack.c.b16 %v1910_v53, %v1909_v52  ;;  %v8477_v52 = vld [vmem:[#allocation2 + $0x94] sm:$0x1]  ;;  %v1222_v53 = vor.u32 %v1221_v42, %v1218_v41  ;;  %v1237_v41 = vrot.slane %v1236_v48, 4  ;;  %v1088_v28 = vsel %vm8130_vm13, %v1083_v9, %v1087_v10 }
 0x118   :  { %v1239_v1 = vshll.u32 %v8477_v52, 16  ;;  %v862_v48 = vshrl.u32 %v735_v47, 16  ;;  %v1995_v3 = vunpack.c.l.b16 %v1088_v28 }
 0x119   :  { %v8418_v12 = vpop.permute.xlu2 %2031  ;;  %1939 = vrot.lane.b32.xlu0 %v1913_v2, %s7904_s27  ;;  %v1223_v23 = vrot.slane %v1222_v53, 4  ;;  %v850_v53 = vrot.slane %v848_v27, 4 }
 0x11a   :  { %12365 = vst [vmem:[#allocation18_spill] sm:$0xff] %v8418_v12  ;;  %v1241_v42 = vrot.slane %v1239_v1, 5  ;;  %v865_v1 = vshll.u32 %v735_v47, 16  ;;  %v1428_v47 = vrot.slane %v8466_v39, 5 }
 0x11c   :  { %1923 = vrot.lane.b32.xlu1 %v1913_v2, %s7903_s26  ;;  %v1242_v9 = vsel %vm8130_vm13, %v1237_v41, %v1241_v42  ;;  %v867_v41 = vrot.slane %v865_v1, 5  ;;  %v857_v42 = vshll.u32 %v8446_v20, 16 }
 0x11d   :  { %v8426_v30 = vpop.permute.xlu0 %2057 }
 0x11e   :  { %12367 = vst [vmem:[#allocation20_spill] sm:$0xff] %v8426_v30  ;;  %v8430_v31 = vpop.permute.xlu1 %1935  ;;  %v994_v30 = vld [vmem:[#allocation2 + $0x40] sm:$0xf] }
 0x11f   :  { %2163 = vrot.lane.b32.xlu2 %v8380_v58, %s7904_s27  ;;  %v1121_v27 = vshll.u32 %v994_v30, 16 }
 0x121   :  { %v8432_v34 = vpop.permute.xlu2 %2151  ;;  %2099 = vrot.lane.b32.xlu0 %v1913_v2, %s7906_s29 }
 0x122   :  { %12368 = vst [vmem:[#allocation21_spill] sm:$0xff] %v8432_v34 }
 0x124   :  { %2083 = vrot.lane.b32.xlu1 %v1913_v2, %s7905_s28  ;;  %v1092_v2 = vrot.slane %v1090_v32, 4  ;;  %v1099_v32 = vshll.u32 %v8466_v39, 16 }
 0x125   :  { %v8452_v15 = vpop.permute.xlu0 %1881 }
 0x126   :  { %12370 = vst [vmem:[#allocation23_spill] sm:$0xff] %v8452_v15  ;;  %v8458_v25 = vpop.permute.xlu1 %2095  ;;  %v1096_v45 = vor.u32 %v1095_v16, %v1092_v2  ;;  %v1101_v14 = vrot.slane %v1099_v32, 5  ;;  %v2117_v2 = vunpack.c.l.b16 %v1321_v49  ;;  %v2118_v16 = vunpack.c.l.b16 %v1325_v50  ;;  %v993_v49 = vld [vmem:[#allocation2 + $0x38] sm:$0xf]  ;;  %v1362_v50 = vld [vmem:[#allocation2 + $0x28] sm:$0xe] }
 0x127   :  { %2061 = vrot.lane.b32.xlu2 %v8444_v62, %s7901_s24  ;;  %12372 = vst [vmem:[#allocation25_spill] sm:$0xff] %v8458_v25  ;;  %v1104_v10 = vshrl.u32 %v993_v49, 16  ;;  %v1107_v6 = vshll.u32 %v993_v49, 16  ;;  %v2006_v49 = vunpack.c.l.b16 %v1242_v9 }
 0x128   :  { %v1097_v7 = vrot.slane %v1096_v45, 4  ;;  %v2130_v32 = vpack.c.b16 %v2118_v16, %v2117_v2  ;;  %v7140_v2 = vrot.slane %v1363_v5, 9  ;;  %v1118_v16 = vshrl.u32 %v994_v30, 16 }
 0x129   :  { %v8456_v24 = vpop.permute.xlu2 %2049  ;;  %1933 = vrot.lane.b32.xlu0 %v8454_v19, %s7903_s26 }
 0x12a   :  { %12371 = vst [vmem:[#allocation24_spill] sm:$0xff] %v8456_v24  ;;  %v1102_v45 = vsel %vm8130_vm13, %v1097_v7, %v1101_v14  ;;  %v7139_v7 = vrot.slane %v1362_v50, 9  ;;  %v1424_v14 = vrot.slane %v8462_v0, 5  ;;  %v871_v0 = vshll.u32 %v8448_v63, 16 }
 0x12b   :  { %v1996_v36 = vunpack.c.l.b16 %v1102_v45  ;;  %v1429_v5 = vsel %vm8093_vm12, %v7140_v2, %v1428_v47  ;;  %v1120_v1 = vrot.slane %v1118_v16, 4  ;;  %v8523_v2 = vld [vmem:[#allocation2 + $0x3c] sm:$0x1] }
 0x12c   :  { %2149 = vrot.lane.b32.xlu1 %v2134_v22, %s7902_s25  ;;  %v2188_v50 = vunpack.c.l.b16 %v1429_v5  ;;  %v1113_v9 = vshll.u32 %v8523_v2, 16 }
 0x12d   :  { %v8515_v39 = vpack.c.b16 %v1996_v36, %v1995_v3  ;;  %v873_v3 = vrot.slane %v871_v0, 5  ;;  %v8529_v36 = vld [vmem:[#allocation2 + $0x44] sm:$0x1] }
 0x12e   :  { %v1115_v0 = vrot.slane %v1113_v9, 5 }
 0x12f   :  { %1949 = vrot.lane.b32.xlu2 %v8454_v19, %s7904_s27  ;;  %12377 = vst [vmem:[#allocation30_spill] sm:$0xff] %v8515_v39 }
 0x131   :  { %v8483_v22 = vpop.permute.xlu2 %2025  ;;  %v8485_v26 = vpop.permute.xlu0 %2015  ;;  %2093 = vrot.lane.b32.xlu0 %v8454_v19, %s7905_s28 }
 0x132   :  { %12373 = vst [vmem:[#allocation26_spill] sm:$0xff] %v8483_v22  ;;  %v8489_v44 = vpop.permute.xlu1 %2167  ;;  %v1228_v22 = vsel %vm8130_vm13, %v1223_v23, %v1227_v33  ;;  %v853_v23 = vrot.slane %v851_v54, 5  ;;  %v864_v33 = vrot.slane %v862_v48, 4  ;;  %v1106_v54 = vrot.slane %v1104_v10, 4  ;;  %v74_v10 = vld [vmem:[#allocation2 + $0x50] sm:$0x1] }
 0x133   :  { %12374 = vst [vmem:[#allocation27_spill] sm:$0xff] %v8489_v44  ;;  %v2005_v45 = vunpack.c.l.b16 %v1228_v22  ;;  %v1109_v48 = vrot.slane %v1107_v6, 5 }
 0x134   :  { %1885 = vrot.lane.b32.xlu1 %v7182_v43, %s7900_s23  ;;  %v854_v63 = vor.u32 %v853_v23, %v850_v53  ;;  %v1127_v53 = vshll.u32 %v8529_v36, 16 }
 0x135   :  { %v8527_v22 = vpack.c.b16 %v2006_v49, %v2005_v45  ;;  %v1110_v6 = vor.u32 %v1109_v48, %v1106_v54  ;;  %v7213_v48 = vld [vmem:[#allocation2 + $0x38] sm:$0xf] }
 0x136   :  { %v855_v23 = vrot.slane %v854_v63, 4 }
 0x137   :  { %2109 = vrot.lane.b32.xlu2 %v8454_v19, %s7906_s29  ;;  %v1425_v19 = vsel %vm8093_vm12, %v7139_v7, %v1424_v14  ;;  %v859_v14 = vrot.slane %v857_v42, 5  ;;  %12380 = vst [vmem:[#allocation33_spill] sm:$0xff] %v8527_v22 }
 0x138   :  { %v2187_v30 = vunpack.c.l.b16 %v1425_v19 }
 0x139   :  { %v8504_v43 = vpop.permute.xlu2 %2073  ;;  %v8506_v28 = vpop.permute.xlu0 %2063  ;;  %2141 = vrot.lane.b32.xlu0 %v2130_v32, %s7902_s25  ;;  %v868_v32 = vor.u32 %v867_v41, %v864_v33  ;;  %v136_v41 = vld [vmem:[#allocation2 + $0x54] sm:$0x1]  ;;  %v860_v45 = vsel %vm8130_vm13, %v855_v23, %v859_v14 }
 0x13a   :  { %12375 = vst [vmem:[#allocation28_spill] sm:$0xff] %v8504_v43  ;;  %v1123_v43 = vrot.slane %v1121_v27, 5  ;;  %v8519_v20 = vpop.permute.xlu1 %2137  ;;  %v8521_v7 = vpack.c.b16 %v2188_v50, %v2187_v30  ;;  %v75_v27 = vsel %vm7990_vm3, 0, %v74_v10  ;;  %v137_v42 = vsel %vm7998_vm5, 0, %v136_v41  ;;  %v737_v50 = vld [vmem:[#allocation2 + $0x58] sm:$0xf] }
 0x13b   :  { %12376 = vst [vmem:[#allocation29_spill] sm:$0xff] %v8506_v28  ;;  %v869_v33 = vrot.slane %v868_v32, 4  ;;  %v1129_v30 = vrot.slane %v1127_v53, 5  ;;  %v1901_v63 = vunpack.c.l.b16 %v860_v45  ;;  %v890_v53 = vshrl.u32 %v737_v50, 16 }
 0x13c   :  { %2035 = vrot.lane.b32.xlu1 %v8515_v39, %s7907_s30  ;;  %12378 = vst [vmem:[#allocation31_spill] sm:$0xff] %v8519_v20  ;;  %v1124_v16 = vor.u32 %v1123_v43, %v1120_v1  ;;  %v1111_v43 = vrot.slane %v1110_v6, 4  ;;  %v7583_v1 = vld [vmem:[#allocation2 + $0x3c] sm:$0xf0] }
 0x13d   :  { %12379 = vst [vmem:[#allocation32_spill] sm:$0xff] %v8521_v7  ;;  %v874_v49 = vsel %vm8130_vm13, %v869_v33, %v873_v3  ;;  %v8561_v23 = vor.u32 %v7583_v1, %v7213_v48  ;;  %v8577_v1 = vld [vmem:[#allocation2 + $0x5c] sm:$0x1] }
 0x13e   :  { %76 = vst [vmem:[#allocation2 + $0x50] sm:$0x1] %v75_v27  ;;  %v1125_v5 = vrot.slane %v1124_v16, 4  ;;  %v1902_v32 = vunpack.c.l.b16 %v874_v49  ;;  %v1116_v9 = vsel %vm8130_vm13, %v1111_v43, %v1115_v0  ;;  %v893_v27 = vshll.u32 %v737_v50, 16 }
 0x13f   :  { %2019 = vrot.lane.b32.xlu2 %v8515_v39, %s7906_s29  ;;  %138 = vst [vmem:[#allocation2 + $0x54] sm:$0x1] %v137_v42  ;;  %v1997_v42 = vunpack.c.l.b16 %v1116_v9  ;;  %v1332_v28 = vrot.slane %v8577_v1, 5 }
 0x140   :  { %v1130_v10 = vsel %vm8130_vm13, %v1125_v5, %v1129_v30  ;;  %v8565_v41 = vpack.c.b16 %v1902_v32, %v1901_v63  ;;  %v892_v30 = vrot.slane %v890_v53, 4  ;;  %v895_v45 = vrot.slane %v893_v27, 5  ;;  %v8587_v27 = vld [vmem:[#allocation2 + $0x24] sm:$0x1] }
 0x141   :  { %v8535_v47 = vpop.permute.xlu2 %1937  ;;  %2045 = vrot.lane.b32.xlu0 %v8527_v22, %s7907_s30  ;;  %v8539_v19 = vpop.permute.xlu0 %1891  ;;  %v1998_v43 = vunpack.c.l.b16 %v1130_v10 }
 0x142   :  { %12381 = vst [vmem:[#allocation34_spill] sm:$0xff] %v8535_v47  ;;  %v896_v10 = vor.u32 %v895_v45, %v892_v30 }
 0x143   :  { %12382 = vst [vmem:[#allocation35_spill] sm:$0xff] %v8539_v19  ;;  %v8573_v50 = vpack.c.b16 %v1998_v43, %v1997_v42  ;;  %v8589_v42 = vld [vmem:[#allocation2 + $0x2c] sm:$0x1]  ;;  %v1729_v43 = vld [vmem:[#allocation2 + $0x20] sm:$0xe] }
 0x144   :  { %2155 = vrot.lane.b32.xlu1 %v8515_v39, %s7904_s27  ;;  %v897_v30 = vrot.slane %v896_v10, 4  ;;  %v7153_v44 = vrot.slane %v1729_v43, 9  ;;  %v1789_v59 = vrot.slane %v8589_v42, 5 }
 0x145   :  { %v736_v14 = vld [vmem:[#allocation2 + $0x50] sm:$0xf]  ;;  %12387 = vst [vmem:[#allocation40_spill] sm:$0xff] %v8573_v50 }
 0x146   :  { %v8549_v54 = vpop.permute.xlu1 %2041  ;;  %v876_v3 = vshrl.u32 %v736_v14, 16  ;;  %v879_v16 = vshll.u32 %v736_v14, 16  ;;  %v8575_v48 = vld [vmem:[#allocation2 + $0x54] sm:$0x1]  ;;  %v899_v14 = vshll.u32 %v8577_v1, 16 }
 0x147   :  { %12383 = vst [vmem:[#allocation36_spill] sm:$0xff] %v8549_v54  ;;  %2067 = vrot.lane.b32.xlu2 %v8515_v39, %s7909_s10  ;;  %v885_v9 = vshll.u32 %v8575_v48, 16 }
 0x148   :  { %v878_v0 = vrot.slane %v876_v3, 4  ;;  %v881_v5 = vrot.slane %v879_v16, 5  ;;  %v738_v3 = vld [vmem:[#allocation2 + $0x60] sm:$0xf]  ;;  %v739_v16 = vld [vmem:[#allocation2 + $0x68] sm:$0xf] }
 0x149   :  { %v8557_v6 = vpop.permute.xlu2 %2097  ;;  %2165 = vrot.lane.b32.xlu0 %v8527_v22, %s7904_s27  ;;  %v901_v45 = vrot.slane %v899_v14, 5  ;;  %v904_v19 = vshrl.u32 %v738_v3, 16  ;;  %v918_v20 = vshrl.u32 %v739_v16, 16  ;;  %v7185_v14 = vld [vmem:[#allocation2 + $0x50] sm:$0xf] }
 0x14a   :  { %12384 = vst [vmem:[#allocation37_spill] sm:$0xff] %v8557_v6  ;;  %v882_v32 = vor.u32 %v881_v5, %v878_v0  ;;  %v887_v5 = vrot.slane %v885_v9, 5  ;;  %v921_v6 = vshll.u32 %v739_v16, 16 }
 0x14b   :  { %v8563_v33 = vpop.permute.xlu0 %1921  ;;  %v902_v10 = vsel %vm8130_vm13, %v897_v30, %v901_v45  ;;  %v906_v16 = vrot.slane %v904_v19, 4  ;;  %v8615_v45 = vld [vmem:[#allocation2 + $0x64] sm:$0x1]  ;;  %v995_v19 = vld [vmem:[#allocation2 + $0x58] sm:$0xf] }
 0x14c   :  { %12385 = vst [vmem:[#allocation38_spill] sm:$0xff] %v8563_v33  ;;  %2053 = vrot.lane.b32.xlu1 %v8561_v23, %s7901_s24  ;;  %v883_v0 = vrot.slane %v882_v32, 4  ;;  %v923_v24 = vrot.slane %v921_v6, 5  ;;  %v1904_v47 = vunpack.c.l.b16 %v902_v10  ;;  %v913_v6 = vshll.u32 %v8615_v45, 16 }
 0x14e   :  { %v8569_v49 = vpop.permute.xlu1 %2161  ;;  %v888_v9 = vsel %vm8130_vm13, %v883_v0, %v887_v5 }
 0x14f   :  { %12386 = vst [vmem:[#allocation39_spill] sm:$0xff] %v8569_v49  ;;  %1925 = vrot.lane.b32.xlu2 %v8565_v41, %s7903_s26  ;;  %v1730_v49 = vld [vmem:[#allocation2 + $0x28] sm:$0xe]  ;;  %v1903_v25 = vunpack.c.l.b16 %v888_v9 }
 0x150   :  { %v7154_v34 = vrot.slane %v1730_v49, 9 }
 0x151   :  { %v8579_v63 = vpop.permute.xlu2 %1931  ;;  %2021 = vrot.lane.b32.xlu0 %v8573_v50, %s7906_s29 }
 0x152   :  { %12388 = vst [vmem:[#allocation41_spill] sm:$0xff] %v8579_v63  ;;  %v907_v63 = vshll.u32 %v738_v3, 16  ;;  %v7576_v3 = vld [vmem:[#allocation2 + $0x54] sm:$0xf0]  ;;  %v1790_v5 = vsel %vm8093_vm12, %v7154_v34, %v1789_v59 }
 0x153   :  { %v8585_v53 = vpop.permute.xlu0 %2081  ;;  %v7186_v30 = vor.u32 %v7576_v3, %v7185_v14  ;;  %v2880_v34 = vunpack.c.l.b16 %v1790_v5  ;;  %v1132_v3 = vshrl.u32 %v995_v19, 16  ;;  %v1251_v5 = vld [vmem:[#allocation2 + $0x50] sm:$0xe] }
 0x154   :  { %12389 = vst [vmem:[#allocation42_spill] sm:$0xff] %v8585_v53  ;;  %2029 = vrot.lane.b32.xlu1 %v8527_v22, %s7906_s29  ;;  %v1785_v53 = vrot.slane %v8587_v27, 5  ;;  %v909_v43 = vrot.slane %v907_v63, 5  ;;  %v996_v63 = vld [vmem:[#allocation2 + $0x60] sm:$0xf]  ;;  %v7127_v15 = vrot.slane %v1251_v5, 9 }
 0x155   :  { %v1146_v17 = vshrl.u32 %v996_v63, 16  ;;  %v1499_v5 = vld [vmem:[#allocation2 + $0x84] sm:$0x1] }
 0x156   :  { %v8593_v54 = vpop.permute.xlu1 %2059  ;;  %v1786_v0 = vsel %vm8093_vm12, %v7153_v44, %v1785_v53  ;;  %v8623_v44 = vpack.c.b16 %v1904_v47, %v1903_v25  ;;  %v8625_v53 = vld [vmem:[#allocation2 + $0x6c] sm:$0x1]  ;;  %v915_v25 = vrot.slane %v913_v6, 5 }
 0x157   :  { %12390 = vst [vmem:[#allocation43_spill] sm:$0xff] %v8593_v54  ;;  %2085 = vrot.lane.b32.xlu2 %v8565_v41, %s7905_s28  ;;  %v920_v54 = vrot.slane %v918_v20, 4  ;;  %v910_v20 = vor.u32 %v909_v43, %v906_v16  ;;  %v2879_v59 = vunpack.c.l.b16 %v1786_v0  ;;  %v8627_v16 = vld [vmem:[#allocation2 + $0x74] sm:$0x1]  ;;  %v927_v47 = vshll.u32 %v8625_v53, 16 }
 0x158   :  { %12394 = vst [vmem:[#allocation47_spill] sm:$0xff] %v8627_v16  ;;  %v1340_v8 = vrot.slane %v8625_v53, 5 }
 0x159   :  { %v8599_v32 = vpop.permute.xlu2 %2091  ;;  %2069 = vrot.lane.b32.xlu0 %v8573_v50, %s7909_s10  ;;  %v924_v14 = vor.u32 %v923_v24, %v920_v54  ;;  %v8631_v62 = vpack.c.b16 %v2880_v34, %v2879_v59  ;;  %v911_v0 = vrot.slane %v910_v20, 4  ;;  %v1252_v24 = vld [vmem:[#allocation2 + $0x58] sm:$0xe]  ;;  %v1134_v59 = vrot.slane %v1132_v3, 4  ;;  %v8651_v3 = vld [vmem:[#allocation2 + $0x5c] sm:$0x1] }
 0x15a   :  { %12391 = vst [vmem:[#allocation44_spill] sm:$0xff] %v8599_v32  ;;  %v101_v32 = vld [vmem:[#allocation2 + $0x98] sm:$0x1]  ;;  %v1738_v54 = vld [vmem:[#allocation2 + $0x78] sm:$0xe]  ;;  %v1148_v20 = vrot.slane %v1146_v17, 4 }
 0x15b   :  { %v8607_v49 = vpop.permute.xlu0 %2147  ;;  %v102_v9 = vsel %vm7990_vm3, 0, %v101_v32  ;;  %v1149_v32 = vshll.u32 %v996_v63, 16  ;;  %12396 = vst [vmem:[#allocation49_spill] sm:$0xff] %v8631_v62  ;;  %v1817_v63 = vrot.slane %v8627_v16, 5  ;;  %v8642_v62 = vld [vmem:[#allocation2 + $0x7c] sm:$0x1] }
 0x15c   :  { %12392 = vst [vmem:[#allocation45_spill] sm:$0xff] %v8607_v49  ;;  %2077 = vrot.lane.b32.xlu1 %v8527_v22, %s7909_s10  ;;  %v1135_v49 = vshll.u32 %v995_v19, 16  ;;  %v1328_v19 = vrot.slane %v8575_v48, 5  ;;  %v7128_v33 = vrot.slane %v1252_v24, 9  ;;  %v916_v48 = vsel %vm8130_vm13, %v911_v0, %v915_v25  ;;  %v8653_v17 = vld [vmem:[#allocation2 + $0x64] sm:$0x1] }
 0x15d   :  { %103 = vst [vmem:[#allocation2 + $0x98] sm:$0x1] %v102_v9  ;;  %v925_v9 = vrot.slane %v924_v14, 4  ;;  %v1151_v6 = vrot.slane %v1149_v32, 5  ;;  %v1155_v32 = vshll.u32 %v8653_v17, 16  ;;  %v1821_v24 = vrot.slane %v8642_v62, 5 }
 0x15e   :  { %v8620_v10 = vpop.permute.xlu1 %1883  ;;  %v1137_v34 = vrot.slane %v1135_v49, 5  ;;  %12398 = vst [vmem:[#allocation51_spill] sm:$0xff] %v8642_v62  ;;  %v1141_v49 = vshll.u32 %v8651_v3, 16  ;;  %v1905_v16 = vunpack.c.l.b16 %v916_v48  ;;  %v1329_v40 = vsel %vm8093_vm12, %v7127_v15, %v1328_v19  ;;  %v1740_v62 = vld [vmem:[#allocation2 + $0x88] sm:$0xe] }
 0x15f   :  { %12393 = vst [vmem:[#allocation46_spill] sm:$0xff] %v8620_v10  ;;  %1887 = vrot.lane.b32.xlu2 %v7186_v30, %s7900_s23  ;;  %v1737_v10 = vld [vmem:[#allocation2 + $0x70] sm:$0xe]  ;;  %v7164_v48 = vrot.slane %v1740_v62, 9  ;;  %v2119_v62 = vunpack.c.l.b16 %v1329_v40 }
 0x160   :  { %v1138_v25 = vor.u32 %v1137_v34, %v1134_v59  ;;  %v1825_v34 = vrot.slane %v1499_v5, 5 }
 0x161   :  { %v8629_v43 = vpop.permute.xlu2 %2169  ;;  %1927 = vrot.lane.b32.xlu0 %v8623_v44, %s7903_s26 }
 0x162   :  { %12395 = vst [vmem:[#allocation48_spill] sm:$0xff] %v8629_v43  ;;  %v7161_v43 = vrot.slane %v1737_v10, 9  ;;  %v929_v10 = vrot.slane %v927_v47, 5  ;;  %v1152_v47 = vor.u32 %v1151_v6, %v1148_v20  ;;  %v1143_v6 = vrot.slane %v1141_v49, 5 }
 0x163   :  { %v8636_v30 = vpop.permute.xlu0 %2033  ;;  %v1139_v15 = vrot.slane %v1138_v25, 4 }
 0x164   :  { %12397 = vst [vmem:[#allocation50_spill] sm:$0xff] %v8636_v30  ;;  %1941 = vrot.lane.b32.xlu1 %v8565_v41, %s7904_s27  ;;  %v7162_v30 = vrot.slane %v1738_v54, 9  ;;  %v1818_v1 = vsel %vm8093_vm12, %v7161_v43, %v1817_v63  ;;  %v930_v0 = vsel %vm8130_vm13, %v925_v9, %v929_v10  ;;  %v1333_v43 = vsel %vm8093_vm12, %v7128_v33, %v1332_v28 }
 0x165   :  { %v2887_v55 = vunpack.c.l.b16 %v1818_v1  ;;  %v1157_v10 = vrot.slane %v1155_v32, 5  ;;  %v1153_v28 = vrot.slane %v1152_v47, 4  ;;  %v1906_v19 = vunpack.c.l.b16 %v930_v0  ;;  %v7189_v0 = vld [vmem:[#allocation2 + $0x60] sm:$0xf]  ;;  %v7577_v47 = vld [vmem:[#allocation2 + $0x64] sm:$0xf0] }
 0x166   :  { %v8645_v14 = vpop.permute.xlu1 %1947  ;;  %v1822_v63 = vsel %vm8093_vm12, %v7162_v30, %v1821_v24  ;;  %v1144_v32 = vsel %vm8130_vm13, %v1139_v15, %v1143_v6  ;;  %v7584_v15 = vld [vmem:[#allocation2 + $0x5c] sm:$0xf0] }
 0x167   :  { %12399 = vst [vmem:[#allocation52_spill] sm:$0xff] %v8645_v14  ;;  %2037 = vrot.lane.b32.xlu2 %v8573_v50, %s7907_s30  ;;  %v1500_v14 = vld [vmem:[#allocation2 + $0x8c] sm:$0x1]  ;;  %v2888_v9 = vunpack.c.l.b16 %v1822_v63  ;;  %v8686_v49 = vpack.c.b16 %v1906_v19, %v1905_v16  ;;  %v1999_v16 = vunpack.c.l.b16 %v1144_v32  ;;  %v7190_v63 = vor.u32 %v7577_v47, %v7189_v0 }
 0x168   :  { %v1829_v12 = vrot.slane %v1500_v14, 5  ;;  %v2120_v14 = vunpack.c.l.b16 %v1333_v43  ;;  %v8718_v19 = vld [vmem:[#allocation2 + $0x6c] sm:$0x1] }
 0x169   :  { %v8660_v54 = vpop.permute.xlu2 %2139  ;;  %2087 = vrot.lane.b32.xlu0 %v8623_v44, %s7905_s28  ;;  %v8676_v33 = vpack.c.b16 %v2888_v9, %v2887_v55  ;;  %v71_v9 = vld [vmem:[#allocation2 + $0x48] sm:$0x1] }
 0x16a   :  { %12400 = vst [vmem:[#allocation53_spill] sm:$0xff] %v8660_v54  ;;  %v1739_v54 = vld [vmem:[#allocation2 + $0x80] sm:$0xe]  ;;  %v1830_v5 = vsel %vm8093_vm12, %v7164_v48, %v1829_v12  ;;  %v2131_v25 = vpack.c.b16 %v2120_v14, %v2119_v62  ;;  %v7217_v48 = vld [vmem:[#allocation2 + $0x58] sm:$0xf] }
 0x16b   :  { %v7163_v59 = vrot.slane %v1739_v54, 9  ;;  %v8672_v20 = vpop.permute.xlu0 %2153  ;;  %12401 = vst [vmem:[#allocation54_spill] sm:$0xff] %v8676_v33  ;;  %v1158_v54 = vsel %vm8130_vm13, %v1153_v28, %v1157_v10  ;;  %v1736_v62 = vld [vmem:[#allocation2 + $0x68] sm:$0xe] }
 0x16c   :  { %2101 = vrot.lane.b32.xlu1 %v8565_v41, %s7906_s29  ;;  %v2890_v41 = vunpack.c.l.b16 %v1830_v5  ;;  %v2000_v43 = vunpack.c.l.b16 %v1158_v54  ;;  %v8720_v5 = vld [vmem:[#allocation2 + $0x64] sm:$0x1]  ;;  %v7160_v0 = vrot.slane %v1736_v62, 9  ;;  %v1358_v33 = vld [vmem:[#allocation2 + $0x8] sm:$0xe] }
 0x16d   :  { %v1826_v30 = vsel %vm8093_vm12, %v7163_v59, %v1825_v34  ;;  %v72_v34 = vsel %vm7990_vm3, 0, %v71_v9  ;;  %v1809_v54 = vrot.slane %v8720_v5, 5  ;;  %v1253_v9 = vld [vmem:[#allocation2 + $0x60] sm:$0xe] }
 0x16e   :  { %v2889_v1 = vunpack.c.l.b16 %v1826_v30  ;;  %v8682_v24 = vpop.permute.xlu1 %2107  ;;  %v8706_v6 = vpack.c.b16 %v2000_v43, %v1999_v16  ;;  %73 = vst [vmem:[#allocation2 + $0x48] sm:$0x1] %v72_v34  ;;  %v8716_v30 = vor.u32 %v7584_v15, %v7217_v48  ;;  %v7129_v62 = vrot.slane %v1253_v9, 9 }
 0x16f   :  { %12402 = vst [vmem:[#allocation55_spill] sm:$0xff] %v8682_v24  ;;  %2157 = vrot.lane.b32.xlu2 %v8573_v50, %s7904_s27 }
 0x170   :  { %v8694_v12 = vpack.c.b16 %v2890_v41, %v2889_v1  ;;  %12405 = vst [vmem:[#allocation58_spill] sm:$0xff] %v8706_v6  ;;  %v1735_v1 = vld [vmem:[#allocation2 + $0x60] sm:$0xe] }
 0x171   :  { %v8688_v55 = vpop.permute.xlu2 %2043  ;;  %1945 = vrot.lane.b32.xlu0 %v8686_v49, %s7904_s27  ;;  %12408 = vst [vmem:[#allocation61_spill] sm:$0xff] %v8716_v30  ;;  %v7159_v32 = vrot.slane %v1735_v1, 9  ;;  %v1254_v1 = vld [vmem:[#allocation2 + $0x68] sm:$0xe] }
 0x172   :  { %12403 = vst [vmem:[#allocation56_spill] sm:$0xff] %v8688_v55 }
 0x173   :  { %12404 = vst [vmem:[#allocation57_spill] sm:$0xff] %v8694_v12  ;;  %v8698_v40 = vpop.permute.xlu0 %2051  ;;  %v1810_v16 = vsel %vm8093_vm12, %v7159_v32, %v1809_v54  ;;  %v1336_v32 = vrot.slane %v8615_v45, 5 }
 0x174   :  { %2143 = vrot.lane.b32.xlu1 %v2131_v25, %s7902_s25  ;;  %v1813_v25 = vrot.slane %v8718_v19, 5  ;;  %v2885_v34 = vunpack.c.l.b16 %v1810_v16 }
 0x175   :  { %v1337_v16 = vsel %vm8093_vm12, %v7129_v62, %v1336_v32 }
 0x176   :  { %v8701_v59 = vpop.permute.xlu1 %2017  ;;  %v1814_v43 = vsel %vm8093_vm12, %v7160_v0, %v1813_v25  ;;  %v7130_v25 = vrot.slane %v1254_v1, 9  ;;  %v133_v1 = vld [vmem:[#allocation2 + $0x4c] sm:$0x1] }
 0x177   :  { %1889 = vrot.lane.b32.xlu2 %v7190_v63, %s7900_s23  ;;  %v2886_v48 = vunpack.c.l.b16 %v1814_v43  ;;  %v163_v43 = vld [vmem:[#allocation2 + $0x9c] sm:$0x1] }
 0x178   :  { %v164_v45 = vsel %vm7998_vm5, 0, %v163_v43  ;;  %v1341_v9 = vsel %vm8093_vm12, %v7130_v25, %v1340_v8  ;;  %v134_v43 = vsel %vm7998_vm5, 0, %v133_v1 }
 0x179   :  { %v8708_v10 = vpop.permute.xlu2 %2163  ;;  %2039 = vrot.lane.b32.xlu0 %v8706_v6, %s7907_s30  ;;  %v8749_v54 = vpack.c.b16 %v2886_v48, %v2885_v34  ;;  %165 = vst [vmem:[#allocation2 + $0x9c] sm:$0x1] %v164_v45  ;;  %v2121_v34 = vunpack.c.l.b16 %v1337_v16  ;;  %v1359_v48 = vld [vmem:[#allocation2 + $0x10] sm:$0xe]  ;;  %v2122_v62 = vunpack.c.l.b16 %v1341_v9  ;;  %v7135_v16 = vrot.slane %v1358_v33, 9 }
 0x17a   :  { %12406 = vst [vmem:[#allocation59_spill] sm:$0xff] %v8708_v10  ;;  %v7885_v45 = vld [vmem:[#allocation2 + $0xc] sm:$0x1]  ;;  %v1432_v33 = vrot.slane %v8523_v2, 5 }
 0x17b   :  { %v8712_v28 = vpop.permute.xlu0 %2027  ;;  %12413 = vst [vmem:[#allocation66_spill] sm:$0xff] %v8749_v54  ;;  %v7884_v54 = vld [vmem:[#allocation2 + $0x14] sm:$0x1]  ;;  %v2132_v8 = vpack.c.b16 %v2122_v62, %v2121_v34  ;;  %v1408_v9 = vrot.slane %v7885_v45, 5 }
 0x17c   :  { %12407 = vst [vmem:[#allocation60_spill] sm:$0xff] %v8712_v28  ;;  %1929 = vrot.lane.b32.xlu1 %v8686_v49, %s7903_s26  ;;  %v1412_v10 = vrot.slane %v7884_v54, 5  ;;  %v1364_v54 = vld [vmem:[#allocation2 + $0x38] sm:$0xe] }
 0x17d   :  { %135 = vst [vmem:[#allocation2 + $0x4c] sm:$0x1] %v134_v43  ;;  %v7141_v62 = vrot.slane %v1364_v54, 9  ;;  %v7142_v43 = vrot.slane %v1365_v11, 9  ;;  %v1366_v54 = vld [vmem:[#allocation2 + $0x58] sm:$0xe] }
 0x17e   :  { %v8722_v14 = vpop.permute.xlu1 %2065  ;;  %v1742_v28 = vld [vmem:[#allocation2 + $0x98] sm:$0xe] }
 0x17f   :  { %2055 = vrot.lane.b32.xlu2 %v8716_v30, %s7901_s24 }
 0x181   :  { %v8726_v41 = vpop.permute.xlu2 %2061  ;;  %2105 = vrot.lane.b32.xlu0 %v8686_v49, %s7906_s29 }
 0x182   :  { %12409 = vst [vmem:[#allocation62_spill] sm:$0xff] %v8726_v41  ;;  %v7886_v41 = vld [vmem:[#allocation2 + $0x74] sm:$0x1] }
 0x183   :  { %v8732_v47 = vpop.permute.xlu0 %2075  ;;  %v1452_v24 = vrot.slane %v7886_v41, 5 }
 0x184   :  { %12410 = vst [vmem:[#allocation63_spill] sm:$0xff] %v8732_v47  ;;  %2023 = vrot.lane.b32.xlu1 %v8706_v6, %s7906_s29  ;;  %v7887_v47 = vld [vmem:[#allocation2 + $0x6c] sm:$0x1] }
 0x186   :  { %v8740_v63 = vpop.permute.xlu1 %1893 }
 0x187   :  { %12411 = vst [vmem:[#allocation64_spill] sm:$0xff] %v8740_v63  ;;  %1943 = vrot.lane.b32.xlu2 %v8623_v44, %s7904_s27  ;;  %v1468_v63 = vrot.slane %v8477_v52, 5 }
 0x189   :  { %v8744_v15 = vpop.permute.xlu2 %1949  ;;  %2159 = vrot.lane.b32.xlu0 %v8706_v6, %s7904_s27 }
 0x18a   :  { %12412 = vst [vmem:[#allocation65_spill] sm:$0xff] %v8744_v15 }
 0x18b   :  { %v8751_v0 = vpop.permute.xlu0 %1939 }
 0x18c   :  { %2071 = vrot.lane.b32.xlu1 %v8706_v6, %s7909_s10 }
 0x18e   :  { %v8758_v12 = vpop.permute.xlu1 %1923 }
 0x18f   :  { %2103 = vrot.lane.b32.xlu2 %v8623_v44, %s7906_s29  ;;  %v7136_v44 = vrot.slane %v1359_v48, 9 }
 0x191   :  { %v8766_v53 = vpop.permute.xlu2 %2109  ;;  %2171 = vrot.lane.b32.xlu0 %v8515_v39, %s7908_s9  ;;  %v1413_v48 = vsel %vm8093_vm12, %v7136_v44, %v1412_v10 }
 0x192   :  { %12414 = vst [vmem:[#allocation67_spill] sm:$0xff] %v8766_v53  ;;  %v2184_v34 = vunpack.c.l.b16 %v1413_v48 }
 0x193   :  { %v8770_v32 = vpop.permute.xlu0 %2099 }
 0x194   :  { %12415 = vst [vmem:[#allocation68_spill] sm:$0xff] %v8770_v32  ;;  %2089 = vrot.lane.b32.xlu1 %v8686_v49, %s7905_s28  ;;  %v1409_v49 = vsel %vm8093_vm12, %v7135_v16, %v1408_v9  ;;  %v1433_v16 = vsel %vm8093_vm12, %v7141_v62, %v1432_v33  ;;  %v1369_v33 = vld [vmem:[#allocation2 + $0x70] sm:$0xe] }
 0x195   :  { %v2183_v10 = vunpack.c.l.b16 %v1409_v49  ;;  %v1367_v49 = vld [vmem:[#allocation2 + $0x60] sm:$0xe] }
 0x196   :  { %v8776_v25 = vpop.permute.xlu1 %2083 }
 0x197   :  { %2145 = vrot.lane.b32.xlu2 %v2132_v8, %s7902_s25  ;;  %v1436_v8 = vrot.slane %v8529_v36, 5  ;;  %v8797_v45 = vpack.c.b16 %v2184_v34, %v2183_v10  ;;  %v2189_v36 = vunpack.c.l.b16 %v1433_v16  ;;  %v7144_v10 = vrot.slane %v1367_v49, 9  ;;  %v1373_v49 = vld [vmem:[#allocation2 + $0x90] sm:$0xe] }
 0x198   :  { %v1444_v16 = vrot.slane %v8653_v17, 5 }
 0x199   :  { %v8781_v53 = vpop.permute.xlu2 %2019  ;;  %2177 = vrot.lane.b32.xlu0 %v8277_v57, %s7908_s9  ;;  %12418 = vst [vmem:[#allocation71_spill] sm:$0xff] %v8797_v45  ;;  %v1437_v2 = vsel %vm8093_vm12, %v7142_v43, %v1436_v8  ;;  %v7143_v43 = vrot.slane %v1366_v54, 9  ;;  %v1440_v8 = vrot.slane %v8651_v3, 5  ;;  %v1372_v54 = vld [vmem:[#allocation2 + $0x88] sm:$0xe] }
 0x19a   :  { %v2190_v9 = vunpack.c.l.b16 %v1437_v2  ;;  %v1368_v2 = vld [vmem:[#allocation2 + $0x68] sm:$0xe]  ;;  %v1445_v17 = vsel %vm8093_vm12, %v7144_v10, %v1444_v16  ;;  %v1464_v10 = vrot.slane %v8475_v51, 5  ;;  %v7150_v16 = vrot.slane %v1373_v49, 9 }
 0x19b   :  { %v8787_v1 = vpop.permute.xlu0 %1933  ;;  %v7145_v15 = vrot.slane %v1368_v2, 9  ;;  %v1441_v3 = vsel %vm8093_vm12, %v7143_v43, %v1440_v8  ;;  %v2192_v2 = vunpack.c.l.b16 %v1445_v17  ;;  %v7149_v8 = vrot.slane %v1372_v54, 9  ;;  %v1741_v17 = vld [vmem:[#allocation2 + $0x90] sm:$0xe] }
 0x19c   :  { %12416 = vst [vmem:[#allocation69_spill] sm:$0xff] %v8787_v1  ;;  %2173 = vrot.lane.b32.xlu1 %v8573_v50, %s7908_s9  ;;  %v8815_v62 = vpack.c.b16 %v2190_v9, %v2189_v36  ;;  %v1448_v36 = vrot.slane %v7887_v47, 5  ;;  %v2191_v47 = vunpack.c.l.b16 %v1441_v3  ;;  %v8841_v1 = vld [vmem:[#allocation2 + $0x94] sm:$0x1]  ;;  %v7166_v54 = vrot.slane %v1742_v28, 9 }
 0x19d   :  { %v1833_v51 = vrot.slane %v8841_v1, 5  ;;  %v1465_v49 = vsel %vm8093_vm12, %v7149_v8, %v1464_v10 }
 0x19e   :  { %v8793_v44 = vpop.permute.xlu1 %2149  ;;  %12420 = vst [vmem:[#allocation73_spill] sm:$0xff] %v8815_v62  ;;  %v1449_v43 = vsel %vm8093_vm12, %v7145_v15, %v1448_v36  ;;  %v8849_v15 = vpack.c.b16 %v2192_v2, %v2191_v47  ;;  %v7165_v36 = vrot.slane %v1741_v17, 9 }
 0x19f   :  { %12417 = vst [vmem:[#allocation70_spill] sm:$0xff] %v8793_v44  ;;  %2175 = vrot.lane.b32.xlu2 %v8706_v6, %s7908_s9  ;;  %v2193_v3 = vunpack.c.l.b16 %v1449_v43 }
 0x1a0   :  { %12423 = vst [vmem:[#allocation76_spill] sm:$0xff] %v8849_v15  ;;  %v1834_v47 = vsel %vm8093_vm12, %v7165_v36, %v1833_v51 }
 0x1a1   :  { %v8803_v11 = vpop.permute.xlu2 %2067  ;;  %2207 = vrot.lane.b32.xlu0 %v8797_v45, %s7910_s3  ;;  %v2891_v2 = vunpack.c.l.b16 %v1834_v47  ;;  %v8905_v47 = vld [vmem:[#allocation2 + $0x4c] sm:$0x1] }
 0x1a3   :  { %v8807_v48 = vpop.permute.xlu0 %2093 }
 0x1a4   :  { %12419 = vst [vmem:[#allocation72_spill] sm:$0xff] %v8807_v48  ;;  %2179 = vrot.lane.b32.xlu1 %v8380_v58, %s7908_s9  ;;  %v7146_v48 = vrot.slane %v1369_v33, 9 }
 0x1a6   :  { %v8811_v34 = vpop.permute.xlu1 %1885  ;;  %v1453_v33 = vsel %vm8093_vm12, %v7146_v48, %v1452_v24  ;;  %v8845_v48 = vld [vmem:[#allocation2 + $0x9c] sm:$0x1] }
 0x1a7   :  { %2181 = vrot.lane.b32.xlu2 %v8527_v22, %s7908_s9  ;;  %v2194_v24 = vunpack.c.l.b16 %v1453_v33  ;;  %v1469_v33 = vsel %vm8093_vm12, %v7150_v16, %v1468_v63  ;;  %v2197_v63 = vunpack.c.l.b16 %v1465_v49 }
 0x1a8   :  { %v2198_v8 = vunpack.c.l.b16 %v1469_v33  ;;  %v8903_v33 = vld [vmem:[#allocation2 + $0x44] sm:$0x1] }
 0x1a9   :  { %v8819_v44 = vpop.permute.xlu2 %1925  ;;  %2213 = vrot.lane.b32.xlu0 %v8815_v62, %s7910_s3  ;;  %v8861_v43 = vpack.c.b16 %v2194_v24, %v2193_v3 }
 0x1aa   :  { %v8877_v24 = vpack.c.b16 %v2198_v8, %v2197_v63  ;;  %v1734_v63 = vld [vmem:[#allocation2 + $0x48] sm:$0xe] }
 0x1ab   :  { %v8823_v9 = vpop.permute.xlu0 %2141  ;;  %12425 = vst [vmem:[#allocation78_spill] sm:$0xff] %v8861_v43 }
 0x1ac   :  { %12421 = vst [vmem:[#allocation74_spill] sm:$0xff] %v8823_v9  ;;  %2209 = vrot.lane.b32.xlu1 %v8411_v61, %s7910_s3  ;;  %v1837_v9 = vrot.slane %v8845_v48, 5 }
 0x1ad   :  { %12429 = vst [vmem:[#allocation82_spill] sm:$0xff] %v8877_v24 }
 0x1ae   :  { %v8833_v41 = vpop.permute.xlu1 %2035  ;;  %v1838_v28 = vsel %vm8093_vm12, %v7166_v54, %v1837_v9 }
 0x1af   :  { %2211 = vrot.lane.b32.xlu2 %v8521_v7, %s7910_s3  ;;  %v2892_v10 = vunpack.c.l.b16 %v1838_v28 }
 0x1b1   :  { %v8843_v55 = vpop.permute.xlu2 %2085  ;;  %2219 = vrot.lane.b32.xlu0 %v8423_v37, %s7910_s3 }
 0x1b2   :  { %12422 = vst [vmem:[#allocation75_spill] sm:$0xff] %v8843_v55 }
 0x1b3   :  { %v8852_v52 = vpop.permute.xlu0 %2045 }
 0x1b4   :  { %12424 = vst [vmem:[#allocation77_spill] sm:$0xff] %v8852_v52  ;;  %2215 = vrot.lane.b32.xlu1 %v8849_v15, %s7910_s3  ;;  %v8873_v52 = vpack.c.b16 %v2892_v10, %v2891_v2  ;;  %v1733_v2 = vld [vmem:[#allocation2 + $0x40] sm:$0xe]  ;;  %v1801_v10 = vrot.slane %v8903_v33, 5 }
 0x1b5   :  { %v7157_v8 = vrot.slane %v1733_v2, 9 }
 0x1b6   :  { %v8867_v17 = vpop.permute.xlu1 %2155  ;;  %12428 = vst [vmem:[#allocation81_spill] sm:$0xff] %v8873_v52  ;;  %v7158_v52 = vrot.slane %v1734_v63, 9 }
 0x1b7   :  { %12426 = vst [vmem:[#allocation79_spill] sm:$0xff] %v8867_v17  ;;  %2217 = vrot.lane.b32.xlu2 %v8861_v43, %s7910_s3 }
 0x1b9   :  { %v8871_v16 = vpop.permute.xlu2 %1887  ;;  %2479 = vrot.lane.b32.xlu0 %v8348_v60, %s7900_s23 }
 0x1ba   :  { %12427 = vst [vmem:[#allocation80_spill] sm:$0xff] %v8871_v16 }
 0x1bb   :  { %v8879_v3 = vpop.permute.xlu0 %2165 }
 0x1bc   :  { %12430 = vst [vmem:[#allocation83_spill] sm:$0xff] %v8879_v3  ;;  %2221 = vrot.lane.b32.xlu1 %v8877_v24, %s7910_s3  ;;  %v1805_v3 = vrot.slane %v8905_v47, 5 }
 0x1be   :  { %v8883_v9 = vpop.permute.xlu1 %2053 }
 0x1bf   :  { %12431 = vst [vmem:[#allocation84_spill] sm:$0xff] %v8883_v9  ;;  %2477 = vrot.lane.b32.xlu2 %v8225_v21, %s7900_s23 }
 0x1c1   :  { %v8887_v36 = vpop.permute.xlu2 %2037  ;;  %2485 = vrot.lane.b32.xlu0 %v8706_v6, %s7900_s23 }
 0x1c2   :  { %12432 = vst [vmem:[#allocation85_spill] sm:$0xff] %v8887_v36 }
 0x1c3   :  { %v8891_v51 = vpop.permute.xlu0 %2021 }
 0x1c4   :  { %2481 = vrot.lane.b32.xlu1 %v8515_v39, %s7900_s23 }
 0x1c6   :  { %v8895_v54 = vpop.permute.xlu1 %2029 }
 0x1c7   :  { %12433 = vst [vmem:[#allocation86_spill] sm:$0xff] %v8895_v54  ;;  %2483 = vrot.lane.b32.xlu2 %v8573_v50, %s7900_s23  ;;  %v1806_v50 = vsel %vm8093_vm12, %v7158_v52, %v1805_v3 }
 0x1c8   :  { %v2884_v2 = vunpack.c.l.b16 %v1806_v50  ;;  %v7602_v50 = vld [vmem:[%s12173_s4 + $0x30] sm:$0xff] }
 0x1c9   :  { %v8899_v49 = vpop.permute.xlu2 %2157  ;;  %2491 = vrot.lane.b32.xlu0 %v8527_v22, %s7900_s23  ;;  %v1802_v22 = vsel %vm8093_vm12, %v7157_v8, %v1801_v10  ;;  %v1471_v10 = vld [vmem:[#allocation2 + $0x10] sm:$0xf] }
 0x1ca   :  { %12434 = vst [vmem:[#allocation87_spill] sm:$0xff] %v8899_v49  ;;  %v2883_v39 = vunpack.c.l.b16 %v1802_v22  ;;  %v1504_v46 = vshrl.u32 %v1471_v10, 16 }
 0x1cb   :  { %v8907_v28 = vpop.permute.xlu0 %2069 }
 0x1cc   :  { %12435 = vst [vmem:[#allocation88_spill] sm:$0xff] %v8907_v28  ;;  %2487 = vrot.lane.b32.xlu1 %v8277_v57, %s7900_s23  ;;  %v8925_v63 = vpack.c.b16 %v2884_v2, %v2883_v39  ;;  %v7603_v39 = vld [vmem:[%s12173_s4 + $0x38] sm:$0xff]  ;;  %v7601_v2 = vld [vmem:[%s12173_s4 + $0x28] sm:$0xff] }
 0x1cd   :  { %3137 = vmatpush.bf16.msra.mxu1 %v7603_v39  ;;  %v1472_v39 = vld [vmem:[#allocation2 + $0x18] sm:$0xf] }
 0x1ce   :  { %v8913_v54 = vpop.permute.xlu1 %2077  ;;  %12438 = vst [vmem:[#allocation91_spill] sm:$0xff] %v8925_v63 }
 0x1cf   :  { %12436 = vst [vmem:[#allocation89_spill] sm:$0xff] %v8913_v54  ;;  %2489 = vrot.lane.b32.xlu2 %v8380_v58, %s7900_s23 }
 0x1d1   :  { %v8921_v57 = vpop.permute.xlu2 %1889  ;;  %2497 = vrot.lane.b32.xlu0 %v8521_v7, %s7903_s26  ;;  %3138 = vmatpush.bf16.msra.mxu1 %v7602_v50  ;;  %v7600_v50 = vld [vmem:[%s12173_s4 + $0x20] sm:$0xff]  ;;  %v1474_v7 = vld [vmem:[#allocation2 + $0x28] sm:$0xf] }
 0x1d2   :  { %12437 = vst [vmem:[#allocation90_spill] sm:$0xff] %v8921_v57 }
 0x1d3   :  { %v8927_v6 = vpop.permute.xlu0 %1927 }
 0x1d4   :  { %12439 = vst [vmem:[#allocation92_spill] sm:$0xff] %v8927_v6  ;;  %2493 = vrot.lane.b32.xlu1 %v8797_v45, %s7903_s26  ;;  %v1541_v6 = vshll.u32 %v8587_v27, 16 }
 0x1d5   :  { %3139 = vmatpush.bf16.msra.mxu1 %v7601_v2  ;;  %v8971_v2 = vld [vmem:[#allocation2 + $0x14] sm:$0x1] }
 0x1d6   :  { %v8931_v54 = vpop.permute.xlu1 %1941  ;;  %12446 = vst [vmem:[#allocation99_spill] sm:$0xff] %v8971_v2 }
 0x1d7   :  { %2495 = vrot.lane.b32.xlu2 %v8411_v61, %s7903_s26  ;;  %v1473_v61 = vld [vmem:[#allocation2 + $0x20] sm:$0xf] }
 0x1d8   :  { %v1535_v21 = vshll.u32 %v1473_v61, 16 }
 0x1d9   :  { %v8935_v52 = vpop.permute.xlu2 %2055  ;;  %2503 = vrot.lane.b32.xlu0 %v8861_v43, %s7903_s26  ;;  %v1521_v43 = vshll.u32 %v1472_v39, 16  ;;  %3140 = vmatpush.bf16.msra.mxu1 %v7600_v50  ;;  %v2226_v50 = vsel %vm2223_vm14, %v8388_v13, %v8378_v38 }
 0x1da   :  { %12440 = vst [vmem:[#allocation93_spill] sm:$0xff] %v8935_v52  ;;  %v2249_v60 = vsel %vm363_vm0, %v2226_v50, %v8430_v31 }
 0x1db   :  { %v8942_v22 = vpop.permute.xlu0 %2087  ;;  %v1523_v49 = vrot.slane %v1521_v43, 5  ;;  %v8998_v43 = vld [vmem:[#allocation2 + $0x10] sm:$0xf] }
 0x1dc   :  { %12441 = vst [vmem:[#allocation94_spill] sm:$0xff] %v8942_v22  ;;  %2499 = vrot.lane.b32.xlu1 %v8815_v62, %s7903_s26  ;;  %v1507_v62 = vshll.u32 %v1471_v10, 16  ;;  %v1506_v10 = vrot.slane %v1504_v46, 4  ;;  %v8975_v22 = vld [vmem:[#allocation2 + $0x24] sm:$0xf0] }
 0x1dd   :  { %v8986_v46 = vld [vmem:[#allocation2 + $0x20] sm:$0xf] }
 0x1de   :  { %v8949_v3 = vpop.permute.xlu1 %2101  ;;  %v1509_v58 = vrot.slane %v1507_v62, 5  ;;  %v7599_v62 = vld [vmem:[%s12173_s4 + $0x18] sm:$0xff] }
 0x1df   :  { %12442 = vst [vmem:[#allocation95_spill] sm:$0xff] %v8949_v3  ;;  %2501 = vrot.lane.b32.xlu2 %v8849_v15, %s7903_s26  ;;  %v1518_v15 = vshrl.u32 %v1472_v39, 16  ;;  %v8979_v39 = vld [vmem:[#allocation2 + $0x74] sm:$0xf0]  ;;  %3141 = vmatpush.bf16.msra.mxu1 %v7599_v62 }
 0x1e0   :  { %v1510_v52 = vor.u32 %v1509_v58, %v1506_v10 }
 0x1e1   :  { %v8953_v8 = vpop.permute.xlu2 %1943  ;;  %2509 = vrot.lane.b32.xlu0 %v8144_v56, %s7911_s16  ;;  %v1520_v57 = vrot.slane %v1518_v15, 4  ;;  %v8991_v15 = vld [vmem:[#allocation2 + $0x1c] sm:$0x1] }
 0x1e2   :  { %12443 = vst [vmem:[#allocation96_spill] sm:$0xff] %v8953_v8  ;;  %v1527_v3 = vshll.u32 %v8991_v15, 16  ;;  %v1537_v8 = vrot.slane %v1535_v21, 5  ;;  %v2266_v21 = vsel %vm2264_vm15, %v2249_v60, %v8144_v56  ;;  %v7597_v56 = vld [vmem:[%s12173_s4 + $0x8] sm:$0xff] }
 0x1e3   :  { %v8960_v63 = vpop.permute.xlu0 %1945  ;;  %12448 = vst [vmem:[#allocation101_spill] sm:$0xff] %v8991_v15  ;;  %v1524_v13 = vor.u32 %v1523_v49, %v1520_v57  ;;  %v1475_v15 = vld [vmem:[#allocation2 + $0x30] sm:$0xf]  ;;  %v1511_v49 = vrot.slane %v1510_v52, 4 }
 0x1e4   :  { %12444 = vst [vmem:[#allocation97_spill] sm:$0xff] %v8960_v63  ;;  %2505 = vrot.lane.b32.xlu1 %v8423_v37, %s7903_s26  ;;  %v8977_v63 = vld [vmem:[#allocation2 + $0x14] sm:$0xf0]  ;;  %v1529_v10 = vrot.slane %v1527_v3, 5  ;;  %v1560_v60 = vshrl.u32 %v1475_v15, 16  ;;  %v1563_v52 = vshll.u32 %v1475_v15, 16 }
 0x1e5   :  { %v1525_v58 = vrot.slane %v1524_v13, 4  ;;  %v9039_v15 = vld [vmem:[#allocation2 + $0x84] sm:$0xf0] }
 0x1e6   :  { %v8967_v45 = vpop.permute.xlu1 %2143 }
 0x1e7   :  { %12445 = vst [vmem:[#allocation98_spill] sm:$0xff] %v8967_v45  ;;  %2507 = vrot.lane.b32.xlu2 %v8877_v24, %s7903_s26  ;;  %v1532_v45 = vshrl.u32 %v1473_v61, 16  ;;  %v1546_v24 = vshrl.u32 %v1474_v7, 16  ;;  %v1513_v61 = vshll.u32 %v8971_v2, 16  ;;  %v9005_v2 = vld [vmem:[#allocation2 + $0x70] sm:$0xf] }
 0x1e9   :  { %v8973_v37 = vpop.permute.xlu2 %2103  ;;  %2515 = vrot.lane.b32.xlu0 %v8561_v23, %s7911_s16  ;;  %v1534_v55 = vrot.slane %v1532_v45, 4  ;;  %v1548_v62 = vrot.slane %v1546_v24, 4  ;;  %v1515_v28 = vrot.slane %v1513_v61, 5  ;;  %v1476_v45 = vld [vmem:[#allocation2 + $0x38] sm:$0xf] }
 0x1ea   :  { %12447 = vst [vmem:[#allocation100_spill] sm:$0xff] %v8973_v37  ;;  %v1549_v37 = vshll.u32 %v1474_v7, 16  ;;  %v1481_v7 = vld [vmem:[#allocation2 + $0x70] sm:$0xf]  ;;  %v1482_v61 = vld [vmem:[#allocation2 + $0x78] sm:$0xf] }
 0x1eb   :  { %v8994_v38 = vpop.permute.xlu0 %2039  ;;  %v1644_v16 = vshrl.u32 %v1481_v7, 16  ;;  %v1647_v57 = vshll.u32 %v1481_v7, 16  ;;  %v1577_v7 = vshll.u32 %v1476_v45, 16  ;;  %v1661_v17 = vshll.u32 %v1482_v61, 16 }
 0x1ec   :  { %12449 = vst [vmem:[#allocation102_spill] sm:$0xff] %v8994_v38  ;;  %2511 = vrot.lane.b32.xlu1 %v8259_v18, %s7911_s16  ;;  %v7598_v38 = vld [vmem:[%s12173_s4 + $0x10] sm:$0xff]  ;;  %v1551_v31 = vrot.slane %v1549_v37, 5  ;;  %v2283_v37 = vsel %vm12255_vm1, %v2266_v21, %v8485_v26  ;;  %v1574_v26 = vshrl.u32 %v1476_v45, 16  ;;  %v1562_v45 = vrot.slane %v1560_v60, 4 }
 0x1ed   :  { %3142 = vmatpush.bf16.msra.mxu1 %v7598_v38  ;;  %v1555_v38 = vshll.u32 %v8589_v42, 16  ;;  %v1646_v21 = vrot.slane %v1644_v16, 4  ;;  %v1649_v13 = vrot.slane %v1647_v57, 5  ;;  %v1516_v42 = vsel %vm8130_vm13, %v1511_v49, %v1515_v28  ;;  %v12456_v28 = vld [vmem:[#allocation8_spill] sm:$0xff] }
 0x1ee   :  { %v9014_v50 = vpop.permute.xlu1 %1929  ;;  %v1552_v3 = vor.u32 %v1551_v31, %v1548_v62  ;;  %v1530_v16 = vsel %vm8130_vm13, %v1525_v58, %v1529_v10  ;;  %v7596_v62 = vld [vmem:[%s12173_s4] sm:$0xff]  ;;  %v1543_v57 = vrot.slane %v1541_v6, 5  ;;  %v1576_v49 = vrot.slane %v1574_v26, 4 }
 0x1ef   :  { %12450 = vst [vmem:[#allocation103_spill] sm:$0xff] %v9014_v50  ;;  %2513 = vrot.lane.b32.xlu2 %v8364_v29, %s7911_s16  ;;  %v1538_v50 = vor.u32 %v1537_v8, %v1534_v55  ;;  %v12452_v55 = vld [vmem:[#allocation18_spill] sm:$0xff]  ;;  %v1579_v58 = vrot.slane %v1577_v7, 5  ;;  %v1650_v10 = vor.u32 %v1649_v13, %v1646_v21  ;;  %v1663_v60 = vrot.slane %v1661_v17, 5  ;;  %v1480_v7 = vld [vmem:[#allocation2 + $0x68] sm:$0xf] }
 0x1f0   :  { %v2300_v27 = vsel %vm12253_vm2, %v2283_v37, %v12452_v55  ;;  %v1565_v37 = vrot.slane %v1563_v52, 5  ;;  %v9069_v17 = vld [vmem:[#allocation2 + $0x3c] sm:$0x1] }
 0x1f1   :  { %v9022_v24 = vpop.permute.xlu2 %2145  ;;  %2521 = vrot.lane.b32.xlu0 %v8320_v4, %s7911_s16  ;;  %3143 = vmatpush.bf16.msra.mxu1 %v7597_v56  ;;  %v1658_v4 = vshrl.u32 %v1482_v61, 16  ;;  %v1539_v31 = vrot.slane %v1538_v50, 4  ;;  %v1553_v61 = vrot.slane %v1552_v3, 4  ;;  %v1557_v56 = vrot.slane %v1555_v38, 5  ;;  %v9058_v3 = vld [vmem:[#allocation2 + $0x34] sm:$0x1] }
 0x1f2   :  { %12451 = vst [vmem:[#allocation104_spill] sm:$0xff] %v9022_v24  ;;  %v9035_v24 = vld [vmem:[#allocation2 + $0x80] sm:$0xf]  ;;  %v2581_v38 = vunpack.c.l.b16 %v1516_v42  ;;  %v1566_v13 = vor.u32 %v1565_v37, %v1562_v45  ;;  %v1569_v42 = vshll.u32 %v9058_v3, 16  ;;  %v12463_v50 = vld [vmem:[#allocation38_spill] sm:$0xff]  ;;  %v12466_v45 = vld [vmem:[#allocation51_spill] sm:$0xff] }
 0x1f3   :  { %v9033_v8 = vpop.permute.xlu0 %2105  ;;  %v1660_v6 = vrot.slane %v1658_v4, 4  ;;  %12458 = vst [vmem:[#allocation108_spill] sm:$0xff] %v9058_v3  ;;  %v12460_v4 = vor.u32 %v8975_v22, %v8986_v46  ;;  %v1667_v37 = vshll.u32 %v12466_v45, 16  ;;  %v1630_v3 = vshrl.u32 %v1480_v7, 16 }
 0x1f4   :  { %12453 = vst [vmem:[#allocation105_spill] sm:$0xff] %v9033_v8  ;;  %2517 = vrot.lane.b32.xlu1 %v8716_v30, %s7911_s16  ;;  %v12454_v8 = vld [vmem:[#allocation15_spill] sm:$0xff] }
 0x1f5   :  { %v2317_v30 = vsel %vm12249_vm4, %v2300_v27, %v12454_v8  ;;  %3144 = vmatpush.bf16.msra.mxu1 %v7596_v62  ;;  %v2582_v27 = vunpack.c.l.b16 %v1530_v16  ;;  %v1544_v8 = vsel %vm8130_vm13, %v1539_v31, %v1543_v57  ;;  %v1558_v16 = vsel %vm8130_vm13, %v1553_v61, %v1557_v56  ;;  %v12462_v62 = vld [vmem:[#allocation29_spill] sm:$0xff]  ;;  %v7249_v61 = vld [vmem:[#allocation2 + $0x60] sm:$0xf] }
 0x1f6   :  { %v9050_v9 = vpop.permute.xlu1 %2023  ;;  %v2333_v21 = vsel %vm12250_vm6, %v2317_v30, %v12452_v55  ;;  %v1580_v57 = vor.u32 %v1579_v58, %v1576_v49  ;;  %v1583_v30 = vshll.u32 %v9069_v17, 16  ;;  %v12464_v55 = vld [vmem:[#allocation23_spill] sm:$0xff]  ;;  %v2584_v49 = vunpack.c.l.b16 %v1558_v16 }
 0x1f7   :  { %12455 = vst [vmem:[#allocation106_spill] sm:$0xff] %v9050_v9  ;;  %2519 = vrot.lane.b32.xlu2 %v12456_v28, %s7911_s16  ;;  %v12459_v28 = vld [vmem:[#allocation47_spill] sm:$0xff]  ;;  %v2343_v31 = vsel %vm12251_vm8, %v2333_v21, %v12462_v62  ;;  %v2229_v22 = vsel %vm2223_vm14, %v12464_v55, %v12463_v50  ;;  %v9085_v56 = vpack.c.b16 %v2582_v27, %v2581_v38  ;;  %v1633_v21 = vshll.u32 %v1480_v7, 16  ;;  %v7241_v27 = vld [vmem:[#allocation2 + $0x30] sm:$0xf] }
 0x1f8   :  { %v1653_v26 = vshll.u32 %v12459_v28, 16  ;;  %12461 = vst [vmem:[#allocation47_spill] sm:$0xff] %v9069_v17  ;;  %v1651_v28 = vrot.slane %v1650_v10, 4  ;;  %v12469_v10 = vld [vmem:[#allocation14_spill] sm:$0xff]  ;;  %v7592_v17 = vld [vmem:[#allocation2 + $0x64] sm:$0xf0]  ;;  %v12472_v38 = vor.u32 %v8977_v63, %v8998_v43 }
 0x1f9   :  { %v9056_v52 = vpop.permute.xlu2 %2175  ;;  %2567 = vrot.lane.b32.xlu0 %v12460_v4, %s7912_s13  ;;  %v1664_v4 = vor.u32 %v1663_v60, %v1660_v6  ;;  %12468 = vst [vmem:[#allocation23_spill] sm:$0xff] %v9085_v56  ;;  %v2360_v62 = vsel %vm12252_vm9, %v2343_v31, %v12469_v10  ;;  %v1567_v55 = vrot.slane %v1566_v13, 4  ;;  %v1571_v50 = vrot.slane %v1569_v42, 5  ;;  %v12470_v6 = vld [vmem:[#allocation34_spill] sm:$0xff]  ;;  %v1479_v10 = vld [vmem:[#allocation2 + $0x60] sm:$0xf] }
 0x1fa   :  { %12457 = vst [vmem:[#allocation107_spill] sm:$0xff] %v9056_v52  ;;  %v12467_v52 = vld [vmem:[#allocation22_spill] sm:$0xff]  ;;  %v1655_v58 = vrot.slane %v1653_v26, 5  ;;  %v2251_v60 = vsel %vm363_vm0, %v2229_v22, %v12470_v6  ;;  %v7590_v26 = vld [vmem:[#allocation2 + $0x34] sm:$0xf0]  ;;  %v1581_v7 = vrot.slane %v1580_v57, 4  ;;  %v7250_v13 = vor.u32 %v7592_v17, %v7249_v61 }
 0x1fb   :  { %v9080_v46 = vpop.permute.xlu0 %2159  ;;  %v1585_v16 = vrot.slane %v1583_v30, 5  ;;  %v1665_v42 = vrot.slane %v1664_v4, 4  ;;  %v12473_v22 = vld [vmem:[#allocation25_spill] sm:$0xff]  ;;  %v1477_v43 = vld [vmem:[#allocation2 + $0x40] sm:$0xf]  ;;  %v1635_v57 = vrot.slane %v1633_v21, 5  ;;  %v2268_v17 = vsel %vm2264_vm15, %v2251_v60, %v8259_v18 }
 0x1fc   :  { %12465 = vst [vmem:[#allocation38_spill] sm:$0xff] %v9080_v46  ;;  %2523 = vrot.lane.b32.xlu1 %v12467_v52, %s7911_s16  ;;  %v2583_v46 = vunpack.c.l.b16 %v1544_v8  ;;  %v1656_v31 = vsel %vm8130_vm13, %v1651_v28, %v1655_v58  ;;  %v1669_v8 = vrot.slane %v1667_v37, 5  ;;  %v1632_v52 = vrot.slane %v1630_v3, 4  ;;  %v7245_v3 = vld [vmem:[#allocation2 + $0x40] sm:$0xf]  ;;  %v12477_v9 = vld [vmem:[#allocation50_spill] sm:$0xff] }
 0x1fd   :  { %v9101_v6 = vsel %vm2375_vm10, %v2360_v62, %v12473_v22  ;;  %v1639_v30 = vshll.u32 %v8718_v19, 16  ;;  %v7242_v28 = vor.u32 %v7590_v26, %v7241_v27  ;;  %v7591_v4 = vld [vmem:[#allocation2 + $0x44] sm:$0xf0]  ;;  %v1572_v62 = vsel %vm8130_vm13, %v1567_v55, %v1571_v50  ;;  %v7595_v27 = vld [vmem:[#allocation2 + $0x94] sm:$0xf0] }
 0x1fe   :  { %v9091_v45 = vpop.permute.xlu1 %2071  ;;  %v9105_v63 = vpack.c.b16 %v2584_v49, %v2583_v46  ;;  %v9113_v37 = vunpack.c.l.b16 %v1656_v31  ;;  %v1483_v46 = vld [vmem:[#allocation2 + $0x80] sm:$0xf]  ;;  %v2285_v61 = vsel %vm12255_vm1, %v2268_v17, %v8701_v59  ;;  %v7261_v49 = vld [vmem:[#allocation2 + $0x90] sm:$0xf]  ;;  %v1586_v19 = vsel %vm8130_vm13, %v1581_v7, %v1585_v16  ;;  %v1484_v21 = vld [vmem:[#allocation2 + $0x88] sm:$0xf] }
 0x1ff   :  { %12471 = vst [vmem:[#allocation51_spill] sm:$0xff] %v9091_v45  ;;  %2565 = vrot.lane.b32.xlu2 %v12472_v38, %s7912_s13  ;;  %v1478_v38 = vld [vmem:[#allocation2 + $0x48] sm:$0xf]  ;;  %v1616_v58 = vshrl.u32 %v1479_v10, 16  ;;  %v1619_v18 = vshll.u32 %v1479_v10, 16  ;;  %v1588_v26 = vshrl.u32 %v1477_v43, 16  ;;  %v7246_v50 = vor.u32 %v7591_v4, %v7245_v3 }
 0x200   :  { %12475 = vst [vmem:[#allocation34_spill] sm:$0xff] %v9105_v63  ;;  %v1602_v22 = vshrl.u32 %v1478_v38, 16  ;;  %v1605_v55 = vshll.u32 %v1478_v38, 16  ;;  %v2585_v31 = vunpack.c.l.b16 %v1572_v62  ;;  %v1675_v59 = vshll.u32 %v1483_v46, 16 }
 0x201   :  { %v9103_v45 = vpop.permute.xlu2 %2181  ;;  %2573 = vrot.lane.b32.xlu0 %v7250_v13, %s7912_s13  ;;  %v1591_v13 = vshll.u32 %v1477_v43, 16  ;;  %v2586_v17 = vunpack.c.l.b16 %v1586_v19  ;;  %v1670_v7 = vsel %vm8130_vm13, %v1665_v42, %v1669_v8  ;;  %v1636_v16 = vor.u32 %v1635_v57, %v1632_v52  ;;  %v12478_v57 = vld [vmem:[#allocation24_spill] sm:$0xff] }
 0x202   :  { %12474 = vst [vmem:[#allocation14_spill] sm:$0xff] %v9103_v45  ;;  %v1672_v45 = vshrl.u32 %v1483_v46, 16  ;;  %v1686_v10 = vshrl.u32 %v1484_v21, 16  ;;  %v7262_v43 = vor.u32 %v7595_v27, %v7261_v49  ;;  %v1618_v38 = vrot.slane %v1616_v58, 4  ;;  %v1485_v27 = vld [vmem:[#allocation2 + $0x90] sm:$0xf] }
 0x203   :  { %v9119_v60 = vpop.permute.xlu0 %2171  ;;  %v1590_v3 = vrot.slane %v1588_v26, 4  ;;  %v1593_v4 = vrot.slane %v1591_v13, 5  ;;  %v1604_v62 = vrot.slane %v1602_v22, 4  ;;  %v1607_v46 = vrot.slane %v1605_v55, 5 }
 0x204   :  { %12476 = vst [vmem:[#allocation25_spill] sm:$0xff] %v9119_v60  ;;  %2569 = vrot.lane.b32.xlu1 %v7242_v28, %s7912_s13  ;;  %v2302_v60 = vsel %vm12253_vm2, %v2285_v61, %v12477_v9  ;;  %v1621_v28 = vrot.slane %v1619_v18, 5  ;;  %v9131_v32 = vunpack.c.l.b16 %v1670_v7  ;;  %v9133_v52 = vrot.slane %v1639_v30, 5 }
 0x205   :  { %v9135_v42 = vrot.slane %v1672_v45, 4  ;;  %v9137_v8 = vrot.slane %v1675_v59, 5  ;;  %v2319_v61 = vsel %vm12249_vm4, %v2302_v60, %v12478_v57  ;;  %v9142_v49 = vpack.c.b16 %v2586_v17, %v2585_v31  ;;  %v1486_v45 = vld [vmem:[#allocation2 + $0x98] sm:$0xf] }
 0x206   :  { %v9126_v36 = vpop.permute.xlu1 %2089  ;;  %v9144_v58 = vrot.slane %v1636_v16, 4  ;;  %v1689_v18 = vshll.u32 %v1484_v21, 16  ;;  %v1622_v26 = vor.u32 %v1621_v28, %v1618_v38  ;;  %v1625_v30 = vshll.u32 %v8720_v5, 16  ;;  %v12482_v16 = vld [vmem:[#allocation16_spill] sm:$0xff] }
 0x207   :  { %2571 = vrot.lane.b32.xlu2 %v7246_v50, %s7912_s13  ;;  %12479 = vst [vmem:[#allocation50_spill] sm:$0xff] %v9142_v49  ;;  %v9147_v13 = vrot.slane %v1686_v10, 4  ;;  %v1594_v55 = vor.u32 %v1593_v4, %v1590_v3  ;;  %v1597_v60 = vshll.u32 %v8903_v33, 16  ;;  %v1608_v50 = vor.u32 %v1607_v46, %v1604_v62 }
 0x208   :  { %v1611_v31 = vshll.u32 %v8905_v47, 16  ;;  %v2334_v59 = vsel %vm12250_vm6, %v2319_v61, %v12477_v9  ;;  %v12481_v21 = vor.u32 %v8979_v39, %v9005_v2  ;;  %v1678_v5 = vor.u32 %v9137_v8, %v9135_v42  ;;  %v12485_v8 = vld [vmem:[#allocation21_spill] sm:$0xff] }
 0x209   :  { %v9129_v19 = vpop.permute.xlu2 %2211  ;;  %2579 = vrot.lane.b32.xlu0 %v7262_v43, %s7912_s13  ;;  %v1700_v17 = vshrl.u32 %v1485_v27, 16  ;;  %v1703_v7 = vshll.u32 %v1485_v27, 16  ;;  %vm2409_vm4 = vcmask 785408   ;;  %v2394_v33 = vsel %vm12254_vm11, %v9101_v6, %v12482_v16 }
 0x20a   :  { %v1714_v10 = vshrl.u32 %v1486_v45, 16  ;;  %v1717_v47 = vshll.u32 %v1486_v45, 16  ;;  %v2345_v43 = vsel %vm12251_vm8, %v2334_v59, %v8722_v14  ;;  %v12484_v2 = vor.u32 %v9039_v15, %v9035_v24  ;;  %v12486_v59 = vld [vmem:[#allocation46_spill] sm:$0xff]  ;;  %v7888_v15 = vld [vmem:[#allocation2 + $0x84] sm:$0x1] }
 0x20b   :  { %v9149_v22 = vpop.permute.xlu0 %2177  ;;  %v1623_v39 = vrot.slane %v1622_v26, 4  ;;  %v1627_v28 = vrot.slane %v1625_v30, 5  ;;  %v1691_v3 = vrot.slane %v1689_v18, 5  ;;  %v1595_v4 = vrot.slane %v1594_v55, 4  ;;  %v12487_v55 = vld [vmem:[#allocation42_spill] sm:$0xff] }
 0x20c   :  { %12480 = vst [vmem:[#allocation24_spill] sm:$0xff] %v9149_v22  ;;  %2575 = vrot.lane.b32.xlu1 %v12481_v21, %s7912_s13  ;;  %v1599_v62 = vrot.slane %v1597_v60, 5  ;;  %v1609_v46 = vrot.slane %v1608_v50, 4  ;;  %v1613_v42 = vrot.slane %v1611_v31, 5  ;;  %vm2426_vm6 = vcmask 850944  }
 0x20d   :  { %v2411_v61 = vsel %vm2409_vm4, %v2394_v33, %v12485_v8  ;;  %v1702_v27 = vrot.slane %v1700_v17, 4  ;;  %v1705_v45 = vrot.slane %v1703_v7, 5  ;;  %v2232_v24 = vsel %vm2223_vm14, %v12486_v59, %v8758_v12  ;;  %v7889_v21 = vld [vmem:[#allocation2 + $0x8c] sm:$0x1]  ;;  %v12488_v7 = vld [vmem:[#allocation27_spill] sm:$0xff] }
 0x20e   :  { %v9166_v38 = vpop.permute.xlu1 %2173  ;;  %v1681_v18 = vshll.u32 %v7888_v15, 16  ;;  %v1716_v26 = vrot.slane %v1714_v10, 4  ;;  %v1719_v30 = vrot.slane %v1717_v47, 5  ;;  %v2362_v60 = vsel %vm12252_vm9, %v2345_v43, %v12487_v55  ;;  %v12493_v55 = vld [vmem:[#allocation31_spill] sm:$0xff] }
 0x20f   :  { %12483 = vst [vmem:[#allocation16_spill] sm:$0xff] %v9166_v38  ;;  %2577 = vrot.lane.b32.xlu2 %v12484_v2, %s7912_s13  ;;  %v1628_v50 = vsel %vm8130_vm13, %v1623_v39, %v1627_v28  ;;  %v1692_v31 = vor.u32 %v1691_v3, %v9147_v13  ;;  %v1695_v17 = vshll.u32 %v7889_v21, 16  ;;  %vm2443_vm8 = vcmask 916480  }
 0x210   :  { %v2428_v16 = vsel %vm2426_vm6, %v2411_v61, %v12488_v7  ;;  %v1600_v33 = vsel %vm8130_vm13, %v1595_v4, %v1599_v62  ;;  %v1614_v10 = vsel %vm8130_vm13, %v1609_v46, %v1613_v42  ;;  %v2253_v47 = vsel %vm363_vm0, %v2232_v24, %v8751_v0 }
 0x211   :  { %v9172_v6 = vpop.permute.xlu2 %2217  ;;  %2609 = vrot.lane.b32.xlu0 %v9142_v49, %s7913_s14  ;;  %vm2460_vm9 = vcmask 982016   ;;  %v1706_v43 = vor.u32 %v1705_v45, %v1702_v27  ;;  %v1709_v39 = vshll.u32 %v8841_v1, 16  ;;  %v1720_v28 = vor.u32 %v1719_v30, %v1716_v26  ;;  %v12491_v27 = vld [vmem:[#allocation37_spill] sm:$0xff] }
 0x212   :  { %v1723_v3 = vshll.u32 %v8845_v48, 16  ;;  %v9207_v0 = vpack.c.b16 %v9131_v32, %v9113_v37  ;;  %v2587_v62 = vunpack.c.l.b16 %v1600_v33  ;;  %v2588_v46 = vunpack.c.l.b16 %v1614_v10 }
 0x213   :  { %v2208_v12 = vpop.permute.xlu0 %2207  ;;  %v1642_v1 = vsel %vm8130_vm13, %v9144_v58, %v9133_v52  ;;  %v1679_v42 = vrot.slane %v1678_v5, 4  ;;  %v1683_v8 = vrot.slane %v1681_v18, 5  ;;  %v1693_v48 = vrot.slane %v1692_v31, 4 }
 0x214   :  { %2605 = vrot.lane.b32.xlu1 %v9085_v56, %s7913_s14  ;;  %v2445_v13 = vsel %vm2443_vm8, %v2428_v16, %v2208_v12  ;;  %12490 = vst [vmem:[#allocation46_spill] sm:$0xff] %v9207_v0  ;;  %v1697_v61 = vrot.slane %v1695_v17, 5  ;;  %v2379_v45 = vsel %vm2375_vm10, %v2362_v60, %v12491_v27  ;;  %v2270_v59 = vsel %vm2264_vm15, %v2253_v47, %v8364_v29 }
 0x215   :  { %v2461_v2 = vsel %vm2460_vm9, %v2445_v13, %v12488_v7  ;;  %v2589_v32 = vunpack.c.l.b16 %v1628_v50  ;;  %v1707_v37 = vrot.slane %v1706_v43, 4  ;;  %v1711_v15 = vrot.slane %v1709_v39, 5 }
 0x216   :  { %v9201_v4 = vpop.permute.xlu1 %2179  ;;  %3145 = vmatmul.bf16.vlgmr.msra.gmra.mxu1 %v2461_v2  ;;  %v1721_v26 = vrot.slane %v1720_v28, 4  ;;  %v1725_v52 = vrot.slane %v1723_v3, 5  ;;  %v2287_v58 = vsel %vm12255_vm1, %v2270_v59, %v8781_v53  ;;  %v9223_v5 = vpack.c.b16 %v2588_v46, %v2587_v62  ;;  %v12497_v3 = vld [vmem:[#allocation48_spill] sm:$0xff] }
 0x217   :  { %12489 = vst [vmem:[#allocation21_spill] sm:$0xff] %v9201_v4  ;;  %2607 = vrot.lane.b32.xlu2 %v9105_v63, %s7913_s14  ;;  %v2590_v18 = vunpack.c.l.b16 %v1642_v1  ;;  %v2304_v30 = vsel %vm12253_vm2, %v2287_v58, %v8833_v41  ;;  %v2396_v60 = vsel %vm12254_vm11, %v2379_v45, %v12493_v55  ;;  %v1684_v50 = vsel %vm8130_vm13, %v1679_v42, %v1683_v8 }
 0x218   :  { %12492 = vst [vmem:[#allocation42_spill] sm:$0xff] %v9223_v5  ;;  %v1698_v31 = vsel %vm8130_vm13, %v1693_v48, %v1697_v61  ;;  %v1712_v21 = vsel %vm8130_vm13, %v1707_v37, %v1711_v15  ;;  %v1726_v17 = vsel %vm8130_vm13, %v1721_v26, %v1725_v52  ;;  %vm12495_vm2 = vcmask 392192  }
 0x219   :  { %v9217_v24 = vpop.permute.xlu2 %2477  ;;  %2615 = vrot.lane.b32.xlu0 %v9207_v0, %s7913_s14  ;;  %v9237_v53 = vpack.c.b16 %v2590_v18, %v2589_v32  ;;  %v2321_v12 = vsel %vm12495_vm2, %v2304_v30, %v8698_v40  ;;  %v2413_v33 = vsel %vm2409_vm4, %v2396_v60, %v8672_v20  ;;  %v2593_v10 = vunpack.c.l.b16 %v1684_v50  ;;  %v12504_v32 = vld [vmem:[#allocation85_spill] sm:$0xff]  ;;  %v12510_v18 = vld [vmem:[#allocation79_spill] sm:$0xff] }
 0x21a   :  { %v2594_v47 = vunpack.c.l.b16 %v1698_v31  ;;  %v2595_v43 = vunpack.c.l.b16 %v1712_v21  ;;  %v2596_v2 = vunpack.c.l.b16 %v1726_v17  ;;  %v2235_v39 = vsel %vm2223_vm14, %v8811_v34, %v8819_v44  ;;  %v12512_v50 = vld [vmem:[#allocation25_spill] sm:$0xff]  ;;  %v12513_v17 = vld [vmem:[#allocation92_spill] sm:$0xff] }
 0x21b   :  { %v9227_v29 = vpop.permute.xlu0 %2213  ;;  %12494 = vst [vmem:[#allocation27_spill] sm:$0xff] %v9237_v53  ;;  %vm12496_vm11 = vcmask 457728   ;;  %v2430_v62 = vsel %vm2426_vm6, %v2413_v33, %v12497_v3  ;;  %v2255_v20 = vsel %vm363_vm0, %v2235_v39, %v8931_v54  ;;  %vm12499_vm2 = vcmask 523264  }
 0x21c   :  { %2611 = vrot.lane.b32.xlu1 %v9223_v5, %s7913_s14  ;;  %v2335_v28 = vsel %vm12496_vm11, %v2321_v12, %v8833_v41  ;;  %v9263_v1 = vpack.c.b16 %v2594_v47, %v2593_v10  ;;  %v9271_v34 = vpack.c.b16 %v2596_v2, %v2595_v43  ;;  %v2272_v8 = vsel %vm2264_vm15, %v2255_v20, %v8561_v23  ;;  %v12503_v23 = vld [vmem:[#allocation68_spill] sm:$0xff]  ;;  %v12521_v20 = vld [vmem:[#allocation61_spill] sm:$0xff] }
 0x21d   :  { %v2347_v44 = vsel %vm12499_vm2, %v2335_v28, %v8803_v11  ;;  %vm12501_vm11 = vcmask 588800   ;;  %v2289_v27 = vsel %vm12255_vm1, %v2272_v8, %v8891_v51  ;;  %vm12505_vm2 = vcmask 326656   ;;  %v12508_v51 = vld [vmem:[#allocation84_spill] sm:$0xff] }
 0x21e   :  { %v2210_v16 = vpop.permute.xlu1 %2209  ;;  %12498 = vst [vmem:[#allocation37_spill] sm:$0xff] %v9263_v1  ;;  %v2364_v61 = vsel %vm12501_vm11, %v2347_v44, %v8776_v25  ;;  %v2306_v37 = vsel %vm12505_vm2, %v2289_v27, %v12504_v32  ;;  %v12506_v25 = vld [vmem:[#allocation53_spill] sm:$0xff]  ;;  %vm12507_vm11 = vcmask 719872   ;;  %vm12509_vm1 = vcmask 392192   ;;  %v12514_v12 = vld [vmem:[#allocation80_spill] sm:$0xff]  ;;  %v12522_v44 = vld [vmem:[#allocation106_spill] sm:$0xff] }
 0x21f   :  { %2613 = vrot.lane.b32.xlu2 %v9237_v53, %s7913_s14  ;;  %v2447_v46 = vsel %vm2443_vm8, %v2430_v62, %v2210_v16  ;;  %12500 = vst [vmem:[#allocation31_spill] sm:$0xff] %v9271_v34  ;;  %v2381_v59 = vsel %vm2375_vm10, %v2364_v61, %v12503_v23  ;;  %v2323_v52 = vsel %vm12509_vm1, %v2306_v37, %v12508_v51  ;;  %vm12511_vm2 = vcmask 457728   ;;  %v12516_v10 = vld [vmem:[#allocation88_spill] sm:$0xff]  ;;  %v12526_v27 = vld [vmem:[#allocation95_spill] sm:$0xff] }
 0x220   :  { %v2463_v54 = vsel %vm2460_vm9, %v2447_v46, %v12497_v3  ;;  %v2398_v26 = vsel %vm12507_vm11, %v2381_v59, %v12506_v25  ;;  %v2336_v60 = vsel %vm12511_vm2, %v2323_v52, %v12504_v32  ;;  %v2238_v16 = vsel %vm2223_vm14, %v12514_v12, %v12513_v17  ;;  %v12518_v43 = vld [vmem:[#allocation96_spill] sm:$0xff]  ;;  %v12527_v59 = vld [vmem:[#allocation102_spill] sm:$0xff] }
 0x221   :  { %v9249_v13 = vpop.permute.xlu2 %2483  ;;  %2621 = vrot.lane.b32.xlu0 %v9085_v56, %s7914_s15  ;;  %v2415_v30 = vsel %vm2409_vm4, %v2398_v26, %v12510_v18  ;;  %vm12517_vm1 = vcmask 523264   ;;  %v2257_v2 = vsel %vm363_vm0, %v2238_v16, %v12518_v43  ;;  %vm12520_vm11 = vcmask 588800   ;;  %v12525_v61 = vld [vmem:[#allocation12_spill] sm:$0xff]  ;;  %v12530_v26 = vld [vmem:[#allocation74_spill] sm:$0xff]  ;;  %v12532_v18 = vld [vmem:[#allocation93_spill] sm:$0xff] }
 0x222   :  { %v2432_v31 = vsel %vm2426_vm6, %v2415_v30, %v12512_v50  ;;  %v2349_v47 = vsel %vm12517_vm1, %v2336_v60, %v12516_v10  ;;  %v2274_v46 = vsel %vm2264_vm15, %v2257_v2, %v12521_v20  ;;  %vm12523_vm2 = vcmask 261120   ;;  %v12538_v16 = vld [vmem:[#allocation103_spill] sm:$0xff] }
 0x223   :  { %v9265_v42 = vpop.permute.xlu0 %2219  ;;  %v2449_v21 = vsel %vm2443_vm8, %v2432_v31, %v9129_v19  ;;  %v12519_v19 = vld [vmem:[#allocation75_spill] sm:$0xff]  ;;  %v2291_v8 = vsel %vm12523_vm2, %v2274_v46, %v12522_v44  ;;  %vm12528_vm1 = vcmask 326656   ;;  %vm12533_vm2 = vcmask 392192   ;;  %v12535_v31 = vld [vmem:[#allocation9_spill] sm:$0xff] }
 0x224   :  { %2617 = vrot.lane.b32.xlu1 %v9263_v1, %s7913_s14  ;;  %v2465_v39 = vsel %vm2460_vm9, %v2449_v21, %v12512_v50  ;;  %v2366_v62 = vsel %vm12520_vm11, %v2349_v47, %v12519_v19  ;;  %v2308_v37 = vsel %vm12528_vm1, %v2291_v8, %v12527_v59  ;;  %vm12531_vm11 = vcmask 719872   ;;  %v12536_v21 = vld [vmem:[#allocation87_spill] sm:$0xff]  ;;  %v12539_v47 = vld [vmem:[#allocation90_spill] sm:$0xff]  ;;  %v12544_v8 = vld [vmem:[#allocation97_spill] sm:$0xff] }
 0x225   :  { %v2383_v23 = vsel %vm2375_vm10, %v2366_v62, %v12526_v27  ;;  %v2325_v30 = vsel %vm12533_vm2, %v2308_v37, %v12532_v18  ;;  %v2241_v43 = vsel %vm2223_vm14, %v12539_v47, %v12538_v16  ;;  %vm12540_vm1 = vcmask 457728   ;;  %v12541_v19 = vld [vmem:[#allocation58_spill] sm:$0xff]  ;;  %v12542_v62 = vld [vmem:[#allocation51_spill] sm:$0xff]  ;;  %v12550_v16 = vld [vmem:[#allocation100_spill] sm:$0xff] }
 0x226   :  { %v9277_v48 = vpop.permute.xlu1 %2215  ;;  %3150 = vmatmul.bf16.gmra.mxu1 %v2463_v54  ;;  %v2400_v52 = vsel %vm12531_vm11, %v2383_v23, %v12530_v26  ;;  %v2337_v2 = vsel %vm12540_vm1, %v2325_v30, %v12527_v59  ;;  %vm12543_vm11 = vcmask 523264   ;;  %v2259_v27 = vsel %vm363_vm0, %v2241_v43, %v12544_v8  ;;  %v12545_v23 = vld [vmem:[#allocation30_spill] sm:$0xff]  ;;  %v3574_v59 = vld [vmem:[#allocation2 + $0x8] sm:$0xf] }
 0x227   :  { %2619 = vrot.lane.b32.xlu2 %v9271_v34, %s7913_s14  ;;  %v2417_v17 = vsel %vm2409_vm4, %v2400_v52, %v12536_v21  ;;  %v2351_v20 = vsel %vm12543_vm11, %v2337_v2, %v12542_v62  ;;  %v12546_v37 = vld [vmem:[#allocation94_spill] sm:$0xff]  ;;  %vm12547_vm2 = vcmask 588800   ;;  %v12548_v21 = vld [vmem:[#allocation40_spill] sm:$0xff]  ;;  %v7613_v2 = vld [vmem:[%s12173_s4 + $0x88] sm:$0xff]  ;;  %vm12553_vm1 = vcmask 261120  }
 0x228   :  { %v2368_v26 = vsel %vm12547_vm2, %v2351_v20, %v12546_v37  ;;  %v12552_v20 = vld [vmem:[#allocation26_spill] sm:$0xff]  ;;  %3241 = vmatpush.bf16.msrb.mxu1 %v7613_v2  ;;  %7660 = vmatpush.bf16.msra.mxu3 %v7613_v2  ;;  %vm12555_vm11 = vcmask 719872   ;;  %vm12559_vm2 = vcmask 326656   ;;  %v12562_v2 = vld [vmem:[#allocation20_spill] sm:$0xff] }
 0x229   :  { %v9285_v45 = vpop.permute.xlu2 %2489  ;;  %2627 = vrot.lane.b32.xlu0 %v9223_v5, %s7914_s15  ;;  %v2385_v47 = vsel %vm2375_vm10, %v2368_v26, %v12550_v16  ;;  %v12554_v8 = vld [vmem:[#allocation98_spill] sm:$0xff] }
 0x22a   :  { %12502 = vst [vmem:[#allocation48_spill] sm:$0xff] %v9285_v45  ;;  %v12557_v26 = vld [vmem:[#allocation10_spill] sm:$0xff]  ;;  %v12570_v45 = vld [vmem:[#allocation35_spill] sm:$0xff] }
 0x22b   :  { %v9293_v15 = vpop.permute.xlu0 %2479  ;;  %v12560_v16 = vld [vmem:[#allocation38_spill] sm:$0xff] }
 0x22c   :  { %2623 = vrot.lane.b32.xlu1 %v9105_v63, %s7914_s15 }
 0x22e   :  { %v9301_v58 = vpop.permute.xlu1 %2221 }
 0x22f   :  { %2625 = vrot.lane.b32.xlu2 %v9142_v49, %s7914_s15 }
 0x231   :  { %v9307_v55 = vpop.permute.xlu2 %2495  ;;  %2633 = vrot.lane.b32.xlu0 %v9263_v1, %s7914_s15 }
 0x233   :  { %v9320_v33 = vpop.permute.xlu0 %2485 }
 0x234   :  { %12515 = vst [vmem:[#allocation68_spill] sm:$0xff] %v9320_v33  ;;  %2629 = vrot.lane.b32.xlu1 %v9237_v53, %s7914_s15 }
 0x236   :  { %v9330_v28 = vpop.permute.xlu1 %2481  ;;  %3155 = vmatmul.bf16.gmra.mxu1 %v2465_v39  ;;  %v2434_v39 = vsel %vm2426_vm6, %v2417_v17, %v9166_v38 }
 0x237   :  { %2631 = vrot.lane.b32.xlu2 %v9207_v0, %s7914_s15  ;;  %v2451_v46 = vsel %vm2443_vm8, %v2434_v39, %v9227_v29  ;;  %v12549_v29 = vld [vmem:[#allocation8_spill] sm:$0xff]  ;;  %v12551_v39 = vld [vmem:[#allocation33_spill] sm:$0xff] }
 0x238   :  { %v2467_v52 = vsel %vm2460_vm9, %v2451_v46, %v9166_v38  ;;  %v2276_v17 = vsel %vm2264_vm15, %v2259_v27, %v12549_v29  ;;  %v2402_v27 = vsel %vm12555_vm11, %v2385_v47, %v12554_v8  ;;  %v12565_v8 = vld [vmem:[#allocation107_spill] sm:$0xff]  ;;  %vm12567_vm11 = vcmask 457728   ;;  %v12623_v38 = vld [vmem:[#allocation89_spill] sm:$0xff] }
 0x239   :  { %v9340_v54 = vpop.permute.xlu2 %2501  ;;  %2639 = vrot.lane.b32.xlu0 %v12525_v61, %s7913_s14  ;;  %v2293_v46 = vsel %vm12553_vm1, %v2276_v17, %v12552_v20  ;;  %v12561_v17 = vld [vmem:[#allocation13_spill] sm:$0xff]  ;;  %vm12563_vm1 = vcmask 392192  }
 0x23a   :  { %12524 = vst [vmem:[#allocation53_spill] sm:$0xff] %v9340_v54 }
 0x23b   :  { %v9348_v25 = vpop.permute.xlu0 %2491 }
 0x23c   :  { %12529 = vst [vmem:[#allocation84_spill] sm:$0xff] %v9348_v25  ;;  %2635 = vrot.lane.b32.xlu1 %v9271_v34, %s7914_s15  ;;  %v2419_v25 = vsel %vm2409_vm4, %v2402_v27, %v12560_v16 }
 0x23e   :  { %v9356_v60 = vpop.permute.xlu1 %2487 }
 0x23f   :  { %12534 = vst [vmem:[#allocation79_spill] sm:$0xff] %v9356_v60  ;;  %2637 = vrot.lane.b32.xlu2 %v12535_v31, %s7913_s14  ;;  %v1728_v60 = vld [vmem:[#allocation2 + $0x18] sm:$0xe] }
 0x241   :  { %v9362_v12 = vpop.permute.xlu2 %2507  ;;  %2645 = vrot.lane.b32.xlu0 %v12541_v19, %s7913_s14  ;;  %v12572_v19 = vld [vmem:[#allocation28_spill] sm:$0xff] }
 0x242   :  { %12537 = vst [vmem:[#allocation92_spill] sm:$0xff] %v9362_v12  ;;  %v2436_v12 = vsel %vm2426_vm6, %v2419_v25, %v12565_v8 }
 0x243   :  { %v9377_v44 = vpop.permute.xlu0 %2497 }
 0x244   :  { %2641 = vrot.lane.b32.xlu1 %v12545_v23, %s7913_s14  ;;  %v9715_v23 = vld [vmem:[#allocation2 + $0x6c] sm:$0x1] }
 0x246   :  { %v9387_v30 = vpop.permute.xlu1 %2493  ;;  %3160 = vmatmul.bf16.gmra.mxu1 %v2467_v52  ;;  %v12558_v52 = vld [vmem:[#allocation36_spill] sm:$0xff] }
 0x247   :  { %2643 = vrot.lane.b32.xlu2 %v12548_v21, %s7913_s14  ;;  %v2310_v29 = vsel %vm12559_vm2, %v2293_v46, %v12558_v52  ;;  %v2453_v46 = vsel %vm2443_vm8, %v2436_v12, %v9277_v48  ;;  %vm12573_vm2 = vcmask 523264  }
 0x248   :  { %v2327_v20 = vsel %vm12563_vm1, %v2310_v29, %v12562_v2  ;;  %v12569_v29 = vld [vmem:[#allocation41_spill] sm:$0xff]  ;;  %v2469_v25 = vsel %vm2460_vm9, %v2453_v46, %v12565_v8  ;;  %v12571_v2 = vld [vmem:[#allocation52_spill] sm:$0xff]  ;;  %vm12576_vm1 = vcmask 588800  }
 0x249   :  { %v9395_v43 = vpop.permute.xlu2 %2513  ;;  %2651 = vrot.lane.b32.xlu0 %v12551_v39, %s7913_s14  ;;  %v2338_v27 = vsel %vm12567_vm11, %v2327_v20, %v12558_v52  ;;  %v12575_v20 = vld [vmem:[#allocation17_spill] sm:$0xff]  ;;  %vm12580_vm11 = vcmask 261120  }
 0x24a   :  { %v2353_v48 = vsel %vm12573_vm2, %v2338_v27, %v12572_v19  ;;  %v12581_v27 = vld [vmem:[#allocation105_spill] sm:$0xff]  ;;  %vm12585_vm2 = vcmask 326656  }
 0x24b   :  { %v9406_v37 = vpop.permute.xlu0 %2503 }
 0x24c   :  { %12556 = vst [vmem:[#allocation80_spill] sm:$0xff] %v9406_v37  ;;  %2647 = vrot.lane.b32.xlu1 %v12557_v26, %s7913_s14  ;;  %v12566_v26 = vld [vmem:[#allocation32_spill] sm:$0xff]  ;;  %v12617_v37 = vld [vmem:[#allocation62_spill] sm:$0xff] }
 0x24e   :  { %v9414_v39 = vpop.permute.xlu1 %2499 }
 0x24f   :  { %2649 = vrot.lane.b32.xlu2 %v12561_v17, %s7913_s14  ;;  %v12568_v17 = vld [vmem:[#allocation71_spill] sm:$0xff] }
 0x251   :  { %v9420_v47 = vpop.permute.xlu2 %2519  ;;  %2849 = vrot.lane.b32.xlu0 %v12566_v26, %s7904_s27 }
 0x252   :  { %12564 = vst [vmem:[#allocation96_spill] sm:$0xff] %v9420_v47  ;;  %v2244_v47 = vsel %vm2223_vm14, %v12570_v45, %v12569_v29  ;;  %v12577_v45 = vld [vmem:[#allocation11_spill] sm:$0xff]  ;;  %v12578_v29 = vld [vmem:[#allocation78_spill] sm:$0xff] }
 0x253   :  { %v9430_v16 = vpop.permute.xlu0 %2509  ;;  %v2261_v26 = vsel %vm363_vm0, %v2244_v47, %v12571_v2  ;;  %v12579_v2 = vld [vmem:[#allocation60_spill] sm:$0xff] }
 0x254   :  { %2845 = vrot.lane.b32.xlu1 %v12568_v17, %s7904_s27  ;;  %v2370_v17 = vsel %vm12576_vm1, %v2353_v48, %v9126_v36  ;;  %v2278_v46 = vsel %vm2264_vm15, %v2261_v26, %v12577_v45  ;;  %v7611_v36 = vld [vmem:[%s12173_s4 + $0x78] sm:$0xff]  ;;  %v12584_v48 = vld [vmem:[#allocation56_spill] sm:$0xff]  ;;  %vm12587_vm1 = vcmask 719872  }
 0x255   :  { %v2295_v47 = vsel %vm12580_vm11, %v2278_v46, %v12579_v2  ;;  %v12588_v46 = vld [vmem:[#allocation76_spill] sm:$0xff]  ;;  %3186 = vmatpush.bf16.msrb.mxu2 %v7611_v36  ;;  %vm12590_vm11 = vcmask 392192  }
 0x256   :  { %v9443_v12 = vpop.permute.xlu1 %2505  ;;  %3165 = vmatmul.bf16.gmra.mxu1 %v2469_v25  ;;  %v12583_v25 = vld [vmem:[#allocation73_spill] sm:$0xff]  ;;  %v2312_v26 = vsel %vm12585_vm2, %v2295_v47, %v12584_v48  ;;  %vm12593_vm2 = vcmask 457728  }
 0x257   :  { %12574 = vst [vmem:[#allocation75_spill] sm:$0xff] %v9443_v12  ;;  %2847 = vrot.lane.b32.xlu2 %v12575_v20, %s7904_s27  ;;  %v2387_v12 = vsel %vm2375_vm10, %v2370_v17, %v12581_v27  ;;  %v12586_v20 = vld [vmem:[#allocation104_spill] sm:$0xff]  ;;  %v12589_v17 = vld [vmem:[#allocation43_spill] sm:$0xff] }
 0x258   :  { %v2404_v45 = vsel %vm12587_vm1, %v2387_v12, %v12586_v20  ;;  %v2329_v2 = vsel %vm12590_vm11, %v2312_v26, %v12589_v17  ;;  %v12591_v27 = vld [vmem:[#allocation39_spill] sm:$0xff]  ;;  %v7610_v12 = vld [vmem:[%s12173_s4 + $0x70] sm:$0xff]  ;;  %v12594_v20 = vld [vmem:[#allocation69_spill] sm:$0xff]  ;;  %vm12598_vm1 = vcmask 523264   ;;  %vm12604_vm11 = vcmask 588800  }
 0x259   :  { %v9449_v52 = vpop.permute.xlu2 %2565  ;;  %2855 = vrot.lane.b32.xlu0 %v12578_v29, %s7904_s27  ;;  %v2339_v26 = vsel %vm12593_vm2, %v2329_v2, %v12584_v48  ;;  %3187 = vmatpush.bf16.msrb.mxu2 %v7610_v12  ;;  %v12602_v12 = vld [vmem:[#allocation82_spill] sm:$0xff]  ;;  %vm12609_vm2 = vcmask 261120  }
 0x25b   :  { %v9459_v19 = vpop.permute.xlu0 %2515 }
 0x25c   :  { %12582 = vst [vmem:[#allocation61_spill] sm:$0xff] %v9459_v19  ;;  %2851 = vrot.lane.b32.xlu1 %v12583_v25, %s7904_s27  ;;  %v2421_v25 = vsel %vm2409_vm4, %v2404_v45, %v12591_v27  ;;  %v12595_v45 = vld [vmem:[#allocation64_spill] sm:$0xff] }
 0x25d   :  { %v2438_v47 = vsel %vm2426_vm6, %v2421_v25, %v9149_v22  ;;  %v12597_v25 = vld [vmem:[#allocation63_spill] sm:$0xff] }
 0x25e   :  { %v9470_v29 = vpop.permute.xlu1 %2511  ;;  %v2455_v36 = vsel %vm2443_vm8, %v2438_v47, %v9172_v6  ;;  %v2355_v17 = vsel %vm12598_vm1, %v2339_v26, %v12597_v25  ;;  %v7609_v6 = vld [vmem:[%s12173_s4 + $0x68] sm:$0xff]  ;;  %v12603_v26 = vld [vmem:[#allocation44_spill] sm:$0xff]  ;;  %vm12612_vm1 = vcmask 326656  }
 0x25f   :  { %2853 = vrot.lane.b32.xlu2 %v12588_v46, %s7904_s27  ;;  %v2247_v46 = vsel %vm2223_vm14, %v12595_v45, %v12594_v20  ;;  %v2471_v2 = vsel %vm2460_vm9, %v2455_v36, %v9149_v22  ;;  %v12600_v47 = vld [vmem:[#allocation65_spill] sm:$0xff]  ;;  %v2372_v45 = vsel %vm12604_vm11, %v2355_v17, %v12603_v26  ;;  %3188 = vmatpush.bf16.msrb.mxu2 %v7609_v6  ;;  %v1727_v36 = vld [vmem:[#allocation2 + $0x10] sm:$0xe]  ;;  %v7608_v17 = vld [vmem:[%s12173_s4 + $0x60] sm:$0xff]  ;;  %vm12614_vm11 = vcmask 719872  }
 0x260   :  { %v2263_v48 = vsel %vm363_vm0, %v2247_v46, %v12600_v47  ;;  %v12607_v46 = vld [vmem:[#allocation55_spill] sm:$0xff]  ;;  %v12608_v22 = vld [vmem:[#allocation86_spill] sm:$0xff]  ;;  %v12611_v26 = vld [vmem:[#allocation77_spill] sm:$0xff] }
 0x261   :  { %v9478_v8 = vpop.permute.xlu2 %2571  ;;  %2861 = vrot.lane.b32.xlu0 %v9085_v56, %s7901_s24  ;;  %v12599_v56 = vld [vmem:[#allocation19_spill] sm:$0xff]  ;;  %v2389_v47 = vsel %vm2375_vm10, %v2372_v45, %v12607_v46  ;;  %v12613_v45 = vld [vmem:[#allocation45_spill] sm:$0xff] }
 0x262   :  { %12592 = vst [vmem:[#allocation106_spill] sm:$0xff] %v9478_v8  ;;  %v2406_v46 = vsel %vm12614_vm11, %v2389_v47, %v12613_v45  ;;  %vm12624_vm11 = vcmask 523264   ;;  %v12629_v8 = vld [vmem:[#allocation47_spill] sm:$0xff] }
 0x263   :  { %v9494_v27 = vpop.permute.xlu0 %2521  ;;  %3189 = vmatpush.bf16.msrb.mxu2 %v7608_v17  ;;  %v1797_v21 = vrot.slane %v12629_v8, 5 }
 0x264   :  { %12596 = vst [vmem:[#allocation12_spill] sm:$0xff] %v9494_v27  ;;  %2857 = vrot.lane.b32.xlu1 %v12599_v56, %s7904_s27  ;;  %v12606_v27 = vld [vmem:[#allocation22_spill] sm:$0xff] }
 0x265   :  { %v2280_v25 = vsel %vm2264_vm15, %v2263_v48, %v12606_v27  ;;  %v7151_v48 = vrot.slane %v1727_v36, 9  ;;  %v12610_v27 = vld [vmem:[#allocation99_spill] sm:$0xff]  ;;  %v12616_v36 = vld [vmem:[#allocation101_spill] sm:$0xff] }
 0x266   :  { %v9507_v20 = vpop.permute.xlu1 %2517  ;;  %3170 = vmatmul.bf16.gmra.mxu1 %v2471_v2  ;;  %v1777_v6 = vrot.slane %v12610_v27, 5  ;;  %v3573_v27 = vld [vmem:[#allocation2] sm:$0xf] }
 0x267   :  { %12601 = vst [vmem:[#allocation95_spill] sm:$0xff] %v9507_v20  ;;  %2859 = vrot.lane.b32.xlu2 %v12602_v12, %s7904_s27  ;;  %v2297_v12 = vsel %vm12609_vm2, %v2280_v25, %v12608_v22  ;;  %v7607_v22 = vld [vmem:[%s12173_s4 + $0x58] sm:$0xff]  ;;  %vm12618_vm2 = vcmask 392192  }
 0x268   :  { %v12619_v20 = vld [vmem:[#allocation59_spill] sm:$0xff]  ;;  %v1778_v62 = vsel %vm8093_vm12, %v7151_v48, %v1777_v6  ;;  %3190 = vmatpush.bf16.msrb.mxu2 %v7607_v22  ;;  %v7606_v22 = vld [vmem:[%s12173_s4 + $0x50] sm:$0xff] }
 0x269   :  { %v9513_v56 = vpop.permute.xlu2 %2577  ;;  %2867 = vrot.lane.b32.xlu0 %v9223_v5, %s7901_s24  ;;  %v1781_v5 = vrot.slane %v12616_v36, 5  ;;  %v2423_v47 = vsel %vm2409_vm4, %v2406_v46, %v12619_v20  ;;  %v3625_v36 = vshll.u32 %v3573_v27, 16  ;;  %v3605_v46 = vld [vmem:[#allocation2 + $0x4] sm:$0x1] }
 0x26a   :  { %12605 = vst [vmem:[#allocation74_spill] sm:$0xff] %v9513_v56  ;;  %v2314_v56 = vsel %vm12612_vm1, %v2297_v12, %v12611_v26  ;;  %vm12621_vm1 = vcmask 457728  }
 0x26b   :  { %v9523_v2 = vpop.permute.xlu0 %2567  ;;  %v2331_v12 = vsel %vm12618_vm2, %v2314_v56, %v12617_v37  ;;  %v1731_v37 = vld [vmem:[#allocation2 + $0x30] sm:$0xe]  ;;  %v3627_v33 = vrot.slane %v3625_v36, 5  ;;  %vm12627_vm2 = vcmask 588800  }
 0x26c   :  { %2863 = vrot.lane.b32.xlu1 %v9105_v63, %s7901_s24  ;;  %v7152_v63 = vrot.slane %v1728_v60, 9  ;;  %v3622_v60 = vshrl.u32 %v3573_v27, 16  ;;  %v2340_v48 = vsel %vm12621_vm1, %v2331_v12, %v12611_v26  ;;  %v3636_v27 = vshrl.u32 %v3574_v59, 16  ;;  %3191 = vmatpush.bf16.msrb.mxu2 %v7606_v22 }
 0x26d   :  { %vm12635_vm1 = vcmask 719872  }
 0x26e   :  { %v9538_v25 = vpop.permute.xlu1 %2523  ;;  %v1782_v20 = vsel %vm8093_vm12, %v7152_v63, %v1781_v5  ;;  %v1732_v63 = vld [vmem:[#allocation2 + $0x38] sm:$0xe]  ;;  %v3639_v5 = vshll.u32 %v3574_v59, 16  ;;  %v3624_v18 = vrot.slane %v3622_v60, 4  ;;  %v7155_v59 = vrot.slane %v1731_v37, 9  ;;  %v12631_v37 = vld [vmem:[#allocation49_spill] sm:$0xff] }
 0x26f   :  { %12615 = vst [vmem:[#allocation9_spill] sm:$0xff] %v9538_v25  ;;  %2865 = vrot.lane.b32.xlu2 %v9142_v49, %s7901_s24  ;;  %v2440_v25 = vsel %vm2426_vm6, %v2423_v47, %v9201_v4  ;;  %v3576_v49 = vld [vmem:[#allocation2 + $0x18] sm:$0xf]  ;;  %v2877_v47 = vunpack.c.l.b16 %v1778_v62  ;;  %v2878_v26 = vunpack.c.l.b16 %v1782_v20  ;;  %v12628_v20 = vld [vmem:[#allocation108_spill] sm:$0xff]  ;;  %v3606_v60 = vld [vmem:[#allocation2 + $0xc] sm:$0x1] }
 0x270   :  { %v2457_v56 = vsel %vm2443_vm8, %v2440_v25, %v9265_v42  ;;  %v2357_v42 = vsel %vm12624_vm11, %v2340_v48, %v12623_v38  ;;  %v3664_v25 = vshrl.u32 %v3576_v49, 16  ;;  %v3667_v12 = vshll.u32 %v3576_v49, 16 }
 0x271   :  { %v9547_v17 = vpop.permute.xlu2 %2607  ;;  %2873 = vrot.lane.b32.xlu0 %v9263_v1, %s7901_s24  ;;  %v3575_v1 = vld [vmem:[#allocation2 + $0x10] sm:$0xf]  ;;  %v2473_v62 = vsel %vm2460_vm9, %v2457_v56, %v9201_v4  ;;  %v3631_v48 = vshll.u32 %v3605_v46, 16  ;;  %v1793_v22 = vrot.slane %v12628_v20, 5  ;;  %v7156_v4 = vrot.slane %v1732_v63, 9  ;;  %v12632_v46 = vld [vmem:[#allocation67_spill] sm:$0xff] }
 0x272   :  { %v3650_v49 = vshrl.u32 %v3575_v1, 16  ;;  %v3653_v38 = vshll.u32 %v3575_v1, 16  ;;  %v3638_v50 = vrot.slane %v3636_v27, 4  ;;  %v3641_v19 = vrot.slane %v3639_v5, 5  ;;  %v3608_v1 = vld [vmem:[#allocation2 + $0x1c] sm:$0x1] }
 0x273   :  { %v9561_v6 = vpop.permute.xlu0 %2573  ;;  %v3666_v10 = vrot.slane %v3664_v25, 4  ;;  %v2893_v8 = vpack.c.b16 %v2878_v26, %v2877_v47  ;;  %v3628_v63 = vor.u32 %v3627_v33, %v3624_v18  ;;  %v3577_v20 = vld [vmem:[#allocation2 + $0x20] sm:$0xf]  ;;  %v3578_v27 = vld [vmem:[#allocation2 + $0x28] sm:$0xf]  ;;  %v1794_v25 = vsel %vm8093_vm12, %v7155_v59, %v1793_v22  ;;  %v12634_v47 = vld [vmem:[#allocation70_spill] sm:$0xff] }
 0x274   :  { %12622 = vst [vmem:[#allocation87_spill] sm:$0xff] %v9561_v6  ;;  %2869 = vrot.lane.b32.xlu1 %v9237_v53, %s7901_s24  ;;  %v7605_v6 = vld [vmem:[%s12173_s4 + $0x48] sm:$0xff]  ;;  %v12626_v53 = vld [vmem:[#allocation72_spill] sm:$0xff]  ;;  %v3607_v26 = vld [vmem:[#allocation2 + $0x14] sm:$0x1]  ;;  %v3673_v18 = vshll.u32 %v3608_v1, 16 }
 0x275   :  { %v2374_v56 = vsel %vm12627_vm2, %v2357_v42, %v12626_v53  ;;  %3192 = vmatpush.bf16.msrb.mxu2 %v7605_v6  ;;  %v7604_v53 = vld [vmem:[%s12173_s4 + $0x40] sm:$0xff]  ;;  %v1798_v6 = vsel %vm8093_vm12, %v7156_v4, %v1797_v21  ;;  %v3692_v59 = vshrl.u32 %v3578_v27, 16  ;;  %v3629_v21 = vrot.slane %v3628_v63, 4  ;;  %v12640_v63 = vld [vmem:[#allocation66_spill] sm:$0xff] }
 0x276   :  { %v9575_v54 = vpop.permute.xlu1 %2569  ;;  %3175 = vmatmul.bf16.gmra.mxu1 %v2473_v62  ;;  %v2391_v42 = vsel %vm2375_vm10, %v2374_v56, %v12632_v46  ;;  %v3645_v62 = vshll.u32 %v3606_v60, 16  ;;  %v3642_v56 = vor.u32 %v3641_v19, %v3638_v50  ;;  %v3678_v46 = vshrl.u32 %v3577_v20, 16 }
 0x277   :  { %12625 = vst [vmem:[#allocation103_spill] sm:$0xff] %v9575_v54  ;;  %2871 = vrot.lane.b32.xlu2 %v9207_v0, %s7901_s24  ;;  %v3669_v0 = vrot.slane %v3667_v12, 5  ;;  %v3652_v12 = vrot.slane %v3650_v49, 4  ;;  %v2408_v60 = vsel %vm12635_vm1, %v2391_v42, %v12634_v47  ;;  %v2882_v4 = vunpack.c.l.b16 %v1798_v6 }
 0x278   :  { %v3695_v45 = vshll.u32 %v3578_v27, 16  ;;  %v3647_v50 = vrot.slane %v3645_v62, 5  ;;  %v3659_v19 = vshll.u32 %v3607_v26, 16  ;;  %v3643_v1 = vrot.slane %v3642_v56, 4 }
 0x279   :  { %v9583_v36 = vpop.permute.xlu2 %2613  ;;  %2903 = vrot.lane.b32.xlu0 %v12631_v37, %s7907_s30  ;;  %v3655_v37 = vrot.slane %v3653_v38, 5  ;;  %v3670_v33 = vor.u32 %v3669_v0, %v3666_v10  ;;  %3193 = vmatpush.bf16.msrb.mxu2 %v7604_v53  ;;  %v2881_v38 = vunpack.c.l.b16 %v1794_v25  ;;  %v2655_v0 = vsel %vm2223_vm14, %v9217_v24, %v9387_v30 }
 0x27a   :  { %12630 = vst [vmem:[#allocation90_spill] sm:$0xff] %v9583_v36  ;;  %v3633_v36 = vrot.slane %v3631_v48, 5  ;;  %v12637_v48 = vld [vmem:[#allocation83_spill] sm:$0xff]  ;;  %v3680_v27 = vrot.slane %v3678_v46, 4  ;;  %v3694_v47 = vrot.slane %v3692_v59, 4  ;;  %vm12646_vm12 = vcmask 261120  }
 0x27b   :  { %v9592_v5 = vpop.permute.xlu0 %2579  ;;  %v3656_v10 = vor.u32 %v3655_v37, %v3652_v12  ;;  %v2425_v49 = vsel %vm2409_vm4, %v2408_v60, %v12637_v48  ;;  %v3671_v42 = vrot.slane %v3670_v33, 4  ;;  %v12641_v12 = vld [vmem:[#allocation15_spill] sm:$0xff]  ;;  %v2895_v26 = vpack.c.b16 %v2882_v4, %v2881_v38  ;;  %v9622_v33 = vld [vmem:[#allocation2] sm:$0xf]  ;;  %v3610_v48 = vld [vmem:[#allocation2 + $0x2c] sm:$0x1] }
 0x27c   :  { %12633 = vst [vmem:[#allocation97_spill] sm:$0xff] %v9592_v5  ;;  %2875 = vrot.lane.b32.xlu1 %v9271_v34, %s7901_s24  ;;  %v3681_v5 = vshll.u32 %v3577_v20, 16  ;;  %v3675_v20 = vrot.slane %v3673_v18, 5  ;;  %v2677_v37 = vsel %vm363_vm0, %v2655_v0, %v12641_v12  ;;  %v3697_v60 = vrot.slane %v3695_v45, 5  ;;  %v3609_v18 = vld [vmem:[#allocation2 + $0x24] sm:$0x1] }
 0x27d   :  { %v3657_v46 = vrot.slane %v3656_v10, 4  ;;  %v3585_v59 = vld [vmem:[#allocation2 + $0x70] sm:$0xf]  ;;  %v9635_v0 = vld [vmem:[#allocation2 + $0x14] sm:$0xf0]  ;;  %v3687_v10 = vshll.u32 %v3609_v18, 16 }
 0x27e   :  { %v9602_v22 = vpop.permute.xlu1 %2575  ;;  %v3683_v6 = vrot.slane %v3681_v5, 5  ;;  %v3634_v5 = vsel %vm8130_vm13, %v3629_v21, %v3633_v36  ;;  %v12643_v38 = vld [vmem:[#allocation18_spill] sm:$0xff]  ;;  %v9641_v36 = vld [vmem:[#allocation2 + $0x24] sm:$0xf0]  ;;  %v3793_v18 = vshll.u32 %v3585_v59, 16  ;;  %vm12648_vm11 = vcmask 326656  }
 0x27f   :  { %12636 = vst [vmem:[#allocation94_spill] sm:$0xff] %v9602_v22  ;;  %2901 = vrot.lane.b32.xlu2 %v2893_v8, %s7907_s30  ;;  %v12639_v8 = vld [vmem:[#allocation14_spill] sm:$0xff]  ;;  %v2685_v4 = vsel %vm2264_vm15, %v2677_v37, %v12643_v38  ;;  %v9647_v37 = vld [vmem:[#allocation2 + $0x20] sm:$0xf]  ;;  %v9651_v38 = vld [vmem:[#allocation2 + $0x74] sm:$0xf0] }
 0x280   :  { %v2442_v25 = vsel %vm2426_vm6, %v2425_v49, %v12639_v8  ;;  %v9625_v49 = vld [vmem:[#allocation2 + $0x4] sm:$0xf0]  ;;  %v9643_v21 = vld [vmem:[#allocation2 + $0x10] sm:$0xf]  ;;  %vm12651_vm2 = vcmask 392192   ;;  %vm12656_vm1 = vcmask 457728  }
 0x281   :  { %v9610_v53 = vpop.permute.xlu2 %2619  ;;  %2909 = vrot.lane.b32.xlu0 %v12640_v63, %s7907_s30  ;;  %v2459_v62 = vsel %vm2443_vm8, %v2442_v25, %v9301_v58  ;;  %v3648_v58 = vsel %vm8130_vm13, %v3643_v1, %v3647_v50  ;;  %v3661_v25 = vrot.slane %v3659_v19, 5  ;;  %v3684_v63 = vor.u32 %v3683_v6, %v3680_v27 }
 0x282   :  { %12638 = vst [vmem:[#allocation8_spill] sm:$0xff] %v9610_v53  ;;  %v2475_v45 = vsel %vm2460_vm9, %v2459_v62, %v12639_v8  ;;  %v3676_v50 = vsel %vm8130_vm13, %v3671_v42, %v3675_v20  ;;  %v3698_v1 = vor.u32 %v3697_v60, %v3694_v47  ;;  %v3701_v62 = vshll.u32 %v3610_v48, 16  ;;  %v9659_v20 = vld [vmem:[#allocation2 + $0x70] sm:$0xf]  ;;  %v3586_v60 = vld [vmem:[#allocation2 + $0x78] sm:$0xf] }
 0x283   :  { %v9620_v56 = vpop.permute.xlu0 %2609  ;;  %v4653_v27 = vunpack.c.l.b16 %v3634_v5  ;;  %v4654_v6 = vunpack.c.l.b16 %v3648_v58  ;;  %v3662_v47 = vsel %vm8130_vm13, %v3657_v46, %v3661_v25  ;;  %v12649_v5 = vld [vmem:[#allocation81_spill] sm:$0xff]  ;;  %v7354_v58 = vor.u32 %v9641_v36, %v9647_v37  ;;  %v7612_v42 = vld [vmem:[%s12173_s4 + $0x80] sm:$0xff]  ;;  %v3617_v46 = vld [vmem:[#allocation2 + $0x74] sm:$0x1] }
 0x284   :  { %12642 = vst [vmem:[#allocation100_spill] sm:$0xff] %v9620_v56  ;;  %2905 = vrot.lane.b32.xlu1 %v2895_v26, %s7907_s30  ;;  %v12644_v26 = vld [vmem:[#allocation91_spill] sm:$0xff]  ;;  %v4656_v19 = vunpack.c.l.b16 %v3676_v50  ;;  %v3685_v53 = vrot.slane %v3684_v63, 4  ;;  %v9676_v25 = vld [vmem:[#allocation2 + $0x84] sm:$0xf0]  ;;  %3242 = vmatpush.bf16.msrb.mxu1 %v7612_v42  ;;  %v4655_v56 = vunpack.c.l.b16 %v3662_v47  ;;  %v3804_v63 = vshrl.u32 %v3586_v60, 16 }
 0x285   :  { %v9680_v36 = vld [vmem:[#allocation2 + $0x60] sm:$0xf]  ;;  %v9682_v37 = vpack.c.b16 %v4654_v6, %v4653_v27  ;;  %7661 = vmatpush.bf16.msra.mxu3 %v7612_v42  ;;  %v3807_v27 = vshll.u32 %v3586_v60, 16  ;;  %v9691_v6 = vld [vmem:[#allocation2 + $0x64] sm:$0xf0]  ;;  %v3799_v32 = vshll.u32 %v3617_v46, 16 }
 0x286   :  { %v9637_v12 = vpop.permute.xlu1 %2605  ;;  %3180 = vmatmul.bf16.gmra.mxu1 %v2475_v45  ;;  %v3790_v45 = vshrl.u32 %v3585_v59, 16  ;;  %v2658_v59 = vsel %vm2223_vm14, %v9293_v15, %v9307_v55  ;;  %v9695_v47 = vpack.c.b16 %v4656_v19, %v4655_v56  ;;  %v3584_v56 = vld [vmem:[#allocation2 + $0x68] sm:$0xf] }
 0x287   :  { %2907 = vrot.lane.b32.xlu2 %v12644_v26, %s7907_s30  ;;  %v12645_v26 = vld [vmem:[#allocation29_spill] sm:$0xff]  ;;  %v2678_v19 = vsel %vm363_vm0, %v2658_v59, %v12478_v57  ;;  %v9722_v57 = vrot.slane %v3799_v32, 5  ;;  %v3776_v59 = vshrl.u32 %v3584_v56, 16  ;;  %v3779_v32 = vshll.u32 %v3584_v56, 16 }
 0x288   :  { %v2693_v34 = vsel %vm12646_vm12, %v2685_v4, %v12645_v26  ;;  %v9669_v4 = vld [vmem:[#allocation2 + $0x80] sm:$0xf]  ;;  %v3792_v50 = vrot.slane %v3790_v45, 4  ;;  %12653 = vst [vmem:[#allocation38_spill] sm:$0xff] %v9695_v47  ;;  %v3618_v45 = vld [vmem:[#allocation2 + $0x7c] sm:$0x1] }
 0x289   :  { %v9655_v8 = vpop.permute.xlu2 %2625  ;;  %v2702_v48 = vsel %vm12648_vm11, %v2693_v34, %v9430_v16  ;;  %2915 = vrot.lane.b32.xlu0 %v12649_v5, %s7907_s30  ;;  %v3689_v34 = vrot.slane %v3687_v10, 5  ;;  %v3699_v16 = vrot.slane %v3698_v1, 4  ;;  %v3703_v5 = vrot.slane %v3701_v62, 5  ;;  %v12652_v1 = vld [vmem:[#allocation54_spill] sm:$0xff]  ;;  %v3580_v62 = vld [vmem:[#allocation2 + $0x38] sm:$0xf] }
 0x28a   :  { %12647 = vst [vmem:[#allocation26_spill] sm:$0xff] %v9655_v8  ;;  %v3579_v8 = vld [vmem:[#allocation2 + $0x30] sm:$0xf]  ;;  %v2717_v10 = vsel %vm12651_vm2, %v2702_v48, %v12645_v26  ;;  %v12655_v26 = vld [vmem:[#allocation57_spill] sm:$0xff]  ;;  %v3720_v46 = vshrl.u32 %v3580_v62, 16  ;;  %v3806_v47 = vrot.slane %v3804_v63, 4 }
 0x28b   :  { %v9678_v22 = vpop.permute.xlu0 %2615  ;;  %v3690_v42 = vsel %vm8130_vm13, %v3685_v53, %v3689_v34  ;;  %v3706_v60 = vshrl.u32 %v3579_v8, 16  ;;  %v3709_v48 = vshll.u32 %v3579_v8, 16  ;;  %v2726_v53 = vsel %vm12656_vm1, %v2717_v10, %v12535_v31  ;;  %v3611_v63 = vld [vmem:[#allocation2 + $0x34] sm:$0x1] }
 0x28c   :  { %12650 = vst [vmem:[#allocation98_spill] sm:$0xff] %v9678_v22  ;;  %2911 = vrot.lane.b32.xlu1 %v12652_v1, %s7907_s30  ;;  %v3795_v22 = vrot.slane %v3793_v18, 5  ;;  %v3704_v1 = vsel %vm8130_vm13, %v3699_v16, %v3703_v5  ;;  %v3723_v34 = vshll.u32 %v3580_v62, 16  ;;  %v3809_v8 = vrot.slane %v3807_v27, 5  ;;  %v9718_v16 = vld [vmem:[#allocation2 + $0x30] sm:$0xf] }
 0x28d   :  { %v9720_v5 = vunpack.c.l.b16 %v3704_v1  ;;  %v3813_v31 = vshll.u32 %v3618_v45, 16  ;;  %vm12658_vm12 = vcmask 523264   ;;  %v3708_v62 = vrot.slane %v3706_v60, 4 }
 0x28e   :  { %v9699_v54 = vpop.permute.xlu1 %2611  ;;  %v3796_v18 = vor.u32 %v3795_v22, %v3792_v50  ;;  %v2742_v10 = vsel %vm12658_vm12, %v2726_v53, %v9449_v52  ;;  %v2686_v22 = vsel %vm2264_vm15, %v2678_v19, %v12477_v9  ;;  %v7617_v50 = vld [vmem:[#allocation2 + $0x34] sm:$0xf0]  ;;  %v3711_v27 = vrot.slane %v3709_v48, 5  ;;  %v3612_v53 = vld [vmem:[#allocation2 + $0x3c] sm:$0x1] }
 0x28f   :  { %12654 = vst [vmem:[#allocation32_spill] sm:$0xff] %v9699_v54  ;;  %2913 = vrot.lane.b32.xlu2 %v12655_v26, %s7907_s30  ;;  %v9713_v26 = vunpack.c.l.b16 %v3690_v42  ;;  %vm12659_vm11 = vcmask 588800   ;;  %v3722_v1 = vrot.slane %v3720_v46, 4  ;;  %v12660_v45 = vor.u32 %v9625_v49, %v9622_v33 }
 0x290   :  { %v9735_v9 = vrot.slane %v3796_v18, 4  ;;  %v3810_v19 = vor.u32 %v3809_v8, %v3806_v47  ;;  %v3785_v60 = vshll.u32 %v9715_v23, 16  ;;  %vm12661_vm2 = vcmask 261120  }
 0x291   :  { %v9711_v54 = vpop.permute.xlu2 %2631  ;;  %4641 = vrot.lane.b32.xlu0 %v7354_v58, %s7908_s9  ;;  %v2758_v58 = vsel %vm12659_vm11, %v2742_v10, %v9637_v12  ;;  %v2694_v12 = vsel %vm12661_vm2, %v2686_v22, %v8722_v14  ;;  %vm12662_vm1 = vcmask 719872   ;;  %v7358_v56 = vor.u32 %v7617_v50, %v9718_v16 }
 0x292   :  { %12657 = vst [vmem:[#allocation71_spill] sm:$0xff] %v9711_v54  ;;  %v3725_v54 = vrot.slane %v3723_v34, 5  ;;  %v3715_v46 = vshll.u32 %v3611_v63, 16  ;;  %vm12663_vm12 = vcmask 326656   ;;  %v12664_v47 = vor.u32 %v9635_v0, %v9643_v21 }
 0x293   :  { %v2622_v42 = vpop.permute.xlu0 %2621  ;;  %v2704_v33 = vsel %vm12663_vm12, %v2694_v12, %v9470_v29  ;;  %v3712_v34 = vor.u32 %v3711_v27, %v3708_v62  ;;  %v9753_v8 = vrot.slane %v3813_v31, 5  ;;  %v3729_v22 = vshll.u32 %v3612_v53, 16  ;;  %v3581_v29 = vld [vmem:[#allocation2 + $0x50] sm:$0xf]  ;;  %v3582_v31 = vld [vmem:[#allocation2 + $0x58] sm:$0xf] }
 0x294   :  { %4637 = vrot.lane.b32.xlu1 %v12660_v45, %s7908_s9  ;;  %v2774_v52 = vsel %vm2375_vm10, %v2758_v58, %v2622_v42  ;;  %v3726_v10 = vor.u32 %v3725_v54, %v3722_v1  ;;  %v9757_v50 = vrot.slane %v3776_v59, 4  ;;  %v3802_v0 = vsel %vm8130_vm13, %v9735_v9, %v9722_v57  ;;  %v3583_v62 = vld [vmem:[#allocation2 + $0x60] sm:$0xf]  ;;  %v7361_v59 = vld [vmem:[#allocation2 + $0x50] sm:$0xf] }
 0x295   :  { %v2789_v48 = vsel %vm12662_vm1, %v2774_v52, %v12488_v7  ;;  %v3587_v7 = vld [vmem:[#allocation2 + $0x80] sm:$0xf]  ;;  %v9765_v21 = vrot.slane %v3810_v19, 4  ;;  %v9767_v27 = vrot.slane %v3779_v32, 5  ;;  %vm12665_vm11 = vcmask 392192   ;;  %v12676_v9 = vld [vmem:[#allocation30_spill] sm:$0xff] }
 0x296   :  { %v2797_v49 = vsel %vm2409_vm4, %v2789_v48, %v9217_v24  ;;  %v9747_v18 = vpop.permute.xlu1 %2617  ;;  %v2718_v54 = vsel %vm12665_vm11, %v2704_v33, %v8722_v14  ;;  %v7618_v42 = vld [vmem:[#allocation2 + $0x54] sm:$0xf0]  ;;  %v3717_v1 = vrot.slane %v3715_v46, 5  ;;  %v3818_v45 = vshrl.u32 %v3587_v7, 16 }
 0x297   :  { %4639 = vrot.lane.b32.xlu2 %v12664_v47, %s7908_s9  ;;  %v2805_v16 = vsel %vm2426_vm6, %v2797_v49, %v9387_v30  ;;  %v12666_v30 = vor.u32 %v9691_v6, %v9680_v36  ;;  %v2661_v52 = vsel %vm2223_vm14, %v9330_v28, %v9377_v44  ;;  %v3713_v32 = vrot.slane %v3712_v34, 4 }
 0x298   :  { %v2813_v58 = vsel %vm2443_vm8, %v2805_v16, %v9217_v24  ;;  %v3734_v53 = vshrl.u32 %v3581_v29, 16  ;;  %v3737_v19 = vshll.u32 %v3581_v29, 16  ;;  %v3727_v12 = vrot.slane %v3726_v10, 4 }
 0x299   :  { %v2638_v63 = vpop.permute.xlu2 %2637  ;;  %4647 = vrot.lane.b32.xlu0 %v12666_v30, %s7908_s9  ;;  %v3731_v48 = vrot.slane %v3729_v22, 5  ;;  %v3748_v36 = vshrl.u32 %v3582_v31, 16  ;;  %v3751_v6 = vshll.u32 %v3582_v31, 16  ;;  %vm12667_vm2 = vcmask 457728   ;;  %v3615_v31 = vld [vmem:[#allocation2 + $0x64] sm:$0x1] }
 0x29a   :  { %v2822_v24 = vsel %vm2460_vm9, %v2813_v58, %v2638_v63  ;;  %v2728_v33 = vsel %vm12667_vm2, %v2718_v54, %v12525_v61  ;;  %v7362_v46 = vor.u32 %v7618_v42, %v7361_v59  ;;  %v3762_v49 = vshrl.u32 %v3583_v62, 16  ;;  %v3614_v59 = vld [vmem:[#allocation2 + $0x5c] sm:$0x1] }
 0x29b   :  { %3194 = vmatmul.bf16.vlgmr.msrb.gmra.mxu2 %v2822_v24  ;;  %v9779_v14 = vpop.permute.xlu0 %2627  ;;  %v3765_v47 = vshll.u32 %v3583_v62, 16  ;;  %v2679_v16 = vsel %vm363_vm0, %v2661_v52, %v8698_v40  ;;  %vm12668_vm1 = vcmask 523264   ;;  %v9788_v29 = vrot.slane %v3818_v45, 4  ;;  %v3588_v62 = vld [vmem:[#allocation2 + $0x88] sm:$0xf] }
 0x29c   :  { %4643 = vrot.lane.b32.xlu1 %v7358_v56, %s7908_s9  ;;  %v2744_v34 = vsel %vm12668_vm1, %v2728_v33, %v9523_v2  ;;  %v3821_v10 = vshll.u32 %v3587_v7, 16  ;;  %vm12669_vm12 = vcmask 588800   ;;  %v3718_v61 = vsel %vm8130_vm13, %v3713_v32, %v3717_v1  ;;  %v3613_v24 = vld [vmem:[#allocation2 + $0x54] sm:$0x1] }
 0x29d   :  { %v2760_v22 = vsel %vm12669_vm12, %v2744_v34, %v9547_v17  ;;  %v3736_v56 = vrot.slane %v3734_v53, 4  ;;  %v3739_v58 = vrot.slane %v3737_v19, 5  ;;  %v3732_v2 = vsel %vm8130_vm13, %v3727_v12, %v3731_v48 }
 0x29e   :  { %v2624_v63 = vpop.permute.xlu1 %2623  ;;  %v3750_v54 = vrot.slane %v3748_v36, 4  ;;  %v3753_v7 = vrot.slane %v3751_v6, 5  ;;  %v2687_v17 = vsel %vm2264_vm15, %v2679_v16, %v8833_v41  ;;  %v3764_v42 = vrot.slane %v3762_v49, 4  ;;  %v3619_v49 = vld [vmem:[#allocation2 + $0x84] sm:$0x1] }
 0x29f   :  { %4645 = vrot.lane.b32.xlu2 %v7362_v46, %s7908_s9  ;;  %v2776_v40 = vsel %vm2375_vm10, %v2760_v22, %v2624_v63  ;;  %v3767_v1 = vrot.slane %v3765_v47, 5  ;;  %v3782_v45 = vor.u32 %v9767_v27, %v9757_v50  ;;  %v3771_v52 = vshll.u32 %v3615_v31, 16  ;;  %v3620_v63 = vld [vmem:[#allocation2 + $0x8c] sm:$0x1] }
 0x2a0   :  { %v3823_v32 = vrot.slane %v3821_v10, 5  ;;  %v3832_v53 = vshrl.u32 %v3588_v62, 16  ;;  %v3835_v19 = vshll.u32 %v3588_v62, 16  ;;  %vm12670_vm11 = vcmask 719872  }
 0x2a1   :  { %v9800_v30 = vpop.permute.xlu2 %2643  ;;  %4677 = vrot.lane.b32.xlu0 %v9682_v37, %s7910_s3  ;;  %v2790_v12 = vsel %vm12670_vm11, %v2776_v40, %v12497_v3  ;;  %v4659_v41 = vunpack.c.l.b16 %v3718_v61  ;;  %v4660_v48 = vunpack.c.l.b16 %v3732_v2  ;;  %v3740_v36 = vor.u32 %v3739_v58, %v3736_v56 }
 0x2a2   :  { %vm12671_vm2 = vcmask 261120   ;;  %v3743_v46 = vshll.u32 %v3613_v24, 16  ;;  %v3754_v50 = vor.u32 %v3753_v7, %v3750_v54  ;;  %v3757_v27 = vshll.u32 %v3614_v59, 16 }
 0x2a3   :  { %v2695_v6 = vsel %vm12671_vm2, %v2687_v17, %v8803_v11  ;;  %v9810_v33 = vpop.permute.xlu0 %2633  ;;  %v12672_v47 = vor.u32 %v9651_v38, %v9659_v20  ;;  %v3816_v3 = vsel %vm8130_vm13, %v9765_v21, %v9753_v8  ;;  %v3768_v16 = vor.u32 %v3767_v1, %v3764_v42 }
 0x2a4   :  { %v3783_v34 = vrot.slane %v3782_v45, 4  ;;  %v3787_v10 = vrot.slane %v3785_v60, 5  ;;  %v2798_v22 = vsel %vm2409_vm4, %v2790_v12, %v9293_v15  ;;  %v3824_v61 = vor.u32 %v3823_v32, %v9788_v29  ;;  %v4086_v45 = vld [vmem:[#allocation2 + $0x10] sm:$0xf] }
 0x2a5   :  { %4649 = vrot.lane.b32.xlu1 %v12672_v47, %s7908_s9  ;;  %v3834_v56 = vrot.slane %v3832_v53, 4  ;;  %v3837_v58 = vrot.slane %v3835_v19, 5  ;;  %vm12673_vm1 = vcmask 326656   ;;  %v12674_v8 = vor.u32 %v9676_v25, %v9669_v4  ;;  %v12678_v53 = vld [vmem:[#allocation38_spill] sm:$0xff] }
 0x2a6   :  { %v2706_v38 = vsel %vm12673_vm1, %v2695_v6, %v9395_v43  ;;  %v9827_v20 = vpop.permute.xlu1 %2629  ;;  %v9833_v23 = vpack.c.b16 %v4660_v48, %v4659_v41  ;;  %v3773_v60 = vrot.slane %v3771_v52, 5  ;;  %v3827_v21 = vshll.u32 %v3619_v49, 16  ;;  %v12679_v41 = vld [vmem:[#allocation103_spill] sm:$0xff]  ;;  %v12682_v49 = vld [vmem:[#allocation100_spill] sm:$0xff] }
 0x2a7   :  { %4651 = vrot.lane.b32.xlu2 %v12674_v8, %s7908_s9  ;;  %v3741_v31 = vrot.slane %v3740_v36, 4  ;;  %v3745_v62 = vrot.slane %v3743_v46, 5  ;;  %v3755_v40 = vrot.slane %v3754_v50, 4  ;;  %v3759_v29 = vrot.slane %v3757_v27, 5  ;;  %v4085_v36 = vld [vmem:[#allocation2 + $0x8] sm:$0xf] }
 0x2a8   :  { %v2664_v2 = vsel %vm2223_vm14, %v9249_v13, %v9414_v39  ;;  %v2806_v54 = vsel %vm2426_vm6, %v2798_v22, %v9307_v55  ;;  %v3769_v7 = vrot.slane %v3768_v16, 4  ;;  %v3841_v4 = vshll.u32 %v3620_v63, 16  ;;  %v12681_v50 = vld [vmem:[#allocation85_spill] sm:$0xff] }
 0x2a9   :  { %v9838_v43 = vpop.permute.xlu2 %2649  ;;  %vm12675_vm12 = vcmask 392192   ;;  %4683 = vrot.lane.b32.xlu0 %v9833_v23, %s7910_s3  ;;  %v9848_v17 = vpack.c.b16 %v9720_v5, %v9713_v26  ;;  %v4665_v24 = vunpack.c.l.b16 %v3802_v0  ;;  %v3838_v59 = vor.u32 %v3837_v58, %v3834_v56 }
 0x2aa   :  { %v2719_v25 = vsel %vm12675_vm12, %v2706_v38, %v8803_v11  ;;  %v4666_v55 = vunpack.c.l.b16 %v3816_v3  ;;  %v3788_v42 = vsel %vm8130_vm13, %v3783_v34, %v3787_v10  ;;  %v3825_v1 = vrot.slane %v3824_v61, 4  ;;  %v12684_v10 = vld [vmem:[#allocation26_spill] sm:$0xff] }
 0x2ab   :  { %v3829_v11 = vrot.slane %v3827_v21, 5  ;;  %v2680_v52 = vsel %vm363_vm0, %v2664_v2, %v12508_v51  ;;  %v2640_v32 = vpop.permute.xlu0 %2639  ;;  %v2814_v26 = vsel %vm2443_vm8, %v2806_v54, %v9293_v15  ;;  %v3746_v5 = vsel %vm8130_vm13, %v3741_v31, %v3745_v62  ;;  %v12685_v21 = vld [vmem:[#allocation88_spill] sm:$0xff]  ;;  %v12687_v2 = vld [vmem:[#allocation61_spill] sm:$0xff] }
 0x2ac   :  { %v3760_v57 = vsel %vm8130_vm13, %v3755_v40, %v3759_v29  ;;  %vm12677_vm11 = vcmask 457728   ;;  %v2825_v19 = vsel %vm2460_vm9, %v2814_v26, %v2640_v32  ;;  %v3774_v51 = vsel %vm8130_vm13, %v3769_v7, %v3773_v60  ;;  %v4087_v60 = vld [vmem:[#allocation2 + $0x18] sm:$0xf]  ;;  %v12689_v7 = vld [vmem:[#allocation25_spill] sm:$0xff] }
 0x2ad   :  { %v2730_v0 = vsel %vm12677_vm11, %v2719_v25, %v12676_v9  ;;  %4679 = vrot.lane.b32.xlu1 %v12678_v53, %s7910_s3  ;;  %v3843_v12 = vrot.slane %v3841_v4, 5  ;;  %vm12680_vm2 = vcmask 523264   ;;  %3199 = vmatmul.bf16.gmra.mxu2 %v2825_v19  ;;  %v3839_v48 = vrot.slane %v3838_v59, 4  ;;  %v4118_v19 = vld [vmem:[#allocation2 + $0x14] sm:$0x1] }
 0x2ae   :  { %v2746_v15 = vsel %vm12680_vm2, %v2730_v0, %v12679_v41  ;;  %v4148_v6 = vshrl.u32 %v4086_v45, 16  ;;  %v4151_v46 = vshll.u32 %v4086_v45, 16  ;;  %v2688_v27 = vsel %vm2264_vm15, %v2680_v52, %v12681_v50  ;;  %v9878_v3 = vpop.permute.xlu1 %2635  ;;  %v4117_v0 = vld [vmem:[#allocation2 + $0xc] sm:$0x1]  ;;  %v4119_v41 = vld [vmem:[#allocation2 + $0x1c] sm:$0x1] }
 0x2af   :  { %vm12683_vm1 = vcmask 588800   ;;  %4681 = vrot.lane.b32.xlu2 %v9848_v17, %s7910_s3  ;;  %v4661_v16 = vunpack.c.l.b16 %v3746_v5  ;;  %v4662_v34 = vunpack.c.l.b16 %v3760_v57  ;;  %v9884_v63 = vpack.c.b16 %v4666_v55, %v4665_v24  ;;  %v4088_v55 = vld [vmem:[#allocation2 + $0x20] sm:$0xf] }
 0x2b0   :  { %v2762_v47 = vsel %vm12683_vm1, %v2746_v15, %v12682_v49  ;;  %v4663_v56 = vunpack.c.l.b16 %v3774_v51  ;;  %v4664_v58 = vunpack.c.l.b16 %v3788_v42  ;;  %v4134_v38 = vshrl.u32 %v4085_v36, 16 }
 0x2b1   :  { %v2778_v22 = vsel %vm2375_vm10, %v2762_v47, %v12684_v10  ;;  %v9886_v61 = vpop.permute.xlu2 %2847  ;;  %v4137_v8 = vshll.u32 %v4085_v36, 16  ;;  %vm12686_vm12 = vcmask 261120   ;;  %4689 = vrot.lane.b32.xlu0 %v9884_v63, %s7910_s3  ;;  %v3830_v62 = vsel %vm8130_vm13, %v3825_v1, %v3829_v11  ;;  %v4097_v36 = vld [vmem:[#allocation2 + $0x78] sm:$0xf]  ;;  %v9920_v47 = vpop.f32.mrf.mxu1 }
 0x2b2   :  { %v2696_v31 = vsel %vm12686_vm12, %v2688_v27, %v12685_v21  ;;  %v3844_v40 = vsel %vm8130_vm13, %v3839_v48, %v3843_v12  ;;  %v4150_v29 = vrot.slane %v4148_v6, 4  ;;  %vm12688_vm11 = vcmask 326656   ;;  %v12692_v6 = vld [vmem:[#allocation40_spill] sm:$0xff]  ;;  %12694 = vst [vmem:[#allocation41_spill] sm:$0xff] %v9920_v47 }
 0x2b3   :  { %v2708_v54 = vsel %vm12688_vm11, %v2696_v31, %v12687_v2  ;;  %vm12690_vm2 = vcmask 719872   ;;  %v9900_v25 = vpack.c.b16 %v4662_v34, %v4661_v16  ;;  %v4153_v24 = vrot.slane %v4151_v46, 5  ;;  %v9902_v59 = vpop.permute.xlu0 %2645 }
 0x2b4   :  { %v2791_v4 = vsel %vm12690_vm2, %v2778_v22, %v12689_v7  ;;  %v4162_v42 = vshrl.u32 %v4087_v60, 16  ;;  %v4165_v45 = vshll.u32 %v4087_v60, 16  ;;  %v9906_v1 = vpack.c.b16 %v4664_v58, %v4663_v56  ;;  %v12695_v60 = vld [vmem:[#allocation106_spill] sm:$0xff] }
 0x2b5   :  { %4685 = vrot.lane.b32.xlu1 %v9900_v25, %s7910_s3  ;;  %v4136_v11 = vrot.slane %v4134_v38, 4  ;;  %v4139_v52 = vrot.slane %v4137_v8, 5  ;;  %vm12691_vm1 = vcmask 392192   ;;  %v2799_v26 = vsel %vm2409_vm4, %v2791_v4, %v9330_v28 }
 0x2b6   :  { %v2720_v32 = vsel %vm12691_vm1, %v2708_v54, %v12685_v21  ;;  %v4667_v5 = vunpack.c.l.b16 %v3830_v62  ;;  %v4668_v57 = vunpack.c.l.b16 %v3844_v40  ;;  %v2642_v9 = vpop.permute.xlu1 %2641  ;;  %v4154_v51 = vor.u32 %v4153_v24, %v4150_v29  ;;  %v12698_v29 = vld [vmem:[#allocation68_spill] sm:$0xff] }
 0x2b7   :  { %4687 = vrot.lane.b32.xlu2 %v9906_v1, %s7910_s3  ;;  %v4176_v12 = vshrl.u32 %v4088_v55, 16  ;;  %v4164_v15 = vrot.slane %v4162_v42, 4  ;;  %v4167_v48 = vrot.slane %v4165_v45, 5  ;;  %vm12693_vm12 = vcmask 457728   ;;  %v12699_v54 = vld [vmem:[#allocation32_spill] sm:$0xff] }
 0x2b8   :  { %v2732_v46 = vsel %vm12693_vm12, %v2720_v32, %v12692_v6  ;;  %v2807_v27 = vsel %vm2426_vm6, %v2799_v26, %v9377_v44  ;;  %v4179_v49 = vshll.u32 %v4088_v55, 16  ;;  %v9924_v16 = vpack.c.b16 %v4668_v57, %v4667_v5  ;;  %v4120_v32 = vld [vmem:[#allocation2 + $0x24] sm:$0x1]  ;;  %v4098_v26 = vld [vmem:[#allocation2 + $0x80] sm:$0xf]  ;;  %v12701_v5 = vld [vmem:[#allocation93_spill] sm:$0xff] }
 0x2b9   :  { %v9916_v50 = vpop.permute.xlu2 %2853  ;;  %4695 = vrot.lane.b32.xlu0 %v12678_v53, %s7903_s26  ;;  %v4140_v34 = vor.u32 %v4139_v52, %v4136_v11  ;;  %v4143_v10 = vshll.u32 %v4117_v0, 16  ;;  %v4157_v22 = vshll.u32 %v4118_v19, 16  ;;  %v4155_v56 = vrot.slane %v4154_v51, 4  ;;  %v12697_v53 = vld [vmem:[#allocation53_spill] sm:$0xff]  ;;  %v7631_v0 = vld [vmem:[#allocation2 + $0x1c] sm:$0xf0] }
 0x2ba   :  { %v4171_v58 = vshll.u32 %v4119_v41, 16  ;;  %v4178_v38 = vrot.slane %v4176_v12, 4  ;;  %v4302_v8 = vshrl.u32 %v4097_v36, 16  ;;  %vm12696_vm11 = vcmask 523264   ;;  %v12702_v12 = vld [vmem:[#allocation16_spill] sm:$0xff] }
 0x2bb   :  { %v2748_v21 = vsel %vm12696_vm11, %v2732_v46, %v12695_v60  ;;  %v9928_v31 = vpop.permute.xlu0 %2651  ;;  %v2815_v44 = vsel %vm2443_vm8, %v2807_v27, %v9330_v28  ;;  %v4168_v62 = vor.u32 %v4167_v48, %v4164_v15  ;;  %v4305_v40 = vshll.u32 %v4097_v36, 16  ;;  %v7630_v28 = vld [vmem:[#allocation2 + $0xc] sm:$0xf0]  ;;  %v4129_v6 = vld [vmem:[#allocation2 + $0x7c] sm:$0x1] }
 0x2bc   :  { %v2667_v2 = vsel %vm2223_vm14, %v12698_v29, %v12697_v53  ;;  %vm12700_vm2 = vcmask 588800   ;;  %v2828_v4 = vsel %vm2460_vm9, %v2815_v44, %v2642_v9  ;;  %v4181_v24 = vrot.slane %v4179_v49, 5  ;;  %v7377_v9 = vld [vmem:[#allocation2 + $0x8] sm:$0xf]  ;;  %v7381_v49 = vld [vmem:[#allocation2 + $0x18] sm:$0xf] }
 0x2bd   :  { %v2764_v7 = vsel %vm12700_vm2, %v2748_v21, %v12699_v54  ;;  %4691 = vrot.lane.b32.xlu1 %v9924_v16, %s7910_s3  ;;  %3204 = vmatmul.bf16.gmra.mxu2 %v2828_v4  ;;  %v4159_v42 = vrot.slane %v4157_v22, 5  ;;  %v4141_v11 = vrot.slane %v4140_v34, 4  ;;  %v4145_v52 = vrot.slane %v4143_v10, 5  ;;  %v4130_v10 = vld [vmem:[#allocation2 + $0x84] sm:$0x1] }
 0x2be   :  { %v2780_v55 = vsel %vm2375_vm10, %v2764_v7, %v9779_v14  ;;  %v9942_v45 = vpop.permute.xlu1 %2647  ;;  %v2681_v57 = vsel %vm363_vm0, %v2667_v2, %v12701_v5  ;;  %v4173_v19 = vrot.slane %v4171_v58, 5  ;;  %v4304_v51 = vrot.slane %v4302_v8, 4  ;;  %v7397_v60 = vld [vmem:[#allocation2 + $0x68] sm:$0xf]  ;;  %v7632_v54 = vld [vmem:[#allocation2 + $0x2c] sm:$0xf0] }
 0x2bf   :  { %4693 = vrot.lane.b32.xlu2 %v9682_v37, %s7903_s26  ;;  %v4160_v14 = vsel %vm8130_vm13, %v4155_v56, %v4159_v42  ;;  %vm12703_vm1 = vcmask 719872   ;;  %v7635_v37 = vld [vmem:[#allocation2 + $0x6c] sm:$0xf0]  ;;  %v4169_v48 = vrot.slane %v4168_v62, 4  ;;  %v4182_v36 = vor.u32 %v4181_v24, %v4178_v38  ;;  %v9964_v44 = vld [vmem:[#allocation2 + $0x68] sm:$0xf]  ;;  %v9968_v62 = vpop.f32.mrf.mxu1 }
 0x2c0   :  { %v2792_v41 = vsel %vm12703_vm1, %v2780_v55, %v12702_v12  ;;  %v4307_v46 = vrot.slane %v4305_v40, 5  ;;  %v9956_v27 = vor.u32 %v7630_v28, %v7377_v9  ;;  %v4185_v34 = vshll.u32 %v4120_v32, 16  ;;  %v12706_v56 = vld [vmem:[#allocation102_spill] sm:$0xff]  ;;  %12708 = vst [vmem:[#allocation11_spill] sm:$0xff] %v9968_v62  ;;  %v7385_v2 = vld [vmem:[#allocation2 + $0x28] sm:$0xf] }
 0x2c1   :  { %v9952_v15 = vpop.permute.xlu2 %2859  ;;  %4701 = vrot.lane.b32.xlu0 %v9900_v25, %s7903_s26  ;;  %v4316_v22 = vshrl.u32 %v4098_v26, 16  ;;  %v2689_v58 = vsel %vm2264_vm15, %v2681_v57, %v12706_v56  ;;  %v9960_v8 = vor.u32 %v7631_v0, %v7381_v49  ;;  %v4146_v38 = vsel %vm8130_vm13, %v4141_v11, %v4145_v52  ;;  %v7401_v55 = vld [vmem:[#allocation2 + $0x78] sm:$0xf]  ;;  %v7636_v28 = vld [vmem:[#allocation2 + $0x7c] sm:$0xf0] }
 0x2c2   :  { %12704 = vst [vmem:[#allocation35_spill] sm:$0xff] %v9952_v15  ;;  %v4319_v21 = vshll.u32 %v4098_v26, 16  ;;  %v2800_v25 = vsel %vm2409_vm4, %v2792_v41, %v9249_v13  ;;  %v9972_v7 = vor.u32 %v7635_v37, %v7397_v60  ;;  %v4766_v4 = vunpack.c.l.b16 %v4160_v14  ;;  %v12710_v26 = vld [vmem:[#allocation51_spill] sm:$0xff]  ;;  %v9999_v49 = vld [vmem:[#allocation2 + $0x70] sm:$0xf] }
 0x2c3   :  { %12705 = vst [vmem:[#allocation52_spill] sm:$0xff] %v9956_v27  ;;  %v9970_v40 = vpop.permute.xlu0 %2849  ;;  %v4311_v24 = vshll.u32 %v4129_v6, 16  ;;  %v4174_v42 = vsel %vm8130_vm13, %v4169_v48, %v4173_v19  ;;  %v4183_v11 = vrot.slane %v4182_v36, 4  ;;  %v4308_v52 = vor.u32 %v4307_v46, %v4304_v51  ;;  %v12712_v14 = vld [vmem:[#allocation95_spill] sm:$0xff]  ;;  %v4089_v19 = vld [vmem:[#allocation2 + $0x28] sm:$0xf] }
 0x2c4   :  { %12707 = vst [vmem:[#allocation17_spill] sm:$0xff] %v9960_v8  ;;  %v4325_v32 = vshll.u32 %v4130_v10, 16  ;;  %vm12711_vm12 = vcmask 261120   ;;  %v4765_v57 = vunpack.c.l.b16 %v4146_v38  ;;  %v4187_v9 = vrot.slane %v4185_v34, 5  ;;  %v4127_v34 = vld [vmem:[#allocation2 + $0x6c] sm:$0x1] }
 0x2c5   :  { %12709 = vst [vmem:[#allocation78_spill] sm:$0xff] %v9972_v7  ;;  %4697 = vrot.lane.b32.xlu1 %v9848_v17, %s7903_s26  ;;  %v2697_v5 = vsel %vm12711_vm12, %v2689_v58, %v12710_v26  ;;  %v9980_v0 = vrot.slane %v4316_v22, 4  ;;  %vm12713_vm11 = vcmask 326656   ;;  %v2808_v17 = vsel %vm2426_vm6, %v2800_v25, %v9414_v39  ;;  %v12736_v15 = vld [vmem:[#allocation75_spill] sm:$0xff] }
 0x2c6   :  { %v2710_v12 = vsel %vm12713_vm11, %v2697_v5, %v12712_v14  ;;  %v9984_v41 = vpop.permute.xlu1 %2845  ;;  %v4321_v51 = vrot.slane %v4319_v21, 5  ;;  %v4274_v37 = vshrl.u32 %v9964_v44, 16  ;;  %v9991_v48 = vor.u32 %v7632_v54, %v7385_v2  ;;  %v12716_v2 = vld [vmem:[#allocation80_spill] sm:$0xff]  ;;  %v12717_v54 = vld [vmem:[#allocation79_spill] sm:$0xff] }
 0x2c7   :  { %4699 = vrot.lane.b32.xlu2 %v9833_v23, %s7903_s26  ;;  %v9993_v36 = vpack.c.b16 %v4766_v4, %v4765_v57  ;;  %v9995_v6 = vor.u32 %v7636_v28, %v7401_v55  ;;  %v9997_v46 = vunpack.c.l.b16 %v4174_v42  ;;  %v4188_v39 = vsel %vm8130_vm13, %v4183_v11, %v4187_v9  ;;  %v4090_v23 = vld [vmem:[#allocation2 + $0x30] sm:$0xf]  ;;  %v4091_v11 = vld [vmem:[#allocation2 + $0x38] sm:$0xf] }
 0x2c8   :  { %12714 = vst [vmem:[#allocation60_spill] sm:$0xff] %v9991_v48  ;;  %v4309_v22 = vrot.slane %v4308_v52, 4  ;;  %v4313_v56 = vrot.slane %v4311_v24, 5  ;;  %v10005_v58 = vrot.slane %v4325_v32, 5  ;;  %vm12715_vm2 = vcmask 392192  }
 0x2c9   :  { %v10001_v10 = vpop.permute.xlu2 %2865  ;;  %v2721_v60 = vsel %vm12715_vm2, %v2710_v12, %v12710_v26  ;;  %4707 = vrot.lane.b32.xlu0 %v9924_v16, %s7903_s26  ;;  %v2816_v38 = vsel %vm2443_vm8, %v2808_v17, %v9249_v13  ;;  %v4190_v21 = vshrl.u32 %v4089_v19, 16  ;;  %v4193_v25 = vshll.u32 %v4089_v19, 16  ;;  %v12718_v26 = vld [vmem:[#allocation58_spill] sm:$0xff]  ;;  %v12721_v12 = vld [vmem:[#allocation87_spill] sm:$0xff]  ;;  %v10035_v19 = vpop.f32.mrf.mxu1 }
 0x2ca   :  { %v2670_v4 = vsel %vm2223_vm14, %v12717_v54, %v12716_v2  ;;  %v4322_v55 = vor.u32 %v4321_v51, %v9980_v0  ;;  %v10017_v24 = vrot.slane %v4274_v37, 4  ;;  %v4277_v28 = vshll.u32 %v9964_v44, 16  ;;  %v12720_v0 = vld [vmem:[#allocation20_spill] sm:$0xff]  ;;  %12723 = vst [vmem:[#allocation105_spill] sm:$0xff] %v10035_v19 }
 0x2cb   :  { %v10020_v42 = vpop.permute.xlu0 %2855  ;;  %v4204_v52 = vshrl.u32 %v4090_v23, 16  ;;  %v4207_v16 = vshll.u32 %v4090_v23, 16  ;;  %v4283_v32 = vshll.u32 %v4127_v34, 16  ;;  %v4288_v13 = vshrl.u32 %v9999_v49, 16  ;;  %v4092_v51 = vld [vmem:[#allocation2 + $0x40] sm:$0xf] }
 0x2cc   :  { %vm12719_vm1 = vcmask 457728   ;;  %v2831_v57 = vsel %vm2460_vm9, %v2816_v38, %v9800_v30  ;;  %v4768_v9 = vunpack.c.l.b16 %v4188_v39  ;;  %v4314_v44 = vsel %vm8130_vm13, %v4309_v22, %v4313_v56  ;;  %v4121_v38 = vld [vmem:[#allocation2 + $0x2c] sm:$0x1] }
 0x2cd   :  { %v2734_v5 = vsel %vm12719_vm1, %v2721_v60, %v12718_v26  ;;  %4703 = vrot.lane.b32.xlu1 %v9906_v1, %s7903_s26  ;;  %v2682_v14 = vsel %vm363_vm0, %v2670_v4, %v12720_v0  ;;  %vm12722_vm12 = vcmask 523264   ;;  %3209 = vmatmul.bf16.gmra.mxu2 %v2831_v57  ;;  %v4192_v37 = vrot.slane %v4190_v21, 4  ;;  %v12724_v1 = vld [vmem:[#allocation90_spill] sm:$0xff] }
 0x2ce   :  { %v2750_v17 = vsel %vm12722_vm12, %v2734_v5, %v12721_v12  ;;  %v4195_v34 = vrot.slane %v4193_v25, 5  ;;  %vm12725_vm11 = vcmask 588800   ;;  %v10039_v30 = vpop.permute.xlu1 %2851  ;;  %v4218_v39 = vshrl.u32 %v4091_v11, 16  ;;  %v12726_v25 = vld [vmem:[#allocation36_spill] sm:$0xff] }
 0x2cf   :  { %v2766_v23 = vsel %vm12725_vm11, %v2750_v17, %v12724_v1  ;;  %4705 = vrot.lane.b32.xlu2 %v9884_v63, %s7903_s26  ;;  %v4221_v22 = vshll.u32 %v4091_v11, 16  ;;  %v10043_v56 = vrot.slane %v4277_v28, 5  ;;  %v4206_v4 = vrot.slane %v4204_v52, 4  ;;  %v4122_v63 = vld [vmem:[#allocation2 + $0x34] sm:$0x1] }
 0x2d0   :  { %v2782_v60 = vsel %vm2375_vm10, %v2766_v23, %v9827_v20  ;;  %v4209_v26 = vrot.slane %v4207_v16, 5  ;;  %v4291_v21 = vshll.u32 %v9999_v49, 16  ;;  %v2690_v5 = vsel %vm2264_vm15, %v2682_v14, %v12726_v25  ;;  %v12727_v49 = vld [vmem:[#allocation107_spill] sm:$0xff] }
 0x2d1   :  { %v10050_v57 = vpop.permute.xlu2 %2871  ;;  %v4232_v0 = vshrl.u32 %v4092_v51, 16  ;;  %v4235_v12 = vshll.u32 %v4092_v51, 16  ;;  %v10052_v17 = vrot.slane %v4322_v55, 4  ;;  %4753 = vrot.lane.b32.xlu0 %v9991_v48, %s7909_s10  ;;  %v4196_v28 = vor.u32 %v4195_v34, %v4192_v37  ;;  %v10064_v51 = vld [vmem:[#allocation2 + $0x74] sm:$0x1]  ;;  %v12729_v55 = vld [vmem:[#allocation28_spill] sm:$0xff]  ;;  %v10094_v62 = vpop.f32.mrf.mxu1 }
 0x2d2   :  { %v10056_v20 = vunpack.c.l.b16 %v4314_v44  ;;  %v10058_v11 = vrot.slane %v4283_v32, 5  ;;  %v10060_v52 = vrot.slane %v4288_v13, 4  ;;  %vm12728_vm2 = vcmask 719872   ;;  %v4123_v48 = vld [vmem:[#allocation2 + $0x3c] sm:$0x1]  ;;  %12734 = vst [vmem:[#allocation104_spill] sm:$0xff] %v10094_v62 }
 0x2d3   :  { %v2793_v16 = vsel %vm12728_vm2, %v2782_v60, %v12727_v49  ;;  %v4220_v14 = vrot.slane %v4218_v39, 4  ;;  %v4223_v1 = vrot.slane %v4221_v22, 5  ;;  %v4199_v23 = vshll.u32 %v4121_v38, 16  ;;  %v2862_v19 = vpop.permute.xlu0 %2861  ;;  %v4124_v13 = vld [vmem:[#allocation2 + $0x44] sm:$0x1] }
 0x2d4   :  { %vm12730_vm1 = vcmask 261120   ;;  %v10069_v44 = vpack.c.b16 %v4768_v9, %v9997_v46  ;;  %v4210_v32 = vor.u32 %v4209_v26, %v4206_v4  ;;  %v4213_v37 = vshll.u32 %v4122_v63, 16  ;;  %v7633_v49 = vld [vmem:[#allocation2 + $0x3c] sm:$0xf0] }
 0x2d5   :  { %v2698_v25 = vsel %vm12730_vm1, %v2690_v5, %v12729_v55  ;;  %4749 = vrot.lane.b32.xlu1 %v9956_v27, %s7909_s10  ;;  %v4234_v34 = vrot.slane %v4232_v0, 4  ;;  %v4237_v39 = vrot.slane %v4235_v12, 5  ;;  %v10075_v60 = vrot.slane %v4291_v21, 5  ;;  %v7389_v5 = vld [vmem:[#allocation2 + $0x38] sm:$0xf]  ;;  %v12731_v26 = vld [vmem:[#allocation96_spill] sm:$0xff]  ;;  %vm12740_vm2 = vmmov %vm12730_vm1 }
 0x2d6   :  { %v2801_v38 = vsel %vm2409_vm4, %v2793_v16, %v12698_v29  ;;  %v10079_v46 = vrot.slane %v4196_v28, 4  ;;  %vm12732_vm12 = vcmask 326656   ;;  %v10088_v12 = vpop.permute.xlu1 %2857  ;;  %v7393_v21 = vld [vmem:[#allocation2 + $0x58] sm:$0xf]  ;;  %v7634_v63 = vld [vmem:[#allocation2 + $0x5c] sm:$0xf0]  ;;  %v4224_v16 = vor.u32 %v4223_v1, %v4220_v14 }
 0x2d7   :  { %v2712_v0 = vsel %vm12732_vm12, %v2698_v25, %v12731_v26  ;;  %12733 = vst [vmem:[#allocation73_spill] sm:$0xff] %v10088_v12  ;;  %4751 = vrot.lane.b32.xlu2 %v9960_v8, %s7909_s10  ;;  %v4227_v28 = vshll.u32 %v4123_v48, 16  ;;  %v10092_v22 = vrot.slane %v4199_v23, 5  ;;  %v12735_v27 = vld [vmem:[#allocation23_spill] sm:$0xff]  ;;  %v4241_v9 = vshll.u32 %v4124_v13, 16  ;;  %v12737_v8 = vld [vmem:[#allocation48_spill] sm:$0xff] }
 0x2d8   :  { %v2919_v4 = vsel %vm2223_vm14, %v9984_v41, %v12735_v27  ;;  %v10099_v47 = vrot.slane %v4210_v32, 4  ;;  %v10101_v25 = vrot.slane %v4213_v37, 5  ;;  %v4093_v26 = vld [vmem:[#allocation2 + $0x58] sm:$0xf]  ;;  %v2673_v12 = vsel %vm2223_vm14, %v12737_v8, %v12736_v15  ;;  %v4094_v62 = vld [vmem:[#allocation2 + $0x60] sm:$0xf] }
 0x2d9   :  { %v2942_v48 = vsel %vm363_vm0, %v2919_v4, %v2862_v19  ;;  %v2902_v14 = vpop.permute.xlu2 %2901  ;;  %v2809_v1 = vsel %vm2426_vm6, %v2801_v38, %v12697_v53  ;;  %v4238_v23 = vor.u32 %v4237_v39, %v4234_v34  ;;  %vm12738_vm11 = vcmask 392192   ;;  %4759 = vrot.lane.b32.xlu0 %v9972_v7, %s7909_s10  ;;  %v4099_v34 = vld [vmem:[#allocation2 + $0x88] sm:$0xf]  ;;  %v12741_v39 = vld [vmem:[#allocation43_spill] sm:$0xff] }
 0x2da   :  { %v2722_v27 = vsel %vm12738_vm11, %v2712_v0, %v12729_v55  ;;  %v2958_v41 = vsel %vm2264_vm15, %v2942_v48, %v2902_v14  ;;  %v10114_v32 = vor.u32 %v7633_v49, %v7389_v5  ;;  %v10116_v37 = vor.u32 %v7634_v63, %v7393_v21  ;;  %v12742_v5 = vld [vmem:[#allocation10_spill] sm:$0xff] }
 0x2db   :  { %7335 = vmatmul.msk.bf16.vlgmr.msrb.gmra.mxu1 %vm12740_vm2, %v2958_v41  ;;  %v4225_v19 = vrot.slane %v4224_v16, 4  ;;  %v4229_v13 = vrot.slane %v4227_v28, 5  ;;  %v4246_v4 = vshrl.u32 %v4093_v26, 16  ;;  %v4249_v53 = vshll.u32 %v4093_v26, 16  ;;  %v2868_v55 = vpop.permute.xlu0 %2867  ;;  %v12744_v28 = vld [vmem:[#allocation94_spill] sm:$0xff] }
 0x2dc   :  { %12739 = vst [vmem:[#allocation76_spill] sm:$0xff] %v10116_v37  ;;  %v2683_v38 = vsel %vm363_vm0, %v2673_v12, %v12741_v39  ;;  %v2817_v0 = vsel %vm2443_vm8, %v2809_v1, %v12698_v29  ;;  %v4260_v48 = vshrl.u32 %v4094_v62, 16  ;;  %v4263_v14 = vshll.u32 %v4094_v62, 16  ;;  %v12746_v1 = vld [vmem:[#allocation56_spill] sm:$0xff] }
 0x2dd   :  { %vm12743_vm1 = vcmask 457728   ;;  %4755 = vrot.lane.b32.xlu1 %v10114_v32, %s7909_s10  ;;  %v2834_v21 = vsel %vm2460_vm9, %v2817_v0, %v9902_v59  ;;  %v4239_v63 = vrot.slane %v4238_v23, 4  ;;  %v4243_v16 = vrot.slane %v4241_v9, 5  ;;  %v12747_v23 = vld [vmem:[#allocation98_spill] sm:$0xff] }
 0x2de   :  { %v2736_v49 = vsel %vm12743_vm1, %v2722_v27, %v12742_v5  ;;  %vm12745_vm12 = vcmask 523264   ;;  %3214 = vmatmul.bf16.gmra.mxu2 %v2834_v21  ;;  %v4202_v29 = vsel %vm8130_vm13, %v10079_v46, %v10092_v22  ;;  %v4216_v62 = vsel %vm8130_vm13, %v10099_v47, %v10101_v25  ;;  %v10143_v27 = vpop.permute.xlu1 %2863  ;;  %v4100_v22 = vld [vmem:[#allocation2 + $0x90] sm:$0xf]  ;;  %v12749_v46 = vld [vmem:[#allocation71_spill] sm:$0xff] }
 0x2df   :  { %v2752_v12 = vsel %vm12745_vm12, %v2736_v49, %v12744_v28  ;;  %v4330_v26 = vshrl.u32 %v4099_v34, 16  ;;  %v2691_v59 = vsel %vm2264_vm15, %v2683_v38, %v12746_v1  ;;  %vm12748_vm11 = vcmask 588800   ;;  %4757 = vrot.lane.b32.xlu2 %v10116_v37, %s7909_s10  ;;  %v12750_v5 = vld [vmem:[#allocation42_spill] sm:$0xff]  ;;  %v4125_v25 = vld [vmem:[#allocation2 + $0x5c] sm:$0x1] }
 0x2e0   :  { %v2768_v9 = vsel %vm12748_vm11, %v2752_v12, %v12747_v23  ;;  %v4248_v41 = vrot.slane %v4246_v4, 4  ;;  %v4251_v39 = vrot.slane %v4249_v53, 5  ;;  %v2928_v47 = vsel %vm2223_vm14, %v10039_v30, %v12750_v5  ;;  %v4126_v53 = vld [vmem:[#allocation2 + $0x64] sm:$0x1]  ;;  %v12751_v23 = vld [vmem:[#allocation63_spill] sm:$0xff]  ;;  %vm12757_vm11 = vmmov %vm12740_vm2 }
 0x2e1   :  { %v2784_v0 = vsel %vm2375_vm10, %v2768_v9, %v12749_v46  ;;  %v4262_v38 = vrot.slane %v4260_v48, 4  ;;  %v4265_v49 = vrot.slane %v4263_v14, 5  ;;  %v2948_v21 = vsel %vm363_vm0, %v2928_v47, %v2868_v55  ;;  %v2908_v28 = vpop.permute.xlu2 %2907  ;;  %v10159_v46 = vpop.f32.mrf.mxu1  ;;  %4789 = vrot.lane.b32.xlu0 %v9993_v36, %s7905_s28  ;;  %v7405_v55 = vld [vmem:[#allocation2 + $0x88] sm:$0xf]  ;;  %v7637_v48 = vld [vmem:[#allocation2 + $0x8c] sm:$0xf0] }
 0x2e2   :  { %v4230_v12 = vsel %vm8130_vm13, %v4225_v19, %v4229_v13  ;;  %v4244_v4 = vsel %vm8130_vm13, %v4239_v63, %v4243_v16  ;;  %v4333_v1 = vshll.u32 %v4099_v34, 16  ;;  %v2699_v9 = vsel %vm12740_vm2, %v2691_v59, %v12751_v23  ;;  %12752 = vst [vmem:[#allocation39_spill] sm:$0xff] %v10159_v46  ;;  %v12753_v19 = vld [vmem:[#allocation12_spill] sm:$0xff] }
 0x2e3   :  { %v2964_v30 = vsel %vm2264_vm15, %v2948_v21, %v2908_v28  ;;  %v4344_v14 = vshrl.u32 %v4100_v22, 16  ;;  %v4347_v5 = vshll.u32 %v4100_v22, 16  ;;  %vm12754_vm1 = vcmask 326656   ;;  %v12755_v63 = vld [vmem:[#allocation24_spill] sm:$0xff]  ;;  %v10169_v47 = vpop.permute.xlu0 %2873 }
 0x2e4   :  { %v2714_v13 = vsel %vm12754_vm1, %v2699_v9, %v12753_v19  ;;  %vm12756_vm12 = vcmask 719872   ;;  %7338 = vmatmul.msk.bf16.vlgmr.msra.gmra.mxu3 %vm12757_vm11, %v2964_v30  ;;  %v4252_v16 = vor.u32 %v4251_v39, %v4248_v41  ;;  %v4255_v59 = vshll.u32 %v4125_v25, 16  ;;  %v4131_v25 = vld [vmem:[#allocation2 + $0x8c] sm:$0x1] }
 0x2e5   :  { %v2794_v34 = vsel %vm12756_vm12, %v2784_v0, %v12755_v63  ;;  %v4771_v21 = vunpack.c.l.b16 %v4230_v12  ;;  %v4772_v28 = vunpack.c.l.b16 %v4244_v4  ;;  %v4266_v7 = vor.u32 %v4265_v49, %v4262_v38  ;;  %4761 = vrot.lane.b32.xlu1 %v9995_v6, %s7909_s10 }
 0x2e6   :  { %v4269_v37 = vshll.u32 %v4126_v53, 16  ;;  %v10173_v22 = vor.u32 %v7637_v48, %v7405_v55  ;;  %v4769_v46 = vunpack.c.l.b16 %v4202_v29  ;;  %v4770_v9 = vunpack.c.l.b16 %v4216_v62  ;;  %v2870_v49 = vpop.permute.xlu1 %2869  ;;  %v4132_v29 = vld [vmem:[#allocation2 + $0x94] sm:$0x1] }
 0x2e7   :  { %v4294_v0 = vor.u32 %v10075_v60, %v10060_v52  ;;  %vm12758_vm2 = vcmask 392192   ;;  %v2802_v39 = vsel %vm2409_vm4, %v2794_v34, %v12717_v54  ;;  %v4332_v12 = vrot.slane %v4330_v26, 4 }
 0x2e8   :  { %v2723_v41 = vsel %vm12758_vm2, %v2714_v13, %v12751_v23  ;;  %v4335_v38 = vrot.slane %v4333_v1, 5  ;;  %4763 = vrot.lane.b32.xlu2 %v10173_v22, %s7909_s10  ;;  %v4253_v4 = vrot.slane %v4252_v16, 4  ;;  %v4257_v53 = vrot.slane %v4255_v59, 5  ;;  %v12760_v1 = vld [vmem:[#allocation13_spill] sm:$0xff]  ;;  %v12764_v16 = vld [vmem:[#allocation34_spill] sm:$0xff] }
 0x2e9   :  { %v4346_v62 = vrot.slane %v4344_v14, 4  ;;  %v4349_v30 = vrot.slane %v4347_v5, 5  ;;  %v10183_v55 = vpack.c.b16 %v4772_v28, %v4771_v21  ;;  %v12759_v52 = vsel %vm8130_vm13, %v10052_v17, %v10005_v58  ;;  %v10192_v19 = vpop.permute.xlu2 %2913  ;;  %v12765_v21 = vld [vmem:[#allocation74_spill] sm:$0xff]  ;;  %v10212_v28 = vpop.f32.mrf.mxu1 }
 0x2ea   :  { %v4778_v60 = vunpack.c.l.b16 %v12759_v52  ;;  %v4267_v23 = vrot.slane %v4266_v7, 4  ;;  %v4271_v26 = vrot.slane %v4269_v37, 5  ;;  %vm12761_vm1 = vcmask 457728  }
 0x2eb   :  { %v2738_v48 = vsel %vm12761_vm1, %v2723_v41, %v12760_v1  ;;  %v2810_v13 = vsel %vm2426_vm6, %v2802_v39, %v12716_v2  ;;  %v12762_v14 = vor.u32 %v10043_v56, %v10017_v24  ;;  %v12763_v63 = vshll.u32 %v10064_v51, 16  ;;  %4795 = vrot.lane.b32.xlu0 %v10183_v55, %s7905_s28  ;;  %v12767_v41 = vld [vmem:[#allocation92_spill] sm:$0xff] }
 0x2ec   :  { %v10203_v7 = vpack.c.b16 %v4770_v9, %v4769_v46  ;;  %v4295_v58 = vrot.slane %v4294_v0, 4  ;;  %v4339_v17 = vshll.u32 %v4131_v25, 16  ;;  %v4353_v37 = vshll.u32 %v4132_v29, 16  ;;  %v2904_v9 = vpop.permute.xlu0 %2903  ;;  %v12768_v39 = vld [vmem:[#allocation84_spill] sm:$0xff] }
 0x2ed   :  { %v4281_v5 = vrot.slane %v12762_v14, 4  ;;  %v4299_v34 = vrot.slane %v12763_v63, 5  ;;  %v2922_v59 = vsel %vm2223_vm14, %v9886_v61, %v12764_v16  ;;  %v4258_v2 = vsel %vm8130_vm13, %v4253_v4, %v4257_v53  ;;  %4791 = vrot.lane.b32.xlu1 %v10069_v44, %s7905_s28  ;;  %v12774_v14 = vld [vmem:[#allocation77_spill] sm:$0xff] }
 0x2ee   :  { %v4336_v24 = vor.u32 %v4335_v38, %v4332_v12  ;;  %v4350_v56 = vor.u32 %v4349_v30, %v4346_v62  ;;  %vm12766_vm12 = vcmask 523264   ;;  %v2944_v46 = vsel %vm363_vm0, %v2922_v59, %v10143_v27  ;;  %v10238_v53 = vpop.permute.xlu1 %2875  ;;  %v12771_v30 = vld [vmem:[#allocation62_spill] sm:$0xff] }
 0x2ef   :  { %v2754_v51 = vsel %vm12766_vm12, %v2738_v48, %v12765_v21  ;;  %v2818_v0 = vsel %vm2443_vm8, %v2810_v13, %v12717_v54  ;;  %v4272_v61 = vsel %vm8130_vm13, %v4267_v23, %v4271_v26  ;;  %v2676_v25 = vsel %vm2223_vm14, %v12768_v39, %v12767_v41  ;;  %v12772_v26 = vld [vmem:[#allocation21_spill] sm:$0xff] }
 0x2f0   :  { %vm12769_vm11 = vcmask 588800   ;;  %v2837_v27 = vsel %vm2460_vm9, %v2818_v0, %v9942_v45  ;;  %v2960_v38 = vsel %vm2264_vm15, %v2944_v46, %v2904_v9  ;;  %vm12770_vm2 = vcmask 261120   ;;  %4793 = vrot.lane.b32.xlu2 %v10203_v7, %s7905_s28 }
 0x2f1   :  { %v2770_v12 = vsel %vm12769_vm11, %v2754_v51, %v9747_v18  ;;  %3219 = vmatmul.bf16.gmra.mxu2 %v2837_v27  ;;  %7336 = vmatmul.msk.bf16.gmra.mxu1 %vm12770_vm2, %v2960_v38  ;;  %v10234_v4 = vpack.c.b16 %v4778_v60, %v10056_v20  ;;  %v4300_v18 = vsel %vm8130_vm13, %v4295_v58, %v4299_v34  ;;  %v4773_v45 = vunpack.c.l.b16 %v4258_v2  ;;  %v10249_v48 = vpop.permute.xlu2 %4639  ;;  %vm12777_vm12 = vmmov %vm12770_vm2  ;;  %v10274_v51 = vpop.f32.mrf.mxu1 }
 0x2f2   :  { %v2786_v54 = vsel %vm2375_vm10, %v2770_v12, %v9810_v33  ;;  %v4774_v29 = vunpack.c.l.b16 %v4272_v61  ;;  %v4286_v33 = vsel %vm8130_vm13, %v4281_v5, %v10058_v11  ;;  %v4341_v62 = vrot.slane %v4339_v17, 5  ;;  %v12775_v11 = vld [vmem:[#allocation27_spill] sm:$0xff]  ;;  %vm12778_vm11 = vmmov %vm12770_vm2 }
 0x2f3   :  { %v2684_v52 = vsel %vm363_vm0, %v2676_v25, %v12771_v30  ;;  %v4337_v20 = vrot.slane %v4336_v24, 4  ;;  %v4351_v60 = vrot.slane %v4350_v56, 4  ;;  %v4355_v23 = vrot.slane %v4353_v37, 5  ;;  %4801 = vrot.lane.b32.xlu0 %v10234_v4, %s7905_s28  ;;  %v12776_v56 = vld [vmem:[#allocation89_spill] sm:$0xff] }
 0x2f4   :  { %vm12773_vm1 = vcmask 719872   ;;  %v4776_v13 = vunpack.c.l.b16 %v4300_v18  ;;  %v2692_v63 = vsel %vm2264_vm15, %v2684_v52, %v12774_v14  ;;  %v2931_v5 = vsel %vm2223_vm14, %v9916_v50, %v12775_v11  ;;  %v2910_v16 = vpop.permute.xlu0 %2909  ;;  %v12785_v52 = vld [vmem:[#allocation97_spill] sm:$0xff]  ;;  %v12792_v14 = vld [vmem:[#allocation46_spill] sm:$0xff] }
 0x2f5   :  { %v2795_v1 = vsel %vm12773_vm1, %v2786_v54, %v12772_v26  ;;  %v10258_v34 = vpack.c.b16 %v4774_v29, %v4773_v45  ;;  %v4775_v58 = vunpack.c.l.b16 %v4286_v33  ;;  %v2950_v37 = vsel %vm363_vm0, %v2931_v5, %v2870_v49  ;;  %v12779_v49 = vld [vmem:[#allocation9_spill] sm:$0xff]  ;;  %v12782_v54 = vld [vmem:[#allocation50_spill] sm:$0xff] }
 0x2f6   :  { %v2803_v17 = vsel %vm2409_vm4, %v2795_v1, %v12737_v8  ;;  %v4342_v59 = vsel %vm8130_vm13, %v4337_v20, %v4341_v62  ;;  %v4356_v2 = vsel %vm8130_vm13, %v4351_v60, %v4355_v23  ;;  %v2966_v50 = vsel %vm2264_vm15, %v2950_v37, %v2910_v16  ;;  %v2906_v9 = vpop.permute.xlu1 %2905  ;;  %v12783_v33 = vld [vmem:[#allocation33_spill] sm:$0xff]  ;;  %v12788_v20 = vld [vmem:[#allocation8_spill] sm:$0xff]  ;;  %v12790_v1 = vld [vmem:[#allocation14_spill] sm:$0xff] }
 0x2f7   :  { %4797 = vrot.lane.b32.xlu1 %v10258_v34, %s7905_s28  ;;  %v10269_v24 = vpack.c.b16 %v4776_v13, %v4775_v58  ;;  %v2700_v21 = vsel %vm12777_vm12, %v2692_v63, %v12776_v56  ;;  %7339 = vmatmul.msk.bf16.gmra.mxu3 %vm12778_vm11, %v2966_v50  ;;  %vm12780_vm2 = vcmask 326656   ;;  %v4779_v0 = vunpack.c.l.b16 %v4342_v59 }
 0x2f8   :  { %v2716_v46 = vsel %vm12780_vm2, %v2700_v21, %v12779_v49  ;;  %v4780_v61 = vunpack.c.l.b16 %v4356_v2  ;;  %v2811_v25 = vsel %vm2426_vm6, %v2803_v17, %v12736_v15  ;;  %vm12781_vm1 = vcmask 392192   ;;  %v12795_v21 = vld [vmem:[#allocation73_spill] sm:$0xff] }
 0x2f9   :  { %4799 = vrot.lane.b32.xlu2 %v10269_v24, %s7905_s28  ;;  %v10283_v12 = vpop.permute.xlu2 %4645  ;;  %v2724_v27 = vsel %vm12781_vm1, %v2716_v46, %v12776_v56  ;;  %v2819_v38 = vsel %vm2443_vm8, %v2811_v25, %v12737_v8  ;;  %v2925_v18 = vsel %vm2223_vm14, %v9970_v40, %v12782_v54  ;;  %vm12784_vm12 = vcmask 457728   ;;  %v10314_v26 = vpop.f32.mrf.mxu1  ;;  %v12794_v56 = vld [vmem:[#allocation37_spill] sm:$0xff] }
 0x2fa   :  { %v10294_v45 = vpack.c.b16 %v4780_v61, %v4779_v0  ;;  %v2946_v15 = vsel %vm363_vm0, %v2925_v18, %v10001_v10  ;;  %v2740_v62 = vsel %vm12784_vm12, %v2724_v27, %v12783_v33  ;;  %v2840_v30 = vsel %vm2460_vm9, %v2819_v38, %v9838_v43  ;;  %v12798_v27 = vld [vmem:[#allocation35_spill] sm:$0xff] }
 0x2fb   :  { %4807 = vrot.lane.b32.xlu0 %v10069_v44, %s7906_s29  ;;  %v2962_v8 = vsel %vm2264_vm15, %v2946_v15, %v2906_v9  ;;  %vm12786_vm11 = vcmask 523264   ;;  %vm12787_vm2 = vcmask 261120   ;;  %vm12789_vm1 = vcmask 588800  }
 0x2fc   :  { %v2916_v29 = vpop.permute.xlu0 %2915  ;;  %v2756_v40 = vsel %vm12786_vm11, %v2740_v62, %v12785_v52  ;;  %vm12791_vm12 = vcmask 719872   ;;  %v2934_v63 = vsel %vm2223_vm14, %v10020_v42, %v12792_v14  ;;  %vm12802_vm11 = vmmov %vm12787_vm2 }
 0x2fd   :  { %v2772_v10 = vsel %vm12789_vm1, %v2756_v40, %v12788_v20  ;;  %v2952_v11 = vsel %vm363_vm0, %v2934_v63, %v10050_v57  ;;  %vm12806_vm1 = vcmask 326656  }
 0x2fe   :  { %v2912_v60 = vpop.permute.xlu1 %2911  ;;  %v2788_v23 = vsel %vm2375_vm10, %v2772_v10, %v9878_v3  ;;  %vm12793_vm10 = vmmov %vm12787_vm2 }
 0x2ff   :  { %4803 = vrot.lane.b32.xlu1 %v10294_v45, %s7905_s28  ;;  %v2796_v13 = vsel %vm12791_vm12, %v2788_v23, %v12790_v1  ;;  %v2968_v3 = vsel %vm2264_vm15, %v2952_v11, %v2912_v60  ;;  %v178_v1 = vld [vmem:[#allocation3 + $0x8] sm:$0x1]  ;;  %vm12808_vm12 = vcmask 392192  }
 0x300   :  { %v2804_v58 = vsel %vm2409_vm4, %v2796_v13, %v12768_v39  ;;  %vm12796_vm4 = vmmov %vm12787_vm2  ;;  %v238_v13 = vld [vmem:[#allocation3 + $0xc] sm:$0x1] }
 0x301   :  { %3224 = vmatmul.bf16.gmra.mxu2 %v2840_v30  ;;  %7337 = vmatmul.msk.bf16.gmra.mxu1 %vm12787_vm2, %v2962_v8  ;;  %v10316_v43 = vpop.permute.xlu2 %4651  ;;  %v2812_v57 = vsel %vm2426_vm6, %v2804_v58, %v12767_v41  ;;  %v10343_v37 = vpop.f32.mrf.mxu1 }
 0x302   :  { %4805 = vrot.lane.b32.xlu2 %v9993_v36, %s7906_s29  ;;  %v2820_v59 = vsel %vm2443_vm8, %v2812_v57, %v12768_v39  ;;  %v2937_v39 = vsel %vm2223_vm14, %v12795_v21, %v12794_v56  ;;  %vm12799_vm8 = vmmov %vm12787_vm2  ;;  %v239_v57 = vsel %vm7998_vm5, 0, %v238_v13 }
 0x303   :  { %4813 = vrot.lane.b32.xlu0 %v10258_v34, %s7906_s29  ;;  %v2843_v2 = vsel %vm2460_vm9, %v2820_v59, %v9928_v31  ;;  %v2954_v46 = vsel %vm363_vm0, %v2937_v39, %v10169_v47  ;;  %240 = vst [vmem:[#allocation3 + $0xc] sm:$0x1] %v239_v57  ;;  %v12804_v57 = vld [vmem:[#allocation41_spill] sm:$0xff] }
 0x304   :  { %v10327_v5 = vpop.permute.xlu0 %4641  ;;  %v2970_v9 = vsel %vm2264_vm15, %v2954_v46, %v10192_v19 }
 0x306   :  { %v10335_v17 = vpop.permute.xlu1 %4637 }
 0x307   :  { %4809 = vrot.lane.b32.xlu1 %v10203_v7, %s7906_s29  ;;  %7340 = vmatmul.msk.bf16.gmra.mxu3 %vm12793_vm10, %v2968_v3  ;;  %v179_v3 = vsel %vm7990_vm3, 0, %v178_v1  ;;  %vm12809_vm10 = vcmask 457728  }
 0x308   :  { %180 = vst [vmem:[#allocation3 + $0x8] sm:$0x1] %v179_v3 }
 0x309   :  { %v10339_v42 = vpop.permute.xlu2 %4681  ;;  %v10364_v49 = vpop.f32.mrf.mxu1 }
 0x30a   :  { %4811 = vrot.lane.b32.xlu2 %v10183_v55, %s7906_s29 }
 0x30b   :  { %4819 = vrot.lane.b32.xlu0 %v10294_v45, %s7906_s29 }
 0x30c   :  { %v10347_v16 = vpop.permute.xlu0 %4647 }
 0x30e   :  { %v10355_v50 = vpop.permute.xlu1 %4643 }
 0x30f   :  { %4815 = vrot.lane.b32.xlu1 %v10269_v24, %s7906_s29 }
 0x311   :  { %3229 = vmatmul.bf16.gmra.mxu2 %v2843_v2  ;;  %v4688_v41 = vpop.permute.xlu2 %4687  ;;  %v10383_v47 = vpop.f32.mrf.mxu1 }
 0x312   :  { %4817 = vrot.lane.b32.xlu2 %v10234_v4, %s7906_s29  ;;  %v5062_v39 = vsel %vm2223_vm14, %v10347_v16, %v4688_v41 }
 0x313   :  { %4825 = vrot.lane.b32.xlu0 %v10203_v7, %s7907_s30 }
 0x314   :  { %v10368_v31 = vpop.permute.xlu0 %4677 }
 0x315   :  { %v5047_v16 = vsel %vm2223_vm14, %v10335_v17, %v10368_v31 }
 0x317   :  { %4821 = vrot.lane.b32.xlu1 %v9993_v36, %s7907_s30  ;;  %7341 = vmatmul.msk.bf16.gmra.mxu3 %vm12796_vm4, %v2970_v9  ;;  %v4650_v7 = vpop.permute.xlu1 %4649 }
 0x319   :  { %v4694_v0 = vpop.permute.xlu2 %4693  ;;  %v10402_v18 = vpop.f32.mrf.mxu1 }
 0x31a   :  { %4823 = vrot.lane.b32.xlu2 %v10069_v44, %s7907_s30  ;;  %v12797_v44 = vld [vmem:[#allocation31_spill] sm:$0xff]  ;;  %v5070_v41 = vsel %vm363_vm0, %v5047_v16, %v4694_v0 }
 0x31b   :  { %4831 = vrot.lane.b32.xlu0 %v10269_v24, %s7907_s30  ;;  %v2940_v38 = vsel %vm2223_vm14, %v12798_v27, %v12797_v44  ;;  %v5053_v27 = vsel %vm2223_vm14, %v10327_v5, %v10339_v42 }
 0x31c   :  { %v10379_v61 = vpop.permute.xlu0 %4683  ;;  %v2956_v24 = vsel %vm363_vm0, %v2940_v38, %v10238_v53 }
 0x31d   :  { %v5056_v0 = vsel %vm2223_vm14, %v10355_v50, %v10379_v61  ;;  %v10482_v50 = vld [vmem:[%s12174_s5] ss:$0 sm:$0xff] }
 0x31e   :  { %v10387_v19 = vpop.f32.mrf.mxu2 }
 0x31f   :  { %4827 = vrot.lane.b32.xlu1 %v10183_v55, %s7907_s30  ;;  %v4680_v36 = vpop.permute.xlu1 %4679  ;;  %v2972_v55 = vsel %vm2264_vm15, %v2956_v24, %v2916_v29 }
 0x320   :  { %v5050_v29 = vsel %vm2223_vm14, %v10249_v48, %v4680_v36 }
 0x321   :  { %v10389_v25 = vpop.permute.xlu2 %4699 }
 0x322   :  { %4829 = vrot.lane.b32.xlu2 %v10258_v34, %s7907_s30 }
 0x324   :  { %v4690_v54 = vpop.permute.xlu0 %4689 }
 0x325   :  { %v5065_v15 = vsel %vm2223_vm14, %v4650_v7, %v4690_v54 }
 0x326   :  { %v10405_v33 = vpop.f32.mrf.mxu2 }
 0x327   :  { %4833 = vrot.lane.b32.xlu1 %v10234_v4, %s7907_s30  ;;  %7342 = vmatmul.msk.bf16.gmra.mxu3 %vm12799_vm8, %v2972_v55  ;;  %v4686_v34 = vpop.permute.xlu1 %4685 }
 0x328   :  { %v5059_v23 = vsel %vm2223_vm14, %v10283_v12, %v4686_v34  ;;  %v181_v34 = vld [vmem:[#allocation3 + $0x10] sm:$0x1] }
 0x329   :  { %v4706_v62 = vpop.permute.xlu2 %4705  ;;  %v182_v5 = vsel %vm7990_vm3, 0, %v181_v34  ;;  %v199_v34 = vld [vmem:[#allocation3 + $0x40] sm:$0x1] }
 0x32a   :  { %4835 = vrot.lane.b32.xlu2 %v10294_v45, %s7907_s30  ;;  %v10408_v53 = vsel %vm363_vm0, %v5065_v15, %v4706_v62  ;;  %v10415_v45 = vpop.f32.mrf.mxu1  ;;  %v241_v15 = vld [vmem:[#allocation3 + $0x14] sm:$0x1]  ;;  %183 = vst [vmem:[#allocation3 + $0x10] sm:$0x1] %v182_v5  ;;  %v12807_v5 = vld [vmem:[#allocation52_spill] sm:$0xff] }
 0x32b   :  { %v242_v42 = vsel %vm7998_vm5, 0, %v241_v15  ;;  %v259_v15 = vld [vmem:[#allocation3 + $0x44] sm:$0x1] }
 0x32c   :  { %v4696_v30 = vpop.permute.xlu0 %4695  ;;  %243 = vst [vmem:[#allocation3 + $0x14] sm:$0x1] %v242_v42 }
 0x32d   :  { %v5072_v8 = vsel %vm363_vm0, %v5050_v29, %v4696_v30 }
 0x32f   :  { %v4692_v4 = vpop.permute.xlu1 %4691 }
 0x330   :  { %v10413_v40 = vpop.f32.mrf.mxu2  ;;  %v5068_v12 = vsel %vm2223_vm14, %v10316_v43, %v4692_v4 }
 0x331   :  { %v4752_v52 = vpop.permute.xlu2 %4751 }
 0x332   :  { %v10418_v20 = vsel %vm2264_vm15, %v5072_v8, %v4752_v52  ;;  %v10432_v2 = vpop.f32.mrf.mxu1  ;;  %v5076_v8 = vsel %vm363_vm0, %v5056_v0, %v10389_v25 }
 0x334   :  { %v4702_v10 = vpop.permute.xlu0 %4701 }
 0x335   :  { %v5078_v14 = vsel %vm363_vm0, %v5059_v23, %v4702_v10  ;;  %v196_v10 = vld [vmem:[#allocation3 + $0x38] sm:$0x1] }
 0x336   :  { %v197_v13 = vsel %vm7990_vm3, 0, %v196_v10  ;;  %v175_v10 = vld [vmem:[#allocation3] sm:$0x1] }
 0x337   :  { %v4698_v60 = vpop.permute.xlu1 %4697  ;;  %198 = vst [vmem:[#allocation3 + $0x38] sm:$0x1] %v197_v13  ;;  %v176_v13 = vsel %vm7990_vm3, 0, %v175_v10 }
 0x338   :  { %v10423_v63 = vpop.f32.mrf.mxu2  ;;  %v5074_v43 = vsel %vm363_vm0, %v5053_v27, %v4698_v60  ;;  %v256_v60 = vld [vmem:[#allocation3 + $0x3c] sm:$0x1]  ;;  %177 = vst [vmem:[#allocation3] sm:$0x1] %v176_v13 }
 0x339   :  { %v4758_v48 = vpop.permute.xlu2 %4757 }
 0x33a   :  { %v10430_v59 = vsel %vm2264_vm15, %v5078_v14, %v4758_v48  ;;  %v10450_v54 = vpop.f32.mrf.mxu1  ;;  %v257_v14 = vsel %vm7998_vm5, 0, %v256_v60  ;;  %v187_v60 = vld [vmem:[#allocation3 + $0x20] sm:$0x1] }
 0x33b   :  { %258 = vst [vmem:[#allocation3 + $0x3c] sm:$0x1] %v257_v14  ;;  %v188_v14 = vsel %vm7990_vm3, 0, %v187_v60 }
 0x33c   :  { %v4708_v56 = vpop.permute.xlu0 %4707  ;;  %189 = vst [vmem:[#allocation3 + $0x20] sm:$0x1] %v188_v14  ;;  %v12818_v14 = vld [vmem:[#allocation105_spill] sm:$0xff] }
 0x33d   :  { %v5084_v21 = vsel %vm363_vm0, %v5068_v12, %v4708_v56  ;;  %v3147_v12 = vadd.f32 %v10482_v50, %v12804_v57 }
 0x33f   :  { %v4704_v46 = vpop.permute.xlu1 %4703 }
 0x340   :  { %v5080_v9 = vsel %vm363_vm0, %v5062_v39, %v4704_v46  ;;  %v10440_v36 = vpop.f32.mrf.mxu2  ;;  %vm12803_vm0 = vmmov %vm12787_vm2  ;;  %v244_v39 = vld [vmem:[#allocation3 + $0x1c] sm:$0x1] }
 0x341   :  { %vm12805_vm2 = vmmov %vm12803_vm0 }
 0x342   :  { %v4764_v7 = vpop.permute.xlu2 %4763  ;;  %v10472_v23 = vpop.f32.mrf.mxu1  ;;  %vm12811_vm4 = vmmov %vm12803_vm0 }
 0x343   :  { %v10443_v44 = vsel %vm2264_vm15, %v5084_v21, %v4764_v7  ;;  %v184_v21 = vld [vmem:[#allocation3 + $0x18] sm:$0x1]  ;;  %v3196_v7 = vadd.f32 %v10387_v19, %v3147_v12  ;;  %v200_v19 = vsel %vm7990_vm3, 0, %v199_v34  ;;  %vm12812_vm8 = vmmov %vm12803_vm0 }
 0x344   :  { %v4754_v38 = vpop.permute.xlu0 %4753  ;;  %v185_v46 = vsel %vm7990_vm3, 0, %v184_v21  ;;  %201 = vst [vmem:[#allocation3 + $0x40] sm:$0x1] %v200_v19 }
 0x345   :  { %v5090_v24 = vsel %vm2264_vm15, %v5074_v43, %v4754_v38  ;;  %186 = vst [vmem:[#allocation3 + $0x18] sm:$0x1] %v185_v46 }
 0x347   :  { %v4750_v55 = vpop.permute.xlu1 %4749 }
 0x348   :  { %v5086_v62 = vsel %vm2264_vm15, %v5070_v41, %v4750_v55  ;;  %v10461_v4 = vpop.f32.mrf.mxu2 }
 0x34a   :  { %v4794_v30 = vpop.permute.xlu2 %4793 }
 0x34b   :  { %v10464_v29 = vsel %vm12802_vm11, %v5090_v24, %v4794_v30  ;;  %vm12813_vm11 = vmmov %vm12806_vm1 }
 0x34c   :  { %v4760_v17 = vpop.permute.xlu0 %4759 }
 0x34d   :  { %v5096_v31 = vsel %vm2264_vm15, %v5080_v9, %v4760_v17  ;;  %v245_v9 = vsel %vm7998_vm5, 0, %v244_v39 }
 0x34e   :  { %246 = vst [vmem:[#allocation3 + $0x1c] sm:$0x1] %v245_v9  ;;  %v3477_v9 = vld [vmem:[#allocation3 + $0x8] sm:$0xf] }
 0x34f   :  { %v4756_v52 = vpop.permute.xlu1 %4755 }
 0x350   :  { %v5092_v1 = vsel %vm2264_vm15, %v5076_v8, %v4756_v52  ;;  %v10484_v25 = vpop.f32.mrf.mxu2 }
 0x353   :  { %v4800_v61 = vpop.permute.xlu2 %4799 }
 0x354   :  { %v10487_v48 = vsel %vm12803_vm0, %v5096_v31, %v4800_v61  ;;  %v4790_v3 = vpop.permute.xlu0 %4789  ;;  %v12810_v31 = vld [vmem:[#allocation11_spill] sm:$0xff]  ;;  %v247_v61 = vld [vmem:[#allocation3 + $0x24] sm:$0x1]  ;;  %vm12814_vm0 = vmmov %vm12808_vm12 }
 0x355   :  { %v5102_v56 = vsel %vm12805_vm2, %v5086_v62, %v4790_v3  ;;  %v3149_v0 = vadd.f32 %v10482_v50, %v12810_v31  ;;  %v248_v21 = vsel %vm7998_vm5, 0, %v247_v61  ;;  %vm12815_vm2 = vmmov %vm12809_vm10  ;;  %v3152_v61 = vadd.f32 %v10482_v50, %v12818_v14 }
 0x356   :  { %249 = vst [vmem:[#allocation3 + $0x24] sm:$0x1] %v248_v21 }
 0x357   :  { %v4762_v27 = vpop.permute.xlu1 %4761  ;;  %v3198_v3 = vadd.f32 %v10405_v33, %v3149_v0  ;;  %v3162_v33 = vadd.f32 %v10482_v50, %v10274_v51 }
 0x358   :  { %v5098_v43 = vsel %vm2264_vm15, %v10408_v53, %v4762_v27  ;;  %v3244_v38 = vpop.f32.mrf.mxu1  ;;  %v10499_v41 = vpop.f32.mrf.mxu2  ;;  %v260_v53 = vsel %vm7998_vm5, 0, %v259_v15 }
 0x359   :  { %v3245_v24 = vadd.f32 %v3244_v38, %v3196_v7  ;;  %261 = vst [vmem:[#allocation3 + $0x44] sm:$0x1] %v260_v53 }
 0x35b   :  { %v3284_v62 = vmax.f32 %v3245_v24, 0.0  ;;  %v3480_v24 = vld [vmem:[#allocation3 + $0xc] sm:$0x1] }
 0x35c   :  { %v4806_v16 = vpop.permute.xlu2 %4805 }
 0x35d   :  { %v5118_v55 = vsel %vm12806_vm1, %v5102_v56, %v4806_v16  ;;  %v4796_v17 = vpop.permute.xlu0 %4795  ;;  %v3300_v8 = vpack.c.bf16 %v3284_v62, %v3284_v62  ;;  %vm12817_vm1 = vmmov %vm12811_vm4 }
 0x35e   :  { %v5134_v42 = vsel %vm12808_vm12, %v5118_v55, %v12807_v5  ;;  %v5108_v52 = vsel %vm12811_vm4, %v5092_v1, %v4796_v17  ;;  %v268_v55 = vld [vmem:[#allocation3 + $0x5c] sm:$0x1]  ;;  %vm12819_vm12 = vmmov %vm12817_vm1 }
 0x35f   :  { %v10509_v30 = vsel %vm12809_vm10, %v5134_v42, %v4806_v16  ;;  %v3317_v57 = vshrl.u32 %v3300_v8, 16  ;;  %v4792_v12 = vpop.permute.xlu1 %4791  ;;  %v3320_v46 = vshll.u32 %v3300_v8, 16  ;;  %v208_v16 = vld [vmem:[#allocation3 + $0x58] sm:$0x1]  ;;  %v3211_v42 = vadd.f32 %v10484_v25, %v3162_v33  ;;  %v3486_v33 = vld [vmem:[#allocation3 + $0x14] sm:$0x1]  ;;  %vm12820_vm10 = vmmov %vm12813_vm11 }
 0x360   :  { %v10521_v56 = vsel %vm12812_vm8, %v10418_v20, %v4792_v12  ;;  %v3246_v1 = vpop.f32.mrf.mxu1  ;;  %v209_v51 = vsel %vm7990_vm3, 0, %v208_v16  ;;  %v269_v17 = vsel %vm7998_vm5, 0, %v268_v55  ;;  %vm12821_vm4 = vmmov %vm12814_vm0 }
 0x361   :  { %v3319_v39 = vrot.slane %v3317_v57, 7  ;;  %v3247_v7 = vadd.f32 %v3246_v1, %v3198_v3  ;;  %v10525_v38 = vpop.f32.mrf.mxu2  ;;  %210 = vst [vmem:[#allocation3 + $0x58] sm:$0x1] %v209_v51  ;;  %v3483_v57 = vld [vmem:[#allocation3 + $0x10] sm:$0xf]  ;;  %vm12823_vm8 = vmmov %vm12815_vm2 }
 0x362   :  { %270 = vst [vmem:[#allocation3 + $0x5c] sm:$0x1] %v269_v17 }
 0x363   :  { %v3322_v34 = vor.u32 %v3320_v46, %v3319_v39  ;;  %v3323_v15 = vrot.slane %v3319_v39, 4  ;;  %v3285_v62 = vmax.f32 %v3247_v7, 0.0  ;;  %v250_v7 = vld [vmem:[#allocation3 + $0x2c] sm:$0x1] }
 0x364   :  { %v4812_v27 = vpop.permute.xlu2 %4811  ;;  %v251_v16 = vsel %vm7998_vm5, 0, %v250_v7  ;;  %v3516_v7 = vld [vmem:[#allocation3 + $0x3c] sm:$0x1] }
 0x365   :  { %v5124_v20 = vsel %vm12813_vm11, %v5108_v52, %v4812_v27  ;;  %v4802_v53 = vpop.permute.xlu0 %4801  ;;  %v3478_v0 = vsel %vm8070_vm7, %v3322_v34, %v3477_v9  ;;  %v3481_v8 = vsel %vm7990_vm3, %v3323_v15, %v3480_v24  ;;  %v3301_v52 = vpack.c.bf16 %v3285_v62, %v3285_v62  ;;  %v190_v9 = vld [vmem:[#allocation3 + $0x28] sm:$0x1]  ;;  %252 = vst [vmem:[#allocation3 + $0x2c] sm:$0x1] %v251_v16  ;;  %vm12824_vm11 = vmmov %vm12820_vm10 }
 0x366   :  { %v5140_v5 = vsel %vm12814_vm0, %v5124_v20, %v10114_v32  ;;  %v5114_v32 = vsel %vm12817_vm1, %v5098_v43, %v4802_v53  ;;  %3479 = vst [vmem:[#allocation3 + $0x8] sm:$0xf] %v3478_v0  ;;  %v3164_v43 = vadd.f32 %v10482_v50, %v10314_v26  ;;  %v7409_v20 = vld [vmem:[#allocation3] sm:$0xf] }
 0x367   :  { %v10534_v19 = vsel %vm12815_vm2, %v5140_v5, %v4812_v27  ;;  %v3259_v25 = vpop.f32.mrf.mxu3  ;;  %3482 = vst [vmem:[#allocation3 + $0xc] sm:$0x1] %v3481_v8  ;;  %v3325_v10 = vshrl.u32 %v3301_v52, 16  ;;  %v3328_v3 = vshll.u32 %v3301_v52, 16  ;;  %v3201_v27 = vadd.f32 %v10413_v40, %v3152_v61  ;;  %v211_v5 = vld [vmem:[#allocation3 + $0x60] sm:$0x1] }
 0x368   :  { %v3260_v13 = vadd.f32 %v3259_v25, %v3211_v42  ;;  %v12822_v40 = vld [vmem:[#allocation104_spill] sm:$0xff]  ;;  %v212_v0 = vsel %vm7990_vm3, 0, %v211_v5  ;;  %v3213_v8 = vadd.f32 %v10499_v41, %v3164_v43  ;;  %v12825_v43 = vld [vmem:[#allocation17_spill] sm:$0xff] }
 0x369   :  { %v4798_v60 = vpop.permute.xlu1 %4797  ;;  %v3327_v1 = vrot.slane %v3325_v10, 7  ;;  %v10553_v46 = vpop.f32.mrf.mxu2  ;;  %v3154_v42 = vadd.f32 %v10482_v50, %v12822_v40  ;;  %213 = vst [vmem:[#allocation3 + $0x60] sm:$0x1] %v212_v0 }
 0x36a   :  { %v10549_v12 = vsel %vm12819_vm12, %v10430_v59, %v4798_v60  ;;  %v3290_v21 = vmax.f32 %v3260_v13, 0.0  ;;  %v191_v59 = vsel %vm7990_vm3, 0, %v190_v9  ;;  %v3513_v9 = vld [vmem:[#allocation3 + $0x38] sm:$0xf]  ;;  %vm12826_vm12 = vcmask 523264  }
 0x36b   :  { %v3330_v26 = vor.u32 %v3328_v3, %v3327_v1  ;;  %v3331_v55 = vrot.slane %v3327_v1, 4  ;;  %192 = vst [vmem:[#allocation3 + $0x28] sm:$0x1] %v191_v59  ;;  %v271_v3 = vld [vmem:[#allocation3 + $0x64] sm:$0x1] }
 0x36c   :  { %v4818_v39 = vpop.permute.xlu2 %4817  ;;  %v3306_v34 = vpack.c.bf16 %v3290_v21, %v3290_v21 }
 0x36d   :  { %v5130_v24 = vsel %vm12820_vm10, %v5114_v32, %v4818_v39  ;;  %v4808_v17 = vpop.permute.xlu0 %4807  ;;  %v3487_v52 = vsel %vm7990_vm3, %v3331_v55, %v3486_v33  ;;  %v7622_v25 = vld [vmem:[#allocation3 + $0x4] sm:$0xf0] }
 0x36e   :  { %v5146_v15 = vsel %vm12821_vm4, %v5130_v24, %v9995_v6  ;;  %v3249_v62 = vpop.f32.mrf.mxu1  ;;  %v3484_v6 = vsel %vm8070_vm7, %v3330_v26, %v3483_v57  ;;  %v3365_v32 = vshrl.u32 %v3306_v34, 16  ;;  %v3368_v10 = vshll.u32 %v3306_v34, 16  ;;  %3488 = vst [vmem:[#allocation3 + $0x14] sm:$0x1] %v3487_v52  ;;  %v193_v34 = vld [vmem:[#allocation3 + $0x30] sm:$0x1]  ;;  %vm12829_vm4 = vmmov %vm12814_vm0 }
 0x36f   :  { %v10566_v53 = vsel %vm12823_vm8, %v5146_v15, %v4818_v39  ;;  %v3250_v51 = vadd.f32 %v3249_v62, %v3201_v27  ;;  %3485 = vst [vmem:[#allocation3 + $0x10] sm:$0xf] %v3484_v6  ;;  %v5120_v13 = vsel %vm12824_vm11, %v10521_v56, %v4808_v17  ;;  %v3261_v14 = vpop.f32.mrf.mxu3  ;;  %v7410_v61 = vor.u32 %v7622_v25, %v7409_v20  ;;  %v253_v15 = vld [vmem:[#allocation3 + $0x34] sm:$0x1]  ;;  %v214_v25 = vld [vmem:[#allocation3 + $0x68] sm:$0x1]  ;;  %vm12830_vm8 = vmmov %vm12815_vm2 }
 0x370   :  { %v3367_v41 = vrot.slane %v3365_v32, 7  ;;  %v5136_v57 = vsel %vm12814_vm0, %v5120_v13, %v12825_v43  ;;  %v3262_v21 = vadd.f32 %v3261_v14, %v3213_v8  ;;  %v272_v39 = vsel %vm7998_vm5, 0, %v271_v3  ;;  %v3492_v14 = vld [vmem:[#allocation3 + $0x1c] sm:$0x1]  ;;  %vm12831_vm11 = vmmov %vm12820_vm10 }
 0x371   :  { %v3286_v60 = vmax.f32 %v3250_v51, 0.0  ;;  %v4804_v1 = vpop.permute.xlu1 %4803  ;;  %v5150_v33 = vsel %vm12815_vm2, %v5136_v57, %v4808_v17  ;;  %4877 = vrot.lane.b32.xlu0 %v7410_v61, %s7906_s29  ;;  %273 = vst [vmem:[#allocation3 + $0x64] sm:$0x1] %v272_v39  ;;  %v3167_v24 = vadd.f32 %v10482_v50, %v10343_v37  ;;  %v3203_v62 = vadd.f32 %v10423_v63, %v3154_v42  ;;  %v3489_v17 = vld [vmem:[#allocation3 + $0x18] sm:$0xf] }
 0x372   :  { %v10584_v56 = vsel %vm12817_vm1, %v10443_v44, %v4804_v1  ;;  %v3370_v20 = vor.u32 %v3368_v10, %v3367_v41  ;;  %v3371_v59 = vrot.slane %v3367_v41, 4  ;;  %v3291_v16 = vmax.f32 %v3262_v21, 0.0  ;;  %v12827_v10 = vld [vmem:[#allocation39_spill] sm:$0xff]  ;;  %v12828_v1 = vld [vmem:[#allocation76_spill] sm:$0xff]  ;;  %v274_v39 = vld [vmem:[#allocation3 + $0x6c] sm:$0x1] }
 0x373   :  { %v3302_v27 = vpack.c.bf16 %v3286_v60, %v3286_v60  ;;  %v194_v6 = vsel %vm7990_vm3, 0, %v193_v34  ;;  %v254_v32 = vsel %vm7998_vm5, 0, %v253_v15  ;;  %v3157_v60 = vadd.f32 %v10482_v50, %v12827_v10  ;;  %vm12833_vm1 = vmmov %vm12826_vm12  ;;  %v3495_v10 = vld [vmem:[#allocation3 + $0x20] sm:$0xf] }
 0x374   :  { %v4824_v26 = vpop.permute.xlu2 %4823  ;;  %v10589_v55 = vpop.f32.mrf.mxu2  ;;  %v3514_v51 = vsel %vm8070_vm7, %v3370_v20, %v3513_v9  ;;  %v3517_v37 = vsel %vm7990_vm3, %v3371_v59, %v3516_v7  ;;  %v3307_v0 = vpack.c.bf16 %v3291_v16, %v3291_v16  ;;  %v3216_v13 = vadd.f32 %v10525_v38, %v3167_v24  ;;  %195 = vst [vmem:[#allocation3 + $0x30] sm:$0x1] %v194_v6  ;;  %v3519_v20 = vld [vmem:[#allocation3 + $0x40] sm:$0xf]  ;;  %v3522_v59 = vld [vmem:[#allocation3 + $0x44] sm:$0x1] }
 0x375   :  { %v3333_v5 = vshrl.u32 %v3302_v27, 16  ;;  %v3336_v40 = vshll.u32 %v3302_v27, 16  ;;  %v10593_v44 = vsel %vm12826_vm12, %v5150_v33, %v4824_v26  ;;  %3515 = vst [vmem:[#allocation3 + $0x38] sm:$0xf] %v3514_v51  ;;  %v4814_v42 = vpop.permute.xlu0 %4813  ;;  %v215_v38 = vsel %vm7990_vm3, 0, %v214_v25  ;;  %vm12834_vm12 = vmmov %vm12820_vm10 }
 0x376   :  { %v3251_v8 = vpop.f32.mrf.mxu1  ;;  %3518 = vst [vmem:[#allocation3 + $0x3c] sm:$0x1] %v3517_v37  ;;  %v3373_v61 = vshrl.u32 %v3307_v0, 16  ;;  %v5126_v3 = vsel %vm12820_vm10, %v10549_v12, %v4814_v42  ;;  %v3376_v7 = vshll.u32 %v3307_v0, 16  ;;  %v275_v37 = vsel %vm7998_vm5, 0, %v274_v39  ;;  %vm12835_vm10 = vmmov %vm12814_vm0 }
 0x377   :  { %v3335_v52 = vrot.slane %v3333_v5, 7  ;;  %v3252_v63 = vadd.f32 %v3251_v8, %v3203_v62  ;;  %v5142_v21 = vsel %vm12829_vm4, %v5126_v3, %v12828_v1  ;;  %255 = vst [vmem:[#allocation3 + $0x34] sm:$0x1] %v254_v32  ;;  %v12832_v62 = vld [vmem:[#allocation60_spill] sm:$0xff]  ;;  %v3206_v0 = vadd.f32 %v10440_v36, %v3157_v60  ;;  %vm12836_vm4 = vmmov %vm12815_vm2 }
 0x378   :  { %v3375_v9 = vrot.slane %v3373_v61, 7  ;;  %v5153_v27 = vsel %vm12830_vm8, %v5142_v21, %v4814_v42  ;;  %216 = vst [vmem:[#allocation3 + $0x68] sm:$0x1] %v215_v38  ;;  %v3498_v1 = vld [vmem:[#allocation3 + $0x24] sm:$0x1]  ;;  %vm12837_vm8 = vmmov %vm12831_vm11 }
 0x379   :  { %v3338_v41 = vor.u32 %v3336_v40, %v3335_v52  ;;  %v3339_v43 = vrot.slane %v3335_v52, 4  ;;  %v3287_v57 = vmax.f32 %v3252_v63, 0.0  ;;  %v4810_v33 = vpop.permute.xlu1 %4809  ;;  %v277_v63 = vld [vmem:[#allocation3 + $0x74] sm:$0x1]  ;;  %276 = vst [vmem:[#allocation3 + $0x6c] sm:$0x1] %v275_v37 }
 0x37a   :  { %v5122_v26 = vsel %vm12831_vm11, %v10464_v29, %v4810_v33  ;;  %v3378_v34 = vor.u32 %v3376_v7, %v3375_v9  ;;  %v3379_v15 = vrot.slane %v3375_v9, 4  ;;  %v3264_v52 = vpop.f32.mrf.mxu3  ;;  %vm12839_vm11 = vmmov %vm12814_vm0 }
 0x37b   :  { %v3490_v12 = vsel %vm8070_vm7, %v3338_v41, %v3489_v17  ;;  %v3493_v24 = vsel %vm7990_vm3, %v3339_v43, %v3492_v14  ;;  %v3303_v16 = vpack.c.bf16 %v3287_v57, %v3287_v57  ;;  %v5138_v5 = vsel %vm12814_vm0, %v5122_v26, %v12832_v62  ;;  %v217_v17 = vld [vmem:[#allocation3 + $0x70] sm:$0x1]  ;;  %vm12840_vm0 = vmmov %vm12815_vm2 }
 0x37c   :  { %3491 = vst [vmem:[#allocation3 + $0x18] sm:$0xf] %v3490_v12  ;;  %v4830_v40 = vpop.permute.xlu2 %4829  ;;  %v10621_v51 = vpop.f32.mrf.mxu2  ;;  %v10627_v29 = vsel %vm12815_vm2, %v5138_v5, %v4810_v33  ;;  %v3520_v42 = vsel %vm8070_vm7, %v3378_v34, %v3519_v20  ;;  %v3523_v32 = vsel %vm7990_vm3, %v3379_v15, %v3522_v59  ;;  %v3265_v14 = vadd.f32 %v3264_v52, %v3216_v13  ;;  %v12838_v34 = vld [vmem:[#allocation78_spill] sm:$0xff]  ;;  %vm12841_vm2 = vmmov %vm12833_vm1 }
 0x37d   :  { %3494 = vst [vmem:[#allocation3 + $0x1c] sm:$0x1] %v3493_v24  ;;  %v3341_v8 = vshrl.u32 %v3303_v16, 16  ;;  %v10630_v6 = vsel %vm12833_vm1, %v5153_v27, %v4830_v40  ;;  %v3344_v25 = vshll.u32 %v3303_v16, 16  ;;  %v4820_v3 = vpop.permute.xlu0 %4819  ;;  %v218_v41 = vsel %vm7990_vm3, 0, %v217_v17 }
 0x37e   :  { %v3254_v36 = vpop.f32.mrf.mxu1  ;;  %3521 = vst [vmem:[#allocation3 + $0x40] sm:$0xf] %v3520_v42  ;;  %v278_v43 = vsel %vm7998_vm5, 0, %v277_v63  ;;  %v3159_v57 = vadd.f32 %v10482_v50, %v10212_v28  ;;  %v3292_v21 = vmax.f32 %v3265_v14, 0.0  ;;  %v5132_v13 = vsel %vm12834_vm12, %v10584_v56, %v4820_v3  ;;  %v7413_v16 = vld [vmem:[#allocation3 + $0x10] sm:$0xf]  ;;  %vm12845_vm12 = vmmov %vm12833_vm1 }
 0x37f   :  { %v3343_v60 = vrot.slane %v3341_v8, 7  ;;  %v3255_v61 = vadd.f32 %v3254_v36, %v3206_v0  ;;  %3524 = vst [vmem:[#allocation3 + $0x44] sm:$0x1] %v3523_v32  ;;  %v5148_v27 = vsel %vm12835_vm10, %v5132_v13, %v10173_v22  ;;  %v3169_v33 = vadd.f32 %v10482_v50, %v10364_v49  ;;  %v205_v40 = vld [vmem:[#allocation3 + $0x50] sm:$0x1] }
 0x380   :  { %219 = vst [vmem:[#allocation3 + $0x70] sm:$0x1] %v218_v41  ;;  %v3208_v38 = vadd.f32 %v10461_v4, %v3159_v57  ;;  %v3308_v12 = vpack.c.bf16 %v3292_v21, %v3292_v21  ;;  %v10650_v28 = vsel %vm12836_vm4, %v5148_v27, %v4820_v3  ;;  %v3525_v17 = vld [vmem:[#allocation3 + $0x58] sm:$0xf]  ;;  %v3528_v0 = vld [vmem:[#allocation3 + $0x5c] sm:$0x1] }
 0x381   :  { %v3346_v39 = vor.u32 %v3344_v25, %v3343_v60  ;;  %v3347_v9 = vrot.slane %v3343_v60, 4  ;;  %v3288_v7 = vmax.f32 %v3255_v61, 0.0  ;;  %v4816_v24 = vpop.permute.xlu1 %4815  ;;  %279 = vst [vmem:[#allocation3 + $0x74] sm:$0x1] %v278_v43  ;;  %v3218_v4 = vadd.f32 %v10553_v46, %v3169_v33  ;;  %v3501_v42 = vld [vmem:[#allocation3 + $0x28] sm:$0xf] }
 0x382   :  { %v5128_v22 = vsel %vm12837_vm8, %v10487_v48, %v4816_v24  ;;  %v3381_v26 = vshrl.u32 %v3308_v12, 16  ;;  %v3384_v37 = vshll.u32 %v3308_v12, 16  ;;  %v3266_v63 = vpop.f32.mrf.mxu3  ;;  %v220_v14 = vld [vmem:[#allocation3 + $0x78] sm:$0x1]  ;;  %v280_v36 = vld [vmem:[#allocation3 + $0x7c] sm:$0x1]  ;;  %v3172_v33 = vadd.f32 %v10482_v50, %v10383_v47 }
 0x383   :  { %v3496_v56 = vsel %vm8070_vm7, %v3346_v39, %v3495_v10  ;;  %v3499_v20 = vsel %vm7990_vm3, %v3347_v9, %v3498_v1  ;;  %v3304_v59 = vpack.c.bf16 %v3288_v7, %v3288_v7  ;;  %v7623_v49 = vld [vmem:[#allocation3 + $0x14] sm:$0xf0]  ;;  %v5144_v15 = vsel %vm12839_vm11, %v5128_v22, %v12838_v34  ;;  %v3504_v21 = vld [vmem:[#allocation3 + $0x2c] sm:$0x1] }
 0x384   :  { %3497 = vst [vmem:[#allocation3 + $0x20] sm:$0xf] %v3496_v56  ;;  %v10661_v62 = vpop.f32.mrf.mxu2  ;;  %v7414_v5 = vor.u32 %v7623_v49, %v7413_v16  ;;  %v10664_v48 = vsel %vm12840_vm0, %v5144_v15, %v4816_v24  ;;  %v3383_v46 = vrot.slane %v3381_v26, 7  ;;  %v3267_v32 = vadd.f32 %v3266_v63, %v3218_v4  ;;  %v3531_v49 = vld [vmem:[#allocation3 + $0x60] sm:$0xf]  ;;  %vm12850_vm0 = vmmov %vm12833_vm1 }
 0x385   :  { %3500 = vst [vmem:[#allocation3 + $0x24] sm:$0x1] %v3499_v20  ;;  %v3349_v8 = vshrl.u32 %v3304_v59, 16  ;;  %v3352_v52 = vshll.u32 %v3304_v59, 16  ;;  %v206_v10 = vsel %vm7990_vm3, 0, %v205_v40  ;;  %v4826_v3 = vpop.permute.xlu0 %4825  ;;  %v221_v41 = vsel %vm7990_vm3, 0, %v220_v14 }
 0x386   :  { %v3256_v25 = vpop.f32.mrf.mxu1  ;;  %4879 = vrot.lane.b32.xlu1 %v7414_v5, %s7906_s29  ;;  %207 = vst [vmem:[#allocation3 + $0x50] sm:$0x1] %v206_v10  ;;  %v281_v43 = vsel %vm7998_vm5, 0, %v280_v36  ;;  %v3386_v57 = vor.u32 %v3384_v37, %v3383_v46  ;;  %v3387_v1 = vrot.slane %v3383_v46, 4  ;;  %v3293_v13 = vmax.f32 %v3267_v32, 0.0 }
 0x387   :  { %v3351_v60 = vrot.slane %v3349_v8, 7  ;;  %v3257_v61 = vadd.f32 %v3256_v25, %v3208_v38  ;;  %v10675_v39 = vsel %vm12841_vm2, %v10627_v29, %v4826_v3  ;;  %222 = vst [vmem:[#allocation3 + $0x78] sm:$0x1] %v221_v41  ;;  %v3221_v22 = vadd.f32 %v10589_v55, %v3172_v33  ;;  %v3534_v4 = vld [vmem:[#allocation3 + $0x64] sm:$0x1] }
 0x388   :  { %282 = vst [vmem:[#allocation3 + $0x7c] sm:$0x1] %v281_v43  ;;  %v3526_v38 = vsel %vm8070_vm7, %v3386_v57, %v3525_v17  ;;  %v3529_v12 = vsel %vm7990_vm3, %v3387_v1, %v3528_v0  ;;  %v3309_v24 = vpack.c.bf16 %v3293_v13, %v3293_v13  ;;  %v223_v15 = vld [vmem:[#allocation3 + $0x80] sm:$0x1]  ;;  %v3507_v37 = vld [vmem:[#allocation3 + $0x30] sm:$0xf] }
 0x389   :  { %v3354_v9 = vor.u32 %v3352_v52, %v3351_v60  ;;  %v3355_v7 = vrot.slane %v3351_v60, 4  ;;  %v3289_v27 = vmax.f32 %v3257_v61, 0.0  ;;  %v10683_v56 = vpop.permute.xlu1 %4821  ;;  %3527 = vst [vmem:[#allocation3 + $0x58] sm:$0xf] %v3526_v38  ;;  %v224_v0 = vsel %vm7990_vm3, 0, %v223_v15 }
 0x38a   :  { %3530 = vst [vmem:[#allocation3 + $0x5c] sm:$0x1] %v3529_v12  ;;  %v3389_v47 = vshrl.u32 %v3309_v24, 16  ;;  %v3269_v34 = vpop.f32.mrf.mxu3  ;;  %v3392_v40 = vshll.u32 %v3309_v24, 16  ;;  %v3510_v52 = vld [vmem:[#allocation3 + $0x34] sm:$0x1]  ;;  %v3174_v60 = vadd.f32 %v10482_v50, %v10402_v18 }
 0x38b   :  { %v3502_v29 = vsel %vm8070_vm7, %v3354_v9, %v3501_v42  ;;  %v3505_v20 = vsel %vm7990_vm3, %v3355_v7, %v3504_v21  ;;  %v3305_v59 = vpack.c.bf16 %v3289_v27, %v3289_v27  ;;  %v3270_v17 = vadd.f32 %v3269_v34, %v3221_v22  ;;  %225 = vst [vmem:[#allocation3 + $0x80] sm:$0x1] %v224_v0  ;;  %v283_v25 = vld [vmem:[#allocation3 + $0x84] sm:$0x1]  ;;  %v7417_v9 = vld [vmem:[#allocation3 + $0x20] sm:$0xf] }
 0x38c   :  { %v10690_v16 = vpop.f32.mrf.mxu2  ;;  %3503 = vst [vmem:[#allocation3 + $0x28] sm:$0xf] %v3502_v29  ;;  %v3391_v5 = vrot.slane %v3389_v47, 7  ;;  %v284_v36 = vsel %vm7998_vm5, 0, %v283_v25  ;;  %v3223_v7 = vadd.f32 %v10621_v51, %v3174_v60  ;;  %v3537_v12 = vld [vmem:[#allocation3 + $0x68] sm:$0xf]  ;;  %v3182_v34 = vadd.f32 %v10482_v50, %v10450_v54 }
 0x38d   :  { %v3357_v26 = vshrl.u32 %v3305_v59, 16  ;;  %3506 = vst [vmem:[#allocation3 + $0x2c] sm:$0x1] %v3505_v20  ;;  %v3360_v55 = vshll.u32 %v3305_v59, 16  ;;  %v3294_v42 = vmax.f32 %v3270_v17, 0.0  ;;  %vm12848_vm8 = vcmask 719872  }
 0x38e   :  { %v3394_v63 = vor.u32 %v3392_v40, %v3391_v5  ;;  %v3395_v46 = vrot.slane %v3391_v5, 4  ;;  %v7425_v32 = vld [vmem:[#allocation3 + $0x50] sm:$0xf]  ;;  %285 = vst [vmem:[#allocation3 + $0x84] sm:$0x1] %v284_v36 }
 0x38f   :  { %v3359_v8 = vrot.slane %v3357_v26, 7  ;;  %v3310_v41 = vpack.c.bf16 %v3294_v42, %v3294_v42  ;;  %v3540_v24 = vld [vmem:[#allocation3 + $0x6c] sm:$0x1]  ;;  %v235_v59 = vld [vmem:[#allocation3 + $0x4] sm:$0x1]  ;;  %v3179_v26 = vadd.f32 %v10482_v50, %v10432_v2 }
 0x390   :  { %v3532_v61 = vsel %vm8070_vm7, %v3394_v63, %v3531_v49  ;;  %v3535_v3 = vsel %vm7990_vm3, %v3395_v46, %v3534_v4  ;;  %v7626_v57 = vld [vmem:[#allocation3 + $0x54] sm:$0xf0]  ;;  %v3589_v22 = vld [vmem:[#allocation3] sm:$0xf]  ;;  %v236_v51 = vsel %vm7998_vm5, 0, %v235_v59  ;;  %v3177_v4 = vadd.f32 %v10482_v50, %v10415_v45 }
 0x391   :  { %v3362_v10 = vor.u32 %v3360_v55, %v3359_v8  ;;  %v3363_v14 = vrot.slane %v3359_v8, 4  ;;  %v4828_v43 = vpop.permute.xlu1 %4827  ;;  %3533 = vst [vmem:[#allocation3 + $0x60] sm:$0xf] %v3532_v61  ;;  %v7426_v13 = vor.u32 %v7626_v57, %v7425_v32  ;;  %v3397_v27 = vshrl.u32 %v3310_v41, 16  ;;  %v3590_v15 = vld [vmem:[#allocation3 + $0x8] sm:$0xf] }
 0x392   :  { %v10708_v18 = vsel %vm12833_vm1, %v10534_v19, %v4828_v43  ;;  %3536 = vst [vmem:[#allocation3 + $0x64] sm:$0x1] %v3535_v3  ;;  %v3271_v29 = vpop.f32.mrf.mxu3  ;;  %v3400_v47 = vshll.u32 %v3310_v41, 16  ;;  %v3846_v5 = vld [vmem:[#allocation3 + $0xc] sm:$0x1]  ;;  %v3862_v0 = vshrl.u32 %v3589_v22, 16  ;;  %v3226_v61 = vadd.f32 %v10661_v62, %v3177_v4 }
 0x393   :  { %v3508_v1 = vsel %vm8070_vm7, %v3362_v10, %v3507_v37  ;;  %v3511_v21 = vsel %vm7990_vm3, %v3363_v14, %v3510_v52  ;;  %v7624_v38 = vld [vmem:[#allocation3 + $0x24] sm:$0xf0]  ;;  %4885 = vrot.lane.b32.xlu1 %v7426_v13, %s7906_s29  ;;  %v3399_v19 = vrot.slane %v3397_v27, 7  ;;  %v3272_v49 = vadd.f32 %v3271_v29, %v3223_v7  ;;  %237 = vst [vmem:[#allocation3 + $0x4] sm:$0x1] %v236_v51 }
 0x394   :  { %v3230_v33 = vpop.f32.mrf.mxu2  ;;  %3509 = vst [vmem:[#allocation3 + $0x30] sm:$0xf] %v3508_v1  ;;  %v7418_v20 = vor.u32 %v7624_v38, %v7417_v9  ;;  %v3865_v8 = vshll.u32 %v3589_v22, 16  ;;  %v3876_v55 = vshrl.u32 %v3590_v15, 16  ;;  %v3879_v52 = vshll.u32 %v3590_v15, 16 }
 0x395   :  { %3512 = vst [vmem:[#allocation3 + $0x34] sm:$0x1] %v3511_v21  ;;  %v3402_v40 = vor.u32 %v3400_v47, %v3399_v19  ;;  %v3403_v37 = vrot.slane %v3399_v19, 4  ;;  %v3295_v17 = vmax.f32 %v3272_v49, 0.0  ;;  %v3885_v63 = vshll.u32 %v3846_v5, 16 }
 0x396   :  { %4881 = vrot.lane.b32.xlu2 %v7418_v20, %s7906_s29  ;;  %v7625_v46 = vld [vmem:[#allocation3 + $0x34] sm:$0xf0]  ;;  %v3864_v42 = vrot.slane %v3862_v0, 4  ;;  %v226_v32 = vld [vmem:[#allocation3 + $0x88] sm:$0x1]  ;;  %v3184_v10 = vadd.f32 %v10482_v50, %v10472_v23  ;;  %v3867_v14 = vrot.slane %v3865_v8, 5  ;;  %v3228_v3 = vadd.f32 %v10690_v16, %v3179_v26 }
 0x397   :  { %v3538_v45 = vsel %vm8070_vm7, %v3402_v40, %v3537_v12  ;;  %v3541_v2 = vsel %vm7990_vm3, %v3403_v37, %v3540_v24  ;;  %v3311_v54 = vpack.c.bf16 %v3295_v17, %v3295_v17  ;;  %v286_v25 = vld [vmem:[#allocation3 + $0x8c] sm:$0x1]  ;;  %v3878_v36 = vrot.slane %v3876_v55, 4  ;;  %v3543_v21 = vld [vmem:[#allocation3 + $0x70] sm:$0xf] }
 0x398   :  { %3539 = vst [vmem:[#allocation3 + $0x68] sm:$0xf] %v3538_v45  ;;  %v3881_v60 = vrot.slane %v3879_v52, 5  ;;  %v10729_v41 = vadd.f32 %v3230_v33, %v3182_v34  ;;  %v3546_v13 = vld [vmem:[#allocation3 + $0x74] sm:$0x1]  ;;  %v3868_v23 = vor.u32 %v3867_v14, %v3864_v42  ;;  %v3887_v62 = vrot.slane %v3885_v63, 5 }
 0x399   :  { %3542 = vst [vmem:[#allocation3 + $0x6c] sm:$0x1] %v3541_v2  ;;  %v3405_v43 = vshrl.u32 %v3311_v54, 16  ;;  %v3408_v1 = vshll.u32 %v3311_v54, 16  ;;  %v227_v16 = vsel %vm7990_vm3, 0, %v226_v32  ;;  %v287_v22 = vsel %vm7998_vm5, 0, %v286_v25 }
 0x39a   :  { %v3274_v7 = vpop.f32.mrf.mxu3  ;;  %v3882_v50 = vor.u32 %v3881_v60, %v3878_v36  ;;  %v3845_v29 = vld [vmem:[#allocation3 + $0x4] sm:$0x1]  ;;  %v3869_v33 = vrot.slane %v3868_v23, 4  ;;  %228 = vst [vmem:[#allocation3 + $0x88] sm:$0x1] %v227_v16 }
 0x39b   :  { %v7421_v57 = vld [vmem:[#allocation3 + $0x30] sm:$0xf]  ;;  %v3407_v12 = vrot.slane %v3405_v43, 7  ;;  %v3275_v24 = vadd.f32 %v3274_v7, %v3226_v61  ;;  %v3871_v20 = vshll.u32 %v3845_v29, 16  ;;  %v7429_v4 = vld [vmem:[#allocation3 + $0x60] sm:$0xf] }
 0x39c   :  { %v3232_v9 = vpop.f32.mrf.mxu2  ;;  %v7422_v27 = vor.u32 %v7625_v46, %v7421_v57  ;;  %v3595_v38 = vld [vmem:[#allocation3 + $0x30] sm:$0xf]  ;;  %v3883_v59 = vrot.slane %v3882_v50, 4  ;;  %288 = vst [vmem:[#allocation3 + $0x8c] sm:$0x1] %v287_v22 }
 0x39d   :  { %v3410_v19 = vor.u32 %v3408_v1, %v3407_v12  ;;  %v3411_v47 = vrot.slane %v3407_v12, 4  ;;  %v10736_v49 = vadd.f32 %v3232_v9, %v3184_v10  ;;  %v3296_v51 = vmax.f32 %v3275_v24, 0.0  ;;  %v3851_v15 = vld [vmem:[#allocation3 + $0x34] sm:$0x1]  ;;  %v3596_v52 = vld [vmem:[#allocation3 + $0x38] sm:$0xf] }
 0x39e   :  { %4883 = vrot.lane.b32.xlu0 %v7422_v27, %s7906_s29  ;;  %v3873_v26 = vrot.slane %v3871_v20, 5  ;;  %v3888_v34 = vsel %vm8130_vm13, %v3883_v59, %v3887_v62  ;;  %v3946_v5 = vshrl.u32 %v3595_v38, 16  ;;  %v3949_v40 = vshll.u32 %v3595_v38, 16  ;;  %v3852_v63 = vld [vmem:[#allocation3 + $0x3c] sm:$0x1] }
 0x39f   :  { %v3544_v37 = vsel %vm8070_vm7, %v3410_v19, %v3543_v21  ;;  %v3547_v17 = vsel %vm7990_vm3, %v3411_v47, %v3546_v13  ;;  %v3312_v0 = vpack.c.bf16 %v3296_v51, %v3296_v51  ;;  %v7627_v8 = vld [vmem:[#allocation3 + $0x64] sm:$0xf0]  ;;  %v4894_v55 = vunpack.c.l.b16 %v3888_v34  ;;  %v3549_v14 = vld [vmem:[#allocation3 + $0x78] sm:$0xf]  ;;  %v229_v1 = vld [vmem:[#allocation3 + $0x90] sm:$0x1] }
 0x3a0   :  { %3545 = vst [vmem:[#allocation3 + $0x70] sm:$0xf] %v3544_v37  ;;  %v7430_v45 = vor.u32 %v7627_v8, %v7429_v4  ;;  %v3874_v2 = vsel %vm8130_vm13, %v3869_v33, %v3873_v26  ;;  %v3948_v54 = vrot.slane %v3946_v5, 4  ;;  %v3951_v46 = vrot.slane %v3949_v40, 5  ;;  %v289_v27 = vld [vmem:[#allocation3 + $0x94] sm:$0x1] }
 0x3a1   :  { %3548 = vst [vmem:[#allocation3 + $0x74] sm:$0x1] %v3547_v17  ;;  %v3413_v42 = vshrl.u32 %v3312_v0, 16  ;;  %v3416_v32 = vshll.u32 %v3312_v0, 16  ;;  %v4893_v25 = vunpack.c.l.b16 %v3874_v2  ;;  %v3955_v10 = vshll.u32 %v3851_v15, 16 }
 0x3a2   :  { %4887 = vrot.lane.b32.xlu2 %v7430_v45, %s7906_s29  ;;  %v3276_v36 = vpop.f32.mrf.mxu3  ;;  %v3952_v60 = vor.u32 %v3951_v46, %v3948_v54  ;;  %v3960_v61 = vshrl.u32 %v3596_v52, 16  ;;  %v3963_v43 = vshll.u32 %v3596_v52, 16  ;;  %v3969_v57 = vshll.u32 %v3852_v63, 16  ;;  %v3591_v23 = vld [vmem:[#allocation3 + $0x10] sm:$0xf] }
 0x3a3   :  { %v3415_v21 = vrot.slane %v3413_v42, 7  ;;  %v3277_v13 = vadd.f32 %v3276_v36, %v3228_v3  ;;  %v4909_v9 = vpack.c.b16 %v4894_v55, %v4893_v25  ;;  %v3957_v7 = vrot.slane %v3955_v10, 5  ;;  %v3552_v50 = vld [vmem:[#allocation3 + $0x7c] sm:$0x1]  ;;  %v3847_v59 = vld [vmem:[#allocation3 + $0x14] sm:$0x1] }
 0x3a4   :  { %v3953_v38 = vrot.slane %v3952_v60, 4  ;;  %v3962_v12 = vrot.slane %v3960_v61, 4  ;;  %v3965_v24 = vrot.slane %v3963_v43, 5  ;;  %v3971_v29 = vrot.slane %v3969_v57, 5  ;;  %v3592_v47 = vld [vmem:[#allocation3 + $0x18] sm:$0xf] }
 0x3a5   :  { %v3418_v62 = vor.u32 %v3416_v32, %v3415_v21  ;;  %v3419_v16 = vrot.slane %v3415_v21, 4  ;;  %v3297_v33 = vmax.f32 %v3277_v13, 0.0  ;;  %v230_v20 = vsel %vm7990_vm3, 0, %v229_v1  ;;  %v3848_v5 = vld [vmem:[#allocation3 + $0x1c] sm:$0x1] }
 0x3a6   :  { %v3958_v22 = vsel %vm8130_vm13, %v3953_v38, %v3957_v7  ;;  %v3966_v3 = vor.u32 %v3965_v24, %v3962_v12  ;;  %231 = vst [vmem:[#allocation3 + $0x90] sm:$0x1] %v230_v20  ;;  %v290_v19 = vsel %vm7998_vm5, 0, %v289_v27  ;;  %v3890_v51 = vshrl.u32 %v3591_v23, 16  ;;  %v3555_v10 = vld [vmem:[#allocation3 + $0x80] sm:$0xf] }
 0x3a7   :  { %v3550_v4 = vsel %vm8070_vm7, %v3418_v62, %v3549_v14  ;;  %v3553_v26 = vsel %vm7990_vm3, %v3419_v16, %v3552_v50  ;;  %v3313_v34 = vpack.c.bf16 %v3297_v33, %v3297_v33  ;;  %v4899_v15 = vunpack.c.l.b16 %v3958_v22  ;;  %291 = vst [vmem:[#allocation3 + $0x94] sm:$0x1] %v290_v19  ;;  %v3601_v40 = vld [vmem:[#allocation3 + $0x70] sm:$0xf]  ;;  %v3558_v14 = vld [vmem:[#allocation3 + $0x84] sm:$0x1] }
 0x3a8   :  { %3551 = vst [vmem:[#allocation3 + $0x78] sm:$0xf] %v3550_v4  ;;  %v3967_v37 = vrot.slane %v3966_v3, 4  ;;  %v3892_v17 = vrot.slane %v3890_v51, 4  ;;  %v3893_v0 = vshll.u32 %v3591_v23, 16  ;;  %v3899_v8 = vshll.u32 %v3847_v59, 16 }
 0x3a9   :  { %3554 = vst [vmem:[#allocation3 + $0x7c] sm:$0x1] %v3553_v26  ;;  %v3421_v55 = vshrl.u32 %v3313_v34, 16  ;;  %v3424_v52 = vshll.u32 %v3313_v34, 16  ;;  %v3904_v63 = vshrl.u32 %v3592_v47, 16  ;;  %v3907_v45 = vshll.u32 %v3592_v47, 16 }
 0x3aa   :  { %4917 = vrot.lane.b32.xlu2 %v4909_v9, %s7914_s15  ;;  %v3279_v2 = vpop.f32.mrf.mxu3  ;;  %v3972_v54 = vsel %vm8130_vm13, %v3967_v37, %v3971_v29  ;;  %v3895_v46 = vrot.slane %v3893_v0, 5  ;;  %v3901_v42 = vrot.slane %v3899_v8, 5  ;;  %v3913_v32 = vshll.u32 %v3848_v5, 16  ;;  %v3857_v21 = vld [vmem:[#allocation3 + $0x74] sm:$0x1] }
 0x3ab   :  { %v3423_v25 = vrot.slane %v3421_v55, 7  ;;  %v3280_v36 = vadd.f32 %v3279_v2, %v10729_v41  ;;  %v4900_v60 = vunpack.c.l.b16 %v3972_v54  ;;  %v3906_v61 = vrot.slane %v3904_v63, 4  ;;  %v7433_v50 = vld [vmem:[#allocation3 + $0x70] sm:$0xf]  ;;  %v265_v22 = vld [vmem:[#allocation3 + $0x54] sm:$0x1] }
 0x3ac   :  { %v3896_v43 = vor.u32 %v3895_v46, %v3892_v17  ;;  %v3909_v57 = vrot.slane %v3907_v45, 5  ;;  %v3915_v1 = vrot.slane %v3913_v32, 5  ;;  %v4030_v13 = vshrl.u32 %v3601_v40, 16  ;;  %v3597_v54 = vld [vmem:[#allocation3 + $0x50] sm:$0xf] }
 0x3ad   :  { %v3426_v9 = vor.u32 %v3424_v52, %v3423_v25  ;;  %v3427_v7 = vrot.slane %v3423_v25, 4  ;;  %v3298_v27 = vmax.f32 %v3280_v36, 0.0  ;;  %v4912_v23 = vpack.c.b16 %v4900_v60, %v4899_v15  ;;  %v3561_v52 = vld [vmem:[#allocation3 + $0x88] sm:$0xf]  ;;  %v3564_v46 = vld [vmem:[#allocation3 + $0x8c] sm:$0x1] }
 0x3ae   :  { %v3897_v38 = vrot.slane %v3896_v43, 4  ;;  %v3910_v12 = vor.u32 %v3909_v57, %v3906_v61  ;;  %v4032_v24 = vrot.slane %v4030_v13, 4  ;;  %v4033_v29 = vshll.u32 %v3601_v40, 16  ;;  %v3598_v61 = vld [vmem:[#allocation3 + $0x58] sm:$0xf] }
 0x3af   :  { %v3556_v62 = vsel %vm8070_vm7, %v3426_v9, %v3555_v10  ;;  %v3559_v41 = vsel %vm7990_vm3, %v3427_v7, %v3558_v14  ;;  %v3314_v16 = vpack.c.bf16 %v3298_v27, %v3298_v27  ;;  %v7628_v33 = vld [vmem:[#allocation3 + $0x74] sm:$0xf0]  ;;  %v4039_v59 = vshll.u32 %v3857_v21, 16  ;;  %v3593_v27 = vld [vmem:[#allocation3 + $0x20] sm:$0xf] }
 0x3b0   :  { %v3602_v20 = vld [vmem:[#allocation3 + $0x78] sm:$0xf]  ;;  %3557 = vst [vmem:[#allocation3 + $0x80] sm:$0xf] %v3556_v62  ;;  %v7434_v3 = vor.u32 %v7628_v33, %v7433_v50  ;;  %v3902_v19 = vsel %vm8130_vm13, %v3897_v38, %v3901_v42  ;;  %v3911_v47 = vrot.slane %v3910_v12, 4  ;;  %v4035_v4 = vrot.slane %v4033_v29, 5 }
 0x3b1   :  { %v3858_v51 = vld [vmem:[#allocation3 + $0x7c] sm:$0x1]  ;;  %3560 = vst [vmem:[#allocation3 + $0x84] sm:$0x1] %v3559_v41  ;;  %v3429_v26 = vshrl.u32 %v3314_v16, 16  ;;  %v3432_v34 = vshll.u32 %v3314_v16, 16  ;;  %v4895_v15 = vunpack.c.l.b16 %v3902_v19 }
 0x3b2   :  { %v4041_v5 = vrot.slane %v4039_v59, 5  ;;  %4923 = vrot.lane.b32.xlu2 %v4912_v23, %s7914_s15  ;;  %v3281_v40 = vpop.f32.mrf.mxu3  ;;  %4889 = vrot.lane.b32.xlu0 %v7434_v3, %s7906_s29  ;;  %v3916_v37 = vsel %vm8130_vm13, %v3911_v47, %v3915_v1  ;;  %v4036_v17 = vor.u32 %v4035_v4, %v4032_v24  ;;  %v4044_v0 = vshrl.u32 %v3602_v20, 16  ;;  %v3854_v1 = vld [vmem:[#allocation3 + $0x5c] sm:$0x1]  ;;  %v3567_v41 = vld [vmem:[#allocation3 + $0x90] sm:$0xf] }
 0x3b3   :  { %v4047_v8 = vshll.u32 %v3602_v20, 16  ;;  %v3431_v55 = vrot.slane %v3429_v26, 7  ;;  %v3282_v63 = vadd.f32 %v3281_v40, %v10736_v49  ;;  %v4896_v45 = vunpack.c.l.b16 %v3916_v37  ;;  %v3570_v16 = vld [vmem:[#allocation3 + $0x94] sm:$0x1]  ;;  %v3594_v4 = vld [vmem:[#allocation3 + $0x28] sm:$0xf] }
 0x3b4   :  { %v4053_v2 = vshll.u32 %v3858_v51, 16  ;;  %v4037_v42 = vrot.slane %v4036_v17, 4  ;;  %v4046_v32 = vrot.slane %v4044_v0, 4  ;;  %v266_v10 = vsel %vm7998_vm5, 0, %v265_v22  ;;  %v3849_v26 = vld [vmem:[#allocation3 + $0x24] sm:$0x1]  ;;  %vm12843_vm5 = vmmov %vm12833_vm1 }
 0x3b5   :  { %v4049_v25 = vrot.slane %v4047_v8, 5  ;;  %v3434_v14 = vor.u32 %v3432_v34, %v3431_v55  ;;  %v3435_v36 = vrot.slane %v3431_v55, 4  ;;  %v3299_v60 = vmax.f32 %v3282_v63, 0.0  ;;  %267 = vst [vmem:[#allocation3 + $0x54] sm:$0x1] %v266_v10  ;;  %vm12852_vm1 = vmmov %vm12850_vm0 }
 0x3b6   :  { %v4910_v43 = vpack.c.b16 %v4896_v45, %v4895_v15  ;;  %v4042_v57 = vsel %vm8130_vm13, %v4037_v42, %v4041_v5  ;;  %v3974_v21 = vshrl.u32 %v3597_v54, 16  ;;  %v4055_v7 = vrot.slane %v4053_v2, 5  ;;  %v3850_v63 = vld [vmem:[#allocation3 + $0x2c] sm:$0x1] }
 0x3b7   :  { %v4050_v49 = vor.u32 %v4049_v25, %v4046_v32  ;;  %v3562_v13 = vsel %vm8070_vm7, %v3434_v14, %v3561_v52  ;;  %v3565_v9 = vsel %vm7990_vm3, %v3435_v36, %v3564_v46  ;;  %v3315_v58 = vpack.c.bf16 %v3299_v60, %v3299_v60  ;;  %v7437_v55 = vld [vmem:[#allocation3 + $0x80] sm:$0xf] }
 0x3b8   :  { %3563 = vst [vmem:[#allocation3 + $0x88] sm:$0xf] %v3562_v13  ;;  %v3976_v50 = vrot.slane %v3974_v21, 4  ;;  %v3977_v38 = vshll.u32 %v3597_v54, 16  ;;  %v3988_v12 = vshrl.u32 %v3598_v61, 16  ;;  %v3991_v29 = vshll.u32 %v3598_v61, 16 }
 0x3b9   :  { %v4051_v23 = vrot.slane %v4050_v49, 4  ;;  %3566 = vst [vmem:[#allocation3 + $0x8c] sm:$0x1] %v3565_v9  ;;  %v3437_v24 = vshrl.u32 %v3315_v58, 16  ;;  %v3997_v62 = vshll.u32 %v3854_v1, 16  ;;  %v4905_v20 = vunpack.c.l.b16 %v4042_v57 }
 0x3ba   :  { %4919 = vrot.lane.b32.xlu0 %v4910_v43, %s7914_s15  ;;  %v3979_v59 = vrot.slane %v3977_v38, 5  ;;  %v3990_v22 = vrot.slane %v3988_v12, 4  ;;  %v3440_v19 = vshll.u32 %v3315_v58, 16  ;;  %v3993_v51 = vrot.slane %v3991_v29, 5  ;;  %v7639_v54 = vld [vmem:[#allocation3 + $0x1c] sm:$0xf0] }
 0x3bb   :  { %v4056_v33 = vsel %vm8130_vm13, %v4051_v23, %v4055_v7  ;;  %v3439_v3 = vrot.slane %v3437_v24, 7  ;;  %v3999_v5 = vrot.slane %v3997_v62, 5  ;;  %v3918_v40 = vshrl.u32 %v3593_v27, 16  ;;  %v3603_v32 = vld [vmem:[#allocation3 + $0x80] sm:$0xf] }
 0x3bc   :  { %v4906_v47 = vunpack.c.l.b16 %v4056_v33  ;;  %v3853_v34 = vld [vmem:[#allocation3 + $0x54] sm:$0x1]  ;;  %v3980_v15 = vor.u32 %v3979_v59, %v3976_v50  ;;  %v3921_v37 = vshll.u32 %v3593_v27, 16  ;;  %v3994_v2 = vor.u32 %v3993_v51, %v3990_v22  ;;  %v3859_v61 = vld [vmem:[#allocation3 + $0x84] sm:$0x1] }
 0x3bd   :  { %v3442_v17 = vor.u32 %v3440_v19, %v3439_v3  ;;  %v3443_v0 = vrot.slane %v3439_v3, 4  ;;  %v3983_v52 = vshll.u32 %v3853_v34, 16  ;;  %v3920_v46 = vrot.slane %v3918_v40, 4  ;;  %v7445_v27 = vld [vmem:[#allocation3 + $0x18] sm:$0xf] }
 0x3be   :  { %v4915_v8 = vpack.c.b16 %v4906_v47, %v4905_v20  ;;  %v3981_v45 = vrot.slane %v3980_v15, 4  ;;  %v3923_v42 = vrot.slane %v3921_v37, 5  ;;  %v3927_v60 = vshll.u32 %v3849_v26, 16  ;;  %v3599_v62 = vld [vmem:[#allocation3 + $0x60] sm:$0xf] }
 0x3bf   :  { %v3568_v25 = vsel %vm8070_vm7, %v3442_v17, %v3567_v41  ;;  %v3571_v10 = vsel %vm7990_vm3, %v3443_v0, %v3570_v16  ;;  %v7629_v14 = vld [vmem:[#allocation3 + $0x84] sm:$0xf0]  ;;  %v3985_v36 = vrot.slane %v3983_v52, 5  ;;  %v3995_v57 = vrot.slane %v3994_v2, 4  ;;  %v3855_v37 = vld [vmem:[#allocation3 + $0x64] sm:$0x1] }
 0x3c0   :  { %4929 = vrot.lane.b32.xlu2 %v4915_v8, %s7914_s15  ;;  %3569 = vst [vmem:[#allocation3 + $0x90] sm:$0xf] %v3568_v25  ;;  %v7438_v43 = vor.u32 %v7629_v14, %v7437_v55  ;;  %v3924_v49 = vor.u32 %v3923_v42, %v3920_v46  ;;  %v3932_v1 = vshrl.u32 %v3594_v4, 16  ;;  %v3604_v21 = vld [vmem:[#allocation3 + $0x88] sm:$0xf]  ;;  %v3935_v13 = vshll.u32 %v3594_v4, 16 }
 0x3c1   :  { %3572 = vst [vmem:[#allocation3 + $0x94] sm:$0x1] %v3571_v10  ;;  %v3986_v31 = vsel %vm8130_vm13, %v3981_v45, %v3985_v36  ;;  %v3941_v9 = vshll.u32 %v3850_v63, 16  ;;  %v4058_v11 = vshrl.u32 %v3603_v32, 16  ;;  %v4000_v58 = vsel %vm8130_vm13, %v3995_v57, %v3999_v5  ;;  %v3860_v41 = vld [vmem:[#allocation3 + $0x8c] sm:$0x1] }
 0x3c2   :  { %4891 = vrot.lane.b32.xlu1 %v7438_v43, %s7906_s29  ;;  %v4901_v7 = vunpack.c.l.b16 %v3986_v31  ;;  %v3925_v23 = vrot.slane %v3924_v49, 4  ;;  %v3934_v50 = vrot.slane %v3932_v1, 4  ;;  %v4902_v38 = vunpack.c.l.b16 %v4000_v58  ;;  %v3600_v34 = vld [vmem:[#allocation3 + $0x68] sm:$0xf]  ;;  %v7642_v2 = vld [vmem:[#allocation3 + $0x5c] sm:$0xf0] }
 0x3c3   :  { %v10793_v12 = vor.u32 %v7639_v54, %v7445_v27  ;;  %v3929_v24 = vrot.slane %v3927_v60, 5  ;;  %v3937_v29 = vrot.slane %v3935_v13, 5  ;;  %v4060_v16 = vrot.slane %v4058_v11, 4  ;;  %v3856_v25 = vld [vmem:[#allocation3 + $0x6c] sm:$0x1] }
 0x3c4   :  { %v4061_v33 = vshll.u32 %v3603_v32, 16  ;;  %v4067_v20 = vshll.u32 %v3859_v61, 16  ;;  %v4072_v59 = vshrl.u32 %v3604_v21, 16  ;;  %v4913_v22 = vpack.c.b16 %v4902_v38, %v4901_v7  ;;  %v7457_v1 = vld [vmem:[#allocation3 + $0x58] sm:$0xf] }
 0x3c5   :  { %v3930_v3 = vsel %vm8130_vm13, %v3925_v23, %v3929_v24  ;;  %v3938_v19 = vor.u32 %v3937_v29, %v3934_v50  ;;  %v4075_v47 = vshll.u32 %v3604_v21, 16  ;;  %v3943_v51 = vrot.slane %v3941_v9, 5  ;;  %v7640_v31 = vld [vmem:[#allocation3 + $0x2c] sm:$0xf0]  ;;  %v4105_v13 = vld [vmem:[#allocation3 + $0x28] sm:$0xf] }
 0x3c6   :  { %v4063_v4 = vrot.slane %v4061_v33, 5  ;;  %v4074_v26 = vrot.slane %v4072_v59, 4  ;;  %4925 = vrot.lane.b32.xlu0 %v4913_v22, %s7914_s15  ;;  %v4081_v40 = vshll.u32 %v3860_v41, 16  ;;  %v4002_v17 = vshrl.u32 %v3599_v62, 16  ;;  %v4106_v27 = vld [vmem:[#allocation3 + $0x30] sm:$0xf] }
 0x3c7   :  { %v3939_v15 = vrot.slane %v3938_v19, 4  ;;  %v4077_v5 = vrot.slane %v4075_v47, 5  ;;  %v4897_v0 = vunpack.c.l.b16 %v3930_v3  ;;  %v4069_v55 = vrot.slane %v4067_v20, 5  ;;  %v4361_v23 = vld [vmem:[#allocation3 + $0x2c] sm:$0x1] }
 0x3c8   :  { %4975 = vrot.lane.b32.xlu2 %v10793_v12, %s7910_s3  ;;  %v4064_v8 = vor.u32 %v4063_v4, %v4060_v16  ;;  %v4005_v52 = vshll.u32 %v3599_v62, 16  ;;  %v4004_v54 = vrot.slane %v4002_v17, 4  ;;  %v4016_v46 = vshrl.u32 %v3600_v34, 16  ;;  %v7449_v62 = vld [vmem:[#allocation3 + $0x28] sm:$0xf] }
 0x3c9   :  { %v3944_v63 = vsel %vm8130_vm13, %v3939_v15, %v3943_v51  ;;  %v4078_v45 = vor.u32 %v4077_v5, %v4074_v26  ;;  %v4011_v14 = vshll.u32 %v3855_v37, 16  ;;  %v4083_v60 = vrot.slane %v4081_v40, 5  ;;  %v7645_v33 = vld [vmem:[#allocation3 + $0x8c] sm:$0xf0]  ;;  %v4362_v19 = vld [vmem:[#allocation3 + $0x34] sm:$0x1] }
 0x3ca   :  { %v4898_v42 = vunpack.c.l.b16 %v3944_v63  ;;  %v4065_v32 = vrot.slane %v4064_v8, 4  ;;  %v4007_v10 = vrot.slane %v4005_v52, 5  ;;  %v4018_v61 = vrot.slane %v4016_v46, 4  ;;  %v4101_v4 = vld [vmem:[#allocation3 + $0x8] sm:$0xf] }
 0x3cb   :  { %v4079_v36 = vrot.slane %v4078_v45, 4  ;;  %v4019_v43 = vshll.u32 %v3600_v34, 16  ;;  %v10806_v11 = vor.u32 %v7642_v2, %v7457_v1  ;;  %v4025_v7 = vshll.u32 %v3856_v25, 16  ;;  %v7469_v15 = vld [vmem:[#allocation3 + $0x88] sm:$0xf] }
 0x3cc   :  { %v4911_v57 = vpack.c.b16 %v4898_v42, %v4897_v0  ;;  %v4070_v49 = vsel %vm8130_vm13, %v4065_v32, %v4069_v55  ;;  %v4008_v21 = vor.u32 %v4007_v10, %v4004_v54  ;;  %v4013_v29 = vrot.slane %v4011_v14, 5  ;;  %v4102_v55 = vld [vmem:[#allocation3 + $0x10] sm:$0xf]  ;;  %v4357_v52 = vld [vmem:[#allocation3 + $0xc] sm:$0x1] }
 0x3cd   :  { %v4084_v9 = vsel %vm8130_vm13, %v4079_v36, %v4083_v60  ;;  %v4021_v58 = vrot.slane %v4019_v43, 5  ;;  %v4907_v50 = vunpack.c.l.b16 %v4070_v49  ;;  %v10811_v16 = vor.u32 %v7640_v31, %v7449_v62  ;;  %v7441_v42 = vld [vmem:[#allocation3 + $0x8] sm:$0xf]  ;;  %v7638_v32 = vld [vmem:[#allocation3 + $0xc] sm:$0xf0] }
 0x3ce   :  { %4921 = vrot.lane.b32.xlu1 %v4911_v57, %s7914_s15  ;;  %v4908_v38 = vunpack.c.l.b16 %v4084_v9  ;;  %v4009_v24 = vrot.slane %v4008_v21, 4  ;;  %v4430_v20 = vshrl.u32 %v4105_v13, 16  ;;  %v4433_v59 = vshll.u32 %v4105_v13, 16  ;;  %v4358_v60 = vld [vmem:[#allocation3 + $0x14] sm:$0x1] }
 0x3cf   :  { %v4022_v41 = vor.u32 %v4021_v58, %v4018_v61  ;;  %v4439_v47 = vshll.u32 %v4361_v23, 16  ;;  %v4444_v51 = vshrl.u32 %v4106_v27, 16  ;;  %v4027_v34 = vrot.slane %v4025_v7, 5  ;;  %v7643_v1 = vld [vmem:[#allocation3 + $0x6c] sm:$0xf0] }
 0x3d0   :  { %4981 = vrot.lane.b32.xlu2 %v10806_v11, %s7910_s3  ;;  %v4916_v22 = vpack.c.b16 %v4908_v38, %v4907_v50  ;;  %v4014_v3 = vsel %vm8130_vm13, %v4009_v24, %v4013_v29  ;;  %v4432_v5 = vrot.slane %v4430_v20, 4  ;;  %v4435_v40 = vrot.slane %v4433_v59, 5  ;;  %v4107_v9 = vld [vmem:[#allocation3 + $0x38] sm:$0xf]  ;;  %v7461_v7 = vld [vmem:[#allocation3 + $0x68] sm:$0xf] }
 0x3d1   :  { %v4023_v26 = vrot.slane %v4022_v41, 4  ;;  %v4903_v37 = vunpack.c.l.b16 %v4014_v3  ;;  %v10816_v17 = vor.u32 %v7645_v33, %v7469_v15  ;;  %v4446_v0 = vrot.slane %v4444_v51, 4  ;;  %v4108_v41 = vld [vmem:[#allocation3 + $0x40] sm:$0xf]  ;;  %v4363_v59 = vld [vmem:[#allocation3 + $0x3c] sm:$0x1] }
 0x3d2   :  { %4931 = vrot.lane.b32.xlu0 %v4916_v22, %s7914_s15  ;;  %v4447_v8 = vshll.u32 %v4106_v27, 16  ;;  %v4436_v45 = vor.u32 %v4435_v40, %v4432_v5  ;;  %v4453_v2 = vshll.u32 %v4362_v19, 16  ;;  %v4374_v54 = vshrl.u32 %v4101_v4, 16  ;;  %v7641_v51 = vld [vmem:[#allocation3 + $0x3c] sm:$0xf0] }
 0x3d3   :  { %v4028_v63 = vsel %vm8130_vm13, %v4023_v26, %v4027_v34  ;;  %v4441_v25 = vrot.slane %v4439_v47, 5  ;;  %v4377_v14 = vshll.u32 %v4101_v4, 16  ;;  %v4383_v43 = vshll.u32 %v4357_v52, 16  ;;  %v4364_v34 = vld [vmem:[#allocation3 + $0x44] sm:$0x1] }
 0x3d4   :  { %v4904_v46 = vunpack.c.l.b16 %v4028_v63  ;;  %v4449_v10 = vrot.slane %v4447_v8, 5  ;;  %v4437_v36 = vrot.slane %v4436_v45, 4  ;;  %v4376_v61 = vrot.slane %v4374_v54, 4  ;;  %v7453_v8 = vld [vmem:[#allocation3 + $0x38] sm:$0xf] }
 0x3d5   :  { %v4388_v57 = vshrl.u32 %v4102_v55, 16  ;;  %v4379_v31 = vrot.slane %v4377_v14, 5  ;;  %v4391_v13 = vshll.u32 %v4102_v55, 16  ;;  %v10822_v58 = vor.u32 %v7638_v32, %v7441_v42  ;;  %v7644_v63 = vld [vmem:[#allocation3 + $0x7c] sm:$0xf0] }
 0x3d6   :  { %v4914_v49 = vpack.c.b16 %v4904_v46, %v4903_v37  ;;  %v4450_v21 = vor.u32 %v4449_v10, %v4446_v0  ;;  %v4442_v27 = vsel %vm8130_vm13, %v4437_v36, %v4441_v25  ;;  %v4455_v23 = vrot.slane %v4453_v2, 5  ;;  %v4115_v0 = vld [vmem:[#allocation3 + $0x88] sm:$0xf]  ;;  %v7465_v42 = vld [vmem:[#allocation3 + $0x78] sm:$0xf] }
 0x3d7   :  { %v4390_v50 = vrot.slane %v4388_v57, 4  ;;  %v4380_v24 = vor.u32 %v4379_v31, %v4376_v61  ;;  %v4393_v29 = vrot.slane %v4391_v13, 5  ;;  %v4397_v62 = vshll.u32 %v4358_v60, 16  ;;  %v4116_v10 = vld [vmem:[#allocation3 + $0x90] sm:$0xf] }
 0x3d8   :  { %4987 = vrot.lane.b32.xlu2 %v10816_v17, %s7910_s3  ;;  %4927 = vrot.lane.b32.xlu1 %v4914_v49, %s7914_s15  ;;  %v4451_v38 = vrot.slane %v4450_v21, 4  ;;  %v10827_v33 = vor.u32 %v7643_v1, %v7461_v7  ;;  %v4385_v20 = vrot.slane %v4383_v43, 5  ;;  %v4458_v22 = vshrl.u32 %v4107_v9, 16  ;;  %v4371_v61 = vld [vmem:[#allocation3 + $0x8c] sm:$0x1] }
 0x3d9   :  { %v4461_v3 = vshll.u32 %v4107_v9, 16  ;;  %v4993_v47 = vunpack.c.l.b16 %v4442_v27  ;;  %v4381_v4 = vrot.slane %v4380_v24, 4  ;;  %v4394_v26 = vor.u32 %v4393_v29, %v4390_v50  ;;  %v4372_v9 = vld [vmem:[#allocation3 + $0x94] sm:$0x1] }
 0x3da   :  { %4977 = vrot.lane.b32.xlu0 %v10811_v16, %s7910_s3  ;;  %v4456_v19 = vsel %vm8130_vm13, %v4451_v38, %v4455_v23  ;;  %v4460_v5 = vrot.slane %v4458_v22, 4  ;;  %v4472_v37 = vshrl.u32 %v4108_v41, 16  ;;  %v4399_v52 = vrot.slane %v4397_v62, 5  ;;  %v4103_v23 = vld [vmem:[#allocation3 + $0x18] sm:$0xf] }
 0x3db   :  { %v4994_v15 = vunpack.c.l.b16 %v4456_v19  ;;  %v4463_v40 = vrot.slane %v4461_v3, 5  ;;  %v4395_v55 = vrot.slane %v4394_v26, 4  ;;  %v4467_v45 = vshll.u32 %v4363_v59, 16  ;;  %v4359_v22 = vld [vmem:[#allocation3 + $0x1c] sm:$0x1] }
 0x3dc   :  { %v4475_v2 = vshll.u32 %v4108_v41, 16  ;;  %v4386_v46 = vsel %vm8130_vm13, %v4381_v4, %v4385_v20  ;;  %v4474_v25 = vrot.slane %v4472_v37, 4  ;;  %v4481_v60 = vshll.u32 %v4364_v34, 16 }
 0x3dd   :  { %v10833_v54 = vpack.c.b16 %v4994_v15, %v4993_v47  ;;  %v4464_v32 = vor.u32 %v4463_v40, %v4460_v5  ;;  %v4400_v14 = vsel %vm8130_vm13, %v4395_v55, %v4399_v52  ;;  %v4570_v43 = vshrl.u32 %v4115_v0, 16  ;;  %v10853_v52 = vpop.permute.xlu2 %4835 }
 0x3de   :  { %v4477_v36 = vrot.slane %v4475_v2, 5  ;;  %v10841_v57 = vor.u32 %v7641_v51, %v7453_v8  ;;  %v10843_v49 = vor.u32 %v7644_v63, %v7465_v42  ;;  %v4573_v21 = vshll.u32 %v4115_v0, 16  ;;  %v4104_v51 = vld [vmem:[#allocation3 + $0x20] sm:$0xf]  ;;  %v4360_v0 = vld [vmem:[#allocation3 + $0x24] sm:$0x1] }
 0x3df   :  { %v4465_v1 = vrot.slane %v4464_v32, 4  ;;  %v4990_v31 = vunpack.c.l.b16 %v4400_v14  ;;  %v4572_v7 = vrot.slane %v4570_v43, 4  ;;  %v4584_v27 = vshrl.u32 %v4116_v10, 16  ;;  %v4111_v42 = vld [vmem:[#allocation3 + $0x68] sm:$0xf] }
 0x3e0   :  { %5017 = vrot.lane.b32.xlu2 %v10833_v54, %s7909_s10  ;;  %4973 = vrot.lane.b32.xlu1 %v10822_v58, %s7910_s3  ;;  %v4478_v13 = vor.u32 %v4477_v36, %v4474_v25  ;;  %v4989_v50 = vunpack.c.l.b16 %v4386_v46  ;;  %v4469_v38 = vrot.slane %v4467_v45, 5  ;;  %v4575_v24 = vrot.slane %v4573_v21, 5  ;;  %v4112_v36 = vld [vmem:[#allocation3 + $0x70] sm:$0xf] }
 0x3e1   :  { %v4579_v29 = vshll.u32 %v4371_v61, 16  ;;  %v4483_v41 = vrot.slane %v4481_v60, 5  ;;  %v4586_v20 = vrot.slane %v4584_v27, 4  ;;  %v4587_v59 = vshll.u32 %v4116_v10, 16 }
 0x3e2   :  { %4983 = vrot.lane.b32.xlu0 %v10827_v33, %s7910_s3  ;;  %v4479_v62 = vrot.slane %v4478_v13, 4  ;;  %v4470_v3 = vsel %vm8130_vm13, %v4465_v1, %v4469_v38  ;;  %v4576_v19 = vor.u32 %v4575_v24, %v4572_v7  ;;  %v4593_v47 = vshll.u32 %v4372_v9, 16  ;;  %v4367_v13 = vld [vmem:[#allocation3 + $0x6c] sm:$0x1] }
 0x3e3   :  { %v4402_v4 = vshrl.u32 %v4103_v23, 16  ;;  %v5005_v26 = vpack.c.b16 %v4990_v31, %v4989_v50  ;;  %v4589_v15 = vrot.slane %v4587_v59, 5  ;;  %v4405_v5 = vshll.u32 %v4103_v23, 16  ;;  %v4109_v59 = vld [vmem:[#allocation3 + $0x58] sm:$0xf] }
 0x3e4   :  { %v4484_v34 = vsel %vm8130_vm13, %v4479_v62, %v4483_v41  ;;  %v4577_v40 = vrot.slane %v4576_v19, 4  ;;  %v4581_v37 = vrot.slane %v4579_v29, 5  ;;  %v4411_v55 = vshll.u32 %v4359_v22, 16  ;;  %v4368_v62 = vld [vmem:[#allocation3 + $0x74] sm:$0x1] }
 0x3e5   :  { %v4404_v8 = vrot.slane %v4402_v4, 4  ;;  %v4995_v63 = vunpack.c.l.b16 %v4470_v3  ;;  %v4590_v45 = vor.u32 %v4589_v15, %v4586_v20  ;;  %v4407_v2 = vrot.slane %v4405_v5, 5  ;;  %v4110_v15 = vld [vmem:[#allocation3 + $0x60] sm:$0xf] }
 0x3e6   :  { %v4416_v46 = vshrl.u32 %v4104_v51, 16  ;;  %v4996_v32 = vunpack.c.l.b16 %v4484_v34  ;;  %v4582_v25 = vsel %vm8130_vm13, %v4577_v40, %v4581_v37  ;;  %v4595_v10 = vrot.slane %v4593_v47, 5 }
 0x3e7   :  { %v4419_v14 = vshll.u32 %v4104_v51, 16  ;;  %v4591_v60 = vrot.slane %v4590_v45, 4  ;;  %v4408_v61 = vor.u32 %v4407_v2, %v4404_v8  ;;  %v4425_v1 = vshll.u32 %v4360_v0, 16  ;;  %v4365_v0 = vld [vmem:[#allocation3 + $0x5c] sm:$0x1] }
 0x3e8   :  { %5277 = vrot.lane.b32.xlu2 %v5005_v26, %s7903_s26  ;;  %4979 = vrot.lane.b32.xlu1 %v10841_v57, %s7910_s3  ;;  %v4418_v43 = vrot.slane %v4416_v46, 4  ;;  %v4413_v21 = vrot.slane %v4411_v55, 5  ;;  %v4514_v9 = vshrl.u32 %v4111_v42, 16  ;;  %v4517_v7 = vshll.u32 %v4111_v42, 16 }
 0x3e9   :  { %v4421_v31 = vrot.slane %v4419_v14, 5  ;;  %v4596_v27 = vsel %vm8130_vm13, %v4591_v60, %v4595_v10  ;;  %v5003_v23 = vunpack.c.l.b16 %v4582_v25  ;;  %v4409_v50 = vrot.slane %v4408_v61, 4  ;;  %v4366_v61 = vld [vmem:[#allocation3 + $0x64] sm:$0x1] }
 0x3ea   :  { %5013 = vrot.lane.b32.xlu0 %v5005_v26, %s7909_s10  ;;  %v4528_v38 = vshrl.u32 %v4112_v36, 16  ;;  %v5004_v24 = vunpack.c.l.b16 %v4596_v27  ;;  %v4516_v41 = vrot.slane %v4514_v9, 4  ;;  %v4519_v20 = vrot.slane %v4517_v7, 5 }
 0x3eb   :  { %v4422_v29 = vor.u32 %v4421_v31, %v4418_v43  ;;  %v4427_v22 = vrot.slane %v4425_v1, 5  ;;  %v4523_v3 = vshll.u32 %v4367_v13, 16  ;;  %v4531_v47 = vshll.u32 %v4112_v36, 16  ;;  %v4113_v36 = vld [vmem:[#allocation3 + $0x78] sm:$0xf] }
 0x3ec   :  { %v4530_v19 = vrot.slane %v4528_v38, 4  ;;  %v10863_v51 = vpack.c.b16 %v5004_v24, %v5003_v23  ;;  %v4414_v4 = vsel %vm8130_vm13, %v4409_v50, %v4413_v21  ;;  %v4520_v34 = vor.u32 %v4519_v20, %v4516_v41  ;;  %v10883_v23 = vpop.permute.xlu1 %4833 }
 0x3ed   :  { %v4423_v26 = vrot.slane %v4422_v29, 4  ;;  %v4533_v40 = vrot.slane %v4531_v47, 5  ;;  %v4537_v37 = vshll.u32 %v4368_v62, 16  ;;  %v4486_v8 = vshrl.u32 %v4109_v59, 16  ;;  %v4114_v29 = vld [vmem:[#allocation3 + $0x80] sm:$0xf] }
 0x3ee   :  { %v4489_v55 = vshll.u32 %v4109_v59, 16  ;;  %vm12842_vm3 = vcmask 588800   ;;  %v4521_v46 = vrot.slane %v4520_v34, 4  ;;  %v10877_v42 = vpack.c.b16 %v4996_v32, %v4995_v63 }
 0x3ef   :  { %v4428_v2 = vsel %vm8130_vm13, %v4423_v26, %v4427_v22  ;;  %v4525_v25 = vrot.slane %v4523_v3, 5  ;;  %v4534_v10 = vor.u32 %v4533_v40, %v4530_v19  ;;  %v4488_v14 = vrot.slane %v4486_v8, 4  ;;  %v4369_v8 = vld [vmem:[#allocation3 + $0x7c] sm:$0x1]  ;;  %vm12844_vm7 = vmmov %vm12842_vm3 }
 0x3f0   :  { %v4882_v5 = vpop.permute.xlu2 %4881  ;;  %5027 = vrot.lane.b32.xlu2 %v10863_v51, %s7909_s10  ;;  %4985 = vrot.lane.b32.xlu1 %v10843_v49, %s7910_s3  ;;  %v4991_v60 = vunpack.c.l.b16 %v4414_v4  ;;  %v4491_v43 = vrot.slane %v4489_v55, 5  ;;  %v4495_v1 = vshll.u32 %v4365_v0, 16  ;;  %v4500_v21 = vshrl.u32 %v4110_v15, 16  ;;  %v4370_v4 = vld [vmem:[#allocation3 + $0x84] sm:$0x1]  ;;  %v4832_v55 = vpop.permute.xlu0 %4831  ;;  %vm12846_vm10 = vmmov %vm12842_vm3 }
 0x3f1   :  { %v10871_v45 = vsel %vm12842_vm3, %v10675_v39, %v4882_v5  ;;  %v4992_v39 = vunpack.c.l.b16 %v4428_v2  ;;  %v4535_v31 = vrot.slane %v4534_v10, 4  ;;  %v4539_v13 = vrot.slane %v4537_v37, 5  ;;  %vm12847_vm4 = vmmov %vm12842_vm3 }
 0x3f2   :  { %5019 = vrot.lane.b32.xlu0 %v10877_v42, %s7909_s10  ;;  %v4503_v9 = vshll.u32 %v4110_v15, 16  ;;  %v4526_v63 = vsel %vm8130_vm13, %v4521_v46, %v4525_v25  ;;  %v4492_v32 = vor.u32 %v4491_v43, %v4488_v14  ;;  %v4502_v7 = vrot.slane %v4500_v21, 4  ;;  %vm12849_vm11 = vmmov %vm12842_vm3 }
 0x3f3   :  { %v4542_v27 = vshrl.u32 %v4113_v36, 16  ;;  %v4540_v50 = vsel %vm8130_vm13, %v4535_v31, %v4539_v13  ;;  %v4509_v24 = vshll.u32 %v4366_v61, 16  ;;  %v4545_v62 = vshll.u32 %v4113_v36, 16  ;;  %vm12851_vm2 = vmmov %vm12842_vm3 }
 0x3f4   :  { %v4505_v38 = vrot.slane %v4503_v9, 5  ;;  %v5000_v41 = vunpack.c.l.b16 %v4540_v50  ;;  %v4493_v20 = vrot.slane %v4492_v32, 4  ;;  %v4497_v59 = vrot.slane %v4495_v1, 5  ;;  %vm12853_vm3 = vmmov %vm12851_vm2 }
 0x3f5   :  { %v4544_v22 = vrot.slane %v4542_v27, 4  ;;  %v5006_v3 = vpack.c.b16 %v4992_v39, %v4991_v60  ;;  %v4999_v19 = vunpack.c.l.b16 %v4526_v63  ;;  %v4547_v26 = vrot.slane %v4545_v62, 5 }
 0x3f6   :  { %v4506_v47 = vor.u32 %v4505_v38, %v4502_v7  ;;  %v4556_v34 = vshrl.u32 %v4114_v29, 16  ;;  %v4559_v15 = vshll.u32 %v4114_v29, 16  ;;  %v4498_v40 = vsel %vm8130_vm13, %v4493_v20, %v4497_v59 }
 0x3f7   :  { %v10890_v5 = vpack.c.b16 %v5000_v41, %v4999_v19  ;;  %v4511_v0 = vrot.slane %v4509_v24, 5  ;;  %v4548_v2 = vor.u32 %v4547_v26, %v4544_v22  ;;  %v4565_v10 = vshll.u32 %v4370_v4, 16  ;;  %v7647_v26 = vld [vmem:[%s12175_s6 + $0x8] sm:$0xff] }
 0x3f8   :  { %5031 = vrot.lane.b32.xlu2 %v10793_v12, %s7901_s24  ;;  %5015 = vrot.lane.b32.xlu1 %v5006_v3, %s7909_s10  ;;  %v4507_v37 = vrot.slane %v4506_v47, 4  ;;  %v4558_v46 = vrot.slane %v4556_v34, 4  ;;  %v4561_v25 = vrot.slane %v4559_v15, 5  ;;  %v4551_v36 = vshll.u32 %v4369_v8, 16  ;;  %v10900_v43 = vpop.permute.xlu1 %4879 }
 0x3f9   :  { %v5168_v61 = vsel %vm12843_vm5, %v10664_v48, %v4832_v55  ;;  %v4997_v1 = vunpack.c.l.b16 %v4498_v40  ;;  %v4549_v31 = vrot.slane %v4548_v2, 4  ;;  %v4567_v9 = vrot.slane %v4565_v10, 5  ;;  %v4878_v48 = vpop.permute.xlu0 %4877  ;;  %vm12854_vm5 = vmmov %vm12848_vm8 }
 0x3fa   :  { %5023 = vrot.lane.b32.xlu0 %v10890_v5, %s7909_s10  ;;  %v4512_v12 = vsel %vm8130_vm13, %v4507_v37, %v4511_v0  ;;  %v4562_v60 = vor.u32 %v4561_v25, %v4558_v46  ;;  %v4553_v32 = vrot.slane %v4551_v36, 5  ;;  %v5158_v38 = vsel %vm12845_vm12, %v10509_v30, %v10683_v56  ;;  %v7653_v56 = vld [vmem:[%s12175_s6 + $0x38] sm:$0xff]  ;;  %vm12856_vm12 = vmmov %vm12854_vm5 }
 0x3fb   :  { %v4998_v14 = vunpack.c.l.b16 %v4512_v12  ;;  %5473 = vmatpush.bf16.msrb.mxu0 %v7653_v56 }
 0x3fc   :  { %v4888_v21 = vpop.permute.xlu2 %4887  ;;  %v4563_v13 = vrot.slane %v4562_v60, 4  ;;  %v4554_v27 = vsel %vm8130_vm13, %v4549_v31, %v4553_v32 }
 0x3fd   :  { %v10903_v39 = vsel %vm12844_vm7, %v5168_v61, %v4888_v21  ;;  %v10905_v63 = vpack.c.b16 %v4998_v14, %v4997_v1  ;;  %v5001_v24 = vunpack.c.l.b16 %v4554_v27  ;;  %vm12855_vm7 = vmmov %vm12854_vm5 }
 0x3fe   :  { %v4568_v7 = vsel %vm8130_vm13, %v4563_v13, %v4567_v9 }
 0x3ff   :  { %v5002_v50 = vunpack.c.l.b16 %v4568_v7 }
 0x400   :  { %5037 = vrot.lane.b32.xlu2 %v10806_v11, %s7901_s24  ;;  %5021 = vrot.lane.b32.xlu1 %v10905_v63, %s7909_s10  ;;  %v5174_v11 = vsel %vm12846_vm10, %v5158_v38, %v4878_v48  ;;  %vm12857_vm10 = vmmov %vm12851_vm2 }
 0x401   :  { %v10924_v59 = vpack.c.b16 %v5002_v50, %v5001_v24 }
 0x402   :  { %5029 = vrot.lane.b32.xlu0 %v10822_v58, %s7901_s24 }
 0x404   :  { %v4918_v62 = vpop.permute.xlu2 %4917 }
 0x405   :  { %v4886_v29 = vpop.permute.xlu1 %4885  ;;  %v5190_v20 = vsel %vm12848_vm8, %v5174_v11, %v4918_v62 }
 0x406   :  { %v5182_v41 = vsel %vm12847_vm4, %v10630_v6, %v4886_v29  ;;  %v10927_v22 = vsel %vm2426_vm6, %v5190_v20, %v4918_v62  ;;  %vm12858_vm4 = vmmov %vm12854_vm5 }
 0x407   :  { %vm12859_vm8 = vmmov %vm12858_vm4 }
 0x408   :  { %5041 = vrot.lane.b32.xlu2 %v10843_v49, %s7901_s24  ;;  %5025 = vrot.lane.b32.xlu1 %v10924_v59, %s7909_s10  ;;  %v7651_v49 = vld [vmem:[%s12175_s6 + $0x28] sm:$0xff] }
 0x40a   :  { %5033 = vrot.lane.b32.xlu0 %v10811_v16, %s7901_s24 }
 0x40c   :  { %v10945_v58 = vpop.permute.xlu2 %4923 }
 0x410   :  { %v4884_v30 = vpop.permute.xlu0 %4883  ;;  %5283 = vrot.lane.b32.xlu2 %v10877_v42, %s7903_s26  ;;  %5279 = vrot.lane.b32.xlu1 %v5006_v3, %s7903_s26  ;;  %v7649_v42 = vld [vmem:[%s12175_s6 + $0x18] sm:$0xff]  ;;  %v5170_v3 = vsel %vm12850_vm0, %v10566_v53, %v10883_v23  ;;  %v7646_v53 = vld [vmem:[%s12175_s6] sm:$0xff]  ;;  %vm12861_vm0 = vmmov %vm12858_vm4 }
 0x411   :  { %v10939_v6 = vsel %vm12849_vm11, %v10708_v18, %v4884_v30  ;;  %v7652_v18 = vld [vmem:[%s12175_s6 + $0x30] sm:$0xff]  ;;  %vm12860_vm11 = vcmask 326656  }
 0x412   :  { %5281 = vrot.lane.b32.xlu0 %v10833_v54, %s7903_s26  ;;  %5474 = vmatpush.bf16.msrb.mxu0 %v7652_v18  ;;  %v7650_v54 = vld [vmem:[%s12175_s6 + $0x20] sm:$0xff] }
 0x416   :  { %5475 = vmatpush.bf16.msrb.mxu0 %v7651_v49 }
 0x418   :  { %5035 = vrot.lane.b32.xlu1 %v10841_v57, %s7901_s24 }
 0x41a   :  { %v10954_v16 = vpop.permute.xlu2 %4929  ;;  %5476 = vmatpush.bf16.msrb.mxu0 %v7650_v54 }
 0x41e   :  { %5477 = vmatpush.bf16.msrb.mxu0 %v7649_v42 }
 0x420   :  { %5039 = vrot.lane.b32.xlu1 %v10827_v33, %s7901_s24  ;;  %v7648_v33 = vld [vmem:[%s12175_s6 + $0x10] sm:$0xff] }
 0x422   :  { %v10964_v57 = vpop.permute.xlu2 %4975  ;;  %5478 = vmatpush.bf16.msrb.mxu0 %v7648_v33 }
 0x424   :  { %v4890_v19 = vpop.permute.xlu0 %4889 }
 0x425   :  { %v10973_v47 = vsel %vm12851_vm2, %v5170_v3, %v4890_v19  ;;  %vm5469_vm2 = vcmask 1043456  }
 0x426   :  { %5479 = vmatpush.bf16.msrb.mxu0 %v7647_v26 }
 0x428   :  { %5043 = vrot.lane.b32.xlu1 %v10816_v17, %s7901_s24  ;;  %v5172_v17 = vsel %vm12852_vm1, %v10650_v28, %v10853_v52  ;;  %vm12862_vm1 = vmmov %vm12861_vm0 }
 0x42a   :  { %v10980_v4 = vpop.permute.xlu2 %4981  ;;  %5480 = vmatpush.bf16.msrb.mxu0 %v7646_v53 }
 0x42c   :  { %v4920_v23 = vpop.permute.xlu0 %4919 }
 0x430   :  { %5287 = vrot.lane.b32.xlu1 %v10890_v5, %s7903_s26 }
 0x432   :  { %v10990_v34 = vpop.permute.xlu2 %4987 }
 0x434   :  { %v4892_v15 = vpop.permute.xlu1 %4891 }
 0x435   :  { %v5188_v40 = vsel %vm12853_vm3, %v5172_v17, %v4892_v15  ;;  %vm12863_vm3 = vmmov %vm12860_vm11 }
 0x438   :  { %5291 = vrot.lane.b32.xlu1 %v10863_v51, %s7903_s26  ;;  %v4926_v37 = vpop.permute.xlu0 %4925 }
 0x439   :  { %v5198_v8 = vsel %vm12854_vm5, %v5182_v41, %v4926_v37  ;;  %vm12864_vm5 = vmmov %vm12863_vm3 }
 0x43a   :  { %v5018_v0 = vpop.permute.xlu2 %5017  ;;  %v11000_v55 = vsel %vm2426_vm6, %v5198_v8, %v4926_v37 }
 0x440   :  { %v4922_v5 = vpop.permute.xlu1 %4921 }
 0x442   :  { %v5278_v2 = vpop.permute.xlu2 %5277 }
 0x443   :  { %5309 = vrot.lane.b32.xlu0 %v5278_v2, %s7914_s15 }
 0x444   :  { %v4932_v46 = vpop.permute.xlu0 %4931 }
 0x445   :  { %v5204_v28 = vsel %vm12855_vm7, %v5188_v40, %v4932_v46  ;;  %vm12866_vm7 = vmmov %vm12863_vm3 }
 0x446   :  { %v11005_v52 = vsel %vm2426_vm6, %v5204_v28, %v4932_v46 }
 0x44a   :  { %v11007_v25 = vpop.permute.xlu2 %5027  ;;  %v4928_v51 = vpop.permute.xlu1 %4927 }
 0x44b   :  { %5285 = vrot.lane.b32.xlu0 %v10905_v63, %s7903_s26  ;;  %v5200_v10 = vsel %vm12856_vm12, %v10903_v39, %v4928_v51  ;;  %v5176_v39 = vsel %vm12857_vm10, %v10593_v44, %v10900_v43  ;;  %vm12867_vm12 = vcmask 457728   ;;  %vm12874_vm10 = vmmov %vm12863_vm3 }
 0x44c   :  { %v5210_v12 = vsel %vm2426_vm6, %v5200_v10, %v4928_v51  ;;  %v4978_v14 = vpop.permute.xlu0 %4977  ;;  %v5192_v32 = vsel %vm12858_vm4, %v5176_v39, %v4920_v23  ;;  %v7656_v51 = vld [vmem:[%s12175_s6 + $0x50] sm:$0xff]  ;;  %v5607_v39 = vld [vmem:[%s12177_s1 + $0x20] sm:$0xf]  ;;  %vm12877_vm4 = vmmov %vm12867_vm12 }
 0x44d   :  { %v5242_v36 = vsel %vm2223_vm14, %v4978_v14, %v5018_v0  ;;  %v5206_v27 = vsel %vm2426_vm6, %v5192_v32, %v4920_v23  ;;  %v5367_v23 = vld [vmem:[%s12175_s6 + $0x68] sm:$0xf]  ;;  %v5692_v32 = vshrl.u32 %v5607_v39, 16 }
 0x44e   :  { %v5255_v63 = vsel %vm2264_vm15, %v5242_v36, %v5018_v0  ;;  %v5217_v11 = vsel %vm2460_vm9, %v5206_v27, %v10964_v57  ;;  %v5425_v15 = vunpack.c.l.b16 %v5367_v23  ;;  %v5252_v36 = vsel %vm2223_vm14, %v10990_v34, %v11007_v25  ;;  %v5603_v23 = vld [vmem:[%s12177_s1] sm:$0xf] }
 0x450   :  { %v5439_v37 = vpack.c.b16 %v5425_v15, %v5425_v15 }
 0x452   :  { %v11015_v60 = vpop.permute.xlu2 %5031  ;;  %v4974_v61 = vpop.permute.xlu1 %4973  ;;  %v5471_v0 = vsel %vm5469_vm2, %v5439_v37, 0  ;;  %vm12900_vm2 = vmmov %vm12877_vm4 }
 0x453   :  { %5289 = vrot.lane.b32.xlu0 %v10924_v59, %s7903_s26  ;;  %v5214_v1 = vsel %vm2460_vm9, %v10927_v22, %v4974_v61  ;;  %v5194_v22 = vsel %vm12859_vm8, %v10871_v45, %v4922_v5  ;;  %v5196_v45 = vsel %vm12861_vm0, %v10939_v6, %v10945_v58  ;;  %v5202_v6 = vsel %vm12862_vm1, %v10973_v47, %v10954_v16  ;;  %v7657_v47 = vld [vmem:[%s12175_s6 + $0x58] sm:$0xff]  ;;  %vm12878_vm8 = vmmov %vm12861_vm0 }
 0x454   :  { %5481 = vmatmul.bf16.vlgmr.msrb.gmra.mxu0 %v5214_v1  ;;  %v4984_v21 = vpop.permute.xlu0 %4983  ;;  %v5207_v30 = vsel %vm2426_vm6, %v5194_v22, %v4922_v5  ;;  %v5208_v53 = vsel %vm2426_vm6, %v5196_v45, %v10945_v58  ;;  %5524 = vmatpush.bf16.msrb.mxu3 %v5471_v0  ;;  %v7658_v58 = vld [vmem:[%s12175_s6 + $0x60] sm:$0xff]  ;;  %v5211_v2 = vsel %vm2426_vm6, %v5202_v6, %v10954_v16  ;;  %vm12865_vm6 = vmmov %vm12863_vm3 }
 0x455   :  { %v5220_v18 = vsel %vm2460_vm9, %v5207_v30, %v4978_v14  ;;  %v5229_v40 = vsel %vm2460_vm9, %v5210_v12, %v4984_v21  ;;  %v5226_v12 = vsel %vm2460_vm9, %v11000_v55, %v10980_v4  ;;  %v7655_v14 = vld [vmem:[%s12175_s6 + $0x48] sm:$0xff]  ;;  %v5260_v1 = vsel %vm2264_vm15, %v5252_v36, %v11007_v25  ;;  %v5623_v25 = vld [vmem:[%s12177_s1 + $0x24] sm:$0x1]  ;;  %vm12901_vm1 = vmmov %vm12861_vm0 }
 0x456   :  { %v5701_v27 = vshll.u32 %v5623_v25, 16  ;;  %v5620_v36 = vld [vmem:[%s12177_s1 + $0xc] sm:$0x1] }
 0x458   :  { %5525 = vmatpush.bf16.msrb.mxu3 %v7658_v58  ;;  %v5703_v30 = vrot.slane %v5701_v27, 5 }
 0x45a   :  { %v11021_v31 = vpop.permute.xlu2 %5037  ;;  %v4980_v13 = vpop.permute.xlu1 %4979 }
 0x45b   :  { %v5223_v17 = vsel %vm2460_vm9, %v5208_v53, %v4980_v13 }
 0x45c   :  { %v5014_v9 = vpop.permute.xlu0 %5013  ;;  %5526 = vmatpush.bf16.msrb.mxu3 %v7657_v47 }
 0x45d   :  { %v5238_v7 = vsel %vm2223_vm14, %v4974_v61, %v5014_v9  ;;  %v7654_v61 = vld [vmem:[%s12175_s6 + $0x40] sm:$0xff] }
 0x45e   :  { %v11030_v48 = vsel %vm2264_vm15, %v5238_v7, %v5014_v9  ;;  %v5608_v9 = vld [vmem:[%s12177_s1 + $0x28] sm:$0xf]  ;;  %v5695_v7 = vshll.u32 %v5607_v39, 16 }
 0x460   :  { %5527 = vmatpush.bf16.msrb.mxu3 %v7656_v51  ;;  %v5697_v22 = vrot.slane %v5695_v7, 5  ;;  %v5636_v51 = vshrl.u32 %v5603_v23, 16 }
 0x462   :  { %v11033_v50 = vpop.permute.xlu2 %5041  ;;  %v4986_v38 = vpop.permute.xlu1 %4985  ;;  %v5638_v25 = vrot.slane %v5636_v51, 4 }
 0x463   :  { %v5232_v28 = vsel %vm2460_vm9, %v5211_v2, %v4986_v38 }
 0x464   :  { %5486 = vmatmul.bf16.gmra.mxu0 %v5217_v11  ;;  %v5020_v44 = vpop.permute.xlu0 %5019  ;;  %5528 = vmatpush.bf16.msrb.mxu3 %v7655_v14  ;;  %v5604_v14 = vld [vmem:[%s12177_s1 + $0x8] sm:$0xf] }
 0x465   :  { %v5244_v43 = vsel %vm2223_vm14, %v4980_v13, %v5020_v44 }
 0x466   :  { %v5256_v24 = vsel %vm2264_vm15, %v5244_v43, %v5020_v44  ;;  %v11125_v43 = vsel %vm2460_vm9, %v11005_v52, %v10990_v34  ;;  %v5621_v34 = vld [vmem:[%s12177_s1 + $0x14] sm:$0x1]  ;;  %vm12868_vm9 = vmmov %vm12861_vm0 }
 0x468   :  { %5529 = vmatpush.bf16.msrb.mxu3 %v7654_v61  ;;  %v5639_v61 = vshll.u32 %v5603_v23, 16 }
 0x46a   :  { %v5284_v29 = vpop.permute.xlu2 %5283  ;;  %v11039_v62 = vpop.permute.xlu1 %5015  ;;  %v5641_v27 = vrot.slane %v5639_v61, 5 }
 0x46b   :  { %5315 = vrot.lane.b32.xlu0 %v5284_v29, %s7914_s15 }
 0x46c   :  { %v5024_v41 = vpop.permute.xlu0 %5023 }
 0x46d   :  { %v5248_v20 = vsel %vm2223_vm14, %v4984_v21, %v5024_v41 }
 0x46e   :  { %v5258_v59 = vsel %vm2264_vm15, %v5248_v20, %v5024_v41  ;;  %v5605_v41 = vld [vmem:[%s12177_s1 + $0x10] sm:$0xf]  ;;  %v5606_v20 = vld [vmem:[%s12177_s1 + $0x18] sm:$0xf] }
 0x46f   :  { %v5667_v45 = vshll.u32 %v5605_v41, 16  ;;  %v5678_v53 = vshrl.u32 %v5606_v20, 16 }
 0x471   :  { %v5669_v0 = vrot.slane %v5667_v45, 5 }
 0x472   :  { %v11047_v56 = vpop.permute.xlu1 %5021 }
 0x474   :  { %5491 = vmatmul.bf16.gmra.mxu0 %v5220_v18  ;;  %v5030_v49 = vpop.permute.xlu0 %5029 }
 0x475   :  { %v5262_v11 = vsel %vm12866_vm7, %v11030_v48, %v5030_v49  ;;  %v5694_v48 = vrot.slane %v5692_v32, 4 }
 0x47a   :  { %v5026_v54 = vpop.permute.xlu1 %5025 }
 0x47b   :  { %v5250_v42 = vsel %vm2223_vm14, %v4986_v38, %v5026_v54  ;;  %v5706_v38 = vshrl.u32 %v5608_v9, 16 }
 0x47c   :  { %v11052_v3 = vsel %vm2264_vm15, %v5250_v42, %v5026_v54  ;;  %v5034_v19 = vpop.permute.xlu0 %5033  ;;  %v5622_v54 = vld [vmem:[%s12177_s1 + $0x1c] sm:$0x1]  ;;  %v5664_v42 = vshrl.u32 %v5605_v41, 16 }
 0x47d   :  { %v11055_v33 = vsel %vm12860_vm11, %v5255_v63, %v5034_v19  ;;  %v5624_v63 = vld [vmem:[%s12177_s1 + $0x2c] sm:$0x1]  ;;  %v5708_v52 = vrot.slane %v5706_v38, 4  ;;  %v5698_v19 = vor.u32 %v5697_v22, %v5694_v48  ;;  %v5687_v37 = vshll.u32 %v5622_v54, 16  ;;  %v5614_v48 = vld [vmem:[%s12177_s1 + $0x68] sm:$0xf]  ;;  %vm12890_vm11 = vmmov %vm12877_vm4 }
 0x47e   :  { %v5715_v29 = vshll.u32 %v5624_v63, 16  ;;  %v5666_v15 = vrot.slane %v5664_v42, 4  ;;  %v5613_v63 = vld [vmem:[%s12177_s1 + $0x60] sm:$0xf]  ;;  %v5629_v22 = vld [vmem:[%s12177_s1 + $0x64] sm:$0x1] }
 0x47f   :  { %v5699_v6 = vrot.slane %v5698_v19, 4  ;;  %v5689_v47 = vrot.slane %v5687_v37, 5  ;;  %v5630_v54 = vld [vmem:[%s12177_s1 + $0x6c] sm:$0x1]  ;;  %v5779_v23 = vshll.u32 %v5613_v63, 16 }
 0x480   :  { %v5717_v49 = vrot.slane %v5715_v29, 5  ;;  %v5659_v29 = vshll.u32 %v5620_v36, 16 }
 0x481   :  { %v5781_v51 = vrot.slane %v5779_v23, 5 }
 0x482   :  { %v5280_v26 = vpop.permute.xlu1 %5279  ;;  %v5661_v45 = vrot.slane %v5659_v29, 5 }
 0x483   :  { %5311 = vrot.lane.b32.xlu2 %v5280_v26, %s7914_s15  ;;  %v5673_v26 = vshll.u32 %v5621_v34, 16 }
 0x484   :  { %5496 = vmatmul.bf16.gmra.mxu0 %v5223_v17  ;;  %v5282_v8 = vpop.permute.xlu0 %5281 }
 0x485   :  { %v5675_v58 = vrot.slane %v5673_v26, 5 }
 0x48a   :  { %v5036_v5 = vpop.permute.xlu1 %5035 }
 0x48b   :  { %v11077_v46 = vsel %vm12863_vm3, %v5256_v24, %v5036_v5  ;;  %5313 = vrot.lane.b32.xlu2 %v5282_v8, %s7914_s15  ;;  %v5709_v24 = vshll.u32 %v5608_v9, 16  ;;  %v5680_v8 = vrot.slane %v5678_v53, 4  ;;  %v5619_v5 = vld [vmem:[%s12177_s1 + $0x4] sm:$0x1] }
 0x48d   :  { %v5711_v18 = vrot.slane %v5709_v24, 5  ;;  %v5653_v24 = vshll.u32 %v5604_v14, 16 }
 0x48f   :  { %v5712_v17 = vor.u32 %v5711_v18, %v5708_v52 }
 0x491   :  { %v5713_v2 = vrot.slane %v5712_v17, 4  ;;  %v5785_v17 = vshll.u32 %v5629_v22, 16 }
 0x492   :  { %v5040_v10 = vpop.permute.xlu1 %5039 }
 0x493   :  { %v11088_v16 = vsel %vm12864_vm5, %v5258_v59, %v5040_v10  ;;  %v5704_v10 = vsel %vm8130_vm13, %v5699_v6, %v5703_v30  ;;  %v5776_v30 = vshrl.u32 %v5613_v63, 16  ;;  %vm12919_vm5 = vmmov %vm12900_vm2 }
 0x494   :  { %5501 = vmatmul.bf16.gmra.mxu0 %v5226_v12  ;;  %v5670_v12 = vor.u32 %v5669_v0, %v5666_v15  ;;  %v11157_v39 = vunpack.c.l.bf16 %v5704_v10  ;;  %v5790_v15 = vshrl.u32 %v5614_v48, 16  ;;  %v5793_v0 = vshll.u32 %v5614_v48, 16 }
 0x495   :  { %v5778_v26 = vrot.slane %v5776_v30, 4  ;;  %v5787_v10 = vrot.slane %v5785_v17, 5  ;;  %v5626_v17 = vld [vmem:[%s12177_s1 + $0x3c] sm:$0x1] }
 0x496   :  { %v5671_v7 = vrot.slane %v5670_v12, 4  ;;  %v11200_v12 = vld [vmem:[%s12177_s1 + $0x58] sm:$0xf]  ;;  %v5795_v36 = vrot.slane %v5793_v0, 5 }
 0x49a   :  { %v5044_v21 = vpop.permute.xlu1 %5043 }
 0x49b   :  { %v11105_v55 = vsel %vm12865_vm6, %v5260_v1, %v5044_v21  ;;  %v5645_v1 = vshll.u32 %v5619_v5, 16  ;;  %vm12920_vm6 = vmmov %vm12861_vm0 }
 0x49d   :  { %v5647_v38 = vrot.slane %v5645_v1, 5 }
 0x4a2   :  { %v5288_v13 = vpop.permute.xlu1 %5287 }
 0x4a3   :  { %5319 = vrot.lane.b32.xlu2 %v5288_v13, %s7914_s15  ;;  %v5718_v13 = vsel %vm8130_vm13, %v5713_v2, %v5717_v49  ;;  %v5655_v49 = vrot.slane %v5653_v24, 5 }
 0x4a4   :  { %5506 = vmatmul.bf16.gmra.mxu0 %v5229_v40  ;;  %v5681_v40 = vshll.u32 %v5606_v20, 16  ;;  %v11163_v32 = vunpack.c.l.bf16 %v5718_v13  ;;  %v5676_v20 = vsel %vm8130_vm13, %v5671_v7, %v5675_v58  ;;  %v5799_v58 = vshll.u32 %v5630_v54, 16  ;;  %v5628_v13 = vld [vmem:[%s12177_s1 + $0x5c] sm:$0x1]  ;;  %v11225_v54 = vld [vmem:[%s12177_s1 + $0x38] sm:$0xf] }
 0x4a5   :  { %v11177_v52 = vunpack.c.l.bf16 %v5676_v20  ;;  %v5765_v20 = vshll.u32 %v11200_v12, 16  ;;  %v5771_v30 = vshll.u32 %v5628_v13, 16 }
 0x4a6   :  { %v7690_v41 = vpack.i.bf16 %v11163_v32, %v11157_v39  ;;  %v5801_v61 = vrot.slane %v5799_v58, 5 }
 0x4a7   :  { %v5773_v23 = vrot.slane %v5771_v30, 5 }
 0x4aa   :  { %v5292_v5 = vpop.permute.xlu1 %5291 }
 0x4b4   :  { %5511 = vmatmul.bf16.gmra.mxu0 %v5232_v28  ;;  %v5683_v28 = vrot.slane %v5681_v40, 5  ;;  %v5611_v40 = vld [vmem:[%s12177_s1 + $0x50] sm:$0xf] }
 0x4b5   :  { %v5310_v44 = vpop.permute.xlu0 %5309  ;;  %v5748_v1 = vshrl.u32 %v5611_v40, 16 }
 0x4b6   :  { %v5326_v59 = vsel %vm12867_vm12, %v5262_v11, %v5310_v44  ;;  %v5684_v9 = vor.u32 %v5683_v28, %v5680_v8  ;;  %v5650_v44 = vshrl.u32 %v5604_v14, 16  ;;  %v5627_v8 = vld [vmem:[%s12177_s1 + $0x54] sm:$0x1]  ;;  %v5792_v14 = vrot.slane %v5790_v15, 4  ;;  %vm12922_vm12 = vmmov %vm12900_vm2 }
 0x4b7   :  { %7523 = vmatmul.msk.bf16.vlgmr.msrb.gmra.mxu3 %vm12868_vm9, %v5326_v59  ;;  %v5642_v59 = vor.u32 %v5641_v27, %v5638_v25  ;;  %v5757_v25 = vshll.u32 %v5627_v8, 16  ;;  %v5750_v27 = vrot.slane %v5748_v1, 4  ;;  %vm12923_vm9 = vmmov %vm12861_vm0 }
 0x4b8   :  { %v5685_v11 = vrot.slane %v5684_v9, 4  ;;  %v5652_v18 = vrot.slane %v5650_v44, 4  ;;  %v5751_v9 = vshll.u32 %v5611_v40, 16  ;;  %v5796_v7 = vor.u32 %v5795_v36, %v5792_v14 }
 0x4b9   :  { %v5643_v19 = vrot.slane %v5642_v59, 4  ;;  %v5759_v29 = vrot.slane %v5757_v25, 5  ;;  %v5743_v36 = vshll.u32 %v5626_v17, 16 }
 0x4ba   :  { %v5690_v34 = vsel %vm8130_vm13, %v5685_v11, %v5689_v47  ;;  %v5656_v53 = vor.u32 %v5655_v49, %v5652_v18  ;;  %v11215_v11 = vld [vmem:[%s12177_s1 + $0x30] sm:$0xf]  ;;  %v5753_v24 = vrot.slane %v5751_v9, 5  ;;  %v5797_v48 = vrot.slane %v5796_v7, 4  ;;  %v11267_v7 = vld [vmem:[%s12177_s1 + $0x8] sm:$0xf] }
 0x4bb   :  { %v11182_v42 = vunpack.c.l.bf16 %v5690_v34  ;;  %v5648_v6 = vsel %vm8130_vm13, %v5643_v19, %v5647_v38  ;;  %v5762_v38 = vshrl.u32 %v11200_v12, 16  ;;  %v5767_v49 = vrot.slane %v5765_v20, 5  ;;  %v5625_v19 = vld [vmem:[%s12177_s1 + $0x34] sm:$0x1]  ;;  %12872 = vst [vmem:[#allocation65_spill] sm:$0xff] %v11267_v7 }
 0x4bc   :  { %v5657_v28 = vrot.slane %v5656_v53, 4  ;;  %v11195_v47 = vunpack.c.l.bf16 %v5648_v6  ;;  %v5754_v18 = vor.u32 %v5753_v24, %v5750_v27  ;;  %v5723_v15 = vshll.u32 %v11215_v11, 16 }
 0x4bd   :  { %v5286_v21 = vpop.permute.xlu0 %5285  ;;  %v7685_v37 = vpack.i.bf16 %v11182_v42, %v11177_v52  ;;  %v5764_v22 = vrot.slane %v5762_v38, 4  ;;  %v5745_v38 = vrot.slane %v5743_v36, 5  ;;  %v6213_v20 = vshrl.u32 %v11267_v7, 16 }
 0x4be   :  { %5317 = vrot.lane.b32.xlu1 %v5286_v21, %s7914_s15  ;;  %v5782_v21 = vor.u32 %v5781_v51, %v5778_v26  ;;  %v5802_v26 = vsel %vm8130_vm13, %v5797_v48, %v5801_v61  ;;  %v5755_v6 = vrot.slane %v5754_v18, 4  ;;  %v5725_v8 = vrot.slane %v5723_v15, 5  ;;  %v11294_v18 = vld [vmem:[%s12177_s1 + $0x88] sm:$0xf] }
 0x4bf   :  { %v11240_v40 = vunpack.c.l.bf16 %v5802_v26  ;;  %v5768_v0 = vor.u32 %v5767_v49, %v5764_v22  ;;  %v5240_v51 = vsel %vm2223_vm14, %v10964_v57, %v11039_v62  ;;  %v6216_v30 = vshll.u32 %v11267_v7, 16 }
 0x4c0   :  { %v5783_v44 = vrot.slane %v5782_v21, 4  ;;  %v5254_v13 = vsel %vm2264_vm15, %v5240_v51, %v11039_v62  ;;  %v11277_v62 = vld [vmem:[%s12177_s1 + $0x80] sm:$0xf]  ;;  %v5849_v36 = vshll.u32 %v11294_v18, 16 }
 0x4c1   :  { %12870 = vst [vmem:[#allocation64_spill] sm:$0xff] %v11240_v40  ;;  %v5769_v14 = vrot.slane %v5768_v0, 4  ;;  %v5264_v22 = vsel %vm12874_vm10, %v5254_v13, %v11015_v60  ;;  %v5634_v60 = vld [vmem:[%s12177_s1 + $0x8c] sm:$0x1]  ;;  %v5832_v26 = vshrl.u32 %v11277_v62, 16  ;;  %v5835_v15 = vshll.u32 %v11277_v62, 16  ;;  %vm12925_vm10 = vmmov %vm12900_vm2 }
 0x4c2   :  { %v5788_v34 = vsel %vm8130_vm13, %v5783_v44, %v5787_v10  ;;  %v5760_v10 = vsel %vm8130_vm13, %v5755_v6, %v5759_v29  ;;  %v11272_v44 = vld [vmem:[%s12177_s1 + $0x10] sm:$0xf]  ;;  %v11325_v51 = vrot.slane %v6216_v30, 5 }
 0x4c3   :  { %v11234_v53 = vunpack.c.l.bf16 %v5788_v34  ;;  %v11254_v61 = vunpack.c.l.bf16 %v5760_v10  ;;  %12873 = vst [vmem:[#allocation82_spill] sm:$0xff] %v11272_v44  ;;  %v6227_v34 = vshrl.u32 %v11272_v44, 16  ;;  %v6230_v17 = vshll.u32 %v11272_v44, 16  ;;  %v11313_v0 = vld [vmem:[%s12177_s1 + $0x70] sm:$0xf] }
 0x4c4   :  { %5516 = vmatmul.bf16.gmra.mxu0 %v11125_v43  ;;  %v5662_v43 = vsel %vm8130_vm13, %v5657_v28, %v5661_v45  ;;  %v5720_v45 = vshrl.u32 %v11215_v11, 16  ;;  %v5737_v28 = vshll.u32 %v11225_v54, 16 }
 0x4c5   :  { %v5290_v2 = vpop.permute.xlu0 %5289  ;;  %v11209_v63 = vunpack.c.l.bf16 %v5662_v43  ;;  %12869 = vst [vmem:[#allocation69_spill] sm:$0xff] %v11234_v53  ;;  %v5774_v43 = vsel %vm8130_vm13, %v5769_v14, %v5773_v23  ;;  %v7705_v57 = vpack.i.bf16 %v11240_v40, %v11234_v53  ;;  %v11327_v10 = vrot.slane %v6227_v34, 4 }
 0x4c6   :  { %5323 = vrot.lane.b32.xlu1 %v5292_v5, %s7914_s15  ;;  %5321 = vrot.lane.b32.xlu0 %v5290_v2, %s7914_s15  ;;  %v5722_v58 = vrot.slane %v5720_v45, 4  ;;  %v5729_v5 = vshll.u32 %v5625_v19, 16  ;;  %v5734_v2 = vshrl.u32 %v11225_v54, 16  ;;  %12871 = vst [vmem:[#allocation19_spill] sm:$0xff] %v11254_v61  ;;  %v5739_v21 = vrot.slane %v5737_v28, 5 }
 0x4c7   :  { %v7680_v59 = vpack.i.bf16 %v11209_v63, %v11195_v47  ;;  %v11262_v9 = vunpack.c.l.bf16 %v5774_v43  ;;  %v12294_v19 = vunpack.c.l.bf16 %v11267_v7  ;;  %v12291_v45 = vunpack.c.l.bf16 %v11272_v44  ;;  %v11323_v28 = vld [vmem:[%s12177_s1 + $0x78] sm:$0xf]  ;;  %v11453_v44 = vld [vmem:[%s12177_s1 + $0x68] sm:$0xf] }
 0x4c8   :  { %v5731_v1 = vrot.slane %v5729_v5, 5  ;;  %v5834_v5 = vrot.slane %v5832_v26, 4  ;;  %v5837_v14 = vrot.slane %v5835_v15, 5  ;;  %v11350_v26 = vld [vmem:[%s12177_s1 + $0x38] sm:$0xf]  ;;  %v6232_v15 = vrot.slane %v6230_v17, 5 }
 0x4c9   :  { %7681 = vrot.lane.b32.xlu2 %v7680_v59, %s7915_s18  ;;  %v7700_v24 = vpack.i.bf16 %v11262_v9, %v11254_v61  ;;  %v5633_v59 = vld [vmem:[%s12177_s1 + $0x84] sm:$0x1]  ;;  %12875 = vst [vmem:[#allocation44_spill] sm:$0xff] %v11350_v26 }
 0x4ca   :  { %v5841_v6 = vshll.u32 %v5633_v59, 16  ;;  %v5838_v13 = vor.u32 %v5837_v14, %v5834_v5  ;;  %v5818_v59 = vshrl.u32 %v11323_v28, 16  ;;  %v11356_v14 = vld [vmem:[%s12177_s1 + $0x40] sm:$0xf]  ;;  %12889 = vst [vmem:[#allocation108_spill] sm:$0xff] %v11453_v44 }
 0x4cb   :  { %12876 = vst [vmem:[#allocation22_spill] sm:$0xff] %v11356_v14 }
 0x4cc   :  { %v5820_v5 = vrot.slane %v5818_v59, 4  ;;  %v6297_v59 = vshrl.u32 %v11350_v26, 16 }
 0x4ce   :  { %7691 = vrot.lane.b32.xlu1 %v7690_v41, %s7915_s18  ;;  %7686 = vrot.lane.b32.xlu0 %v7685_v37, %s7915_s18  ;;  %v5726_v41 = vor.u32 %v5725_v8, %v5722_v58  ;;  %v5736_v37 = vrot.slane %v5734_v2, 4  ;;  %v11317_v8 = vrot.slane %v6213_v20, 4  ;;  %v5846_v2 = vshrl.u32 %v11294_v18, 16 }
 0x4d0   :  { %v5727_v25 = vrot.slane %v5726_v41, 4  ;;  %v5740_v27 = vor.u32 %v5739_v21, %v5736_v37  ;;  %v5631_v41 = vld [vmem:[%s12177_s1 + $0x74] sm:$0x1]  ;;  %v7720_v37 = vpack.i.bf16 %v12291_v45, %v12294_v19  ;;  %v5848_v43 = vrot.slane %v5846_v2, 4 }
 0x4d1   :  { %v5855_v21 = vshll.u32 %v5634_v60, 16  ;;  %v5813_v20 = vshll.u32 %v5631_v41, 16  ;;  %v5821_v60 = vshll.u32 %v11323_v28, 16  ;;  %v5482_v35 = vpop.f32.mrf.mxu0 }
 0x4d2   :  { %v5732_v29 = vsel %vm8130_vm13, %v5727_v25, %v5731_v1  ;;  %v5741_v48 = vrot.slane %v5740_v27, 4  ;;  %v5851_v25 = vrot.slane %v5849_v36, 5  ;;  %v5632_v27 = vld [vmem:[%s12177_s1 + $0x7c] sm:$0x1] }
 0x4d3   :  { %v11298_v49 = vunpack.c.l.bf16 %v5732_v29  ;;  %v5807_v29 = vshll.u32 %v11313_v0, 16  ;;  %v5827_v2 = vshll.u32 %v5632_v27, 16 }
 0x4d4   :  { %v5746_v23 = vsel %vm8130_vm13, %v5741_v48, %v5745_v38  ;;  %v5804_v38 = vshrl.u32 %v11313_v0, 16  ;;  %v5839_v48 = vrot.slane %v5838_v13, 4  ;;  %v5852_v30 = vor.u32 %v5851_v25, %v5848_v43 }
 0x4d5   :  { %v11315_v58 = vunpack.c.l.bf16 %v5746_v23  ;;  %v5823_v43 = vrot.slane %v5821_v60, 5  ;;  %v5829_v13 = vrot.slane %v5827_v2, 5 }
 0x4d6   :  { %7706 = vrot.lane.b32.xlu1 %v7705_v57, %s7915_s18  ;;  %7701 = vrot.lane.b32.xlu0 %v7700_v24, %s7915_s18  ;;  %v5843_v57 = vrot.slane %v5841_v6, 5  ;;  %v5857_v24 = vrot.slane %v5855_v21, 5  ;;  %v5806_v34 = vrot.slane %v5804_v38, 4  ;;  %v5809_v6 = vrot.slane %v5807_v29, 5 }
 0x4d7   :  { %v7695_v1 = vpack.i.bf16 %v11315_v58, %v11298_v49  ;;  %v5815_v21 = vrot.slane %v5813_v20, 5  ;;  %v5824_v27 = vor.u32 %v5823_v43, %v5820_v5  ;;  %v12290_v38 = vunpack.c.l.bf16 %v11350_v26 }
 0x4d8   :  { %v5844_v41 = vsel %vm8130_vm13, %v5839_v48, %v5843_v57  ;;  %v6219_v48 = vor.u32 %v11325_v51, %v11317_v8  ;;  %v6300_v20 = vshll.u32 %v11350_v26, 16  ;;  %v6311_v8 = vshrl.u32 %v11356_v14, 16 }
 0x4d9   :  { %7696 = vrot.lane.b32.xlu2 %v7695_v1, %s7915_s18  ;;  %v5853_v1 = vrot.slane %v5852_v30, 4  ;;  %v11362_v17 = vunpack.c.l.bf16 %v5844_v41  ;;  %v5825_v30 = vrot.slane %v5824_v27, 4  ;;  %v6314_v51 = vshll.u32 %v11356_v14, 16  ;;  %v11416_v27 = vld [vmem:[%s12177_s1 + $0x20] sm:$0xf] }
 0x4da   :  { %12884 = vst [vmem:[#allocation59_spill] sm:$0xff] %v11416_v27 }
 0x4db   :  { %12879 = vst [vmem:[#allocation55_spill] sm:$0xff] %v11362_v17  ;;  %v5858_v25 = vsel %vm8130_vm13, %v5853_v1, %v5857_v24  ;;  %v11377_v24 = vld [vmem:[%s12177_s1 + $0x28] sm:$0xf]  ;;  %v5830_v5 = vsel %vm8130_vm13, %v5825_v30, %v5829_v13  ;;  %v6299_v1 = vrot.slane %v6297_v59, 4  ;;  %v6313_v59 = vrot.slane %v6311_v8, 4 }
 0x4dc   :  { %v11368_v29 = vunpack.c.l.bf16 %v5858_v25  ;;  %12881 = vst [vmem:[#allocation99_spill] sm:$0xff] %v11377_v24  ;;  %v11400_v41 = vunpack.c.l.bf16 %v5830_v5  ;;  %v12293_v43 = vunpack.c.l.bf16 %v11377_v24  ;;  %v6272_v13 = vshll.u32 %v11377_v24, 16 }
 0x4dd   :  { %v5312_v23 = vpop.permute.xlu2 %5311  ;;  %v6316_v30 = vrot.slane %v6314_v51, 5  ;;  %v11432_v51 = vld [vmem:[%s12177_s1 + $0x78] sm:$0xf] }
 0x4de   :  { %7721 = vrot.lane.b32.xlu1 %v7720_v37, %s7909_s10  ;;  %v5328_v36 = vsel %vm12877_vm4, %v5264_v22, %v5312_v23  ;;  %v5810_v37 = vor.u32 %v5809_v6, %v5806_v34  ;;  %v12289_v22 = vunpack.c.l.bf16 %v11356_v14  ;;  %12880 = vst [vmem:[#allocation86_spill] sm:$0xff] %v11368_v29  ;;  %v11382_v34 = vld [vmem:[%s12177_s1 + $0x30] sm:$0xf]  ;;  %v7715_v60 = vpack.i.bf16 %v11368_v29, %v11362_v17  ;;  %vm12926_vm4 = vmmov %vm12861_vm0 }
 0x4df   :  { %7524 = vmatmul.msk.bf16.gmra.mxu3 %vm12878_vm8, %v5328_v36  ;;  %12882 = vst [vmem:[#allocation45_spill] sm:$0xff] %v11382_v34  ;;  %v6233_v6 = vor.u32 %v6232_v15, %v11327_v10  ;;  %v11407_v10 = vld [vmem:[%s12177_s1 + $0x18] sm:$0xf]  ;;  %v6302_v15 = vrot.slane %v6300_v20, 5  ;;  %v6283_v25 = vshrl.u32 %v11382_v34, 16  ;;  %v6286_v20 = vshll.u32 %v11382_v34, 16 }
 0x4e0   :  { %v5811_v57 = vrot.slane %v5810_v37, 4  ;;  %v7735_v36 = vpack.i.bf16 %v12289_v22, %v12290_v38  ;;  %7716 = vrot.lane.b32.xlu0 %v7715_v60, %s7915_s18  ;;  %v12292_v37 = vunpack.c.l.bf16 %v11382_v34  ;;  %12883 = vst [vmem:[#allocation101_spill] sm:$0xff] %v11407_v10  ;;  %v6241_v8 = vshrl.u32 %v11407_v10, 16 }
 0x4e1   :  { %v6285_v5 = vrot.slane %v6283_v25, 4  ;;  %v6288_v22 = vrot.slane %v6286_v20, 5  ;;  %12885 = vst [vmem:[#allocation7_spill] sm:$0xff] %v11432_v51  ;;  %v11443_v20 = vld [vmem:[%s12177_s1 + $0x80] sm:$0xf]  ;;  %v6317_v19 = vor.u32 %v6316_v30, %v6313_v59  ;;  %v6258_v38 = vshll.u32 %v11416_v27, 16 }
 0x4e2   :  { %v5816_v23 = vsel %vm8130_vm13, %v5811_v57, %v5815_v21  ;;  %v6269_v21 = vshrl.u32 %v11377_v24, 16  ;;  %12886 = vst [vmem:[#allocation72_spill] sm:$0xff] %v11443_v20  ;;  %v6243_v45 = vrot.slane %v6241_v8, 4  ;;  %v12888_v14 = vunpack.c.l.bf16 %v11416_v27 }
 0x4e3   :  { %v11393_v2 = vunpack.c.l.bf16 %v5816_v23  ;;  %v6274_v23 = vrot.slane %v6272_v13, 5  ;;  %v11436_v13 = vrot.slane %v6233_v6, 4  ;;  %v12887_v6 = vunpack.c.l.bf16 %v11407_v10 }
 0x4e4   :  { %v6271_v60 = vrot.slane %v6269_v21, 4  ;;  %v11434_v21 = vrot.slane %v6219_v48, 4  ;;  %v6289_v48 = vor.u32 %v6288_v22, %v6285_v5  ;;  %v12302_v59 = vunpack.c.l.bf16 %v11432_v51 }
 0x4e5   :  { %v7710_v57 = vpack.i.bf16 %v11400_v41, %v11393_v2  ;;  %v5314_v25 = vpop.permute.xlu2 %5313  ;;  %v7725_v26 = vpack.i.bf16 %v12888_v14, %v12887_v6  ;;  %v12301_v22 = vunpack.c.l.bf16 %v11443_v20  ;;  %v6381_v30 = vshrl.u32 %v11432_v51, 16 }
 0x4e6   :  { %7736 = vrot.lane.b32.xlu1 %v7735_v36, %s7909_s10  ;;  %v7730_v36 = vpack.i.bf16 %v12292_v37, %v12293_v43  ;;  %v6244_v37 = vshll.u32 %v11407_v10, 16  ;;  %v6303_v43 = vor.u32 %v6302_v15, %v6299_v1  ;;  %v6275_v34 = vor.u32 %v6274_v23, %v6271_v60  ;;  %v11466_v23 = vld [vmem:[%s12177_s1 + $0x70] sm:$0xf] }
 0x4e7   :  { %7711 = vrot.lane.b32.xlu2 %v7710_v57, %s7915_s18  ;;  %v6255_v57 = vshrl.u32 %v11416_v27, 16  ;;  %v5330_v15 = vsel %vm12890_vm11, %v11055_v33, %v5314_v25  ;;  %v6384_v14 = vshll.u32 %v11432_v51, 16  ;;  %v6395_v60 = vshrl.u32 %v11443_v20, 16  ;;  %12891 = vst [vmem:[#allocation47_spill] sm:$0xff] %v11466_v23  ;;  %v7549_v27 = vld [vmem:[%s12177_s1 + $0x1c] sm:$0x1] }
 0x4e8   :  { %v6246_v24 = vrot.slane %v6244_v37, 5  ;;  %7731 = vrot.lane.b32.xlu0 %v7730_v36, %s7909_s10  ;;  %v6260_v37 = vrot.slane %v6258_v38, 5  ;;  %v6398_v33 = vshll.u32 %v11443_v20, 16  ;;  %v7750_v38 = vpack.i.bf16 %v12301_v22, %v12302_v59  ;;  %v11486_v22 = vld [vmem:[%s12177_s1 + $0x58] sm:$0xf] }
 0x4e9   :  { %v6257_v1 = vrot.slane %v6255_v57, 4  ;;  %v12308_v36 = vunpack.c.l.bf16 %v11453_v44  ;;  %v11475_v8 = vrot.slane %v6303_v43, 4  ;;  %v6383_v25 = vrot.slane %v6381_v30, 4  ;;  %12892 = vst [vmem:[#allocation49_spill] sm:$0xff] %v11486_v22 }
 0x4ea   :  { %v6247_v5 = vor.u32 %v6246_v24, %v6243_v45  ;;  %v6386_v57 = vrot.slane %v6384_v14, 5  ;;  %v6397_v6 = vrot.slane %v6395_v60, 4  ;;  %v11477_v7 = vrot.slane %v6317_v19, 4  ;;  %v11497_v14 = vld [vmem:[%s12177_s1 + $0x60] sm:$0xf] }
 0x4eb   :  { %v6400_v45 = vrot.slane %v6398_v33, 5  ;;  %v12307_v24 = vunpack.c.l.bf16 %v11466_v23  ;;  %v11488_v43 = vrot.slane %v6275_v34, 4  ;;  %v11490_v30 = vrot.slane %v6289_v48, 4  ;;  %12893 = vst [vmem:[#allocation67_spill] sm:$0xff] %v11497_v14 }
 0x4ec   :  { %v6356_v19 = vshll.u32 %v11453_v44, 16  ;;  %v6248_v60 = vrot.slane %v6247_v5, 4  ;;  %v6261_v33 = vor.u32 %v6260_v37, %v6257_v1  ;;  %v6387_v48 = vor.u32 %v6386_v57, %v6383_v25  ;;  %v7550_v25 = vld [vmem:[%s12177_s1 + $0x24] sm:$0x1] }
 0x4ed   :  { %v7745_v34 = vpack.i.bf16 %v12307_v24, %v12308_v36  ;;  %v6401_v59 = vor.u32 %v6400_v45, %v6397_v6  ;;  %v12316_v51 = vunpack.c.l.bf16 %v11486_v22  ;;  %v12315_v37 = vunpack.c.l.bf16 %v11497_v14 }
 0x4ee   :  { %7751 = vrot.lane.b32.xlu1 %v7750_v38, %s7909_s10  ;;  %v6370_v38 = vshll.u32 %v11466_v23, 16  ;;  %v11510_v10 = vrot.slane %v6356_v19, 5  ;;  %v6325_v5 = vshrl.u32 %v11486_v22, 16  ;;  %v6328_v6 = vshll.u32 %v11486_v22, 16  ;;  %v7547_v19 = vld [vmem:[%s12177_s1 + $0xc] sm:$0x1] }
 0x4ef   :  { %7525 = vmatmul.msk.bf16.gmra.mxu3 %vm12861_vm0, %v5330_v15  ;;  %7726 = vrot.lane.b32.xlu2 %v7725_v26, %s7909_s10  ;;  %v6353_v15 = vshrl.u32 %v11453_v44, 16  ;;  %v6367_v26 = vshrl.u32 %v11466_v23, 16  ;;  %v6339_v45 = vshrl.u32 %v11497_v14, 16  ;;  %v7740_v24 = vpack.i.bf16 %v12315_v37, %v12316_v51 }
 0x4f0   :  { %7746 = vrot.lane.b32.xlu0 %v7745_v34, %s7909_s10  ;;  %v11520_v57 = vrot.slane %v6370_v38, 5  ;;  %v6327_v34 = vrot.slane %v6325_v5, 4  ;;  %v6250_v36 = vshll.u32 %v7549_v27, 16  ;;  %v7548_v38 = vld [vmem:[%s12177_s1 + $0x14] sm:$0x1]  ;;  %v11535_v23 = vrot.slane %v6387_v48, 4  ;;  %v5316_v48 = vpop.permute.xlu0 %5315 }
 0x4f1   :  { %v11504_v20 = vrot.slane %v6353_v15, 4  ;;  %v11512_v1 = vrot.slane %v6367_v26, 4  ;;  %v6342_v15 = vshll.u32 %v11497_v14, 16  ;;  %v6262_v26 = vrot.slane %v6261_v33, 4  ;;  %v11543_v27 = vld [vmem:[%s12177_s1 + $0x88] sm:$0xf] }
 0x4f2   :  { %v6330_v44 = vrot.slane %v6328_v6, 5  ;;  %v6341_v29 = vrot.slane %v6339_v45, 4  ;;  %v11537_v40 = vrot.slane %v6401_v59, 4  ;;  %v6252_v33 = vrot.slane %v6250_v36, 5  ;;  %12894 = vst [vmem:[#allocation70_spill] sm:$0xff] %v11543_v27 }
 0x4f3   :  { %v6344_v17 = vrot.slane %v6342_v15, 5  ;;  %v6264_v5 = vshll.u32 %v7550_v25, 16  ;;  %v6222_v22 = vshll.u32 %v7547_v19, 16  ;;  %v6236_v45 = vshll.u32 %v7548_v38, 16  ;;  %v11552_v59 = vld [vmem:[%s12177_s1 + $0x90] sm:$0xf] }
 0x4f4   :  { %v6331_v6 = vor.u32 %v6330_v44, %v6327_v34  ;;  %12895 = vst [vmem:[#allocation83_spill] sm:$0xff] %v11552_v59  ;;  %v12320_v14 = vunpack.c.l.bf16 %v11543_v27  ;;  %vm6988_vm8 = vcmask 228352   ;;  %vm7054_vm11 = vcmask 257024  }
 0x4f5   :  { %v6345_v36 = vor.u32 %v6344_v17, %v6341_v29  ;;  %v6266_v25 = vrot.slane %v6264_v5, 5  ;;  %v6224_v15 = vrot.slane %v6222_v22, 5  ;;  %v6238_v37 = vrot.slane %v6236_v45, 5 }
 0x4f6   :  { %v6332_v19 = vrot.slane %v6331_v6, 4  ;;  %v12319_v17 = vunpack.c.l.bf16 %v11552_v59  ;;  %v6409_v29 = vshrl.u32 %v11543_v27, 16  ;;  %v6423_v45 = vshrl.u32 %v11552_v59, 16 }
 0x4f7   :  { %7741 = vrot.lane.b32.xlu2 %v7740_v24, %s7909_s10  ;;  %v6253_v24 = vsel %vm8130_vm13, %v6248_v60, %v6252_v33  ;;  %v6267_v44 = vsel %vm8130_vm13, %v6262_v26, %v6266_v25  ;;  %v6225_v34 = vsel %vm8130_vm13, %v11434_v21, %v6224_v15  ;;  %v6239_v22 = vsel %vm8130_vm13, %v11436_v13, %v6238_v37  ;;  %v7555_v26 = vld [vmem:[%s12177_s1 + $0x5c] sm:$0x1]  ;;  %v7556_v21 = vld [vmem:[%s12177_s1 + $0x64] sm:$0x1] }
 0x4f8   :  { %v11556_v51 = vunpack.c.l.bf16 %v6253_v24  ;;  %v11566_v60 = vunpack.c.l.bf16 %v6267_v44  ;;  %v11571_v38 = vunpack.c.l.bf16 %v6225_v34  ;;  %v6412_v33 = vshll.u32 %v11543_v27, 16  ;;  %v7553_v13 = vld [vmem:[%s12177_s1 + $0x3c] sm:$0x1]  ;;  %v7554_v34 = vld [vmem:[%s12177_s1 + $0x44] sm:$0x1] }
 0x4f9   :  { %v11580_v5 = vunpack.c.l.bf16 %v6239_v22  ;;  %v6411_v6 = vrot.slane %v6409_v29, 4  ;;  %v6426_v24 = vshll.u32 %v11552_v59, 16  ;;  %v7755_v15 = vpack.i.bf16 %v12319_v17, %v12320_v14  ;;  %v7551_v29 = vld [vmem:[%s12177_s1 + $0x2c] sm:$0x1] }
 0x4fa   :  { %12896 = vst [vmem:[#allocation66_spill] sm:$0xff] %v11556_v51  ;;  %v11589_v37 = vpack.i.bf16 %v11566_v60, %v11556_v51  ;;  %v6414_v25 = vrot.slane %v6412_v33, 5  ;;  %v5332_v44 = vsel %vm12900_vm2, %v11077_v46, %v5316_v48  ;;  %v6425_v33 = vrot.slane %v6423_v45, 4  ;;  %v7552_v46 = vld [vmem:[%s12177_s1 + $0x34] sm:$0x1] }
 0x4fb   :  { %12897 = vst [vmem:[#allocation15_spill] sm:$0xff] %v11566_v60  ;;  %v11605_v22 = vpack.i.bf16 %v11580_v5, %v11571_v38  ;;  %v6428_v27 = vrot.slane %v6426_v24, 5  ;;  %v6334_v17 = vshll.u32 %v7555_v26, 16  ;;  %v6346_v48 = vrot.slane %v6345_v36, 4 }
 0x4fc   :  { %12898 = vst [vmem:[#allocation18_spill] sm:$0xff] %v11571_v38  ;;  %7766 = vrot.lane.b32.xlu1 %v11589_v37, %s7916_s2  ;;  %v6415_v14 = vor.u32 %v6414_v25, %v6411_v6  ;;  %v6348_v59 = vshll.u32 %v7556_v21, 16  ;;  %v6320_v26 = vshll.u32 %v7554_v34, 16  ;;  %v6292_v36 = vshll.u32 %v7552_v46, 16  ;;  %v7561_v21 = vld [vmem:[%s12177_s1 + $0x8c] sm:$0x1] }
 0x4fd   :  { %12899 = vst [vmem:[#allocation91_spill] sm:$0xff] %v11580_v5  ;;  %v6306_v5 = vshll.u32 %v7553_v13, 16  ;;  %7761 = vrot.lane.b32.xlu0 %v11605_v22, %s7916_s2  ;;  %v6429_v45 = vor.u32 %v6428_v27, %v6425_v33  ;;  %v6336_v24 = vrot.slane %v6334_v17, 5  ;;  %v6418_v33 = vshll.u32 %v7561_v21, 16 }
 0x4fe   :  { %v6416_v38 = vrot.slane %v6415_v14, 4  ;;  %v6350_v60 = vrot.slane %v6348_v59, 5  ;;  %v6322_v6 = vrot.slane %v6320_v26, 5  ;;  %v6294_v59 = vrot.slane %v6292_v36, 5 }
 0x4ff   :  { %7526 = vmatmul.msk.bf16.gmra.mxu3 %vm12901_vm1, %v5332_v44  ;;  %7756 = vrot.lane.b32.xlu2 %v7755_v15, %s7909_s10  ;;  %v6278_v44 = vshll.u32 %v7551_v29, 16  ;;  %v6308_v51 = vrot.slane %v6306_v5, 5  ;;  %v6430_v53 = vrot.slane %v6429_v45, 4  ;;  %v6337_v61 = vsel %vm8130_vm13, %v6332_v19, %v6336_v24  ;;  %v7562_v19 = vld [vmem:[%s12177_s1 + $0x94] sm:$0x1] }
 0x500   :  { %v6351_v27 = vsel %vm8130_vm13, %v6346_v48, %v6350_v60  ;;  %v11623_v17 = vunpack.c.l.bf16 %v6337_v61  ;;  %v7559_v5 = vld [vmem:[%s12177_s1 + $0x7c] sm:$0x1]  ;;  %v6323_v61 = vsel %vm8130_vm13, %v11477_v7, %v6322_v6  ;;  %v6295_v34 = vsel %vm8130_vm13, %v11490_v30, %v6294_v59  ;;  %v7557_v7 = vld [vmem:[%s12177_s1 + $0x6c] sm:$0x1]  ;;  %v7558_v24 = vld [vmem:[%s12177_s1 + $0x74] sm:$0x1] }
 0x501   :  { %v6280_v25 = vrot.slane %v6278_v44, 5  ;;  %v6309_v14 = vsel %vm8130_vm13, %v11475_v8, %v6308_v51  ;;  %v11634_v13 = vunpack.c.l.bf16 %v6351_v27  ;;  %v7560_v8 = vld [vmem:[%s12177_s1 + $0x84] sm:$0x1]  ;;  %v11647_v15 = vunpack.c.l.bf16 %v6323_v61 }
 0x502   :  { %v11639_v60 = vunpack.c.l.bf16 %v6309_v14  ;;  %v11661_v46 = vunpack.c.l.bf16 %v6295_v34  ;;  %v6432_v48 = vshll.u32 %v7562_v19, 16  ;;  %v6390_v45 = vshll.u32 %v7559_v5, 16 }
 0x503   :  { %12902 = vst [vmem:[#allocation29_spill] sm:$0xff] %v11634_v13  ;;  %v6281_v51 = vsel %vm8130_vm13, %v11488_v43, %v6280_v25  ;;  %v11659_v43 = vpack.i.bf16 %v11634_v13, %v11623_v17  ;;  %v12907_v30 = vor.u32 %v11510_v10, %v11504_v20  ;;  %v6420_v36 = vrot.slane %v6418_v33, 5 }
 0x504   :  { %12903 = vst [vmem:[#allocation81_spill] sm:$0xff] %v11639_v60  ;;  %v11652_v29 = vunpack.c.l.bf16 %v6281_v51  ;;  %v7775_v44 = vpack.i.bf16 %v11647_v15, %v11639_v60  ;;  %v6404_v6 = vshll.u32 %v7560_v8, 16  ;;  %v6434_v21 = vrot.slane %v6432_v48, 5 }
 0x505   :  { %12904 = vst [vmem:[#allocation54_spill] sm:$0xff] %v11647_v15  ;;  %v6360_v26 = vrot.slane %v12907_v30, 4  ;;  %7781 = vrot.lane.b32.xlu1 %v11659_v43, %s7916_s2  ;;  %v6392_v27 = vrot.slane %v6390_v45, 5  ;;  %v6362_v14 = vshll.u32 %v7557_v7, 16  ;;  %v12908_v59 = vor.u32 %v11520_v57, %v11512_v1 }
 0x506   :  { %12905 = vst [vmem:[#allocation57_spill] sm:$0xff] %v11652_v29  ;;  %v7770_v25 = vpack.i.bf16 %v11661_v46, %v11652_v29  ;;  %7776 = vrot.lane.b32.xlu0 %v7775_v44, %s7916_s2  ;;  %v6421_v10 = vsel %vm8130_vm13, %v6416_v38, %v6420_v36  ;;  %v6406_v20 = vrot.slane %v6404_v6, 5  ;;  %v6376_v5 = vshll.u32 %v7558_v24, 16  ;;  %v7896_v29 = vld [vmem:[%s12177_s1 + $0x60] sm:$0xf] }
 0x507   :  { %12906 = vst [vmem:[#allocation30_spill] sm:$0xff] %v11661_v46  ;;  %v6374_v19 = vrot.slane %v12908_v59, 4  ;;  %v6435_v61 = vsel %vm8130_vm13, %v6430_v53, %v6434_v21  ;;  %v11684_v51 = vunpack.c.l.bf16 %v6421_v10  ;;  %v6393_v8 = vsel %vm8130_vm13, %v11535_v23, %v6392_v27  ;;  %v5484_v59 = vpop.f32.mrf.mxu0 }
 0x508   :  { %7771 = vrot.lane.b32.xlu2 %v7770_v25, %s7916_s2  ;;  %v6364_v1 = vrot.slane %v6362_v14, 5  ;;  %v11689_v57 = vunpack.c.l.bf16 %v6435_v61  ;;  %v6407_v38 = vsel %vm8130_vm13, %v11537_v40, %v6406_v20  ;;  %v11694_v34 = vunpack.c.l.bf16 %v6393_v8 }
 0x509   :  { %12909 = vst [vmem:[#allocation38_spill] sm:$0xff] %v11684_v51  ;;  %v6378_v33 = vrot.slane %v6376_v5, 5  ;;  %v11696_v7 = vunpack.c.l.bf16 %v6407_v38  ;;  %v5246_v36 = vsel %vm2223_vm14, %v10980_v4, %v11047_v56  ;;  %vm12917_vm14 = vmmov %vm12861_vm0  ;;  %v11743_v4 = vld [vmem:[%s12176_s7] ss:$0 sm:$0xff] }
 0x50a   :  { %12910 = vst [vmem:[#allocation103_spill] sm:$0xff] %v11689_v57  ;;  %v6365_v53 = vsel %vm8130_vm13, %v6360_v26, %v6364_v1  ;;  %v7795_v48 = vpack.i.bf16 %v11689_v57, %v11684_v51  ;;  %v5320_v26 = vpop.permute.xlu2 %5319  ;;  %v5257_v6 = vsel %vm2264_vm15, %v5246_v36, %v11047_v56  ;;  %v5483_v56 = vadd.f32 %v11743_v4, %v5482_v35 }
 0x50b   :  { %12911 = vst [vmem:[#allocation85_spill] sm:$0xff] %v11694_v34  ;;  %v6379_v23 = vsel %vm8130_vm13, %v6374_v19, %v6378_v33  ;;  %v11704_v45 = vunpack.c.l.bf16 %v6365_v53  ;;  %v7790_v24 = vpack.i.bf16 %v11696_v7, %v11694_v34  ;;  %vm12915_vm13 = vmmov %vm12863_vm3 }
 0x50c   :  { %12912 = vst [vmem:[#allocation100_spill] sm:$0xff] %v11696_v7  ;;  %v11708_v40 = vunpack.c.l.bf16 %v6379_v23  ;;  %v5270_v14 = vsel %vm12915_vm13, %v5257_v6, %v11021_v31  ;;  %vm12916_vm3 = vmmov %vm12900_vm2 }
 0x50d   :  { %12913 = vst [vmem:[#allocation26_spill] sm:$0xff] %v11704_v45  ;;  %7796 = vrot.lane.b32.xlu1 %v7795_v48, %s7916_s2 }
 0x50e   :  { %12914 = vst [vmem:[#allocation88_spill] sm:$0xff] %v11708_v40  ;;  %v7785_v30 = vpack.i.bf16 %v11708_v40, %v11704_v45  ;;  %7791 = vrot.lane.b32.xlu0 %v7790_v24, %s7916_s2 }
 0x50f   :  { %12918 = vst [vmem:[#allocation61_spill] sm:$0xff] %v11743_v4  ;;  %v5487_v5 = vpop.f32.mrf.mxu0 }
 0x510   :  { %7786 = vrot.lane.b32.xlu2 %v7785_v30, %s7916_s2 }
 0x515   :  { %7811 = vrot.lane.b32.xlu1 %v7770_v25, %s7909_s10 }
 0x516   :  { %7806 = vrot.lane.b32.xlu0 %v11589_v37, %s7909_s10 }
 0x517   :  { %v5489_v23 = vpop.f32.mrf.mxu0 }
 0x518   :  { %7801 = vrot.lane.b32.xlu2 %v11605_v22, %s7909_s10 }
 0x51d   :  { %7826 = vrot.lane.b32.xlu1 %v7785_v30, %s7909_s10 }
 0x51e   :  { %7821 = vrot.lane.b32.xlu0 %v11659_v43, %s7909_s10 }
 0x520   :  { %7816 = vrot.lane.b32.xlu2 %v7775_v44, %s7909_s10 }
 0x523   :  { %v11733_v21 = vpop.permute.xlu2 %7681 }
 0x525   :  { %7841 = vrot.lane.b32.xlu1 %v11605_v22, %s7915_s18 }
 0x526   :  { %7836 = vrot.lane.b32.xlu0 %v7795_v48, %s7909_s10 }
 0x528   :  { %7831 = vrot.lane.b32.xlu2 %v7790_v24, %s7909_s10 }
 0x52d   :  { %7856 = vrot.lane.b32.xlu1 %v7775_v44, %s7915_s18  ;;  %v5336_v44 = vsel %vm12919_vm5, %v11088_v16, %v5320_v26 }
 0x52e   :  { %7851 = vrot.lane.b32.xlu0 %v7770_v25, %s7915_s18 }
 0x530   :  { %v5318_v27 = vpop.permute.xlu1 %5317  ;;  %7846 = vrot.lane.b32.xlu2 %v11589_v37, %s7915_s18  ;;  %v5485_v37 = vadd.f32 %v11743_v4, %v5484_v59  ;;  %v5274_v59 = vsel %vm12866_vm7, %v11052_v3, %v11033_v50  ;;  %v5488_v50 = vadd.f32 %v11743_v4, %v5487_v5 }
 0x531   :  { %v5334_v19 = vsel %vm12916_vm3, %v5270_v14, %v5318_v27  ;;  %v5492_v14 = vpop.f32.mrf.mxu0 }
 0x532   :  { %7527 = vmatmul.msk.bf16.gmra.mxu3 %vm12917_vm14, %v5334_v19 }
 0x533   :  { %v11749_v31 = vpop.permute.xlu2 %7696 }
 0x534   :  { %v7699_v45 = vunpack.i.h.bf16 %v11749_v31 }
 0x535   :  { %7871 = vrot.lane.b32.xlu1 %v7790_v24, %s7915_s18 }
 0x536   :  { %7866 = vrot.lane.b32.xlu0 %v7785_v30, %s7915_s18 }
 0x538   :  { %v5324_v22 = vpop.permute.xlu1 %5323  ;;  %v5322_v10 = vpop.permute.xlu0 %5321  ;;  %7861 = vrot.lane.b32.xlu2 %v11659_v43, %s7915_s18 }
 0x53a   :  { %v5531_v20 = vpop.f32.mrf.mxu3 }
 0x53b   :  { %v5532_v61 = vadd.f32 %v5531_v20, %v5483_v56 }
 0x53d   :  { %v5571_v25 = vmax.f32 %v5532_v61, 0.0  ;;  %v11785_v61 = vpop.f32.mrf.mxu0 }
 0x53e   :  { %12924 = vst [vmem:[#allocation40_spill] sm:$0xff] %v11785_v61 }
 0x53f   :  { %v5587_v43 = vpack.c.bf16 %v5571_v25, %v5571_v25 }
 0x540   :  { %v11759_v1 = vpop.permute.xlu1 %7691  ;;  %v11763_v33 = vpop.permute.xlu0 %7686  ;;  %7876 = vrot.lane.b32.xlu2 %v7795_v48, %s7915_s18  ;;  %v5338_v48 = vsel %vm12922_vm12, %v5274_v59, %v5322_v10 }
 0x541   :  { %v11761_v38 = vpop.permute.xlu2 %7711  ;;  %v6884_v16 = vunpack.c.l.b16 %v5587_v43 }
 0x542   :  { %v5533_v8 = vpop.f32.mrf.mxu3  ;;  %7528 = vmatmul.msk.bf16.gmra.mxu3 %vm12920_vm6, %v5336_v44 }
 0x543   :  { %v5534_v53 = vadd.f32 %v5533_v8, %v5485_v37  ;;  %v5340_v37 = vsel %vm12925_vm10, %v11105_v55, %v5324_v22 }
 0x545   :  { %v5572_v24 = vmax.f32 %v5534_v53, 0.0  ;;  %v5497_v10 = vpop.f32.mrf.mxu0 }
 0x547   :  { %v5588_v30 = vpack.c.bf16 %v5572_v24, %v5572_v24  ;;  %v5490_v24 = vadd.f32 %v11743_v4, %v5489_v23  ;;  %v7890_v23 = vld [vmem:[%s12177_s1] sm:$0xf] }
 0x548   :  { %v11770_v6 = vpop.permute.xlu1 %7706  ;;  %v11772_v27 = vpop.permute.xlu0 %7701 }
 0x549   :  { %v6885_v35 = vunpack.c.l.b16 %v5588_v30  ;;  %v11768_v36 = vpop.permute.xlu2 %7726  ;;  %v7704_v60 = vunpack.i.h.bf16 %v11772_v27 }
 0x54b   :  { %v11766_v26 = vpack.c.b16 %v6885_v35, %v6884_v16 }
 0x54d   :  { %12921 = vst [vmem:[#allocation25_spill] sm:$0xff] %v11766_v26  ;;  %v5499_v59 = vpop.f32.mrf.mxu0  ;;  %v5493_v26 = vadd.f32 %v11743_v4, %v5492_v14  ;;  %v7684_v14 = vunpack.i.h.bf16 %v11733_v21 }
 0x550   :  { %v11781_v56 = vpop.permute.xlu1 %7721 }
 0x551   :  { %v11779_v19 = vpop.permute.xlu2 %7741 }
 0x552   :  { %7529 = vmatmul.msk.bf16.gmra.mxu3 %vm12923_vm9, %v5338_v48  ;;  %v11783_v20 = vpop.permute.xlu0 %7716 }
 0x558   :  { %v11791_v25 = vpop.permute.xlu1 %7736 }
 0x559   :  { %v11787_v44 = vpop.permute.xlu2 %7756 }
 0x55a   :  { %v11794_v3 = vpop.permute.xlu0 %7731 }
 0x560   :  { %v11800_v16 = vpop.permute.xlu1 %7751 }
 0x562   :  { %7530 = vmatmul.msk.bf16.gmra.mxu3 %vm12926_vm4, %v5340_v37  ;;  %v5536_v8 = vpop.f32.mrf.mxu3  ;;  %v11797_v43 = vpop.permute.xlu2 %7771  ;;  %v11806_v37 = vadd.f32 %v11743_v4, %v5497_v10  ;;  %v7683_v10 = vunpack.i.l.bf16 %v11733_v21 }
 0x563   :  { %v5537_v53 = vadd.f32 %v5536_v8, %v5488_v50  ;;  %v11802_v55 = vpop.permute.xlu0 %7746  ;;  %v11809_v50 = vadd.f32 %v11743_v4, %v5499_v59  ;;  %v5875_v8 = vunpack.c.l.bf16 %v7890_v23  ;;  %v5882_v59 = vunpack.c.l.bf16 %v11225_v54 }
 0x564   :  { %v5887_v4 = vunpack.c.l.bf16 %v11313_v0  ;;  %v5888_v23 = vunpack.c.l.bf16 %v11323_v28  ;;  %v7894_v0 = vld [vmem:[%s12177_s1 + $0x18] sm:$0xf] }
 0x565   :  { %v5573_v30 = vmax.f32 %v5537_v53, 0.0  ;;  %v7891_v53 = vld [vmem:[%s12177_s1 + $0x8] sm:$0xf]  ;;  %v5878_v28 = vunpack.c.l.bf16 %v7894_v0  ;;  %v5885_v0 = vunpack.c.l.bf16 %v7896_v29 }
 0x567   :  { %v5589_v5 = vpack.c.bf16 %v5573_v30, %v5573_v30 }
 0x569   :  { %v6886_v61 = vunpack.c.l.b16 %v5589_v5  ;;  %v7689_v5 = vunpack.i.h.bf16 %v11763_v33 }
 0x56a   :  { %v5538_v35 = vpop.f32.mrf.mxu3  ;;  %v11817_v30 = vpop.permute.xlu2 %7786 }
 0x56b   :  { %v5539_v22 = vadd.f32 %v5538_v35, %v5490_v24  ;;  %v5876_v24 = vunpack.c.l.bf16 %v7891_v53  ;;  %v7698_v53 = vunpack.i.l.bf16 %v11749_v31 }
 0x56d   :  { %v5574_v48 = vmax.f32 %v5539_v22, 0.0  ;;  %v5881_v22 = vunpack.c.l.bf16 %v11215_v11  ;;  %v7893_v11 = vld [vmem:[%s12177_s1 + $0x28] sm:$0xf]  ;;  %v11841_v34 = vmax.f32 %v5876_v24, %v7684_v14  ;;  %v7898_v24 = vld [vmem:[%s12177_s1 + $0x50] sm:$0xf] }
 0x56e   :  { %v5880_v54 = vunpack.c.l.bf16 %v7893_v11  ;;  %v7895_v11 = vld [vmem:[%s12177_s1 + $0x10] sm:$0xf]  ;;  %v11851_v15 = vpop.permute.xlu1 %7766  ;;  %v5883_v14 = vunpack.c.l.bf16 %v7898_v24  ;;  %v7708_v24 = vunpack.i.l.bf16 %v11770_v6 }
 0x56f   :  { %v5590_v35 = vpack.c.bf16 %v5574_v48, %v5574_v48  ;;  %v7892_v48 = vld [vmem:[%s12177_s1 + $0x20] sm:$0xf]  ;;  %v5877_v46 = vunpack.c.l.bf16 %v7895_v11  ;;  %v11865_v29 = vmax.f32 %v5881_v22, %v7698_v53  ;;  %v7694_v11 = vunpack.i.h.bf16 %v11759_v1 }
 0x570   :  { %v5879_v7 = vunpack.c.l.bf16 %v7892_v48  ;;  %v11843_v48 = vmax.f32 %v5875_v8, %v7683_v10  ;;  %v11861_v10 = vpop.permute.xlu0 %7761  ;;  %v7709_v53 = vunpack.i.h.bf16 %v11770_v6  ;;  %v7719_v6 = vunpack.i.h.bf16 %v11783_v20 }
 0x571   :  { %v6887_v40 = vunpack.c.l.b16 %v5590_v35  ;;  %v6025_v51 = vmax.f32 %v11865_v29, %v11298_v49 }
 0x572   :  { %v5541_v21 = vpop.f32.mrf.mxu3  ;;  %v11872_v57 = vpop.permute.xlu2 %7801  ;;  %v6019_v22 = vmax.f32 %v11843_v48, %v11195_v47  ;;  %v7729_v48 = vunpack.i.h.bf16 %v11768_v36 }
 0x573   :  { %v11837_v35 = vpack.c.b16 %v6887_v40, %v6886_v61  ;;  %v11839_v31 = vadd.f32 %v5541_v21, %v5493_v26  ;;  %v7693_v40 = vunpack.i.l.bf16 %v11759_v1  ;;  %v7688_v26 = vunpack.i.l.bf16 %v11763_v33  ;;  %v7897_v61 = vld [vmem:[%s12177_s1 + $0x68] sm:$0xf] }
 0x574   :  { %v5886_v8 = vunpack.c.l.bf16 %v7897_v61  ;;  %v11863_v21 = vmax.f32 %v5882_v59, %v7699_v45  ;;  %v5884_v33 = vunpack.c.l.bf16 %v11200_v12  ;;  %v5974_v61 = vmax.f32 %v5878_v28, %v7689_v5 }
 0x575   :  { %12927 = vst [vmem:[#allocation106_spill] sm:$0xff] %v11837_v35  ;;  %v7714_v35 = vunpack.i.h.bf16 %v11761_v38  ;;  %v7703_v45 = vunpack.i.l.bf16 %v11772_v27  ;;  %v6020_v1 = vmax.f32 %v11841_v34, %v11209_v63  ;;  %v5975_v12 = vmax.f32 %v5879_v7, %v7693_v40 }
 0x576   :  { %12928 = vst [vmem:[#allocation53_spill] sm:$0xff] %v11839_v31  ;;  %v7713_v31 = vunpack.i.l.bf16 %v11761_v38  ;;  %v5973_v59 = vmax.f32 %v5877_v46, %v7688_v26  ;;  %v5889_v38 = vunpack.c.l.bf16 %v11277_v62  ;;  %v5976_v28 = vmax.f32 %v5880_v54, %v7694_v11 }
 0x577   :  { %v5890_v5 = vunpack.c.l.bf16 %v11294_v18  ;;  %v6026_v27 = vmax.f32 %v11863_v21, %v11315_v58  ;;  %v11889_v47 = vmax.f32 %v5888_v23, %v7714_v35  ;;  %v6022_v46 = vmax.f32 %v5974_v61, %v11182_v42  ;;  %v11899_v23 = vpop.permute.xlu1 %7781 }
 0x578   :  { %v11891_v63 = vmax.f32 %v5887_v4, %v7713_v31  ;;  %v5980_v34 = vmax.f32 %v5884_v33, %v7704_v60  ;;  %v5981_v7 = vmax.f32 %v5885_v0, %v7708_v24  ;;  %v5979_v62 = vmax.f32 %v5883_v14, %v7703_v45  ;;  %v11905_v31 = vpop.permute.xlu0 %7776  ;;  %v12930_v33 = vld [vmem:[#allocation69_spill] sm:$0xff]  ;;  %v12931_v45 = vld [vmem:[#allocation64_spill] sm:$0xff] }
 0x579   :  { %v7718_v18 = vunpack.i.l.bf16 %v11783_v20  ;;  %v6021_v54 = vmax.f32 %v5973_v59, %v11177_v52  ;;  %v5982_v40 = vmax.f32 %v5886_v8, %v7709_v53  ;;  %v6023_v26 = vmax.f32 %v5975_v12, %v11157_v39 }
 0x57a   :  { %v11887_v13 = vpop.f32.mrf.mxu3  ;;  %v7728_v4 = vunpack.i.l.bf16 %v11768_v36  ;;  %v7724_v42 = vunpack.i.h.bf16 %v11781_v56  ;;  %v7723_v60 = vunpack.i.l.bf16 %v11781_v56  ;;  %v6024_v35 = vmax.f32 %v5976_v28, %v11163_v32  ;;  %v11913_v8 = vpop.permute.xlu2 %7816  ;;  %v12929_v36 = vld [vmem:[#allocation19_spill] sm:$0xff] }
 0x57b   :  { %v6028_v20 = vmax.f32 %v5980_v34, %v11262_v9  ;;  %v7744_v52 = vunpack.i.h.bf16 %v11779_v19  ;;  %v6031_v0 = vmax.f32 %v11891_v63, %v11393_v2  ;;  %v6032_v39 = vmax.f32 %v11889_v47, %v11400_v41  ;;  %v12932_v63 = vld [vmem:[#allocation55_spill] sm:$0xff]  ;;  %v12933_v34 = vld [vmem:[#allocation86_spill] sm:$0xff] }
 0x57c   :  { %v6027_v14 = vmax.f32 %v5979_v62, %v12929_v36  ;;  %v5986_v11 = vmax.f32 %v5890_v5, %v7719_v6  ;;  %v5985_v56 = vmax.f32 %v5889_v38, %v7718_v18  ;;  %v6029_v32 = vmax.f32 %v5981_v7, %v12930_v33 }
 0x57d   :  { %v6167_v61 = vmax.f32 %v6022_v46, %v7729_v48  ;;  %v7734_v24 = vunpack.i.h.bf16 %v11794_v3  ;;  %v7733_v9 = vunpack.i.l.bf16 %v11794_v3  ;;  %v6030_v12 = vmax.f32 %v5982_v40, %v12931_v45 }
 0x57e   :  { %v6166_v59 = vmax.f32 %v6021_v54, %v7728_v4  ;;  %v7743_v2 = vunpack.i.l.bf16 %v11779_v19  ;;  %v6164_v53 = vmax.f32 %v6019_v22, %v7723_v60  ;;  %v6165_v41 = vmax.f32 %v6020_v1, %v7724_v42 }
 0x57f   :  { %v11921_v28 = vmax.f32 %v6028_v20, %v7744_v52  ;;  %v7739_v47 = vunpack.i.h.bf16 %v11791_v25  ;;  %v7749_v38 = vunpack.i.h.bf16 %v11802_v55  ;;  %v7748_v5 = vunpack.i.l.bf16 %v11802_v55  ;;  %v11931_v18 = vpop.permute.xlu1 %7796 }
 0x580   :  { %v6033_v46 = vmax.f32 %v5985_v56, %v12932_v63  ;;  %v6034_v7 = vmax.f32 %v5986_v11, %v12933_v34  ;;  %v7759_v3 = vunpack.i.h.bf16 %v11787_v44  ;;  %v7738_v62 = vunpack.i.l.bf16 %v11791_v25  ;;  %v11938_v42 = vpop.permute.xlu0 %7791 }
 0x581   :  { %v7758_v19 = vunpack.i.l.bf16 %v11787_v44  ;;  %v6169_v22 = vmax.f32 %v6024_v35, %v7734_v24  ;;  %v6168_v1 = vmax.f32 %v6023_v26, %v7733_v9  ;;  %v7774_v48 = vunpack.i.h.bf16 %v11797_v43 }
 0x582   :  { %v5546_v6 = vpop.f32.mrf.mxu3  ;;  %v7773_v55 = vunpack.i.l.bf16 %v11797_v43  ;;  %v7754_v40 = vunpack.i.h.bf16 %v11800_v16  ;;  %v7753_v4 = vunpack.i.l.bf16 %v11800_v16  ;;  %v6175_v25 = vmax.f32 %v6030_v12, %v7749_v38  ;;  %v11942_v35 = vpop.permute.xlu2 %7831 }
 0x583   :  { %v5547_v54 = vadd.f32 %v5546_v6, %v11806_v37  ;;  %v6174_v60 = vmax.f32 %v6029_v32, %v7748_v5  ;;  %v7789_v44 = vunpack.i.h.bf16 %v11817_v30  ;;  %v7788_v26 = vunpack.i.l.bf16 %v11817_v30 }
 0x584   :  { %v6172_v20 = vmax.f32 %v6027_v14, %v7743_v2  ;;  %v6170_v37 = vmax.f32 %v6025_v51, %v7738_v62  ;;  %v7769_v43 = vunpack.i.h.bf16 %v11851_v15  ;;  %v7768_v52 = vunpack.i.l.bf16 %v11851_v15 }
 0x585   :  { %v11949_v16 = vmax.f32 %v6034_v7, %v7759_v3  ;;  %v6171_v36 = vmax.f32 %v6026_v27, %v7739_v47  ;;  %v7764_v11 = vunpack.i.h.bf16 %v11861_v10  ;;  %v7763_v30 = vunpack.i.l.bf16 %v11861_v10 }
 0x586   :  { %v11956_v56 = vmax.f32 %v6033_v46, %v7758_v19  ;;  %v11958_v14 = vmax.f32 %v6169_v22, %v7774_v48  ;;  %v6176_v49 = vmax.f32 %v6031_v0, %v7753_v4  ;;  %v6177_v51 = vmax.f32 %v6032_v39, %v7754_v40  ;;  %v12934_v48 = vld [vmem:[#allocation101_spill] sm:$0xff]  ;;  %v12936_v4 = vld [vmem:[#allocation59_spill] sm:$0xff] }
 0x587   :  { %v11960_v29 = vmax.f32 %v6168_v1, %v7773_v55  ;;  %v11962_v33 = vmax.f32 %v6175_v25, %v7789_v44  ;;  %v11964_v15 = vmax.f32 %v6174_v60, %v7788_v26  ;;  %v5577_v32 = vmax.f32 %v5547_v54, 0.0  ;;  %v11969_v0 = vpop.permute.xlu1 %7811 }
 0x588   :  { %v6550_v24 = vmax.f32 %v6166_v59, %v7768_v52  ;;  %v6551_v58 = vmax.f32 %v6167_v61, %v7769_v43  ;;  %v7779_v21 = vunpack.i.h.bf16 %v11905_v31  ;;  %v7778_v27 = vunpack.i.l.bf16 %v11905_v31  ;;  %v7807_v38 = vpop.permute.xlu0 %7806 }
 0x589   :  { %v6548_v9 = vmax.f32 %v6164_v53, %v7763_v30  ;;  %v6549_v45 = vmax.f32 %v6165_v41, %v7764_v11  ;;  %v7804_v12 = vunpack.i.h.bf16 %v11872_v57  ;;  %v7803_v2 = vunpack.i.l.bf16 %v11872_v57 }
 0x58a   :  { %v5548_v10 = vpop.f32.mrf.mxu3  ;;  %v7784_v47 = vunpack.i.h.bf16 %v11899_v23  ;;  %v7783_v59 = vunpack.i.l.bf16 %v11899_v23  ;;  %v7819_v61 = vunpack.i.h.bf16 %v11913_v8  ;;  %v5593_v5 = vpack.c.bf16 %v5577_v32, %v5577_v32  ;;  %v7847_v53 = vpop.permute.xlu2 %7846 }
 0x58b   :  { %v5549_v39 = vadd.f32 %v5548_v10, %v11809_v50  ;;  %v7809_v31 = vunpack.i.h.bf16 %v7807_v38  ;;  %v7808_v63 = vunpack.i.l.bf16 %v7807_v38  ;;  %v6554_v46 = vmax.f32 %v6170_v37, %v7778_v27  ;;  %v12938_v27 = vld [vmem:[#allocation66_spill] sm:$0xff] }
 0x58c   :  { %v6555_v34 = vmax.f32 %v6171_v36, %v7779_v21  ;;  %v7818_v7 = vunpack.i.l.bf16 %v11913_v8  ;;  %v7849_v3 = vunpack.i.h.bf16 %v7847_v53  ;;  %v7848_v57 = vunpack.i.l.bf16 %v7847_v53 }
 0x58d   :  { %v5578_v41 = vmax.f32 %v5549_v39, 0.0  ;;  %v6646_v50 = vmax.f32 %v6550_v24, %v7808_v63  ;;  %v6647_v62 = vmax.f32 %v6551_v58, %v7809_v31  ;;  %v6644_v19 = vmax.f32 %v6548_v9, %v7803_v2  ;;  %v12939_v9 = vld [vmem:[#allocation15_spill] sm:$0xff]  ;;  %v12940_v63 = vld [vmem:[#allocation65_spill] sm:$0xff] }
 0x58e   :  { %v6645_v22 = vmax.f32 %v6549_v45, %v7804_v12  ;;  %v6556_v23 = vmax.f32 %v6172_v20, %v7783_v59  ;;  %v7793_v1 = vunpack.i.l.bf16 %v11938_v42  ;;  %v6890_v54 = vunpack.c.l.b16 %v5593_v5 }
 0x58f   :  { %v5594_v6 = vpack.c.bf16 %v5578_v41, %v5578_v41  ;;  %v12935_v55 = vunpack.c.l.bf16 %v12934_v48  ;;  %v12937_v25 = vunpack.c.l.bf16 %v12936_v4  ;;  %v6557_v8 = vmax.f32 %v11921_v28, %v7784_v47  ;;  %v11989_v30 = vpop.permute.xlu1 %7826 }
 0x590   :  { %v6650_v26 = vmax.f32 %v6554_v46, %v7818_v7  ;;  %v11983_v37 = vmax.f32 %v6555_v34, %v7819_v61  ;;  %v7794_v43 = vunpack.i.h.bf16 %v11938_v42  ;;  %v7799_v52 = vunpack.i.h.bf16 %v11931_v18  ;;  %v7822_v21 = vpop.permute.xlu0 %7821  ;;  %v12942_v46 = vld [vmem:[#allocation82_spill] sm:$0xff] }
 0x591   :  { %v6694_v40 = vmax.f32 %v6646_v50, %v12935_v55  ;;  %v6695_v60 = vmax.f32 %v6647_v62, %v12937_v25  ;;  %v6891_v44 = vunpack.c.l.b16 %v5594_v6  ;;  %v7798_v32 = vunpack.i.l.bf16 %v11931_v18  ;;  %v12944_v50 = vld [vmem:[#allocation49_spill] sm:$0xff]  ;;  %v12946_v6 = vld [vmem:[#allocation67_spill] sm:$0xff] }
 0x592   :  { %v6560_v24 = vmax.f32 %v6176_v49, %v7793_v1  ;;  %v7834_v58 = vunpack.i.h.bf16 %v11942_v35  ;;  %v7833_v28 = vunpack.i.l.bf16 %v11942_v35  ;;  %v7824_v45 = vunpack.i.h.bf16 %v7822_v21  ;;  %v7862_v39 = vpop.permute.xlu2 %7861 }
 0x593   :  { %v6790_v20 = vmax.f32 %v6694_v40, %v7848_v57  ;;  %v6791_v36 = vmax.f32 %v6695_v60, %v7849_v3  ;;  %v11987_v11 = vpack.c.b16 %v6891_v44, %v6890_v54  ;;  %v7823_v12 = vunpack.i.l.bf16 %v7822_v21 }
 0x594   :  { %v6561_v2 = vmax.f32 %v6177_v51, %v7794_v43  ;;  %v7813_v47 = vunpack.i.l.bf16 %v11969_v0  ;;  %v7864_v59 = vunpack.i.h.bf16 %v7862_v39  ;;  %v7863_v61 = vunpack.i.l.bf16 %v7862_v39  ;;  %v12952_v39 = vld [vmem:[#allocation91_spill] sm:$0xff] }
 0x595   :  { %v6838_v10 = vmax.f32 %v6790_v20, %v12938_v27  ;;  %v6839_v42 = vmax.f32 %v6791_v36, %v12939_v9  ;;  %v6652_v49 = vmax.f32 %v6556_v23, %v7823_v12  ;;  %v6653_v5 = vmax.f32 %v6557_v8, %v7824_v45  ;;  %v12950_v36 = vld [vmem:[#allocation29_spill] sm:$0xff]  ;;  %v12951_v45 = vld [vmem:[#allocation18_spill] sm:$0xff] }
 0x596   :  { %v6562_v31 = vmax.f32 %v11956_v56, %v7798_v32  ;;  %v7814_v35 = vunpack.i.h.bf16 %v11969_v0  ;;  %v12941_v53 = vunpack.c.l.bf16 %v12940_v63  ;;  %v12943_v34 = vunpack.c.l.bf16 %v12942_v46  ;;  %v12948_v0 = vld [vmem:[#allocation44_spill] sm:$0xff] }
 0x597   :  { %v6854_v38 = vpack.c.bf16 %v6838_v10, %v6838_v10  ;;  %v6855_v18 = vpack.c.bf16 %v6839_v42, %v6839_v42  ;;  %v12945_v62 = vunpack.c.l.bf16 %v12944_v50  ;;  %v12947_v1 = vunpack.c.l.bf16 %v12946_v6  ;;  %v7842_v25 = vpop.permute.xlu1 %7841 }
 0x598   :  { %v6692_v41 = vmax.f32 %v6644_v19, %v12941_v53  ;;  %v6693_v7 = vmax.f32 %v6645_v22, %v12943_v34  ;;  %v6563_v23 = vmax.f32 %v11949_v16, %v7799_v52  ;;  %v12008_v48 = vmax.f32 %v6560_v24, %v7833_v28  ;;  %v7837_v16 = vpop.permute.xlu0 %7836 }
 0x599   :  { %v6926_v3 = vunpack.c.l.b16 %v6854_v38  ;;  %v6927_v51 = vunpack.c.l.b16 %v6855_v18  ;;  %v6700_v57 = vmax.f32 %v6652_v49, %v12945_v62  ;;  %v6701_v54 = vmax.f32 %v6653_v5, %v12947_v1 }
 0x59a   :  { %v12010_v56 = vmax.f32 %v6561_v2, %v7834_v58  ;;  %v12949_v55 = vunpack.c.l.bf16 %v12948_v0  ;;  %v6648_v40 = vmax.f32 %v11960_v29, %v7813_v47  ;;  %v6649_v44 = vmax.f32 %v11958_v14, %v7814_v35  ;;  %v7877_v29 = vpop.permute.xlu2 %7876  ;;  %v12957_v35 = vld [vmem:[#allocation70_spill] sm:$0xff] }
 0x59b   :  { %v6796_v22 = vmax.f32 %v6700_v57, %v7863_v61  ;;  %v6797_v4 = vmax.f32 %v6701_v54, %v7864_v59  ;;  %v6941_v60 = vpack.c.b16 %v6927_v51, %v6926_v3  ;;  %v7828_v8 = vunpack.i.l.bf16 %v11989_v30  ;;  %v12955_v61 = vld [vmem:[#allocation99_spill] sm:$0xff]  ;;  %v12961_v51 = vld [vmem:[#allocation45_spill] sm:$0xff] }
 0x59c   :  { %v6698_v19 = vmax.f32 %v6650_v26, %v12949_v55  ;;  %v7844_v43 = vunpack.i.h.bf16 %v7842_v25  ;;  %v7843_v20 = vunpack.i.l.bf16 %v7842_v25  ;;  %v7839_v24 = vunpack.i.h.bf16 %v7837_v16 }
 0x59d   :  { %v6844_v52 = vmax.f32 %v6796_v22, %v11623_v17  ;;  %v6845_v32 = vmax.f32 %v6797_v4, %v12950_v36  ;;  %v7838_v58 = vunpack.i.l.bf16 %v7837_v16  ;;  %6950 = vrot.lane.b32.xlu1 %v6941_v60, %s7916_s2  ;;  %v7879_v21 = vunpack.i.h.bf16 %v7877_v29  ;;  %v12953_v17 = vld [vmem:[#allocation22_spill] sm:$0xff]  ;;  %v12964_v60 = vld [vmem:[#allocation103_spill] sm:$0xff] }
 0x59e   :  { %v6788_v26 = vmax.f32 %v6692_v41, %v7843_v20  ;;  %v6789_v28 = vmax.f32 %v6693_v7, %v7844_v43  ;;  %v7878_v27 = vunpack.i.l.bf16 %v7877_v29  ;;  %v6659_v42 = vmax.f32 %v6563_v23, %v7839_v24  ;;  %v12959_v41 = vld [vmem:[#allocation83_spill] sm:$0xff]  ;;  %v12963_v4 = vld [vmem:[#allocation38_spill] sm:$0xff] }
 0x59f   :  { %v6860_v10 = vpack.c.bf16 %v6844_v52, %v6844_v52  ;;  %v6861_v14 = vpack.c.bf16 %v6845_v32, %v6845_v32  ;;  %v6658_v9 = vmax.f32 %v6562_v31, %v7838_v58  ;;  %v12954_v47 = vunpack.c.l.bf16 %v12953_v17  ;;  %v7857_v1 = vpop.permute.xlu1 %7856  ;;  %v12965_v58 = vld [vmem:[#allocation81_spill] sm:$0xff] }
 0x5a0   :  { %v6836_v12 = vmax.f32 %v6788_v26, %v12951_v45  ;;  %v6837_v2 = vmax.f32 %v6789_v28, %v12952_v39  ;;  %v12956_v38 = vunpack.c.l.bf16 %v12955_v61  ;;  %v12958_v63 = vunpack.c.l.bf16 %v12957_v35  ;;  %v7852_v22 = vpop.permute.xlu0 %7851  ;;  %v12966_v26 = vld [vmem:[#allocation54_spill] sm:$0xff]  ;;  %v12975_v35 = vld [vmem:[#allocation47_spill] sm:$0xff] }
 0x5a1   :  { %v6699_v59 = vmax.f32 %v11983_v37, %v12954_v47  ;;  %v6932_v49 = vunpack.c.l.b16 %v6860_v10  ;;  %v6933_v5 = vunpack.c.l.b16 %v6861_v14  ;;  %v12960_v46 = vunpack.c.l.bf16 %v12959_v41 }
 0x5a2   :  { %v6696_v18 = vmax.f32 %v6648_v40, %v12956_v38  ;;  %v6706_v53 = vmax.f32 %v6658_v9, %v12958_v63  ;;  %v7829_v34 = vunpack.i.h.bf16 %v11989_v30  ;;  %v6852_v7 = vpack.c.bf16 %v6836_v12, %v6836_v12 }
 0x5a3   :  { %v6707_v31 = vmax.f32 %v6659_v42, %v12960_v46  ;;  %v6853_v3 = vpack.c.bf16 %v6837_v2, %v6837_v2  ;;  %v12962_v50 = vunpack.c.l.bf16 %v12961_v51  ;;  %v6654_v37 = vmax.f32 %v11964_v15, %v7828_v8  ;;  %v12970_v42 = vld [vmem:[#allocation30_spill] sm:$0xff]  ;;  %v12971_v2 = vld [vmem:[#allocation72_spill] sm:$0xff] }
 0x5a4   :  { %v6802_v57 = vmax.f32 %v6706_v53, %v7878_v27  ;;  %v6944_v54 = vpack.c.b16 %v6933_v5, %v6932_v49  ;;  %v6924_v23 = vunpack.c.l.b16 %v6852_v7  ;;  %v7859_v55 = vunpack.i.h.bf16 %v7857_v1 }
 0x5a5   :  { %v6697_v62 = vmax.f32 %v6649_v44, %v12962_v50  ;;  %v6803_v6 = vmax.f32 %v6707_v31, %v7879_v21  ;;  %v6925_v0 = vunpack.c.l.b16 %v6853_v3  ;;  %v7858_v40 = vunpack.i.l.bf16 %v7857_v1  ;;  %v12967_v21 = vld [vmem:[#allocation7_spill] sm:$0xff] }
 0x5a6   :  { %v6850_v25 = vmax.f32 %v6802_v57, %v12963_v4  ;;  %v7854_v43 = vunpack.i.h.bf16 %v7852_v22  ;;  %v7853_v20 = vunpack.i.l.bf16 %v7852_v22  ;;  %6956 = vrot.lane.b32.xlu1 %v6944_v54, %s7916_s2  ;;  %v6655_v44 = vmax.f32 %v11962_v33, %v7829_v34  ;;  %v12969_v33 = vld [vmem:[#allocation57_spill] sm:$0xff]  ;;  %v12979_v22 = vld [vmem:[#allocation26_spill] sm:$0xff] }
 0x5a7   :  { %v6851_v30 = vmax.f32 %v6803_v6, %v12964_v60  ;;  %v6794_v15 = vmax.f32 %v6698_v19, %v7858_v40  ;;  %v6795_v8 = vmax.f32 %v6699_v59, %v7859_v55  ;;  %v6940_v16 = vpack.c.b16 %v6925_v0, %v6924_v23  ;;  %v12973_v59 = vld [vmem:[#allocation108_spill] sm:$0xff]  ;;  %v7872_v5 = vpop.permute.xlu1 %7871  ;;  %v12977_v23 = vld [vmem:[#allocation85_spill] sm:$0xff] }
 0x5a8   :  { %v6866_v52 = vpack.c.bf16 %v6850_v25, %v6850_v25  ;;  %v6792_v32 = vmax.f32 %v6696_v18, %v7853_v20  ;;  %v6793_v24 = vmax.f32 %v6697_v62, %v7854_v43  ;;  %v12968_v27 = vunpack.c.l.bf16 %v12967_v21  ;;  %v7867_v7 = vpop.permute.xlu0 %7866  ;;  %v12978_v55 = vld [vmem:[#allocation100_spill] sm:$0xff] }
 0x5a9   :  { %v6867_v36 = vpack.c.bf16 %v6851_v30, %v6851_v30  ;;  %v6842_v29 = vmax.f32 %v6794_v15, %v12965_v58  ;;  %v6843_v28 = vmax.f32 %v6795_v8, %v12966_v26  ;;  %6948 = vrot.lane.b32.xlu0 %v6940_v16, %s7916_s2  ;;  %v12972_v17 = vunpack.c.l.bf16 %v12971_v2  ;;  %v12980_v25 = vld [vmem:[#allocation88_spill] sm:$0xff] }
 0x5aa   :  { %v6704_v10 = vmax.f32 %v12008_v48, %v12968_v27  ;;  %v6938_v14 = vunpack.c.l.b16 %v6866_v52  ;;  %v6840_v19 = vmax.f32 %v6792_v32, %v12969_v33  ;;  %v6841_v45 = vmax.f32 %v6793_v24, %v12970_v42  ;;  %v5502_v24 = vpop.f32.mrf.mxu0  ;;  %v12981_v42 = vld [vmem:[#allocation40_spill] sm:$0xff] }
 0x5ab   :  { %v6939_v9 = vunpack.c.l.b16 %v6867_v36  ;;  %v6858_v12 = vpack.c.bf16 %v6842_v29, %v6842_v29  ;;  %v6859_v39 = vpack.c.bf16 %v6843_v28, %v6843_v28  ;;  %v6705_v47 = vmax.f32 %v12010_v56, %v12972_v17 }
 0x5ac   :  { %v12974_v61 = vunpack.c.l.bf16 %v12973_v59  ;;  %v6856_v18 = vpack.c.bf16 %v6840_v19, %v6840_v19  ;;  %v6857_v49 = vpack.c.bf16 %v6841_v45, %v6841_v45  ;;  %v12976_v48 = vunpack.c.l.bf16 %v12975_v35  ;;  %v12982_v45 = vld [vmem:[#allocation61_spill] sm:$0xff] }
 0x5ad   :  { %v6947_v53 = vpack.c.b16 %v6939_v9, %v6938_v14  ;;  %v6930_v41 = vunpack.c.l.b16 %v6858_v12  ;;  %v6931_v46 = vunpack.c.l.b16 %v6859_v39  ;;  %v7874_v31 = vunpack.i.h.bf16 %v7872_v5  ;;  %v12983_v59 = vld [vmem:[#allocation53_spill] sm:$0xff] }
 0x5ae   :  { %v6702_v38 = vmax.f32 %v6654_v37, %v12974_v61  ;;  %v6703_v63 = vmax.f32 %v6655_v44, %v12976_v48  ;;  %v7873_v34 = vunpack.i.l.bf16 %v7872_v5  ;;  %v6928_v3 = vunpack.c.l.b16 %v6856_v18 }
 0x5af   :  { %v6929_v51 = vunpack.c.l.b16 %v6857_v49  ;;  %v7869_v50 = vunpack.i.h.bf16 %v7867_v7  ;;  %v7868_v62 = vunpack.i.l.bf16 %v7867_v7  ;;  %6962 = vrot.lane.b32.xlu1 %v6947_v53, %s7916_s2  ;;  %v6801_v37 = vmax.f32 %v6705_v47, %v7874_v31 }
 0x5b0   :  { %v6800_v56 = vmax.f32 %v6704_v10, %v7873_v34  ;;  %v6943_v57 = vpack.c.b16 %v6931_v46, %v6930_v41  ;;  %v5495_v12 = vadd.f32 %v12982_v45, %v12981_v42  ;;  %v5575_v61 = vmax.f32 %v12983_v59, 0.0 }
 0x5b1   :  { %v6798_v6 = vmax.f32 %v6702_v38, %v7868_v62  ;;  %v6799_v1 = vmax.f32 %v6703_v63, %v7869_v50  ;;  %v6942_v54 = vpack.c.b16 %v6929_v51, %v6928_v3  ;;  %v6849_v40 = vmax.f32 %v6801_v37, %v12978_v55 }
 0x5b2   :  { %v6848_v0 = vmax.f32 %v6800_v56, %v12977_v23  ;;  %6954 = vrot.lane.b32.xlu0 %v6943_v57, %s7916_s2  ;;  %v5504_v29 = vpop.f32.mrf.mxu0  ;;  %v5544_v39 = vadd.f32 %v11887_v13, %v5495_v12  ;;  %v5591_v63 = vpack.c.bf16 %v5575_v61, %v5575_v61  ;;  %v5503_v53 = vadd.f32 %v12982_v45, %v5502_v24 }
 0x5b3   :  { %v6846_v4 = vmax.f32 %v6798_v6, %v12979_v22  ;;  %v6847_v60 = vmax.f32 %v6799_v1, %v12980_v25  ;;  %6952 = vrot.lane.b32.xlu2 %v6942_v54, %s7916_s2  ;;  %v6865_v43 = vpack.c.bf16 %v6849_v40, %v6849_v40  ;;  %v5505_v35 = vadd.f32 %v12982_v45, %v5504_v29 }
 0x5b4   :  { %v6864_v30 = vpack.c.bf16 %v6848_v0, %v6848_v0  ;;  %v5576_v2 = vmax.f32 %v5544_v39, 0.0  ;;  %v6888_v7 = vunpack.c.l.b16 %v5591_v63 }
 0x5b5   :  { %v6862_v20 = vpack.c.bf16 %v6846_v4, %v6846_v4  ;;  %v6863_v44 = vpack.c.bf16 %v6847_v60, %v6847_v60  ;;  %v6937_v8 = vunpack.c.l.b16 %v6865_v43  ;;  %v5551_v58 = vpop.f32.mrf.mxu3 }
 0x5b6   :  { %v6936_v15 = vunpack.c.l.b16 %v6864_v30  ;;  %v5592_v49 = vpack.c.bf16 %v5576_v2, %v5576_v2  ;;  %v5552_v31 = vadd.f32 %v5551_v58, %v5503_v53 }
 0x5b7   :  { %v6934_v16 = vunpack.c.l.b16 %v6862_v20  ;;  %v6935_v52 = vunpack.c.l.b16 %v6863_v44 }
 0x5b8   :  { %v6946_v36 = vpack.c.b16 %v6937_v8, %v6936_v15  ;;  %v6889_v46 = vunpack.c.l.b16 %v5592_v49  ;;  %v5579_v56 = vmax.f32 %v5552_v31, 0.0  ;;  %v12984_v8 = vld [vmem:[#allocation106_spill] sm:$0xff] }
 0x5b9   :  { %v6945_v32 = vpack.c.b16 %v6935_v52, %v6934_v16 }
 0x5ba   :  { %6960 = vrot.lane.b32.xlu0 %v6946_v36, %s7916_s2  ;;  %v5507_v28 = vpop.f32.mrf.mxu0  ;;  %v6902_v50 = vpack.c.b16 %v6889_v46, %v6888_v7  ;;  %v5595_v60 = vpack.c.bf16 %v5579_v56, %v5579_v56 }
 0x5bb   :  { %6958 = vrot.lane.b32.xlu2 %v6945_v32, %s7916_s2  ;;  %v5508_v38 = vadd.f32 %v12982_v45, %v5507_v28 }
 0x5bd   :  { %v5553_v26 = vpop.f32.mrf.mxu3 }
 0x5be   :  { %v5554_v41 = vadd.f32 %v5553_v26, %v5505_v35  ;;  %v6892_v26 = vunpack.c.l.b16 %v5595_v60 }
 0x5c0   :  { %v5580_v51 = vmax.f32 %v5554_v41, 0.0 }
 0x5c2   :  { %v5509_v27 = vpop.f32.mrf.mxu0  ;;  %v5596_v0 = vpack.c.bf16 %v5580_v51, %v5580_v51 }
 0x5c3   :  { %v5510_v47 = vadd.f32 %v12982_v45, %v5509_v27 }
 0x5c4   :  { %v6893_v52 = vunpack.c.l.b16 %v5596_v0 }
 0x5c5   :  { %v5556_v21 = vpop.f32.mrf.mxu3 }
 0x5c6   :  { %v5557_v48 = vadd.f32 %v5556_v21, %v5508_v38  ;;  %v6904_v39 = vpack.c.b16 %v6893_v52, %v6892_v26 }
 0x5c8   :  { %v5581_v34 = vmax.f32 %v5557_v48, 0.0 }
 0x5ca   :  { %v12063_v14 = vpop.f32.mrf.mxu0  ;;  %v5597_v37 = vpack.c.bf16 %v5581_v34, %v5581_v34 }
 0x5cb   :  { %v5513_v35 = vadd.f32 %v12982_v45, %v12063_v14  ;;  %v12985_v14 = vld [vmem:[#allocation25_spill] sm:$0xff] }
 0x5cc   :  { %v6894_v30 = vunpack.c.l.b16 %v5597_v37 }
 0x5cd   :  { %v5558_v10 = vpop.f32.mrf.mxu3 }
 0x5ce   :  { %v5559_v5 = vadd.f32 %v5558_v10, %v5510_v47 }
 0x5d0   :  { %v5582_v13 = vmax.f32 %v5559_v5, 0.0 }
 0x5d2   :  { %v12067_v33 = vpop.f32.mrf.mxu0  ;;  %v5598_v62 = vpack.c.bf16 %v5582_v13, %v5582_v13 }
 0x5d3   :  { %v5515_v59 = vadd.f32 %v12982_v45, %v12067_v33 }
 0x5d4   :  { %v6895_v40 = vunpack.c.l.b16 %v5598_v62 }
 0x5d5   :  { %v12065_v9 = vpop.f32.mrf.mxu3 }
 0x5d6   :  { %v6905_v32 = vpack.c.b16 %v6895_v40, %v6894_v30  ;;  %v5562_v13 = vadd.f32 %v12065_v9, %v5513_v35 }
 0x5d8   :  { %v5583_v9 = vmax.f32 %v5562_v13, 0.0 }
 0x5da   :  { %v5517_v17 = vpop.f32.mrf.mxu0  ;;  %v5599_v40 = vpack.c.bf16 %v5583_v9, %v5583_v9 }
 0x5db   :  { %v5518_v23 = vadd.f32 %v12982_v45, %v5517_v17 }
 0x5dd   :  { %v12069_v19 = vpop.f32.mrf.mxu3 }
 0x5de   :  { %v5564_v48 = vadd.f32 %v12069_v19, %v5515_v59 }
 0x5e2   :  { %v5519_v3 = vpop.f32.mrf.mxu0 }
 0x5e3   :  { %v5520_v1 = vadd.f32 %v12982_v45, %v5519_v3  ;;  %v5584_v3 = vmax.f32 %v5564_v48, 0.0 }
 0x5e5   :  { %v5566_v18 = vpop.f32.mrf.mxu3 }
 0x5e6   :  { %v5567_v20 = vadd.f32 %v5566_v18, %v5518_v23 }
 0x5e8   :  { %v5585_v21 = vmax.f32 %v5567_v20, 0.0 }
 0x5ea   :  { %v5601_v38 = vpack.c.bf16 %v5585_v21, %v5585_v21 }
 0x5ec   :  { %v6898_v45 = vunpack.c.l.b16 %v5601_v38 }
 0x5ed   :  { %v5568_v57 = vpop.f32.mrf.mxu3 }
 0x5ee   :  { %v5569_v22 = vadd.f32 %v5568_v57, %v5520_v1  ;;  %v5600_v1 = vpack.c.bf16 %v5584_v3, %v5584_v3 }
 0x5f0   :  { %v5586_v24 = vmax.f32 %v5569_v22, 0.0  ;;  %v6897_v30 = vunpack.c.l.b16 %v5600_v1 }
 0x5f2   :  { %v5602_v2 = vpack.c.bf16 %v5586_v24, %v5586_v24 }
 0x5f4   :  { %v6899_v53 = vunpack.c.l.b16 %v5602_v2 }
 0x5f6   :  { %v6907_v62 = vpack.c.b16 %v6899_v53, %v6898_v45 }
 0x60d   :  { %v6953_v6 = vpop.permute.xlu2 %6952 }
 0x60e   :  { %v6972_v54 = vsel %vm2264_vm15, %v6902_v50, %v6953_v6 }
 0x60f   :  { %v6992_v55 = vsel %vm6988_vm8, %v6972_v54, 0  ;;  %v6951_v43 = vpop.permute.xlu1 %6950 }
 0x610   :  { %v7010_v4 = vunpack.c.l.b16 %v6992_v55  ;;  %v7011_v25 = vunpack.c.h.b16 %v6992_v55  ;;  %v6969_v16 = vsel %vm2264_vm15, %v12984_v8, %v6951_v43 }
 0x611   :  { %v6991_v36 = vsel %vm6988_vm8, %v6969_v16, 0 }
 0x612   :  { %v7026_v44 = vpack.c.b16 %v7010_v4, %v7010_v4  ;;  %v7027_v15 = vpack.c.b16 %v7011_v25, %v7011_v25  ;;  %v7008_v58 = vunpack.c.l.b16 %v6991_v36  ;;  %v7009_v29 = vunpack.c.h.b16 %v6991_v36 }
 0x614   :  { %7059 = vst.msk [vmem:[%s12178_s8 + $0x10] sm:$0xf] %vm7054_vm11, %v7026_v44  ;;  %v7024_v27 = vpack.c.b16 %v7008_v58, %v7008_v58  ;;  %v7025_v10 = vpack.c.b16 %v7009_v29, %v7009_v29  ;;  %v6896_v44 = vunpack.c.l.b16 %v5599_v40 }
 0x615   :  { %7060 = vst.msk [vmem:[%s12178_s8 + $0x14] sm:$0xf] %vm7054_vm11, %v7027_v15  ;;  %v6959_v28 = vpop.permute.xlu2 %6958 }
 0x616   :  { %v6981_v42 = vsel %vm2264_vm15, %v6905_v32, %v6959_v28  ;;  %7057 = vst.msk [vmem:[%s12178_s8 + $0x8] sm:$0xf] %vm7054_vm11, %v7024_v27  ;;  %v6906_v8 = vpack.c.b16 %v6897_v30, %v6896_v44 }
 0x617   :  { %v6995_v12 = vsel %vm6988_vm8, %v6981_v42, 0  ;;  %7058 = vst.msk [vmem:[%s12178_s8 + $0xc] sm:$0xf] %vm7054_vm11, %v7025_v10 }
 0x618   :  { %v7016_v17 = vunpack.c.l.b16 %v6995_v12  ;;  %v7017_v47 = vunpack.c.h.b16 %v6995_v12  ;;  %v6957_v61 = vpop.permute.xlu1 %6956 }
 0x619   :  { %v6978_v5 = vsel %vm2264_vm15, %v6904_v39, %v6957_v61 }
 0x61a   :  { %v7032_v18 = vpack.c.b16 %v7016_v17, %v7016_v17  ;;  %v7033_v49 = vpack.c.b16 %v7017_v47, %v7017_v47  ;;  %v6994_v63 = vsel %vm6988_vm8, %v6978_v5, 0 }
 0x61b   :  { %v7014_v33 = vunpack.c.l.b16 %v6994_v63  ;;  %v7015_v41 = vunpack.c.h.b16 %v6994_v63  ;;  %v6949_v46 = vpop.permute.xlu0 %6948 }
 0x61c   :  { %7065 = vst.msk [vmem:[%s12178_s8 + $0x28] sm:$0xf] %vm7054_vm11, %v7032_v18  ;;  %v6966_v19 = vsel %vm2264_vm15, %v12985_v14, %v6949_v46 }
 0x61d   :  { %7066 = vst.msk [vmem:[%s12178_s8 + $0x2c] sm:$0xf] %vm7054_vm11, %v7033_v49  ;;  %v7030_v31 = vpack.c.b16 %v7014_v33, %v7014_v33  ;;  %v7031_v34 = vpack.c.b16 %v7015_v41, %v7015_v41  ;;  %v6990_v7 = vsel %vm6988_vm8, %v6966_v19, 0 }
 0x61e   :  { %v7006_v51 = vunpack.c.l.b16 %v6990_v7  ;;  %v7007_v50 = vunpack.c.h.b16 %v6990_v7 }
 0x61f   :  { %7063 = vst.msk [vmem:[%s12178_s8 + $0x20] sm:$0xf] %vm7054_vm11, %v7030_v31 }
 0x620   :  { %7064 = vst.msk [vmem:[%s12178_s8 + $0x24] sm:$0xf] %vm7054_vm11, %v7031_v34  ;;  %v7022_v56 = vpack.c.b16 %v7006_v51, %v7006_v51  ;;  %v7023_v37 = vpack.c.b16 %v7007_v50, %v7007_v50 }
 0x621   :  { %v6963_v57 = vpop.permute.xlu1 %6962 }
 0x622   :  { %v6987_v6 = vsel %vm2264_vm15, %v6907_v62, %v6963_v57  ;;  %7055 = vst.msk [vmem:[%s12178_s8] sm:$0xf] %vm7054_vm11, %v7022_v56 }
 0x623   :  { %v6997_v54 = vsel %vm6988_vm8, %v6987_v6, 0  ;;  %7056 = vst.msk [vmem:[%s12178_s8 + $0x4] sm:$0xf] %vm7054_vm11, %v7023_v37 }
 0x624   :  { %v7020_v23 = vunpack.c.l.b16 %v6997_v54  ;;  %v7021_v0 = vunpack.c.h.b16 %v6997_v54  ;;  %v6955_v55 = vpop.permute.xlu0 %6954 }
 0x625   :  { %v6975_v22 = vsel %vm2264_vm15, %v11987_v11, %v6955_v55 }
 0x626   :  { %v7036_v4 = vpack.c.b16 %v7020_v23, %v7020_v23  ;;  %v7037_v25 = vpack.c.b16 %v7021_v0, %v7021_v0  ;;  %v6993_v60 = vsel %vm6988_vm8, %v6975_v22, 0 }
 0x627   :  { %v7012_v43 = vunpack.c.l.b16 %v6993_v60  ;;  %v7013_v20 = vunpack.c.h.b16 %v6993_v60 }
 0x628   :  { %7069 = vst.msk [vmem:[%s12178_s8 + $0x38] sm:$0xf] %vm7054_vm11, %v7036_v4 }
 0x629   :  { %7070 = vst.msk [vmem:[%s12178_s8 + $0x3c] sm:$0xf] %vm7054_vm11, %v7037_v25  ;;  %v7028_v15 = vpack.c.b16 %v7012_v43, %v7012_v43  ;;  %v7029_v11 = vpack.c.b16 %v7013_v20, %v7013_v20 }
 0x62b   :  { %7061 = vst.msk [vmem:[%s12178_s8 + $0x18] sm:$0xf] %vm7054_vm11, %v7028_v15 }
 0x62c   :  { %7062 = vst.msk [vmem:[%s12178_s8 + $0x1c] sm:$0xf] %vm7054_vm11, %v7029_v11  ;;  %v6961_v16 = vpop.permute.xlu0 %6960 }
 0x62d   :  { %v6984_v52 = vsel %vm2264_vm15, %v6906_v8, %v6961_v16 }
 0x62e   :  { %v6996_v36 = vsel %vm6988_vm8, %v6984_v52, 0 }
 0x62f   :  { %v7018_v32 = vunpack.c.l.b16 %v6996_v36  ;;  %v7019_v24 = vunpack.c.h.b16 %v6996_v36 }
 0x631   :  { %v7034_v58 = vpack.c.b16 %v7018_v32, %v7018_v32  ;;  %v7035_v29 = vpack.c.b16 %v7019_v24, %v7019_v24 }
 0x633   :  { %7067 = vst.msk [vmem:[%s12178_s8 + $0x30] sm:$0xf] %vm7054_vm11, %v7034_v58 }
 0x634   :  { %7068 = vst.msk [vmem:[%s12178_s8 + $0x34] sm:$0xf] %vm7054_vm11, %v7035_v29 }

</bundles_post_ra>
